<compile_context>
chip_gen: v7x
topology: tpu7x:2x2x1
jax: 0.10.0
libtpu: 0.0.40
codegen_flags: <defaults>
</compile_context>

<pallas_src>
import functools

import numpy as np

import jax
import jax.numpy as jnp
from jax import lax
from jax.experimental import pallas as pl
from jax.experimental.pallas import tpu as pltpu


# ----------------------------------------------------------------------------
# helpers
# ----------------------------------------------------------------------------
def _round_up(x, m):
    return ((x + m - 1) // m) * m


def _pick_tm(m_grid, max_lane_off, rows, cout):
    """Lane-dense M tile: multiple of 128, >= max tap lane offset, as large as
    possible (<=512) while keeping >=2 grid steps (v7x megacore) when possible,
    within a conservative VMEM budget (fits v5e's 16 MiB default scoped VMEM)."""
    min_tm = _round_up(max(max_lane_off, 128), 128)
    if m_grid > min_tm:
        tm_two = ((m_grid - 1) // 128) * 128      # largest 128-multiple < m_grid
        tm = max(min_tm, min(512, tm_two))
    else:
        tm = min_tm

    def vmem_bytes(t):
        # 2 shifted views x 2 buffers of (rows, t) bf16 + 2 buffers of (cout, t) f32
        return 2 * 2 * rows * t * 2 + 2 * cout * t * 4

    while tm > min_tm and vmem_bytes(tm) > 8 * 1024 * 1024:
        tm -= 128
    return tm


# ----------------------------------------------------------------------------
# Pallas kernel: fused multi-tap GEMM + folded-BN bias + optional ReLU.
#   x0/x1 : two TM-shifted (rows, TM) bf16 windows of the activation slab
#   w     : (T, Cout, rows) bf16 per-tap weights (BN scale folded)
#   b     : (Cout, 1) f32 folded BN bias
#   out   : (Cout, TM) f32, lane-dense stores.
# For every output column m (global col = i*TM + local), tap t reads slab
# column m + lane_offs[t]; lane_offs[t] <= TM so the concatenated (rows, 2*TM)
# window always covers it with STATIC slice offsets.
# ----------------------------------------------------------------------------
def _tap_gemm_kernel(x0_ref, x1_ref, w_ref, b_ref, o_ref, *, lane_offs, relu):
    tm = o_ref.shape[1]
    x = jnp.concatenate([x0_ref[...], x1_ref[...]], axis=1)      # (rows, 2*TM)
    acc = None
    for t, lo in enumerate(lane_offs):                           # static unroll
        y = jnp.dot(w_ref[t], x[:, lo:lo + tm],
                    preferred_element_type=jnp.float32)          # (Cout, TM)
        acc = y if acc is None else acc + y
    acc = acc + b_ref[...]                                       # f32 epilogue
    if relu:
        acc = jnp.maximum(acc, 0.0)
    o_ref[...] = acc


def tap_gemm(slab, w_taps, bias, lane_offs, *, relu):
    """slab: (rows, m_grid) activation slab (flattened padded grid).
    w_taps: (T, cout, rows) per-tap weights.  bias: (cout,).
    Returns (cout, m_grid) f32 = act(sum_t w_taps[t] @ shift(slab, lane_offs[t]) + bias)."""
    rows, m_grid = slab.shape
    T, cout, wrows = w_taps.shape
    assert wrows == rows
    max_lane = max(lane_offs)
    tm = _pick_tm(m_grid, max_lane, rows, cout)
    assert max_lane <= tm, "tap offset exceeds tile; needs spatial tiling (TODO)"
    g = (m_grid + tm - 1) // tm
    m_slab = (g + 1) * tm                      # covers the i+1 shifted view too
    slab_b = jnp.pad(slab, ((0, 0), (0, m_slab - m_grid))).astype(jnp.bfloat16)
    w_b = w_taps.astype(jnp.bfloat16)
    bias2 = bias.reshape(cout, 1).astype(jnp.float32)

    kernel = functools.partial(_tap_gemm_kernel,
                               lane_offs=tuple(int(l) for l in lane_offs),
                               relu=relu)
    flops = 2 * g * tm * T * cout * rows
    bytes_accessed = (2 * slab_b.size * 2 + w_b.size * 2
                      + 4 * cout * g * tm + 4 * cout)

    out = pl.pallas_call(
        kernel,
        out_shape=jax.ShapeDtypeStruct((cout, g * tm), jnp.float32),
        grid=(g,),
        in_specs=[
            pl.BlockSpec((rows, tm), lambda i: (0, i)),        # window [i*TM, i*TM+TM)
            pl.BlockSpec((rows, tm), lambda i: (0, i + 1)),    # window [+TM, +2TM)
            pl.BlockSpec((T, cout, rows), lambda i: (0, 0, 0)),  # grid-invariant weights
            pl.BlockSpec((cout, 1), lambda i: (0, 0)),           # folded BN bias
        ],
        out_specs=pl.BlockSpec((cout, tm), lambda i: (0, i)),
        compiler_params=pltpu.CompilerParams(
            dimension_semantics=("parallel",)),
        cost_estimate=pl.CostEstimate(flops=flops, transcendentals=0,
                                      bytes_accessed=bytes_accessed),
    )(slab_b, slab_b, w_b, bias2)
    return out[:, :m_grid]


# ----------------------------------------------------------------------------
# layer wrappers (internal activation layout: channel-first (C, N, D, H, W))
# ----------------------------------------------------------------------------
def _fold_bn(bn, conv_bias=None):
    scale = bn['gamma'] / jnp.sqrt(bn['var'] + bn['eps'])
    bias = bn['beta'] - bn['mean'] * scale
    if conv_bias is not None:
        bias = bias + scale * conv_bias
    return scale.astype(jnp.float32), bias.astype(jnp.float32)


def conv3d_s1(xc, W, b, bn, *, dilation, relu):
    """Conv3d k=3, stride 1, padding=dilation, + folded BN (+ optional ReLU)."""
    C, N, D, H, Wd = xc.shape
    d = dilation
    cout = W.shape[0]
    Dg, Hg, Wg = D + 2 * d, H + 2 * d, Wd + 2 * d
    scale, bias = _fold_bn(bn, b)
    w_taps = (W * scale[:, None, None, None, None]) \
        .transpose(2, 3, 4, 0, 1).reshape(27, cout, C)
    lane_offs = [(kd * d * Hg + kh * d) * Wg + kw * d
                 for kd in range(3) for kh in range(3) for kw in range(3)]
    m_grid = N * Dg * Hg * Wg
    slab = jnp.pad(xc, ((0, 0), (0, 0), (d, d), (d, d), (d, d))).reshape(C, m_grid)
    out = tap_gemm(slab, w_taps, bias, lane_offs, relu=relu)
    return out.reshape(cout, N, Dg, Hg, Wg)[:, :, :D, :H, :Wd]


def conv3d_s2(xc, W, b, bn, *, dilation, relu):
    """Conv3d k=3, stride 2, padding=dilation, via space-to-phase split so the
    kernel sees a stride-1 problem with constant flattened tap offsets."""
    C, N, D, H, Wd = xc.shape
    d = dilation
    cout = W.shape[0]
    Dq = _round_up(D + 2 * d, 2)
    Hq = _round_up(H + 2 * d, 2)
    Wq = _round_up(Wd + 2 * d, 2)
    xq = jnp.pad(xc, ((0, 0), (0, 0),
                      (d, Dq - D - d), (d, Hq - H - d), (d, Wq - Wd - d)))
    Dh, Hh, Wh = Dq // 2, Hq // 2, Wq // 2
    m_grid = N * Dh * Hh * Wh
    # phase split: rows = (phase, channel), cols = phase-grid position
    slab = xq.reshape(C, N, Dh, 2, Hh, 2, Wh, 2) \
             .transpose(3, 5, 7, 0, 1, 2, 4, 6).reshape(8 * C, m_grid)

    scale, bias = _fold_bn(bn, b)
    w_small = (W * scale[:, None, None, None, None]) \
        .transpose(2, 3, 4, 0, 1).reshape(27, cout, C)
    onehot = np.zeros((27, 8), np.float32)
    lane_offs = []
    t = 0
    for kd in range(3):
        for kh in range(3):
            for kw in range(3):
                pd, od = (kd * d) % 2, (kd * d) // 2
                ph, oh = (kh * d) % 2, (kh * d) // 2
                pw, ow = (kw * d) % 2, (kw * d) // 2
                onehot[t, (pd * 2 + ph) * 2 + pw] = 1.0
                lane_offs.append((od * Hh + oh) * Wh + ow)
                t += 1
    # zero-pad each tap's (cout, C) weight into its phase slot -> (27, cout, 8C)
    w_taps = (jnp.asarray(onehot)[:, None, :, None]
              * w_small[:, :, None, :]).reshape(27, cout, 8 * C)

    out = tap_gemm(slab, w_taps, bias, lane_offs, relu=relu)
    Do, Ho, Wo = (D - 1) // 2 + 1, (H - 1) // 2 + 1, (Wd - 1) // 2 + 1
    return out.reshape(cout, N, Dh, Hh, Wh)[:, :, :Do, :Ho, :Wo]


def _phase_tables(d):
    """Per-axis tap selection for ConvTranspose3d(k=3, stride=2, pad=d, dil=d,
    output_padding=1).  S[r, j, t] in {0,1}."""
    pairs = []
    for r in (0, 1):
        for t in (0, 1, 2):
            num = r - (t - 1) * d
            if num % 2 == 0:
                pairs.append((r, t, num // 2))
    smin = min(s for _, _, s in pairs)
    smax = max(s for _, _, s in pairs)
    L = smax - smin + 1
    S = np.zeros((2, L, 3), np.float32)
    for r, t, s in pairs:
        S[r, s - smin, t] = 1.0
    return S, smin, smax, L


def deconv3d(xc, W, bn, *, dilation):
    """ConvTranspose3d k=3, stride 2, pad=dil, output_padding=1, bias=False,
    + folded BN.  Returns (Cout, N, 2D, 2H, 2W) (pixel shuffle done in the
    fused XLA extraction pass)."""
    Cin, cout = W.shape[0], W.shape[1]
    C, N, Di, Hi, Wi = xc.shape
    d = dilation
    S_np, smin, smax, L = _phase_tables(d)
    S = jnp.asarray(S_np)
    Wg = jnp.einsum('xap,ybq,zcr,iopqr->xyzoiabc', S, S, S, W)  # (2,2,2,Co,Ci,L,L,L)
    scale, bias = _fold_bn(bn, None)
    Wg = Wg * scale[None, None, None, :, None, None, None, None]
    w_taps = Wg.transpose(5, 6, 7, 0, 1, 2, 3, 4).reshape(L ** 3, 8 * cout, Cin)
    bias8 = jnp.tile(bias, 8)

    plo, phi = -smin, smax
    Dg, Hg, Wg2 = Di + plo + phi, Hi + plo + phi, Wi + plo + phi
    m_grid = N * Dg * Hg * Wg2
    slab = jnp.pad(xc, ((0, 0), (0, 0),
                        (plo, phi), (plo, phi), (plo, phi))).reshape(Cin, m_grid)
    lane_offs = [(jd * Hg + jh) * Wg2 + jw
                 for jd in range(L) for jh in range(L) for jw in range(L)]

    out = tap_gemm(slab, w_taps, bias8, lane_offs, relu=False)
    o = out.reshape(2, 2, 2, cout, N, Dg, Hg, Wg2)[..., :Di, :Hi, :Wi]
    o = o.transpose(3, 4, 5, 0, 6, 1, 7, 2).reshape(cout, N, 2 * Di, 2 * Hi, 2 * Wi)
    return o


# ----------------------------------------------------------------------------
# hourglass forward (module boundary is NCDHW)
# ----------------------------------------------------------------------------
def hourglass_forward(params, x, presqu=None, postqu=None, dilation=1):
    d = dilation
    xc = jnp.transpose(x, (1, 0, 2, 3, 4))
    postqu_c = (jnp.transpose(postqu, (1, 0, 2, 3, 4))
                if postqu is not None else None)
    presqu_c = (jnp.transpose(presqu, (1, 0, 2, 3, 4))
                if presqu is not None else None)

    out1 = conv3d_s2(xc, params['W1'], params['b1'], params['bn1'],
                     dilation=d, relu=True)
    pre_lin = conv3d_s1(out1, params['W2'], params['b2'], params['bn2'],
                        dilation=d, relu=(postqu is None))
    pre = jax.nn.relu(pre_lin + postqu_c) if postqu is not None else pre_lin
    out3 = conv3d_s2(pre, params['W3'], params['b3'], params['bn3'],
                     dilation=d, relu=True)
    out4 = conv3d_s1(out3, params['W4'], params['b4'], params['bn4'],
                     dilation=d, relu=True)
    res5 = presqu_c if presqu is not None else pre
    post = jax.nn.relu(deconv3d(out4, params['W5'], params['bn5'],
                                dilation=d) + res5)
    out6 = deconv3d(post, params['W6'], params['bn6'], dilation=d)

    return (jnp.transpose(out6, (1, 0, 2, 3, 4)),
            jnp.transpose(pre, (1, 0, 2, 3, 4)),
            jnp.transpose(post, (1, 0, 2, 3, 4)))


# ----------------------------------------------------------------------------
# deterministic synthetic parameters (shapes match the torch module)
# ----------------------------------------------------------------------------
def init_params(key, inplanes):
    c = inplanes
    keys = iter(jax.random.split(key, 64))

    def w(shape, scale=0.1):
        return scale * jax.random.normal(next(keys), shape, jnp.float32)

    def bn_params(nch, eps=1e-5):
        return dict(
            gamma=1.0 + 0.1 * jax.random.normal(next(keys), (nch,), jnp.float32),
            beta=0.1 * jax.random.normal(next(keys), (nch,), jnp.float32),
            mean=0.1 * jax.random.normal(next(keys), (nch,), jnp.float32),
            var=1.0 + 0.1 * jnp.abs(jax.random.normal(next(keys), (nch,), jnp.float32)),
            eps=jnp.float32(eps))

    return dict(
        W1=w((2 * c, c, 3, 3, 3)), b1=w((2 * c,)), bn1=bn_params(2 * c),
        W2=w((2 * c, 2 * c, 3, 3, 3)), b2=w((2 * c,)), bn2=bn_params(2 * c),
        W3=w((2 * c, 2 * c, 3, 3, 3)), b3=w((2 * c,)), bn3=bn_params(2 * c),
        # quirk reproduced: torch calls BatchNorm3d(inplanes*2, inplanes*2),
        # i.e. conv4's BN uses eps = inplanes*2.
        W4=w((2 * c, 2 * c, 3, 3, 3)), b4=w((2 * c,)),
        bn4=bn_params(2 * c, eps=float(2 * c)),
        W5=w((2 * c, 2 * c, 3, 3, 3)), bn5=bn_params(2 * c),   # ConvTranspose (Cin,Cout,k,k,k)
        W6=w((2 * c, c, 3, 3, 3)), bn6=bn_params(c),
    )


# ----------------------------------------------------------------------------
# pure-JAX (lax) reference
# ----------------------------------------------------------------------------
def reference_forward(params, x, dilation, presqu=None, postqu=None):
    dn = ('NCDHW', 'OIDHW', 'NCDHW')

    def bn(y, p):
        s = p['gamma'] / jnp.sqrt(p['var'] + p['eps'])
        b = p['beta'] - p['mean'] * s
        return y * s.reshape(1, -1, 1, 1, 1) + b.reshape(1, -1, 1, 1, 1)

    def conv(y, W, b, stride):
        z = lax.conv_general_dilated(
            y, W, (stride,) * 3, [(dilation, dilation)] * 3,
            rhs_dilation=(dilation,) * 3, dimension_numbers=dn)
        return z + b.reshape(1, -1, 1, 1, 1)

    def deconv(y, W):
        Wc = jnp.flip(W, axis=(2, 3, 4)).transpose(1, 0, 2, 3, 4)
        pad = (dilation, dilation + 1)
        return lax.conv_general_dilated(
            y, Wc, (1, 1, 1), [pad] * 3,
            lhs_dilation=(2, 2, 2), rhs_dilation=(dilation,) * 3,
            dimension_numbers=dn)

    out = jax.nn.relu(bn(conv(x, params['W1'], params['b1'], 2), params['bn1']))
    pre = bn(conv(out, params['W2'], params['b2'], 1), params['bn2'])
    pre = jax.nn.relu(pre + postqu) if postqu is not None else jax.nn.relu(pre)
    out = jax.nn.relu(bn(conv(pre, params['W3'], params['b3'], 2), params['bn3']))
    out = jax.nn.relu(bn(conv(out, params['W4'], params['b4'], 1), params['bn4']))
    res = presqu if presqu is not None else pre
    post = jax.nn.relu(bn(deconv(out, params['W5']), params['bn5']) + res)
    out = bn(deconv(post, params['W6']), params['bn6'])
    return out, pre, post


# ----------------------------------------------------------------------------
if __name__ == "__main__":
    INPLANES = 4
    DILATION = 1

    key = jax.random.PRNGKey(0)
    pkey, xkey, qkey1, qkey2 = jax.random.split(key, 4)
    params = init_params(pkey, INPLANES)
    # x is the PSMNet cost volume: (N, C, D_disp, H, W)
    x = jax.random.normal(xkey, (2, INPLANES, 8, 16, 16), jnp.float32)

    fwd = jax.jit(functools.partial(hourglass_forward, dilation=DILATION))

    # tolerance accommodates the (single-pass bf16) MXU precision vs the f32 lax ref
    TOL = 6e-2

    # --- case 1: presqu = postqu = None --------------------------------------
    out, pre, post = fwd(params, x)
    jax.block_until_ready((out, pre, post))
    assert out.shape == (2, INPLANES, 8, 16, 16)
    assert pre.shape == (2, 2 * INPLANES, 4, 8, 8)
    assert post.shape == (2, 2 * INPLANES, 4, 8, 8)

    ref_out, ref_pre, ref_post = reference_forward(params, x, DILATION)
    for a, b in ((out, ref_out), (pre, ref_pre), (post, ref_post)):
        err = float(jnp.max(jnp.abs(a - b)))
        assert err < TOL, f"mismatch vs reference: max abs err = {err}"

    # --- case 2: with presqu / postqu residuals ------------------------------
    postqu = 0.5 * jax.random.normal(qkey1, (2, 2 * INPLANES, 4, 8, 8), jnp.float32)
    presqu = 0.5 * jax.random.normal(qkey2, (2, 2 * INPLANES, 4, 8, 8), jnp.float32)
    out2, pre2, post2 = fwd(params, x, presqu, postqu)
    jax.block_until_ready((out2, pre2, post2))
    r_out2, r_pre2, r_post2 = reference_forward(params, x, DILATION,
                                                presqu=presqu, postqu=postqu)
    for a, b in ((out2, r_out2), (pre2, r_pre2), (post2, r_post2)):
        err = float(jnp.max(jnp.abs(a - b)))
        assert err < TOL, f"mismatch vs reference (residual path): max abs err = {err}"

    print("KERNEL_OK")
</pallas_src>

<mosaic_0001>
module attributes {stable_mosaic.version = 11 : i64} {
  func.func @_tap_gemm_kernel(%arg0: i32, %arg1: memref<32x512xbf16, #tpu.memory_space<vmem>>, %arg2: memref<32x512xbf16, #tpu.memory_space<vmem>>, %arg3: memref<27x8x32xbf16, #tpu.memory_space<vmem>>, %arg4: memref<8x1xf32, #tpu.memory_space<vmem>>, %arg5: memref<8x512xf32, #tpu.memory_space<vmem>>) attributes {dimension_semantics = [#tpu.dimension_semantics<parallel>], iteration_bounds = array<i64: 2>, scalar_prefetch = 0 : i64, scratch_operands = 0 : i64, tpu.core_type = #tpu.core_type<tc>, window_params = [{transform_indices = @transform_0, window_bounds = array<i64: 32, 512>}, {transform_indices = @transform_1, window_bounds = array<i64: 32, 512>}, {pipeline_mode = #tpu.pipeline_mode<synchronous>, transform_indices = @transform_2, window_bounds = array<i64: 27, 8, 32>}, {pipeline_mode = #tpu.pipeline_mode<synchronous>, transform_indices = @transform_3, window_bounds = array<i64: 8, 1>}, {transform_indices = @transform_4, window_bounds = array<i64: 8, 512>}]} {
    %c0 = arith.constant 0 : index
    %c0_0 = arith.constant 0 : index
    %0 = vector.load %arg1[%c0, %c0_0] : memref<32x512xbf16, #tpu.memory_space<vmem>>, vector<32x512xbf16>
    %c0_1 = arith.constant 0 : index
    %c0_2 = arith.constant 0 : index
    %1 = vector.load %arg2[%c0_1, %c0_2] : memref<32x512xbf16, #tpu.memory_space<vmem>>, vector<32x512xbf16>
    %2 = tpu.concatenate %0, %1 in 1 : vector<32x512xbf16>, vector<32x512xbf16> -> vector<32x1024xbf16>
    %c0_3 = arith.constant 0 : index
    %c0_4 = arith.constant 0 : index
    %c0_5 = arith.constant 0 : index
    %3 = vector.load %arg3[%c0_3, %c0_4, %c0_5] : memref<27x8x32xbf16, #tpu.memory_space<vmem>>, vector<1x8x32xbf16>
    %4 = vector.shape_cast %3 : vector<1x8x32xbf16> to vector<8x32xbf16>
    %5 = vector.extract_strided_slice %2 {offsets = [0, 0], sizes = [32, 512], strides = [1, 1]} : vector<32x1024xbf16> to vector<32x512xbf16>
    %cst = arith.constant dense<0.000000e+00> : vector<8x512xf32>
    %6 = tpu.matmul %4, %5, %cst {dimension_numbers = #tpu.dot_dimension_numbers<[1], [0], [0], [1], [0, 0, 1, 1], [], []>} : vector<8x32xbf16>, vector<32x512xbf16>, vector<8x512xf32> -> vector<8x512xf32>
    %c1 = arith.constant 1 : index
    %c0_6 = arith.constant 0 : index
    %c0_7 = arith.constant 0 : index
    %7 = vector.load %arg3[%c1, %c0_6, %c0_7] : memref<27x8x32xbf16, #tpu.memory_space<vmem>>, vector<1x8x32xbf16>
    %8 = vector.shape_cast %7 : vector<1x8x32xbf16> to vector<8x32xbf16>
    %9 = vector.extract_strided_slice %2 {offsets = [0, 0], sizes = [32, 512], strides = [1, 1]} : vector<32x1024xbf16> to vector<32x512xbf16>
    %cst_8 = arith.constant dense<0.000000e+00> : vector<8x512xf32>
    %10 = tpu.matmul %8, %9, %cst_8 {dimension_numbers = #tpu.dot_dimension_numbers<[1], [0], [0], [1], [0, 0, 1, 1], [], []>} : vector<8x32xbf16>, vector<32x512xbf16>, vector<8x512xf32> -> vector<8x512xf32>
    %11 = arith.addf %6, %10 : vector<8x512xf32>
    %c2 = arith.constant 2 : index
    %c0_9 = arith.constant 0 : index
    %c0_10 = arith.constant 0 : index
    %12 = vector.load %arg3[%c2, %c0_9, %c0_10] : memref<27x8x32xbf16, #tpu.memory_space<vmem>>, vector<1x8x32xbf16>
    %13 = vector.shape_cast %12 : vector<1x8x32xbf16> to vector<8x32xbf16>
    %14 = vector.extract_strided_slice %2 {offsets = [0, 1], sizes = [32, 512], strides = [1, 1]} : vector<32x1024xbf16> to vector<32x512xbf16>
    %cst_11 = arith.constant dense<0.000000e+00> : vector<8x512xf32>
    %15 = tpu.matmul %13, %14, %cst_11 {dimension_numbers = #tpu.dot_dimension_numbers<[1], [0], [0], [1], [0, 0, 1, 1], [], []>} : vector<8x32xbf16>, vector<32x512xbf16>, vector<8x512xf32> -> vector<8x512xf32>
    %16 = arith.addf %11, %15 : vector<8x512xf32>
    %c3 = arith.constant 3 : index
    %c0_12 = arith.constant 0 : index
    %c0_13 = arith.constant 0 : index
    %17 = vector.load %arg3[%c3, %c0_12, %c0_13] : memref<27x8x32xbf16, #tpu.memory_space<vmem>>, vector<1x8x32xbf16>
    %18 = vector.shape_cast %17 : vector<1x8x32xbf16> to vector<8x32xbf16>
    %19 = vector.extract_strided_slice %2 {offsets = [0, 0], sizes = [32, 512], strides = [1, 1]} : vector<32x1024xbf16> to vector<32x512xbf16>
    %cst_14 = arith.constant dense<0.000000e+00> : vector<8x512xf32>
    %20 = tpu.matmul %18, %19, %cst_14 {dimension_numbers = #tpu.dot_dimension_numbers<[1], [0], [0], [1], [0, 0, 1, 1], [], []>} : vector<8x32xbf16>, vector<32x512xbf16>, vector<8x512xf32> -> vector<8x512xf32>
    %21 = arith.addf %16, %20 : vector<8x512xf32>
    %c4 = arith.constant 4 : index
    %c0_15 = arith.constant 0 : index
    %c0_16 = arith.constant 0 : index
    %22 = vector.load %arg3[%c4, %c0_15, %c0_16] : memref<27x8x32xbf16, #tpu.memory_space<vmem>>, vector<1x8x32xbf16>
    %23 = vector.shape_cast %22 : vector<1x8x32xbf16> to vector<8x32xbf16>
    %24 = vector.extract_strided_slice %2 {offsets = [0, 0], sizes = [32, 512], strides = [1, 1]} : vector<32x1024xbf16> to vector<32x512xbf16>
    %cst_17 = arith.constant dense<0.000000e+00> : vector<8x512xf32>
    %25 = tpu.matmul %23, %24, %cst_17 {dimension_numbers = #tpu.dot_dimension_numbers<[1], [0], [0], [1], [0, 0, 1, 1], [], []>} : vector<8x32xbf16>, vector<32x512xbf16>, vector<8x512xf32> -> vector<8x512xf32>
    %26 = arith.addf %21, %25 : vector<8x512xf32>
    %c5 = arith.constant 5 : index
    %c0_18 = arith.constant 0 : index
    %c0_19 = arith.constant 0 : index
    %27 = vector.load %arg3[%c5, %c0_18, %c0_19] : memref<27x8x32xbf16, #tpu.memory_space<vmem>>, vector<1x8x32xbf16>
    %28 = vector.shape_cast %27 : vector<1x8x32xbf16> to vector<8x32xbf16>
    %29 = vector.extract_strided_slice %2 {offsets = [0, 1], sizes = [32, 512], strides = [1, 1]} : vector<32x1024xbf16> to vector<32x512xbf16>
    %cst_20 = arith.constant dense<0.000000e+00> : vector<8x512xf32>
    %30 = tpu.matmul %28, %29, %cst_20 {dimension_numbers = #tpu.dot_dimension_numbers<[1], [0], [0], [1], [0, 0, 1, 1], [], []>} : vector<8x32xbf16>, vector<32x512xbf16>, vector<8x512xf32> -> vector<8x512xf32>
    %31 = arith.addf %26, %30 : vector<8x512xf32>
    %c6 = arith.constant 6 : index
    %c0_21 = arith.constant 0 : index
    %c0_22 = arith.constant 0 : index
    %32 = vector.load %arg3[%c6, %c0_21, %c0_22] : memref<27x8x32xbf16, #tpu.memory_space<vmem>>, vector<1x8x32xbf16>
    %33 = vector.shape_cast %32 : vector<1x8x32xbf16> to vector<8x32xbf16>
    %34 = vector.extract_strided_slice %2 {offsets = [0, 9], sizes = [32, 512], strides = [1, 1]} : vector<32x1024xbf16> to vector<32x512xbf16>
    %cst_23 = arith.constant dense<0.000000e+00> : vector<8x512xf32>
    %35 = tpu.matmul %33, %34, %cst_23 {dimension_numbers = #tpu.dot_dimension_numbers<[1], [0], [0], [1], [0, 0, 1, 1], [], []>} : vector<8x32xbf16>, vector<32x512xbf16>, vector<8x512xf32> -> vector<8x512xf32>
    %36 = arith.addf %31, %35 : vector<8x512xf32>
    %c7 = arith.constant 7 : index
    %c0_24 = arith.constant 0 : index
    %c0_25 = arith.constant 0 : index
    %37 = vector.load %arg3[%c7, %c0_24, %c0_25] : memref<27x8x32xbf16, #tpu.memory_space<vmem>>, vector<1x8x32xbf16>
    %38 = vector.shape_cast %37 : vector<1x8x32xbf16> to vector<8x32xbf16>
    %39 = vector.extract_strided_slice %2 {offsets = [0, 9], sizes = [32, 512], strides = [1, 1]} : vector<32x1024xbf16> to vector<32x512xbf16>
    %cst_26 = arith.constant dense<0.000000e+00> : vector<8x512xf32>
    %40 = tpu.matmul %38, %39, %cst_26 {dimension_numbers = #tpu.dot_dimension_numbers<[1], [0], [0], [1], [0, 0, 1, 1], [], []>} : vector<8x32xbf16>, vector<32x512xbf16>, vector<8x512xf32> -> vector<8x512xf32>
    %41 = arith.addf %36, %40 : vector<8x512xf32>
    %c8 = arith.constant 8 : index
    %c0_27 = arith.constant 0 : index
    %c0_28 = arith.constant 0 : index
    %42 = vector.load %arg3[%c8, %c0_27, %c0_28] : memref<27x8x32xbf16, #tpu.memory_space<vmem>>, vector<1x8x32xbf16>
    %43 = vector.shape_cast %42 : vector<1x8x32xbf16> to vector<8x32xbf16>
    %44 = vector.extract_strided_slice %2 {offsets = [0, 10], sizes = [32, 512], strides = [1, 1]} : vector<32x1024xbf16> to vector<32x512xbf16>
    %cst_29 = arith.constant dense<0.000000e+00> : vector<8x512xf32>
    %45 = tpu.matmul %43, %44, %cst_29 {dimension_numbers = #tpu.dot_dimension_numbers<[1], [0], [0], [1], [0, 0, 1, 1], [], []>} : vector<8x32xbf16>, vector<32x512xbf16>, vector<8x512xf32> -> vector<8x512xf32>
    %46 = arith.addf %41, %45 : vector<8x512xf32>
    %c9 = arith.constant 9 : index
    %c0_30 = arith.constant 0 : index
    %c0_31 = arith.constant 0 : index
    %47 = vector.load %arg3[%c9, %c0_30, %c0_31] : memref<27x8x32xbf16, #tpu.memory_space<vmem>>, vector<1x8x32xbf16>
    %48 = vector.shape_cast %47 : vector<1x8x32xbf16> to vector<8x32xbf16>
    %49 = vector.extract_strided_slice %2 {offsets = [0, 0], sizes = [32, 512], strides = [1, 1]} : vector<32x1024xbf16> to vector<32x512xbf16>
    %cst_32 = arith.constant dense<0.000000e+00> : vector<8x512xf32>
    %50 = tpu.matmul %48, %49, %cst_32 {dimension_numbers = #tpu.dot_dimension_numbers<[1], [0], [0], [1], [0, 0, 1, 1], [], []>} : vector<8x32xbf16>, vector<32x512xbf16>, vector<8x512xf32> -> vector<8x512xf32>
    %51 = arith.addf %46, %50 : vector<8x512xf32>
    %c10 = arith.constant 10 : index
    %c0_33 = arith.constant 0 : index
    %c0_34 = arith.constant 0 : index
    %52 = vector.load %arg3[%c10, %c0_33, %c0_34] : memref<27x8x32xbf16, #tpu.memory_space<vmem>>, vector<1x8x32xbf16>
    %53 = vector.shape_cast %52 : vector<1x8x32xbf16> to vector<8x32xbf16>
    %54 = vector.extract_strided_slice %2 {offsets = [0, 0], sizes = [32, 512], strides = [1, 1]} : vector<32x1024xbf16> to vector<32x512xbf16>
    %cst_35 = arith.constant dense<0.000000e+00> : vector<8x512xf32>
    %55 = tpu.matmul %53, %54, %cst_35 {dimension_numbers = #tpu.dot_dimension_numbers<[1], [0], [0], [1], [0, 0, 1, 1], [], []>} : vector<8x32xbf16>, vector<32x512xbf16>, vector<8x512xf32> -> vector<8x512xf32>
    %56 = arith.addf %51, %55 : vector<8x512xf32>
    %c11 = arith.constant 11 : index
    %c0_36 = arith.constant 0 : index
    %c0_37 = arith.constant 0 : index
    %57 = vector.load %arg3[%c11, %c0_36, %c0_37] : memref<27x8x32xbf16, #tpu.memory_space<vmem>>, vector<1x8x32xbf16>
    %58 = vector.shape_cast %57 : vector<1x8x32xbf16> to vector<8x32xbf16>
    %59 = vector.extract_strided_slice %2 {offsets = [0, 1], sizes = [32, 512], strides = [1, 1]} : vector<32x1024xbf16> to vector<32x512xbf16>
    %cst_38 = arith.constant dense<0.000000e+00> : vector<8x512xf32>
    %60 = tpu.matmul %58, %59, %cst_38 {dimension_numbers = #tpu.dot_dimension_numbers<[1], [0], [0], [1], [0, 0, 1, 1], [], []>} : vector<8x32xbf16>, vector<32x512xbf16>, vector<8x512xf32> -> vector<8x512xf32>
    %61 = arith.addf %56, %60 : vector<8x512xf32>
    %c12 = arith.constant 12 : index
    %c0_39 = arith.constant 0 : index
    %c0_40 = arith.constant 0 : index
    %62 = vector.load %arg3[%c12, %c0_39, %c0_40] : memref<27x8x32xbf16, #tpu.memory_space<vmem>>, vector<1x8x32xbf16>
    %63 = vector.shape_cast %62 : vector<1x8x32xbf16> to vector<8x32xbf16>
    %64 = vector.extract_strided_slice %2 {offsets = [0, 0], sizes = [32, 512], strides = [1, 1]} : vector<32x1024xbf16> to vector<32x512xbf16>
    %cst_41 = arith.constant dense<0.000000e+00> : vector<8x512xf32>
    %65 = tpu.matmul %63, %64, %cst_41 {dimension_numbers = #tpu.dot_dimension_numbers<[1], [0], [0], [1], [0, 0, 1, 1], [], []>} : vector<8x32xbf16>, vector<32x512xbf16>, vector<8x512xf32> -> vector<8x512xf32>
    %66 = arith.addf %61, %65 : vector<8x512xf32>
    %c13 = arith.constant 13 : index
    %c0_42 = arith.constant 0 : index
    %c0_43 = arith.constant 0 : index
    %67 = vector.load %arg3[%c13, %c0_42, %c0_43] : memref<27x8x32xbf16, #tpu.memory_space<vmem>>, vector<1x8x32xbf16>
    %68 = vector.shape_cast %67 : vector<1x8x32xbf16> to vector<8x32xbf16>
    %69 = vector.extract_strided_slice %2 {offsets = [0, 0], sizes = [32, 512], strides = [1, 1]} : vector<32x1024xbf16> to vector<32x512xbf16>
    %cst_44 = arith.constant dense<0.000000e+00> : vector<8x512xf32>
    %70 = tpu.matmul %68, %69, %cst_44 {dimension_numbers = #tpu.dot_dimension_numbers<[1], [0], [0], [1], [0, 0, 1, 1], [], []>} : vector<8x32xbf16>, vector<32x512xbf16>, vector<8x512xf32> -> vector<8x512xf32>
    %71 = arith.addf %66, %70 : vector<8x512xf32>
    %c14 = arith.constant 14 : index
    %c0_45 = arith.constant 0 : index
    %c0_46 = arith.constant 0 : index
    %72 = vector.load %arg3[%c14, %c0_45, %c0_46] : memref<27x8x32xbf16, #tpu.memory_space<vmem>>, vector<1x8x32xbf16>
    %73 = vector.shape_cast %72 : vector<1x8x32xbf16> to vector<8x32xbf16>
    %74 = vector.extract_strided_slice %2 {offsets = [0, 1], sizes = [32, 512], strides = [1, 1]} : vector<32x1024xbf16> to vector<32x512xbf16>
    %cst_47 = arith.constant dense<0.000000e+00> : vector<8x512xf32>
    %75 = tpu.matmul %73, %74, %cst_47 {dimension_numbers = #tpu.dot_dimension_numbers<[1], [0], [0], [1], [0, 0, 1, 1], [], []>} : vector<8x32xbf16>, vector<32x512xbf16>, vector<8x512xf32> -> vector<8x512xf32>
    %76 = arith.addf %71, %75 : vector<8x512xf32>
    %c15 = arith.constant 15 : index
    %c0_48 = arith.constant 0 : index
    %c0_49 = arith.constant 0 : index
    %77 = vector.load %arg3[%c15, %c0_48, %c0_49] : memref<27x8x32xbf16, #tpu.memory_space<vmem>>, vector<1x8x32xbf16>
    %78 = vector.shape_cast %77 : vector<1x8x32xbf16> to vector<8x32xbf16>
    %79 = vector.extract_strided_slice %2 {offsets = [0, 9], sizes = [32, 512], strides = [1, 1]} : vector<32x1024xbf16> to vector<32x512xbf16>
    %cst_50 = arith.constant dense<0.000000e+00> : vector<8x512xf32>
    %80 = tpu.matmul %78, %79, %cst_50 {dimension_numbers = #tpu.dot_dimension_numbers<[1], [0], [0], [1], [0, 0, 1, 1], [], []>} : vector<8x32xbf16>, vector<32x512xbf16>, vector<8x512xf32> -> vector<8x512xf32>
    %81 = arith.addf %76, %80 : vector<8x512xf32>
    %c16 = arith.constant 16 : index
    %c0_51 = arith.constant 0 : index
    %c0_52 = arith.constant 0 : index
    %82 = vector.load %arg3[%c16, %c0_51, %c0_52] : memref<27x8x32xbf16, #tpu.memory_space<vmem>>, vector<1x8x32xbf16>
    %83 = vector.shape_cast %82 : vector<1x8x32xbf16> to vector<8x32xbf16>
    %84 = vector.extract_strided_slice %2 {offsets = [0, 9], sizes = [32, 512], strides = [1, 1]} : vector<32x1024xbf16> to vector<32x512xbf16>
    %cst_53 = arith.constant dense<0.000000e+00> : vector<8x512xf32>
    %85 = tpu.matmul %83, %84, %cst_53 {dimension_numbers = #tpu.dot_dimension_numbers<[1], [0], [0], [1], [0, 0, 1, 1], [], []>} : vector<8x32xbf16>, vector<32x512xbf16>, vector<8x512xf32> -> vector<8x512xf32>
    %86 = arith.addf %81, %85 : vector<8x512xf32>
    %c17 = arith.constant 17 : index
    %c0_54 = arith.constant 0 : index
    %c0_55 = arith.constant 0 : index
    %87 = vector.load %arg3[%c17, %c0_54, %c0_55] : memref<27x8x32xbf16, #tpu.memory_space<vmem>>, vector<1x8x32xbf16>
    %88 = vector.shape_cast %87 : vector<1x8x32xbf16> to vector<8x32xbf16>
    %89 = vector.extract_strided_slice %2 {offsets = [0, 10], sizes = [32, 512], strides = [1, 1]} : vector<32x1024xbf16> to vector<32x512xbf16>
    %cst_56 = arith.constant dense<0.000000e+00> : vector<8x512xf32>
    %90 = tpu.matmul %88, %89, %cst_56 {dimension_numbers = #tpu.dot_dimension_numbers<[1], [0], [0], [1], [0, 0, 1, 1], [], []>} : vector<8x32xbf16>, vector<32x512xbf16>, vector<8x512xf32> -> vector<8x512xf32>
    %91 = arith.addf %86, %90 : vector<8x512xf32>
    %c18 = arith.constant 18 : index
    %c0_57 = arith.constant 0 : index
    %c0_58 = arith.constant 0 : index
    %92 = vector.load %arg3[%c18, %c0_57, %c0_58] : memref<27x8x32xbf16, #tpu.memory_space<vmem>>, vector<1x8x32xbf16>
    %93 = vector.shape_cast %92 : vector<1x8x32xbf16> to vector<8x32xbf16>
    %94 = vector.extract_strided_slice %2 {offsets = [0, 81], sizes = [32, 512], strides = [1, 1]} : vector<32x1024xbf16> to vector<32x512xbf16>
    %cst_59 = arith.constant dense<0.000000e+00> : vector<8x512xf32>
    %95 = tpu.matmul %93, %94, %cst_59 {dimension_numbers = #tpu.dot_dimension_numbers<[1], [0], [0], [1], [0, 0, 1, 1], [], []>} : vector<8x32xbf16>, vector<32x512xbf16>, vector<8x512xf32> -> vector<8x512xf32>
    %96 = arith.addf %91, %95 : vector<8x512xf32>
    %c19 = arith.constant 19 : index
    %c0_60 = arith.constant 0 : index
    %c0_61 = arith.constant 0 : index
    %97 = vector.load %arg3[%c19, %c0_60, %c0_61] : memref<27x8x32xbf16, #tpu.memory_space<vmem>>, vector<1x8x32xbf16>
    %98 = vector.shape_cast %97 : vector<1x8x32xbf16> to vector<8x32xbf16>
    %99 = vector.extract_strided_slice %2 {offsets = [0, 81], sizes = [32, 512], strides = [1, 1]} : vector<32x1024xbf16> to vector<32x512xbf16>
    %cst_62 = arith.constant dense<0.000000e+00> : vector<8x512xf32>
    %100 = tpu.matmul %98, %99, %cst_62 {dimension_numbers = #tpu.dot_dimension_numbers<[1], [0], [0], [1], [0, 0, 1, 1], [], []>} : vector<8x32xbf16>, vector<32x512xbf16>, vector<8x512xf32> -> vector<8x512xf32>
    %101 = arith.addf %96, %100 : vector<8x512xf32>
    %c20 = arith.constant 20 : index
    %c0_63 = arith.constant 0 : index
    %c0_64 = arith.constant 0 : index
    %102 = vector.load %arg3[%c20, %c0_63, %c0_64] : memref<27x8x32xbf16, #tpu.memory_space<vmem>>, vector<1x8x32xbf16>
    %103 = vector.shape_cast %102 : vector<1x8x32xbf16> to vector<8x32xbf16>
    %104 = vector.extract_strided_slice %2 {offsets = [0, 82], sizes = [32, 512], strides = [1, 1]} : vector<32x1024xbf16> to vector<32x512xbf16>
    %cst_65 = arith.constant dense<0.000000e+00> : vector<8x512xf32>
    %105 = tpu.matmul %103, %104, %cst_65 {dimension_numbers = #tpu.dot_dimension_numbers<[1], [0], [0], [1], [0, 0, 1, 1], [], []>} : vector<8x32xbf16>, vector<32x512xbf16>, vector<8x512xf32> -> vector<8x512xf32>
    %106 = arith.addf %101, %105 : vector<8x512xf32>
    %c21 = arith.constant 21 : index
    %c0_66 = arith.constant 0 : index
    %c0_67 = arith.constant 0 : index
    %107 = vector.load %arg3[%c21, %c0_66, %c0_67] : memref<27x8x32xbf16, #tpu.memory_space<vmem>>, vector<1x8x32xbf16>
    %108 = vector.shape_cast %107 : vector<1x8x32xbf16> to vector<8x32xbf16>
    %109 = vector.extract_strided_slice %2 {offsets = [0, 81], sizes = [32, 512], strides = [1, 1]} : vector<32x1024xbf16> to vector<32x512xbf16>
    %cst_68 = arith.constant dense<0.000000e+00> : vector<8x512xf32>
    %110 = tpu.matmul %108, %109, %cst_68 {dimension_numbers = #tpu.dot_dimension_numbers<[1], [0], [0], [1], [0, 0, 1, 1], [], []>} : vector<8x32xbf16>, vector<32x512xbf16>, vector<8x512xf32> -> vector<8x512xf32>
    %111 = arith.addf %106, %110 : vector<8x512xf32>
    %c22 = arith.constant 22 : index
    %c0_69 = arith.constant 0 : index
    %c0_70 = arith.constant 0 : index
    %112 = vector.load %arg3[%c22, %c0_69, %c0_70] : memref<27x8x32xbf16, #tpu.memory_space<vmem>>, vector<1x8x32xbf16>
    %113 = vector.shape_cast %112 : vector<1x8x32xbf16> to vector<8x32xbf16>
    %114 = vector.extract_strided_slice %2 {offsets = [0, 81], sizes = [32, 512], strides = [1, 1]} : vector<32x1024xbf16> to vector<32x512xbf16>
    %cst_71 = arith.constant dense<0.000000e+00> : vector<8x512xf32>
    %115 = tpu.matmul %113, %114, %cst_71 {dimension_numbers = #tpu.dot_dimension_numbers<[1], [0], [0], [1], [0, 0, 1, 1], [], []>} : vector<8x32xbf16>, vector<32x512xbf16>, vector<8x512xf32> -> vector<8x512xf32>
    %116 = arith.addf %111, %115 : vector<8x512xf32>
    %c23 = arith.constant 23 : index
    %c0_72 = arith.constant 0 : index
    %c0_73 = arith.constant 0 : index
    %117 = vector.load %arg3[%c23, %c0_72, %c0_73] : memref<27x8x32xbf16, #tpu.memory_space<vmem>>, vector<1x8x32xbf16>
    %118 = vector.shape_cast %117 : vector<1x8x32xbf16> to vector<8x32xbf16>
    %119 = vector.extract_strided_slice %2 {offsets = [0, 82], sizes = [32, 512], strides = [1, 1]} : vector<32x1024xbf16> to vector<32x512xbf16>
    %cst_74 = arith.constant dense<0.000000e+00> : vector<8x512xf32>
    %120 = tpu.matmul %118, %119, %cst_74 {dimension_numbers = #tpu.dot_dimension_numbers<[1], [0], [0], [1], [0, 0, 1, 1], [], []>} : vector<8x32xbf16>, vector<32x512xbf16>, vector<8x512xf32> -> vector<8x512xf32>
    %121 = arith.addf %116, %120 : vector<8x512xf32>
    %c24 = arith.constant 24 : index
    %c0_75 = arith.constant 0 : index
    %c0_76 = arith.constant 0 : index
    %122 = vector.load %arg3[%c24, %c0_75, %c0_76] : memref<27x8x32xbf16, #tpu.memory_space<vmem>>, vector<1x8x32xbf16>
    %123 = vector.shape_cast %122 : vector<1x8x32xbf16> to vector<8x32xbf16>
    %124 = vector.extract_strided_slice %2 {offsets = [0, 90], sizes = [32, 512], strides = [1, 1]} : vector<32x1024xbf16> to vector<32x512xbf16>
    %cst_77 = arith.constant dense<0.000000e+00> : vector<8x512xf32>
    %125 = tpu.matmul %123, %124, %cst_77 {dimension_numbers = #tpu.dot_dimension_numbers<[1], [0], [0], [1], [0, 0, 1, 1], [], []>} : vector<8x32xbf16>, vector<32x512xbf16>, vector<8x512xf32> -> vector<8x512xf32>
    %126 = arith.addf %121, %125 : vector<8x512xf32>
    %c25 = arith.constant 25 : index
    %c0_78 = arith.constant 0 : index
    %c0_79 = arith.constant 0 : index
    %127 = vector.load %arg3[%c25, %c0_78, %c0_79] : memref<27x8x32xbf16, #tpu.memory_space<vmem>>, vector<1x8x32xbf16>
    %128 = vector.shape_cast %127 : vector<1x8x32xbf16> to vector<8x32xbf16>
    %129 = vector.extract_strided_slice %2 {offsets = [0, 90], sizes = [32, 512], strides = [1, 1]} : vector<32x1024xbf16> to vector<32x512xbf16>
    %cst_80 = arith.constant dense<0.000000e+00> : vector<8x512xf32>
    %130 = tpu.matmul %128, %129, %cst_80 {dimension_numbers = #tpu.dot_dimension_numbers<[1], [0], [0], [1], [0, 0, 1, 1], [], []>} : vector<8x32xbf16>, vector<32x512xbf16>, vector<8x512xf32> -> vector<8x512xf32>
    %131 = arith.addf %126, %130 : vector<8x512xf32>
    %c26 = arith.constant 26 : index
    %c0_81 = arith.constant 0 : index
    %c0_82 = arith.constant 0 : index
    %132 = vector.load %arg3[%c26, %c0_81, %c0_82] : memref<27x8x32xbf16, #tpu.memory_space<vmem>>, vector<1x8x32xbf16>
    %133 = vector.shape_cast %132 : vector<1x8x32xbf16> to vector<8x32xbf16>
    %134 = vector.extract_strided_slice %2 {offsets = [0, 91], sizes = [32, 512], strides = [1, 1]} : vector<32x1024xbf16> to vector<32x512xbf16>
    %cst_83 = arith.constant dense<0.000000e+00> : vector<8x512xf32>
    %135 = tpu.matmul %133, %134, %cst_83 {dimension_numbers = #tpu.dot_dimension_numbers<[1], [0], [0], [1], [0, 0, 1, 1], [], []>} : vector<8x32xbf16>, vector<32x512xbf16>, vector<8x512xf32> -> vector<8x512xf32>
    %136 = arith.addf %131, %135 : vector<8x512xf32>
    %c0_84 = arith.constant 0 : index
    %c0_85 = arith.constant 0 : index
    %137 = vector.load %arg4[%c0_84, %c0_85] : memref<8x1xf32, #tpu.memory_space<vmem>>, vector<8x1xf32>
    %138 = vector.broadcast %137 : vector<8x1xf32> to vector<8x512xf32>
    %139 = arith.addf %136, %138 : vector<8x512xf32>
    %cst_86 = arith.constant 0.000000e+00 : f32
    %140 = vector.broadcast %cst_86 : f32 to vector<8x512xf32>
    %141 = arith.maximumf %139, %140 : vector<8x512xf32>
    %c0_87 = arith.constant 0 : index
    %c0_88 = arith.constant 0 : index
    %142 = vector.load %arg5[%c0_87, %c0_88] : memref<8x512xf32, #tpu.memory_space<vmem>>, vector<8x512xf32>
    tpu.vector_store %arg5[%c0_87, %c0_88], %141 {strides = array<i32>} : memref<8x512xf32, #tpu.memory_space<vmem>>, vector<8x512xf32>,
    return
  }
  func.func @transform_0(%arg0: i32) -> (i32, i32) {
    %c0_i32 = arith.constant 0 : i32
    %c0_i32_0 = arith.constant 0 : i32
    return %c0_i32, %arg0 : i32, i32
  }
  func.func @transform_1(%arg0: i32) -> (i32, i32) {
    %c1_i32 = arith.constant 1 : i32
    %0 = arith.addi %arg0, %c1_i32 : i32
    %c0_i32 = arith.constant 0 : i32
    %c0_i32_0 = arith.constant 0 : i32
    return %c0_i32, %0 : i32, i32
  }
  func.func @transform_2(%arg0: i32) -> (i32, i32, i32) {
    %c0_i32 = arith.constant 0 : i32
    %c0_i32_0 = arith.constant 0 : i32
    %c0_i32_1 = arith.constant 0 : i32
    %c0_i32_2 = arith.constant 0 : i32
    return %c0_i32, %c0_i32_0, %c0_i32_1 : i32, i32, i32
  }
  func.func @transform_3(%arg0: i32) -> (i32, i32) {
    %c0_i32 = arith.constant 0 : i32
    %c0_i32_0 = arith.constant 0 : i32
    %c0_i32_1 = arith.constant 0 : i32
    return %c0_i32, %c0_i32_0 : i32, i32
  }
  func.func @transform_4(%arg0: i32) -> (i32, i32) {
    %c0_i32 = arith.constant 0 : i32
    %c0_i32_0 = arith.constant 0 : i32
    return %c0_i32, %arg0 : i32, i32
  }
}

module attributes {stable_mosaic.version = 11 : i64} {
  func.func @_tap_gemm_kernel(%arg0: i32, %arg1: memref<8x512xbf16, #tpu.memory_space<vmem>>, %arg2: memref<8x512xbf16, #tpu.memory_space<vmem>>, %arg3: memref<27x8x8xbf16, #tpu.memory_space<vmem>>, %arg4: memref<8x1xf32, #tpu.memory_space<vmem>>, %arg5: memref<8x512xf32, #tpu.memory_space<vmem>>) attributes {dimension_semantics = [#tpu.dimension_semantics<parallel>], iteration_bounds = array<i64: 3>, scalar_prefetch = 0 : i64, scratch_operands = 0 : i64, tpu.core_type = #tpu.core_type<tc>, window_params = [{transform_indices = @transform_0, window_bounds = array<i64: 8, 512>}, {transform_indices = @transform_1, window_bounds = array<i64: 8, 512>}, {pipeline_mode = #tpu.pipeline_mode<synchronous>, transform_indices = @transform_2, window_bounds = array<i64: 27, 8, 8>}, {pipeline_mode = #tpu.pipeline_mode<synchronous>, transform_indices = @transform_3, window_bounds = array<i64: 8, 1>}, {transform_indices = @transform_4, window_bounds = array<i64: 8, 512>}]} {
    %c0 = arith.constant 0 : index
    %c0_0 = arith.constant 0 : index
    %0 = vector.load %arg1[%c0, %c0_0] : memref<8x512xbf16, #tpu.memory_space<vmem>>, vector<8x512xbf16>
    %c0_1 = arith.constant 0 : index
    %c0_2 = arith.constant 0 : index
    %1 = vector.load %arg2[%c0_1, %c0_2] : memref<8x512xbf16, #tpu.memory_space<vmem>>, vector<8x512xbf16>
    %2 = tpu.concatenate %0, %1 in 1 : vector<8x512xbf16>, vector<8x512xbf16> -> vector<8x1024xbf16>
    %c0_3 = arith.constant 0 : index
    %c0_4 = arith.constant 0 : index
    %c0_5 = arith.constant 0 : index
    %3 = vector.load %arg3[%c0_3, %c0_4, %c0_5] : memref<27x8x8xbf16, #tpu.memory_space<vmem>>, vector<1x8x8xbf16>
    %4 = vector.shape_cast %3 : vector<1x8x8xbf16> to vector<8x8xbf16>
    %5 = vector.extract_strided_slice %2 {offsets = [0, 0], sizes = [8, 512], strides = [1, 1]} : vector<8x1024xbf16> to vector<8x512xbf16>
    %cst = arith.constant dense<0.000000e+00> : vector<8x512xf32>
    %6 = tpu.matmul %4, %5, %cst {dimension_numbers = #tpu.dot_dimension_numbers<[1], [0], [0], [1], [0, 0, 1, 1], [], []>} : vector<8x8xbf16>, vector<8x512xbf16>, vector<8x512xf32> -> vector<8x512xf32>
    %c1 = arith.constant 1 : index
    %c0_6 = arith.constant 0 : index
    %c0_7 = arith.constant 0 : index
    %7 = vector.load %arg3[%c1, %c0_6, %c0_7] : memref<27x8x8xbf16, #tpu.memory_space<vmem>>, vector<1x8x8xbf16>
    %8 = vector.shape_cast %7 : vector<1x8x8xbf16> to vector<8x8xbf16>
    %9 = vector.extract_strided_slice %2 {offsets = [0, 1], sizes = [8, 512], strides = [1, 1]} : vector<8x1024xbf16> to vector<8x512xbf16>
    %cst_8 = arith.constant dense<0.000000e+00> : vector<8x512xf32>
    %10 = tpu.matmul %8, %9, %cst_8 {dimension_numbers = #tpu.dot_dimension_numbers<[1], [0], [0], [1], [0, 0, 1, 1], [], []>} : vector<8x8xbf16>, vector<8x512xbf16>, vector<8x512xf32> -> vector<8x512xf32>
    %11 = arith.addf %6, %10 : vector<8x512xf32>
    %c2 = arith.constant 2 : index
    %c0_9 = arith.constant 0 : index
    %c0_10 = arith.constant 0 : index
    %12 = vector.load %arg3[%c2, %c0_9, %c0_10] : memref<27x8x8xbf16, #tpu.memory_space<vmem>>, vector<1x8x8xbf16>
    %13 = vector.shape_cast %12 : vector<1x8x8xbf16> to vector<8x8xbf16>
    %14 = vector.extract_strided_slice %2 {offsets = [0, 2], sizes = [8, 512], strides = [1, 1]} : vector<8x1024xbf16> to vector<8x512xbf16>
    %cst_11 = arith.constant dense<0.000000e+00> : vector<8x512xf32>
    %15 = tpu.matmul %13, %14, %cst_11 {dimension_numbers = #tpu.dot_dimension_numbers<[1], [0], [0], [1], [0, 0, 1, 1], [], []>} : vector<8x8xbf16>, vector<8x512xbf16>, vector<8x512xf32> -> vector<8x512xf32>
    %16 = arith.addf %11, %15 : vector<8x512xf32>
    %c3 = arith.constant 3 : index
    %c0_12 = arith.constant 0 : index
    %c0_13 = arith.constant 0 : index
    %17 = vector.load %arg3[%c3, %c0_12, %c0_13] : memref<27x8x8xbf16, #tpu.memory_space<vmem>>, vector<1x8x8xbf16>
    %18 = vector.shape_cast %17 : vector<1x8x8xbf16> to vector<8x8xbf16>
    %19 = vector.extract_strided_slice %2 {offsets = [0, 10], sizes = [8, 512], strides = [1, 1]} : vector<8x1024xbf16> to vector<8x512xbf16>
    %cst_14 = arith.constant dense<0.000000e+00> : vector<8x512xf32>
    %20 = tpu.matmul %18, %19, %cst_14 {dimension_numbers = #tpu.dot_dimension_numbers<[1], [0], [0], [1], [0, 0, 1, 1], [], []>} : vector<8x8xbf16>, vector<8x512xbf16>, vector<8x512xf32> -> vector<8x512xf32>
    %21 = arith.addf %16, %20 : vector<8x512xf32>
    %c4 = arith.constant 4 : index
    %c0_15 = arith.constant 0 : index
    %c0_16 = arith.constant 0 : index
    %22 = vector.load %arg3[%c4, %c0_15, %c0_16] : memref<27x8x8xbf16, #tpu.memory_space<vmem>>, vector<1x8x8xbf16>
    %23 = vector.shape_cast %22 : vector<1x8x8xbf16> to vector<8x8xbf16>
    %24 = vector.extract_strided_slice %2 {offsets = [0, 11], sizes = [8, 512], strides = [1, 1]} : vector<8x1024xbf16> to vector<8x512xbf16>
    %cst_17 = arith.constant dense<0.000000e+00> : vector<8x512xf32>
    %25 = tpu.matmul %23, %24, %cst_17 {dimension_numbers = #tpu.dot_dimension_numbers<[1], [0], [0], [1], [0, 0, 1, 1], [], []>} : vector<8x8xbf16>, vector<8x512xbf16>, vector<8x512xf32> -> vector<8x512xf32>
    %26 = arith.addf %21, %25 : vector<8x512xf32>
    %c5 = arith.constant 5 : index
    %c0_18 = arith.constant 0 : index
    %c0_19 = arith.constant 0 : index
    %27 = vector.load %arg3[%c5, %c0_18, %c0_19] : memref<27x8x8xbf16, #tpu.memory_space<vmem>>, vector<1x8x8xbf16>
    %28 = vector.shape_cast %27 : vector<1x8x8xbf16> to vector<8x8xbf16>
    %29 = vector.extract_strided_slice %2 {offsets = [0, 12], sizes = [8, 512], strides = [1, 1]} : vector<8x1024xbf16> to vector<8x512xbf16>
    %cst_20 = arith.constant dense<0.000000e+00> : vector<8x512xf32>
    %30 = tpu.matmul %28, %29, %cst_20 {dimension_numbers = #tpu.dot_dimension_numbers<[1], [0], [0], [1], [0, 0, 1, 1], [], []>} : vector<8x8xbf16>, vector<8x512xbf16>, vector<8x512xf32> -> vector<8x512xf32>
    %31 = arith.addf %26, %30 : vector<8x512xf32>
    %c6 = arith.constant 6 : index
    %c0_21 = arith.constant 0 : index
    %c0_22 = arith.constant 0 : index
    %32 = vector.load %arg3[%c6, %c0_21, %c0_22] : memref<27x8x8xbf16, #tpu.memory_space<vmem>>, vector<1x8x8xbf16>
    %33 = vector.shape_cast %32 : vector<1x8x8xbf16> to vector<8x8xbf16>
    %34 = vector.extract_strided_slice %2 {offsets = [0, 20], sizes = [8, 512], strides = [1, 1]} : vector<8x1024xbf16> to vector<8x512xbf16>
    %cst_23 = arith.constant dense<0.000000e+00> : vector<8x512xf32>
    %35 = tpu.matmul %33, %34, %cst_23 {dimension_numbers = #tpu.dot_dimension_numbers<[1], [0], [0], [1], [0, 0, 1, 1], [], []>} : vector<8x8xbf16>, vector<8x512xbf16>, vector<8x512xf32> -> vector<8x512xf32>
    %36 = arith.addf %31, %35 : vector<8x512xf32>
    %c7 = arith.constant 7 : index
    %c0_24 = arith.constant 0 : index
    %c0_25 = arith.constant 0 : index
    %37 = vector.load %arg3[%c7, %c0_24, %c0_25] : memref<27x8x8xbf16, #tpu.memory_space<vmem>>, vector<1x8x8xbf16>
    %38 = vector.shape_cast %37 : vector<1x8x8xbf16> to vector<8x8xbf16>
    %39 = vector.extract_strided_slice %2 {offsets = [0, 21], sizes = [8, 512], strides = [1, 1]} : vector<8x1024xbf16> to vector<8x512xbf16>
    %cst_26 = arith.constant dense<0.000000e+00> : vector<8x512xf32>
    %40 = tpu.matmul %38, %39, %cst_26 {dimension_numbers = #tpu.dot_dimension_numbers<[1], [0], [0], [1], [0, 0, 1, 1], [], []>} : vector<8x8xbf16>, vector<8x512xbf16>, vector<8x512xf32> -> vector<8x512xf32>
    %41 = arith.addf %36, %40 : vector<8x512xf32>
    %c8 = arith.constant 8 : index
    %c0_27 = arith.constant 0 : index
    %c0_28 = arith.constant 0 : index
    %42 = vector.load %arg3[%c8, %c0_27, %c0_28] : memref<27x8x8xbf16, #tpu.memory_space<vmem>>, vector<1x8x8xbf16>
    %43 = vector.shape_cast %42 : vector<1x8x8xbf16> to vector<8x8xbf16>
    %44 = vector.extract_strided_slice %2 {offsets = [0, 22], sizes = [8, 512], strides = [1, 1]} : vector<8x1024xbf16> to vector<8x512xbf16>
    %cst_29 = arith.constant dense<0.000000e+00> : vector<8x512xf32>
    %45 = tpu.matmul %43, %44, %cst_29 {dimension_numbers = #tpu.dot_dimension_numbers<[1], [0], [0], [1], [0, 0, 1, 1], [], []>} : vector<8x8xbf16>, vector<8x512xbf16>, vector<8x512xf32> -> vector<8x512xf32>
    %46 = arith.addf %41, %45 : vector<8x512xf32>
    %c9 = arith.constant 9 : index
    %c0_30 = arith.constant 0 : index
    %c0_31 = arith.constant 0 : index
    %47 = vector.load %arg3[%c9, %c0_30, %c0_31] : memref<27x8x8xbf16, #tpu.memory_space<vmem>>, vector<1x8x8xbf16>
    %48 = vector.shape_cast %47 : vector<1x8x8xbf16> to vector<8x8xbf16>
    %49 = vector.extract_strided_slice %2 {offsets = [0, 100], sizes = [8, 512], strides = [1, 1]} : vector<8x1024xbf16> to vector<8x512xbf16>
    %cst_32 = arith.constant dense<0.000000e+00> : vector<8x512xf32>
    %50 = tpu.matmul %48, %49, %cst_32 {dimension_numbers = #tpu.dot_dimension_numbers<[1], [0], [0], [1], [0, 0, 1, 1], [], []>} : vector<8x8xbf16>, vector<8x512xbf16>, vector<8x512xf32> -> vector<8x512xf32>
    %51 = arith.addf %46, %50 : vector<8x512xf32>
    %c10 = arith.constant 10 : index
    %c0_33 = arith.constant 0 : index
    %c0_34 = arith.constant 0 : index
    %52 = vector.load %arg3[%c10, %c0_33, %c0_34] : memref<27x8x8xbf16, #tpu.memory_space<vmem>>, vector<1x8x8xbf16>
    %53 = vector.shape_cast %52 : vector<1x8x8xbf16> to vector<8x8xbf16>
    %54 = vector.extract_strided_slice %2 {offsets = [0, 101], sizes = [8, 512], strides = [1, 1]} : vector<8x1024xbf16> to vector<8x512xbf16>
    %cst_35 = arith.constant dense<0.000000e+00> : vector<8x512xf32>
    %55 = tpu.matmul %53, %54, %cst_35 {dimension_numbers = #tpu.dot_dimension_numbers<[1], [0], [0], [1], [0, 0, 1, 1], [], []>} : vector<8x8xbf16>, vector<8x512xbf16>, vector<8x512xf32> -> vector<8x512xf32>
    %56 = arith.addf %51, %55 : vector<8x512xf32>
    %c11 = arith.constant 11 : index
    %c0_36 = arith.constant 0 : index
    %c0_37 = arith.constant 0 : index
    %57 = vector.load %arg3[%c11, %c0_36, %c0_37] : memref<27x8x8xbf16, #tpu.memory_space<vmem>>, vector<1x8x8xbf16>
    %58 = vector.shape_cast %57 : vector<1x8x8xbf16> to vector<8x8xbf16>
    %59 = vector.extract_strided_slice %2 {offsets = [0, 102], sizes = [8, 512], strides = [1, 1]} : vector<8x1024xbf16> to vector<8x512xbf16>
    %cst_38 = arith.constant dense<0.000000e+00> : vector<8x512xf32>
    %60 = tpu.matmul %58, %59, %cst_38 {dimension_numbers = #tpu.dot_dimension_numbers<[1], [0], [0], [1], [0, 0, 1, 1], [], []>} : vector<8x8xbf16>, vector<8x512xbf16>, vector<8x512xf32> -> vector<8x512xf32>
    %61 = arith.addf %56, %60 : vector<8x512xf32>
    %c12 = arith.constant 12 : index
    %c0_39 = arith.constant 0 : index
    %c0_40 = arith.constant 0 : index
    %62 = vector.load %arg3[%c12, %c0_39, %c0_40] : memref<27x8x8xbf16, #tpu.memory_space<vmem>>, vector<1x8x8xbf16>
    %63 = vector.shape_cast %62 : vector<1x8x8xbf16> to vector<8x8xbf16>
    %64 = vector.extract_strided_slice %2 {offsets = [0, 110], sizes = [8, 512], strides = [1, 1]} : vector<8x1024xbf16> to vector<8x512xbf16>
    %cst_41 = arith.constant dense<0.000000e+00> : vector<8x512xf32>
    %65 = tpu.matmul %63, %64, %cst_41 {dimension_numbers = #tpu.dot_dimension_numbers<[1], [0], [0], [1], [0, 0, 1, 1], [], []>} : vector<8x8xbf16>, vector<8x512xbf16>, vector<8x512xf32> -> vector<8x512xf32>
    %66 = arith.addf %61, %65 : vector<8x512xf32>
    %c13 = arith.constant 13 : index
    %c0_42 = arith.constant 0 : index
    %c0_43 = arith.constant 0 : index
    %67 = vector.load %arg3[%c13, %c0_42, %c0_43] : memref<27x8x8xbf16, #tpu.memory_space<vmem>>, vector<1x8x8xbf16>
    %68 = vector.shape_cast %67 : vector<1x8x8xbf16> to vector<8x8xbf16>
    %69 = vector.extract_strided_slice %2 {offsets = [0, 111], sizes = [8, 512], strides = [1, 1]} : vector<8x1024xbf16> to vector<8x512xbf16>
    %cst_44 = arith.constant dense<0.000000e+00> : vector<8x512xf32>
    %70 = tpu.matmul %68, %69, %cst_44 {dimension_numbers = #tpu.dot_dimension_numbers<[1], [0], [0], [1], [0, 0, 1, 1], [], []>} : vector<8x8xbf16>, vector<8x512xbf16>, vector<8x512xf32> -> vector<8x512xf32>
    %71 = arith.addf %66, %70 : vector<8x512xf32>
    %c14 = arith.constant 14 : index
    %c0_45 = arith.constant 0 : index
    %c0_46 = arith.constant 0 : index
    %72 = vector.load %arg3[%c14, %c0_45, %c0_46] : memref<27x8x8xbf16, #tpu.memory_space<vmem>>, vector<1x8x8xbf16>
    %73 = vector.shape_cast %72 : vector<1x8x8xbf16> to vector<8x8xbf16>
    %74 = vector.extract_strided_slice %2 {offsets = [0, 112], sizes = [8, 512], strides = [1, 1]} : vector<8x1024xbf16> to vector<8x512xbf16>
    %cst_47 = arith.constant dense<0.000000e+00> : vector<8x512xf32>
    %75 = tpu.matmul %73, %74, %cst_47 {dimension_numbers = #tpu.dot_dimension_numbers<[1], [0], [0], [1], [0, 0, 1, 1], [], []>} : vector<8x8xbf16>, vector<8x512xbf16>, vector<8x512xf32> -> vector<8x512xf32>
    %76 = arith.addf %71, %75 : vector<8x512xf32>
    %c15 = arith.constant 15 : index
    %c0_48 = arith.constant 0 : index
    %c0_49 = arith.constant 0 : index
    %77 = vector.load %arg3[%c15, %c0_48, %c0_49] : memref<27x8x8xbf16, #tpu.memory_space<vmem>>, vector<1x8x8xbf16>
    %78 = vector.shape_cast %77 : vector<1x8x8xbf16> to vector<8x8xbf16>
    %79 = vector.extract_strided_slice %2 {offsets = [0, 120], sizes = [8, 512], strides = [1, 1]} : vector<8x1024xbf16> to vector<8x512xbf16>
    %cst_50 = arith.constant dense<0.000000e+00> : vector<8x512xf32>
    %80 = tpu.matmul %78, %79, %cst_50 {dimension_numbers = #tpu.dot_dimension_numbers<[1], [0], [0], [1], [0, 0, 1, 1], [], []>} : vector<8x8xbf16>, vector<8x512xbf16>, vector<8x512xf32> -> vector<8x512xf32>
    %81 = arith.addf %76, %80 : vector<8x512xf32>
    %c16 = arith.constant 16 : index
    %c0_51 = arith.constant 0 : index
    %c0_52 = arith.constant 0 : index
    %82 = vector.load %arg3[%c16, %c0_51, %c0_52] : memref<27x8x8xbf16, #tpu.memory_space<vmem>>, vector<1x8x8xbf16>
    %83 = vector.shape_cast %82 : vector<1x8x8xbf16> to vector<8x8xbf16>
    %84 = vector.extract_strided_slice %2 {offsets = [0, 121], sizes = [8, 512], strides = [1, 1]} : vector<8x1024xbf16> to vector<8x512xbf16>
    %cst_53 = arith.constant dense<0.000000e+00> : vector<8x512xf32>
    %85 = tpu.matmul %83, %84, %cst_53 {dimension_numbers = #tpu.dot_dimension_numbers<[1], [0], [0], [1], [0, 0, 1, 1], [], []>} : vector<8x8xbf16>, vector<8x512xbf16>, vector<8x512xf32> -> vector<8x512xf32>
    %86 = arith.addf %81, %85 : vector<8x512xf32>
    %c17 = arith.constant 17 : index
    %c0_54 = arith.constant 0 : index
    %c0_55 = arith.constant 0 : index
    %87 = vector.load %arg3[%c17, %c0_54, %c0_55] : memref<27x8x8xbf16, #tpu.memory_space<vmem>>, vector<1x8x8xbf16>
    %88 = vector.shape_cast %87 : vector<1x8x8xbf16> to vector<8x8xbf16>
    %89 = vector.extract_strided_slice %2 {offsets = [0, 122], sizes = [8, 512], strides = [1, 1]} : vector<8x1024xbf16> to vector<8x512xbf16>
    %cst_56 = arith.constant dense<0.000000e+00> : vector<8x512xf32>
    %90 = tpu.matmul %88, %89, %cst_56 {dimension_numbers = #tpu.dot_dimension_numbers<[1], [0], [0], [1], [0, 0, 1, 1], [], []>} : vector<8x8xbf16>, vector<8x512xbf16>, vector<8x512xf32> -> vector<8x512xf32>
    %91 = arith.addf %86, %90 : vector<8x512xf32>
    %c18 = arith.constant 18 : index
    %c0_57 = arith.constant 0 : index
    %c0_58 = arith.constant 0 : index
    %92 = vector.load %arg3[%c18, %c0_57, %c0_58] : memref<27x8x8xbf16, #tpu.memory_space<vmem>>, vector<1x8x8xbf16>
    %93 = vector.shape_cast %92 : vector<1x8x8xbf16> to vector<8x8xbf16>
    %94 = vector.extract_strided_slice %2 {offsets = [0, 200], sizes = [8, 512], strides = [1, 1]} : vector<8x1024xbf16> to vector<8x512xbf16>
    %cst_59 = arith.constant dense<0.000000e+00> : vector<8x512xf32>
    %95 = tpu.matmul %93, %94, %cst_59 {dimension_numbers = #tpu.dot_dimension_numbers<[1], [0], [0], [1], [0, 0, 1, 1], [], []>} : vector<8x8xbf16>, vector<8x512xbf16>, vector<8x512xf32> -> vector<8x512xf32>
    %96 = arith.addf %91, %95 : vector<8x512xf32>
    %c19 = arith.constant 19 : index
    %c0_60 = arith.constant 0 : index
    %c0_61 = arith.constant 0 : index
    %97 = vector.load %arg3[%c19, %c0_60, %c0_61] : memref<27x8x8xbf16, #tpu.memory_space<vmem>>, vector<1x8x8xbf16>
    %98 = vector.shape_cast %97 : vector<1x8x8xbf16> to vector<8x8xbf16>
    %99 = vector.extract_strided_slice %2 {offsets = [0, 201], sizes = [8, 512], strides = [1, 1]} : vector<8x1024xbf16> to vector<8x512xbf16>
    %cst_62 = arith.constant dense<0.000000e+00> : vector<8x512xf32>
    %100 = tpu.matmul %98, %99, %cst_62 {dimension_numbers = #tpu.dot_dimension_numbers<[1], [0], [0], [1], [0, 0, 1, 1], [], []>} : vector<8x8xbf16>, vector<8x512xbf16>, vector<8x512xf32> -> vector<8x512xf32>
    %101 = arith.addf %96, %100 : vector<8x512xf32>
    %c20 = arith.constant 20 : index
    %c0_63 = arith.constant 0 : index
    %c0_64 = arith.constant 0 : index
    %102 = vector.load %arg3[%c20, %c0_63, %c0_64] : memref<27x8x8xbf16, #tpu.memory_space<vmem>>, vector<1x8x8xbf16>
    %103 = vector.shape_cast %102 : vector<1x8x8xbf16> to vector<8x8xbf16>
    %104 = vector.extract_strided_slice %2 {offsets = [0, 202], sizes = [8, 512], strides = [1, 1]} : vector<8x1024xbf16> to vector<8x512xbf16>
    %cst_65 = arith.constant dense<0.000000e+00> : vector<8x512xf32>
    %105 = tpu.matmul %103, %104, %cst_65 {dimension_numbers = #tpu.dot_dimension_numbers<[1], [0], [0], [1], [0, 0, 1, 1], [], []>} : vector<8x8xbf16>, vector<8x512xbf16>, vector<8x512xf32> -> vector<8x512xf32>
    %106 = arith.addf %101, %105 : vector<8x512xf32>
    %c21 = arith.constant 21 : index
    %c0_66 = arith.constant 0 : index
    %c0_67 = arith.constant 0 : index
    %107 = vector.load %arg3[%c21, %c0_66, %c0_67] : memref<27x8x8xbf16, #tpu.memory_space<vmem>>, vector<1x8x8xbf16>
    %108 = vector.shape_cast %107 : vector<1x8x8xbf16> to vector<8x8xbf16>
    %109 = vector.extract_strided_slice %2 {offsets = [0, 210], sizes = [8, 512], strides = [1, 1]} : vector<8x1024xbf16> to vector<8x512xbf16>
    %cst_68 = arith.constant dense<0.000000e+00> : vector<8x512xf32>
    %110 = tpu.matmul %108, %109, %cst_68 {dimension_numbers = #tpu.dot_dimension_numbers<[1], [0], [0], [1], [0, 0, 1, 1], [], []>} : vector<8x8xbf16>, vector<8x512xbf16>, vector<8x512xf32> -> vector<8x512xf32>
    %111 = arith.addf %106, %110 : vector<8x512xf32>
    %c22 = arith.constant 22 : index
    %c0_69 = arith.constant 0 : index
    %c0_70 = arith.constant 0 : index
    %112 = vector.load %arg3[%c22, %c0_69, %c0_70] : memref<27x8x8xbf16, #tpu.memory_space<vmem>>, vector<1x8x8xbf16>
    %113 = vector.shape_cast %112 : vector<1x8x8xbf16> to vector<8x8xbf16>
    %114 = vector.extract_strided_slice %2 {offsets = [0, 211], sizes = [8, 512], strides = [1, 1]} : vector<8x1024xbf16> to vector<8x512xbf16>
    %cst_71 = arith.constant dense<0.000000e+00> : vector<8x512xf32>
    %115 = tpu.matmul %113, %114, %cst_71 {dimension_numbers = #tpu.dot_dimension_numbers<[1], [0], [0], [1], [0, 0, 1, 1], [], []>} : vector<8x8xbf16>, vector<8x512xbf16>, vector<8x512xf32> -> vector<8x512xf32>
    %116 = arith.addf %111, %115 : vector<8x512xf32>
    %c23 = arith.constant 23 : index
    %c0_72 = arith.constant 0 : index
    %c0_73 = arith.constant 0 : index
    %117 = vector.load %arg3[%c23, %c0_72, %c0_73] : memref<27x8x8xbf16, #tpu.memory_space<vmem>>, vector<1x8x8xbf16>
    %118 = vector.shape_cast %117 : vector<1x8x8xbf16> to vector<8x8xbf16>
    %119 = vector.extract_strided_slice %2 {offsets = [0, 212], sizes = [8, 512], strides = [1, 1]} : vector<8x1024xbf16> to vector<8x512xbf16>
    %cst_74 = arith.constant dense<0.000000e+00> : vector<8x512xf32>
    %120 = tpu.matmul %118, %119, %cst_74 {dimension_numbers = #tpu.dot_dimension_numbers<[1], [0], [0], [1], [0, 0, 1, 1], [], []>} : vector<8x8xbf16>, vector<8x512xbf16>, vector<8x512xf32> -> vector<8x512xf32>
    %121 = arith.addf %116, %120 : vector<8x512xf32>
    %c24 = arith.constant 24 : index
    %c0_75 = arith.constant 0 : index
    %c0_76 = arith.constant 0 : index
    %122 = vector.load %arg3[%c24, %c0_75, %c0_76] : memref<27x8x8xbf16, #tpu.memory_space<vmem>>, vector<1x8x8xbf16>
    %123 = vector.shape_cast %122 : vector<1x8x8xbf16> to vector<8x8xbf16>
    %124 = vector.extract_strided_slice %2 {offsets = [0, 220], sizes = [8, 512], strides = [1, 1]} : vector<8x1024xbf16> to vector<8x512xbf16>
    %cst_77 = arith.constant dense<0.000000e+00> : vector<8x512xf32>
    %125 = tpu.matmul %123, %124, %cst_77 {dimension_numbers = #tpu.dot_dimension_numbers<[1], [0], [0], [1], [0, 0, 1, 1], [], []>} : vector<8x8xbf16>, vector<8x512xbf16>, vector<8x512xf32> -> vector<8x512xf32>
    %126 = arith.addf %121, %125 : vector<8x512xf32>
    %c25 = arith.constant 25 : index
    %c0_78 = arith.constant 0 : index
    %c0_79 = arith.constant 0 : index
    %127 = vector.load %arg3[%c25, %c0_78, %c0_79] : memref<27x8x8xbf16, #tpu.memory_space<vmem>>, vector<1x8x8xbf16>
    %128 = vector.shape_cast %127 : vector<1x8x8xbf16> to vector<8x8xbf16>
    %129 = vector.extract_strided_slice %2 {offsets = [0, 221], sizes = [8, 512], strides = [1, 1]} : vector<8x1024xbf16> to vector<8x512xbf16>
    %cst_80 = arith.constant dense<0.000000e+00> : vector<8x512xf32>
    %130 = tpu.matmul %128, %129, %cst_80 {dimension_numbers = #tpu.dot_dimension_numbers<[1], [0], [0], [1], [0, 0, 1, 1], [], []>} : vector<8x8xbf16>, vector<8x512xbf16>, vector<8x512xf32> -> vector<8x512xf32>
    %131 = arith.addf %126, %130 : vector<8x512xf32>
    %c26 = arith.constant 26 : index
    %c0_81 = arith.constant 0 : index
    %c0_82 = arith.constant 0 : index
    %132 = vector.load %arg3[%c26, %c0_81, %c0_82] : memref<27x8x8xbf16, #tpu.memory_space<vmem>>, vector<1x8x8xbf16>
    %133 = vector.shape_cast %132 : vector<1x8x8xbf16> to vector<8x8xbf16>
    %134 = vector.extract_strided_slice %2 {offsets = [0, 222], sizes = [8, 512], strides = [1, 1]} : vector<8x1024xbf16> to vector<8x512xbf16>
    %cst_83 = arith.constant dense<0.000000e+00> : vector<8x512xf32>
    %135 = tpu.matmul %133, %134, %cst_83 {dimension_numbers = #tpu.dot_dimension_numbers<[1], [0], [0], [1], [0, 0, 1, 1], [], []>} : vector<8x8xbf16>, vector<8x512xbf16>, vector<8x512xf32> -> vector<8x512xf32>
    %136 = arith.addf %131, %135 : vector<8x512xf32>
    %c0_84 = arith.constant 0 : index
    %c0_85 = arith.constant 0 : index
    %137 = vector.load %arg4[%c0_84, %c0_85] : memref<8x1xf32, #tpu.memory_space<vmem>>, vector<8x1xf32>
    %138 = vector.broadcast %137 : vector<8x1xf32> to vector<8x512xf32>
    %139 = arith.addf %136, %138 : vector<8x512xf32>
    %cst_86 = arith.constant 0.000000e+00 : f32
    %140 = vector.broadcast %cst_86 : f32 to vector<8x512xf32>
    %141 = arith.maximumf %139, %140 : vector<8x512xf32>
    %c0_87 = arith.constant 0 : index
    %c0_88 = arith.constant 0 : index
    %142 = vector.load %arg5[%c0_87, %c0_88] : memref<8x512xf32, #tpu.memory_space<vmem>>, vector<8x512xf32>
    tpu.vector_store %arg5[%c0_87, %c0_88], %141 {strides = array<i32>} : memref<8x512xf32, #tpu.memory_space<vmem>>, vector<8x512xf32>,
    return
  }
  func.func @transform_0(%arg0: i32) -> (i32, i32) {
    %c0_i32 = arith.constant 0 : i32
    %c0_i32_0 = arith.constant 0 : i32
    return %c0_i32, %arg0 : i32, i32
  }
  func.func @transform_1(%arg0: i32) -> (i32, i32) {
    %c1_i32 = arith.constant 1 : i32
    %0 = arith.addi %arg0, %c1_i32 : i32
    %c0_i32 = arith.constant 0 : i32
    %c0_i32_0 = arith.constant 0 : i32
    return %c0_i32, %0 : i32, i32
  }
  func.func @transform_2(%arg0: i32) -> (i32, i32, i32) {
    %c0_i32 = arith.constant 0 : i32
    %c0_i32_0 = arith.constant 0 : i32
    %c0_i32_1 = arith.constant 0 : i32
    %c0_i32_2 = arith.constant 0 : i32
    return %c0_i32, %c0_i32_0, %c0_i32_1 : i32, i32, i32
  }
  func.func @transform_3(%arg0: i32) -> (i32, i32) {
    %c0_i32 = arith.constant 0 : i32
    %c0_i32_0 = arith.constant 0 : i32
    %c0_i32_1 = arith.constant 0 : i32
    return %c0_i32, %c0_i32_0 : i32, i32
  }
  func.func @transform_4(%arg0: i32) -> (i32, i32) {
    %c0_i32 = arith.constant 0 : i32
    %c0_i32_0 = arith.constant 0 : i32
    return %c0_i32, %arg0 : i32, i32
  }
}

module attributes {stable_mosaic.version = 11 : i64} {
  func.func @_tap_gemm_kernel(%arg0: i32, %arg1: memref<64x128xbf16, #tpu.memory_space<vmem>>, %arg2: memref<64x128xbf16, #tpu.memory_space<vmem>>, %arg3: memref<27x8x64xbf16, #tpu.memory_space<vmem>>, %arg4: memref<8x1xf32, #tpu.memory_space<vmem>>, %arg5: memref<8x128xf32, #tpu.memory_space<vmem>>) attributes {dimension_semantics = [#tpu.dimension_semantics<parallel>], iteration_bounds = array<i64: 2>, scalar_prefetch = 0 : i64, scratch_operands = 0 : i64, tpu.core_type = #tpu.core_type<tc>, window_params = [{transform_indices = @transform_0, window_bounds = array<i64: 64, 128>}, {transform_indices = @transform_1, window_bounds = array<i64: 64, 128>}, {pipeline_mode = #tpu.pipeline_mode<synchronous>, transform_indices = @transform_2, window_bounds = array<i64: 27, 8, 64>}, {pipeline_mode = #tpu.pipeline_mode<synchronous>, transform_indices = @transform_3, window_bounds = array<i64: 8, 1>}, {transform_indices = @transform_4, window_bounds = array<i64: 8, 128>}]} {
    %c0 = arith.constant 0 : index
    %c0_0 = arith.constant 0 : index
    %0 = vector.load %arg1[%c0, %c0_0] : memref<64x128xbf16, #tpu.memory_space<vmem>>, vector<64x128xbf16>
    %c0_1 = arith.constant 0 : index
    %c0_2 = arith.constant 0 : index
    %1 = vector.load %arg2[%c0_1, %c0_2] : memref<64x128xbf16, #tpu.memory_space<vmem>>, vector<64x128xbf16>
    %2 = tpu.concatenate %0, %1 in 1 : vector<64x128xbf16>, vector<64x128xbf16> -> vector<64x256xbf16>
    %c0_3 = arith.constant 0 : index
    %c0_4 = arith.constant 0 : index
    %c0_5 = arith.constant 0 : index
    %3 = vector.load %arg3[%c0_3, %c0_4, %c0_5] : memref<27x8x64xbf16, #tpu.memory_space<vmem>>, vector<1x8x64xbf16>
    %4 = vector.shape_cast %3 : vector<1x8x64xbf16> to vector<8x64xbf16>
    %5 = vector.extract_strided_slice %2 {offsets = [0, 0], sizes = [64, 128], strides = [1, 1]} : vector<64x256xbf16> to vector<64x128xbf16>
    %cst = arith.constant dense<0.000000e+00> : vector<8x128xf32>
    %6 = tpu.matmul %4, %5, %cst {dimension_numbers = #tpu.dot_dimension_numbers<[1], [0], [0], [1], [0, 0, 1, 1], [], []>} : vector<8x64xbf16>, vector<64x128xbf16>, vector<8x128xf32> -> vector<8x128xf32>
    %c1 = arith.constant 1 : index
    %c0_6 = arith.constant 0 : index
    %c0_7 = arith.constant 0 : index
    %7 = vector.load %arg3[%c1, %c0_6, %c0_7] : memref<27x8x64xbf16, #tpu.memory_space<vmem>>, vector<1x8x64xbf16>
    %8 = vector.shape_cast %7 : vector<1x8x64xbf16> to vector<8x64xbf16>
    %9 = vector.extract_strided_slice %2 {offsets = [0, 0], sizes = [64, 128], strides = [1, 1]} : vector<64x256xbf16> to vector<64x128xbf16>
    %cst_8 = arith.constant dense<0.000000e+00> : vector<8x128xf32>
    %10 = tpu.matmul %8, %9, %cst_8 {dimension_numbers = #tpu.dot_dimension_numbers<[1], [0], [0], [1], [0, 0, 1, 1], [], []>} : vector<8x64xbf16>, vector<64x128xbf16>, vector<8x128xf32> -> vector<8x128xf32>
    %11 = arith.addf %6, %10 : vector<8x128xf32>
    %c2 = arith.constant 2 : index
    %c0_9 = arith.constant 0 : index
    %c0_10 = arith.constant 0 : index
    %12 = vector.load %arg3[%c2, %c0_9, %c0_10] : memref<27x8x64xbf16, #tpu.memory_space<vmem>>, vector<1x8x64xbf16>
    %13 = vector.shape_cast %12 : vector<1x8x64xbf16> to vector<8x64xbf16>
    %14 = vector.extract_strided_slice %2 {offsets = [0, 1], sizes = [64, 128], strides = [1, 1]} : vector<64x256xbf16> to vector<64x128xbf16>
    %cst_11 = arith.constant dense<0.000000e+00> : vector<8x128xf32>
    %15 = tpu.matmul %13, %14, %cst_11 {dimension_numbers = #tpu.dot_dimension_numbers<[1], [0], [0], [1], [0, 0, 1, 1], [], []>} : vector<8x64xbf16>, vector<64x128xbf16>, vector<8x128xf32> -> vector<8x128xf32>
    %16 = arith.addf %11, %15 : vector<8x128xf32>
    %c3 = arith.constant 3 : index
    %c0_12 = arith.constant 0 : index
    %c0_13 = arith.constant 0 : index
    %17 = vector.load %arg3[%c3, %c0_12, %c0_13] : memref<27x8x64xbf16, #tpu.memory_space<vmem>>, vector<1x8x64xbf16>
    %18 = vector.shape_cast %17 : vector<1x8x64xbf16> to vector<8x64xbf16>
    %19 = vector.extract_strided_slice %2 {offsets = [0, 0], sizes = [64, 128], strides = [1, 1]} : vector<64x256xbf16> to vector<64x128xbf16>
    %cst_14 = arith.constant dense<0.000000e+00> : vector<8x128xf32>
    %20 = tpu.matmul %18, %19, %cst_14 {dimension_numbers = #tpu.dot_dimension_numbers<[1], [0], [0], [1], [0, 0, 1, 1], [], []>} : vector<8x64xbf16>, vector<64x128xbf16>, vector<8x128xf32> -> vector<8x128xf32>
    %21 = arith.addf %16, %20 : vector<8x128xf32>
    %c4 = arith.constant 4 : index
    %c0_15 = arith.constant 0 : index
    %c0_16 = arith.constant 0 : index
    %22 = vector.load %arg3[%c4, %c0_15, %c0_16] : memref<27x8x64xbf16, #tpu.memory_space<vmem>>, vector<1x8x64xbf16>
    %23 = vector.shape_cast %22 : vector<1x8x64xbf16> to vector<8x64xbf16>
    %24 = vector.extract_strided_slice %2 {offsets = [0, 0], sizes = [64, 128], strides = [1, 1]} : vector<64x256xbf16> to vector<64x128xbf16>
    %cst_17 = arith.constant dense<0.000000e+00> : vector<8x128xf32>
    %25 = tpu.matmul %23, %24, %cst_17 {dimension_numbers = #tpu.dot_dimension_numbers<[1], [0], [0], [1], [0, 0, 1, 1], [], []>} : vector<8x64xbf16>, vector<64x128xbf16>, vector<8x128xf32> -> vector<8x128xf32>
    %26 = arith.addf %21, %25 : vector<8x128xf32>
    %c5 = arith.constant 5 : index
    %c0_18 = arith.constant 0 : index
    %c0_19 = arith.constant 0 : index
    %27 = vector.load %arg3[%c5, %c0_18, %c0_19] : memref<27x8x64xbf16, #tpu.memory_space<vmem>>, vector<1x8x64xbf16>
    %28 = vector.shape_cast %27 : vector<1x8x64xbf16> to vector<8x64xbf16>
    %29 = vector.extract_strided_slice %2 {offsets = [0, 1], sizes = [64, 128], strides = [1, 1]} : vector<64x256xbf16> to vector<64x128xbf16>
    %cst_20 = arith.constant dense<0.000000e+00> : vector<8x128xf32>
    %30 = tpu.matmul %28, %29, %cst_20 {dimension_numbers = #tpu.dot_dimension_numbers<[1], [0], [0], [1], [0, 0, 1, 1], [], []>} : vector<8x64xbf16>, vector<64x128xbf16>, vector<8x128xf32> -> vector<8x128xf32>
    %31 = arith.addf %26, %30 : vector<8x128xf32>
    %c6 = arith.constant 6 : index
    %c0_21 = arith.constant 0 : index
    %c0_22 = arith.constant 0 : index
    %32 = vector.load %arg3[%c6, %c0_21, %c0_22] : memref<27x8x64xbf16, #tpu.memory_space<vmem>>, vector<1x8x64xbf16>
    %33 = vector.shape_cast %32 : vector<1x8x64xbf16> to vector<8x64xbf16>
    %34 = vector.extract_strided_slice %2 {offsets = [0, 5], sizes = [64, 128], strides = [1, 1]} : vector<64x256xbf16> to vector<64x128xbf16>
    %cst_23 = arith.constant dense<0.000000e+00> : vector<8x128xf32>
    %35 = tpu.matmul %33, %34, %cst_23 {dimension_numbers = #tpu.dot_dimension_numbers<[1], [0], [0], [1], [0, 0, 1, 1], [], []>} : vector<8x64xbf16>, vector<64x128xbf16>, vector<8x128xf32> -> vector<8x128xf32>
    %36 = arith.addf %31, %35 : vector<8x128xf32>
    %c7 = arith.constant 7 : index
    %c0_24 = arith.constant 0 : index
    %c0_25 = arith.constant 0 : index
    %37 = vector.load %arg3[%c7, %c0_24, %c0_25] : memref<27x8x64xbf16, #tpu.memory_space<vmem>>, vector<1x8x64xbf16>
    %38 = vector.shape_cast %37 : vector<1x8x64xbf16> to vector<8x64xbf16>
    %39 = vector.extract_strided_slice %2 {offsets = [0, 5], sizes = [64, 128], strides = [1, 1]} : vector<64x256xbf16> to vector<64x128xbf16>
    %cst_26 = arith.constant dense<0.000000e+00> : vector<8x128xf32>
    %40 = tpu.matmul %38, %39, %cst_26 {dimension_numbers = #tpu.dot_dimension_numbers<[1], [0], [0], [1], [0, 0, 1, 1], [], []>} : vector<8x64xbf16>, vector<64x128xbf16>, vector<8x128xf32> -> vector<8x128xf32>
    %41 = arith.addf %36, %40 : vector<8x128xf32>
    %c8 = arith.constant 8 : index
    %c0_27 = arith.constant 0 : index
    %c0_28 = arith.constant 0 : index
    %42 = vector.load %arg3[%c8, %c0_27, %c0_28] : memref<27x8x64xbf16, #tpu.memory_space<vmem>>, vector<1x8x64xbf16>
    %43 = vector.shape_cast %42 : vector<1x8x64xbf16> to vector<8x64xbf16>
    %44 = vector.extract_strided_slice %2 {offsets = [0, 6], sizes = [64, 128], strides = [1, 1]} : vector<64x256xbf16> to vector<64x128xbf16>
    %cst_29 = arith.constant dense<0.000000e+00> : vector<8x128xf32>
    %45 = tpu.matmul %43, %44, %cst_29 {dimension_numbers = #tpu.dot_dimension_numbers<[1], [0], [0], [1], [0, 0, 1, 1], [], []>} : vector<8x64xbf16>, vector<64x128xbf16>, vector<8x128xf32> -> vector<8x128xf32>
    %46 = arith.addf %41, %45 : vector<8x128xf32>
    %c9 = arith.constant 9 : index
    %c0_30 = arith.constant 0 : index
    %c0_31 = arith.constant 0 : index
    %47 = vector.load %arg3[%c9, %c0_30, %c0_31] : memref<27x8x64xbf16, #tpu.memory_space<vmem>>, vector<1x8x64xbf16>
    %48 = vector.shape_cast %47 : vector<1x8x64xbf16> to vector<8x64xbf16>
    %49 = vector.extract_strided_slice %2 {offsets = [0, 0], sizes = [64, 128], strides = [1, 1]} : vector<64x256xbf16> to vector<64x128xbf16>
    %cst_32 = arith.constant dense<0.000000e+00> : vector<8x128xf32>
    %50 = tpu.matmul %48, %49, %cst_32 {dimension_numbers = #tpu.dot_dimension_numbers<[1], [0], [0], [1], [0, 0, 1, 1], [], []>} : vector<8x64xbf16>, vector<64x128xbf16>, vector<8x128xf32> -> vector<8x128xf32>
    %51 = arith.addf %46, %50 : vector<8x128xf32>
    %c10 = arith.constant 10 : index
    %c0_33 = arith.constant 0 : index
    %c0_34 = arith.constant 0 : index
    %52 = vector.load %arg3[%c10, %c0_33, %c0_34] : memref<27x8x64xbf16, #tpu.memory_space<vmem>>, vector<1x8x64xbf16>
    %53 = vector.shape_cast %52 : vector<1x8x64xbf16> to vector<8x64xbf16>
    %54 = vector.extract_strided_slice %2 {offsets = [0, 0], sizes = [64, 128], strides = [1, 1]} : vector<64x256xbf16> to vector<64x128xbf16>
    %cst_35 = arith.constant dense<0.000000e+00> : vector<8x128xf32>
    %55 = tpu.matmul %53, %54, %cst_35 {dimension_numbers = #tpu.dot_dimension_numbers<[1], [0], [0], [1], [0, 0, 1, 1], [], []>} : vector<8x64xbf16>, vector<64x128xbf16>, vector<8x128xf32> -> vector<8x128xf32>
    %56 = arith.addf %51, %55 : vector<8x128xf32>
    %c11 = arith.constant 11 : index
    %c0_36 = arith.constant 0 : index
    %c0_37 = arith.constant 0 : index
    %57 = vector.load %arg3[%c11, %c0_36, %c0_37] : memref<27x8x64xbf16, #tpu.memory_space<vmem>>, vector<1x8x64xbf16>
    %58 = vector.shape_cast %57 : vector<1x8x64xbf16> to vector<8x64xbf16>
    %59 = vector.extract_strided_slice %2 {offsets = [0, 1], sizes = [64, 128], strides = [1, 1]} : vector<64x256xbf16> to vector<64x128xbf16>
    %cst_38 = arith.constant dense<0.000000e+00> : vector<8x128xf32>
    %60 = tpu.matmul %58, %59, %cst_38 {dimension_numbers = #tpu.dot_dimension_numbers<[1], [0], [0], [1], [0, 0, 1, 1], [], []>} : vector<8x64xbf16>, vector<64x128xbf16>, vector<8x128xf32> -> vector<8x128xf32>
    %61 = arith.addf %56, %60 : vector<8x128xf32>
    %c12 = arith.constant 12 : index
    %c0_39 = arith.constant 0 : index
    %c0_40 = arith.constant 0 : index
    %62 = vector.load %arg3[%c12, %c0_39, %c0_40] : memref<27x8x64xbf16, #tpu.memory_space<vmem>>, vector<1x8x64xbf16>
    %63 = vector.shape_cast %62 : vector<1x8x64xbf16> to vector<8x64xbf16>
    %64 = vector.extract_strided_slice %2 {offsets = [0, 0], sizes = [64, 128], strides = [1, 1]} : vector<64x256xbf16> to vector<64x128xbf16>
    %cst_41 = arith.constant dense<0.000000e+00> : vector<8x128xf32>
    %65 = tpu.matmul %63, %64, %cst_41 {dimension_numbers = #tpu.dot_dimension_numbers<[1], [0], [0], [1], [0, 0, 1, 1], [], []>} : vector<8x64xbf16>, vector<64x128xbf16>, vector<8x128xf32> -> vector<8x128xf32>
    %66 = arith.addf %61, %65 : vector<8x128xf32>
    %c13 = arith.constant 13 : index
    %c0_42 = arith.constant 0 : index
    %c0_43 = arith.constant 0 : index
    %67 = vector.load %arg3[%c13, %c0_42, %c0_43] : memref<27x8x64xbf16, #tpu.memory_space<vmem>>, vector<1x8x64xbf16>
    %68 = vector.shape_cast %67 : vector<1x8x64xbf16> to vector<8x64xbf16>
    %69 = vector.extract_strided_slice %2 {offsets = [0, 0], sizes = [64, 128], strides = [1, 1]} : vector<64x256xbf16> to vector<64x128xbf16>
    %cst_44 = arith.constant dense<0.000000e+00> : vector<8x128xf32>
    %70 = tpu.matmul %68, %69, %cst_44 {dimension_numbers = #tpu.dot_dimension_numbers<[1], [0], [0], [1], [0, 0, 1, 1], [], []>} : vector<8x64xbf16>, vector<64x128xbf16>, vector<8x128xf32> -> vector<8x128xf32>
    %71 = arith.addf %66, %70 : vector<8x128xf32>
    %c14 = arith.constant 14 : index
    %c0_45 = arith.constant 0 : index
    %c0_46 = arith.constant 0 : index
    %72 = vector.load %arg3[%c14, %c0_45, %c0_46] : memref<27x8x64xbf16, #tpu.memory_space<vmem>>, vector<1x8x64xbf16>
    %73 = vector.shape_cast %72 : vector<1x8x64xbf16> to vector<8x64xbf16>
    %74 = vector.extract_strided_slice %2 {offsets = [0, 1], sizes = [64, 128], strides = [1, 1]} : vector<64x256xbf16> to vector<64x128xbf16>
    %cst_47 = arith.constant dense<0.000000e+00> : vector<8x128xf32>
    %75 = tpu.matmul %73, %74, %cst_47 {dimension_numbers = #tpu.dot_dimension_numbers<[1], [0], [0], [1], [0, 0, 1, 1], [], []>} : vector<8x64xbf16>, vector<64x128xbf16>, vector<8x128xf32> -> vector<8x128xf32>
    %76 = arith.addf %71, %75 : vector<8x128xf32>
    %c15 = arith.constant 15 : index
    %c0_48 = arith.constant 0 : index
    %c0_49 = arith.constant 0 : index
    %77 = vector.load %arg3[%c15, %c0_48, %c0_49] : memref<27x8x64xbf16, #tpu.memory_space<vmem>>, vector<1x8x64xbf16>
    %78 = vector.shape_cast %77 : vector<1x8x64xbf16> to vector<8x64xbf16>
    %79 = vector.extract_strided_slice %2 {offsets = [0, 5], sizes = [64, 128], strides = [1, 1]} : vector<64x256xbf16> to vector<64x128xbf16>
    %cst_50 = arith.constant dense<0.000000e+00> : vector<8x128xf32>
    %80 = tpu.matmul %78, %79, %cst_50 {dimension_numbers = #tpu.dot_dimension_numbers<[1], [0], [0], [1], [0, 0, 1, 1], [], []>} : vector<8x64xbf16>, vector<64x128xbf16>, vector<8x128xf32> -> vector<8x128xf32>
    %81 = arith.addf %76, %80 : vector<8x128xf32>
    %c16 = arith.constant 16 : index
    %c0_51 = arith.constant 0 : index
    %c0_52 = arith.constant 0 : index
    %82 = vector.load %arg3[%c16, %c0_51, %c0_52] : memref<27x8x64xbf16, #tpu.memory_space<vmem>>, vector<1x8x64xbf16>
    %83 = vector.shape_cast %82 : vector<1x8x64xbf16> to vector<8x64xbf16>
    %84 = vector.extract_strided_slice %2 {offsets = [0, 5], sizes = [64, 128], strides = [1, 1]} : vector<64x256xbf16> to vector<64x128xbf16>
    %cst_53 = arith.constant dense<0.000000e+00> : vector<8x128xf32>
    %85 = tpu.matmul %83, %84, %cst_53 {dimension_numbers = #tpu.dot_dimension_numbers<[1], [0], [0], [1], [0, 0, 1, 1], [], []>} : vector<8x64xbf16>, vector<64x128xbf16>, vector<8x128xf32> -> vector<8x128xf32>
    %86 = arith.addf %81, %85 : vector<8x128xf32>
    %c17 = arith.constant 17 : index
    %c0_54 = arith.constant 0 : index
    %c0_55 = arith.constant 0 : index
    %87 = vector.load %arg3[%c17, %c0_54, %c0_55] : memref<27x8x64xbf16, #tpu.memory_space<vmem>>, vector<1x8x64xbf16>
    %88 = vector.shape_cast %87 : vector<1x8x64xbf16> to vector<8x64xbf16>
    %89 = vector.extract_strided_slice %2 {offsets = [0, 6], sizes = [64, 128], strides = [1, 1]} : vector<64x256xbf16> to vector<64x128xbf16>
    %cst_56 = arith.constant dense<0.000000e+00> : vector<8x128xf32>
    %90 = tpu.matmul %88, %89, %cst_56 {dimension_numbers = #tpu.dot_dimension_numbers<[1], [0], [0], [1], [0, 0, 1, 1], [], []>} : vector<8x64xbf16>, vector<64x128xbf16>, vector<8x128xf32> -> vector<8x128xf32>
    %91 = arith.addf %86, %90 : vector<8x128xf32>
    %c18 = arith.constant 18 : index
    %c0_57 = arith.constant 0 : index
    %c0_58 = arith.constant 0 : index
    %92 = vector.load %arg3[%c18, %c0_57, %c0_58] : memref<27x8x64xbf16, #tpu.memory_space<vmem>>, vector<1x8x64xbf16>
    %93 = vector.shape_cast %92 : vector<1x8x64xbf16> to vector<8x64xbf16>
    %94 = vector.extract_strided_slice %2 {offsets = [0, 25], sizes = [64, 128], strides = [1, 1]} : vector<64x256xbf16> to vector<64x128xbf16>
    %cst_59 = arith.constant dense<0.000000e+00> : vector<8x128xf32>
    %95 = tpu.matmul %93, %94, %cst_59 {dimension_numbers = #tpu.dot_dimension_numbers<[1], [0], [0], [1], [0, 0, 1, 1], [], []>} : vector<8x64xbf16>, vector<64x128xbf16>, vector<8x128xf32> -> vector<8x128xf32>
    %96 = arith.addf %91, %95 : vector<8x128xf32>
    %c19 = arith.constant 19 : index
    %c0_60 = arith.constant 0 : index
    %c0_61 = arith.constant 0 : index
    %97 = vector.load %arg3[%c19, %c0_60, %c0_61] : memref<27x8x64xbf16, #tpu.memory_space<vmem>>, vector<1x8x64xbf16>
    %98 = vector.shape_cast %97 : vector<1x8x64xbf16> to vector<8x64xbf16>
    %99 = vector.extract_strided_slice %2 {offsets = [0, 25], sizes = [64, 128], strides = [1, 1]} : vector<64x256xbf16> to vector<64x128xbf16>
    %cst_62 = arith.constant dense<0.000000e+00> : vector<8x128xf32>
    %100 = tpu.matmul %98, %99, %cst_62 {dimension_numbers = #tpu.dot_dimension_numbers<[1], [0], [0], [1], [0, 0, 1, 1], [], []>} : vector<8x64xbf16>, vector<64x128xbf16>, vector<8x128xf32> -> vector<8x128xf32>
    %101 = arith.addf %96, %100 : vector<8x128xf32>
    %c20 = arith.constant 20 : index
    %c0_63 = arith.constant 0 : index
    %c0_64 = arith.constant 0 : index
    %102 = vector.load %arg3[%c20, %c0_63, %c0_64] : memref<27x8x64xbf16, #tpu.memory_space<vmem>>, vector<1x8x64xbf16>
    %103 = vector.shape_cast %102 : vector<1x8x64xbf16> to vector<8x64xbf16>
    %104 = vector.extract_strided_slice %2 {offsets = [0, 26], sizes = [64, 128], strides = [1, 1]} : vector<64x256xbf16> to vector<64x128xbf16>
    %cst_65 = arith.constant dense<0.000000e+00> : vector<8x128xf32>
    %105 = tpu.matmul %103, %104, %cst_65 {dimension_numbers = #tpu.dot_dimension_numbers<[1], [0], [0], [1], [0, 0, 1, 1], [], []>} : vector<8x64xbf16>, vector<64x128xbf16>, vector<8x128xf32> -> vector<8x128xf32>
    %106 = arith.addf %101, %105 : vector<8x128xf32>
    %c21 = arith.constant 21 : index
    %c0_66 = arith.constant 0 : index
    %c0_67 = arith.constant 0 : index
    %107 = vector.load %arg3[%c21, %c0_66, %c0_67] : memref<27x8x64xbf16, #tpu.memory_space<vmem>>, vector<1x8x64xbf16>
    %108 = vector.shape_cast %107 : vector<1x8x64xbf16> to vector<8x64xbf16>
    %109 = vector.extract_strided_slice %2 {offsets = [0, 25], sizes = [64, 128], strides = [1, 1]} : vector<64x256xbf16> to vector<64x128xbf16>
    %cst_68 = arith.constant dense<0.000000e+00> : vector<8x128xf32>
    %110 = tpu.matmul %108, %109, %cst_68 {dimension_numbers = #tpu.dot_dimension_numbers<[1], [0], [0], [1], [0, 0, 1, 1], [], []>} : vector<8x64xbf16>, vector<64x128xbf16>, vector<8x128xf32> -> vector<8x128xf32>
    %111 = arith.addf %106, %110 : vector<8x128xf32>
    %c22 = arith.constant 22 : index
    %c0_69 = arith.constant 0 : index
    %c0_70 = arith.constant 0 : index
    %112 = vector.load %arg3[%c22, %c0_69, %c0_70] : memref<27x8x64xbf16, #tpu.memory_space<vmem>>, vector<1x8x64xbf16>
    %113 = vector.shape_cast %112 : vector<1x8x64xbf16> to vector<8x64xbf16>
    %114 = vector.extract_strided_slice %2 {offsets = [0, 25], sizes = [64, 128], strides = [1, 1]} : vector<64x256xbf16> to vector<64x128xbf16>
    %cst_71 = arith.constant dense<0.000000e+00> : vector<8x128xf32>
    %115 = tpu.matmul %113, %114, %cst_71 {dimension_numbers = #tpu.dot_dimension_numbers<[1], [0], [0], [1], [0, 0, 1, 1], [], []>} : vector<8x64xbf16>, vector<64x128xbf16>, vector<8x128xf32> -> vector<8x128xf32>
    %116 = arith.addf %111, %115 : vector<8x128xf32>
    %c23 = arith.constant 23 : index
    %c0_72 = arith.constant 0 : index
    %c0_73 = arith.constant 0 : index
    %117 = vector.load %arg3[%c23, %c0_72, %c0_73] : memref<27x8x64xbf16, #tpu.memory_space<vmem>>, vector<1x8x64xbf16>
    %118 = vector.shape_cast %117 : vector<1x8x64xbf16> to vector<8x64xbf16>
    %119 = vector.extract_strided_slice %2 {offsets = [0, 26], sizes = [64, 128], strides = [1, 1]} : vector<64x256xbf16> to vector<64x128xbf16>
    %cst_74 = arith.constant dense<0.000000e+00> : vector<8x128xf32>
    %120 = tpu.matmul %118, %119, %cst_74 {dimension_numbers = #tpu.dot_dimension_numbers<[1], [0], [0], [1], [0, 0, 1, 1], [], []>} : vector<8x64xbf16>, vector<64x128xbf16>, vector<8x128xf32> -> vector<8x128xf32>
    %121 = arith.addf %116, %120 : vector<8x128xf32>
    %c24 = arith.constant 24 : index
    %c0_75 = arith.constant 0 : index
    %c0_76 = arith.constant 0 : index
    %122 = vector.load %arg3[%c24, %c0_75, %c0_76] : memref<27x8x64xbf16, #tpu.memory_space<vmem>>, vector<1x8x64xbf16>
    %123 = vector.shape_cast %122 : vector<1x8x64xbf16> to vector<8x64xbf16>
    %124 = vector.extract_strided_slice %2 {offsets = [0, 30], sizes = [64, 128], strides = [1, 1]} : vector<64x256xbf16> to vector<64x128xbf16>
    %cst_77 = arith.constant dense<0.000000e+00> : vector<8x128xf32>
    %125 = tpu.matmul %123, %124, %cst_77 {dimension_numbers = #tpu.dot_dimension_numbers<[1], [0], [0], [1], [0, 0, 1, 1], [], []>} : vector<8x64xbf16>, vector<64x128xbf16>, vector<8x128xf32> -> vector<8x128xf32>
    %126 = arith.addf %121, %125 : vector<8x128xf32>
    %c25 = arith.constant 25 : index
    %c0_78 = arith.constant 0 : index
    %c0_79 = arith.constant 0 : index
    %127 = vector.load %arg3[%c25, %c0_78, %c0_79] : memref<27x8x64xbf16, #tpu.memory_space<vmem>>, vector<1x8x64xbf16>
    %128 = vector.shape_cast %127 : vector<1x8x64xbf16> to vector<8x64xbf16>
    %129 = vector.extract_strided_slice %2 {offsets = [0, 30], sizes = [64, 128], strides = [1, 1]} : vector<64x256xbf16> to vector<64x128xbf16>
    %cst_80 = arith.constant dense<0.000000e+00> : vector<8x128xf32>
    %130 = tpu.matmul %128, %129, %cst_80 {dimension_numbers = #tpu.dot_dimension_numbers<[1], [0], [0], [1], [0, 0, 1, 1], [], []>} : vector<8x64xbf16>, vector<64x128xbf16>, vector<8x128xf32> -> vector<8x128xf32>
    %131 = arith.addf %126, %130 : vector<8x128xf32>
    %c26 = arith.constant 26 : index
    %c0_81 = arith.constant 0 : index
    %c0_82 = arith.constant 0 : index
    %132 = vector.load %arg3[%c26, %c0_81, %c0_82] : memref<27x8x64xbf16, #tpu.memory_space<vmem>>, vector<1x8x64xbf16>
    %133 = vector.shape_cast %132 : vector<1x8x64xbf16> to vector<8x64xbf16>
    %134 = vector.extract_strided_slice %2 {offsets = [0, 31], sizes = [64, 128], strides = [1, 1]} : vector<64x256xbf16> to vector<64x128xbf16>
    %cst_83 = arith.constant dense<0.000000e+00> : vector<8x128xf32>
    %135 = tpu.matmul %133, %134, %cst_83 {dimension_numbers = #tpu.dot_dimension_numbers<[1], [0], [0], [1], [0, 0, 1, 1], [], []>} : vector<8x64xbf16>, vector<64x128xbf16>, vector<8x128xf32> -> vector<8x128xf32>
    %136 = arith.addf %131, %135 : vector<8x128xf32>
    %c0_84 = arith.constant 0 : index
    %c0_85 = arith.constant 0 : index
    %137 = vector.load %arg4[%c0_84, %c0_85] : memref<8x1xf32, #tpu.memory_space<vmem>>, vector<8x1xf32>
    %138 = vector.broadcast %137 : vector<8x1xf32> to vector<8x128xf32>
    %139 = arith.addf %136, %138 : vector<8x128xf32>
    %cst_86 = arith.constant 0.000000e+00 : f32
    %140 = vector.broadcast %cst_86 : f32 to vector<8x128xf32>
    %141 = arith.maximumf %139, %140 : vector<8x128xf32>
    %c0_87 = arith.constant 0 : index
    %c0_88 = arith.constant 0 : index
    %142 = vector.load %arg5[%c0_87, %c0_88] : memref<8x128xf32, #tpu.memory_space<vmem>>, vector<8x128xf32>
    tpu.vector_store %arg5[%c0_87, %c0_88], %141 {strides = array<i32>} : memref<8x128xf32, #tpu.memory_space<vmem>>, vector<8x128xf32>,
    return
  }
  func.func @transform_0(%arg0: i32) -> (i32, i32) {
    %c0_i32 = arith.constant 0 : i32
    %c0_i32_0 = arith.constant 0 : i32
    return %c0_i32, %arg0 : i32, i32
  }
  func.func @transform_1(%arg0: i32) -> (i32, i32) {
    %c1_i32 = arith.constant 1 : i32
    %0 = arith.addi %arg0, %c1_i32 : i32
    %c0_i32 = arith.constant 0 : i32
    %c0_i32_0 = arith.constant 0 : i32
    return %c0_i32, %0 : i32, i32
  }
  func.func @transform_2(%arg0: i32) -> (i32, i32, i32) {
    %c0_i32 = arith.constant 0 : i32
    %c0_i32_0 = arith.constant 0 : i32
    %c0_i32_1 = arith.constant 0 : i32
    %c0_i32_2 = arith.constant 0 : i32
    return %c0_i32, %c0_i32_0, %c0_i32_1 : i32, i32, i32
  }
  func.func @transform_3(%arg0: i32) -> (i32, i32) {
    %c0_i32 = arith.constant 0 : i32
    %c0_i32_0 = arith.constant 0 : i32
    %c0_i32_1 = arith.constant 0 : i32
    return %c0_i32, %c0_i32_0 : i32, i32
  }
  func.func @transform_4(%arg0: i32) -> (i32, i32) {
    %c0_i32 = arith.constant 0 : i32
    %c0_i32_0 = arith.constant 0 : i32
    return %c0_i32, %arg0 : i32, i32
  }
}

module attributes {stable_mosaic.version = 11 : i64} {
  func.func @_tap_gemm_kernel(%arg0: i32, %arg1: memref<8x256xbf16, #tpu.memory_space<vmem>>, %arg2: memref<8x256xbf16, #tpu.memory_space<vmem>>, %arg3: memref<27x8x8xbf16, #tpu.memory_space<vmem>>, %arg4: memref<8x1xf32, #tpu.memory_space<vmem>>, %arg5: memref<8x256xf32, #tpu.memory_space<vmem>>) attributes {dimension_semantics = [#tpu.dimension_semantics<parallel>], iteration_bounds = array<i64: 2>, scalar_prefetch = 0 : i64, scratch_operands = 0 : i64, tpu.core_type = #tpu.core_type<tc>, window_params = [{transform_indices = @transform_0, window_bounds = array<i64: 8, 256>}, {transform_indices = @transform_1, window_bounds = array<i64: 8, 256>}, {pipeline_mode = #tpu.pipeline_mode<synchronous>, transform_indices = @transform_2, window_bounds = array<i64: 27, 8, 8>}, {pipeline_mode = #tpu.pipeline_mode<synchronous>, transform_indices = @transform_3, window_bounds = array<i64: 8, 1>}, {transform_indices = @transform_4, window_bounds = array<i64: 8, 256>}]} {
    %c0 = arith.constant 0 : index
    %c0_0 = arith.constant 0 : index
    %0 = vector.load %arg1[%c0, %c0_0] : memref<8x256xbf16, #tpu.memory_space<vmem>>, vector<8x256xbf16>
    %c0_1 = arith.constant 0 : index
    %c0_2 = arith.constant 0 : index
    %1 = vector.load %arg2[%c0_1, %c0_2] : memref<8x256xbf16, #tpu.memory_space<vmem>>, vector<8x256xbf16>
    %2 = tpu.concatenate %0, %1 in 1 : vector<8x256xbf16>, vector<8x256xbf16> -> vector<8x512xbf16>
    %c0_3 = arith.constant 0 : index
    %c0_4 = arith.constant 0 : index
    %c0_5 = arith.constant 0 : index
    %3 = vector.load %arg3[%c0_3, %c0_4, %c0_5] : memref<27x8x8xbf16, #tpu.memory_space<vmem>>, vector<1x8x8xbf16>
    %4 = vector.shape_cast %3 : vector<1x8x8xbf16> to vector<8x8xbf16>
    %5 = vector.extract_strided_slice %2 {offsets = [0, 0], sizes = [8, 256], strides = [1, 1]} : vector<8x512xbf16> to vector<8x256xbf16>
    %cst = arith.constant dense<0.000000e+00> : vector<8x256xf32>
    %6 = tpu.matmul %4, %5, %cst {dimension_numbers = #tpu.dot_dimension_numbers<[1], [0], [0], [1], [0, 0, 1, 1], [], []>} : vector<8x8xbf16>, vector<8x256xbf16>, vector<8x256xf32> -> vector<8x256xf32>
    %c1 = arith.constant 1 : index
    %c0_6 = arith.constant 0 : index
    %c0_7 = arith.constant 0 : index
    %7 = vector.load %arg3[%c1, %c0_6, %c0_7] : memref<27x8x8xbf16, #tpu.memory_space<vmem>>, vector<1x8x8xbf16>
    %8 = vector.shape_cast %7 : vector<1x8x8xbf16> to vector<8x8xbf16>
    %9 = vector.extract_strided_slice %2 {offsets = [0, 1], sizes = [8, 256], strides = [1, 1]} : vector<8x512xbf16> to vector<8x256xbf16>
    %cst_8 = arith.constant dense<0.000000e+00> : vector<8x256xf32>
    %10 = tpu.matmul %8, %9, %cst_8 {dimension_numbers = #tpu.dot_dimension_numbers<[1], [0], [0], [1], [0, 0, 1, 1], [], []>} : vector<8x8xbf16>, vector<8x256xbf16>, vector<8x256xf32> -> vector<8x256xf32>
    %11 = arith.addf %6, %10 : vector<8x256xf32>
    %c2 = arith.constant 2 : index
    %c0_9 = arith.constant 0 : index
    %c0_10 = arith.constant 0 : index
    %12 = vector.load %arg3[%c2, %c0_9, %c0_10] : memref<27x8x8xbf16, #tpu.memory_space<vmem>>, vector<1x8x8xbf16>
    %13 = vector.shape_cast %12 : vector<1x8x8xbf16> to vector<8x8xbf16>
    %14 = vector.extract_strided_slice %2 {offsets = [0, 2], sizes = [8, 256], strides = [1, 1]} : vector<8x512xbf16> to vector<8x256xbf16>
    %cst_11 = arith.constant dense<0.000000e+00> : vector<8x256xf32>
    %15 = tpu.matmul %13, %14, %cst_11 {dimension_numbers = #tpu.dot_dimension_numbers<[1], [0], [0], [1], [0, 0, 1, 1], [], []>} : vector<8x8xbf16>, vector<8x256xbf16>, vector<8x256xf32> -> vector<8x256xf32>
    %16 = arith.addf %11, %15 : vector<8x256xf32>
    %c3 = arith.constant 3 : index
    %c0_12 = arith.constant 0 : index
    %c0_13 = arith.constant 0 : index
    %17 = vector.load %arg3[%c3, %c0_12, %c0_13] : memref<27x8x8xbf16, #tpu.memory_space<vmem>>, vector<1x8x8xbf16>
    %18 = vector.shape_cast %17 : vector<1x8x8xbf16> to vector<8x8xbf16>
    %19 = vector.extract_strided_slice %2 {offsets = [0, 6], sizes = [8, 256], strides = [1, 1]} : vector<8x512xbf16> to vector<8x256xbf16>
    %cst_14 = arith.constant dense<0.000000e+00> : vector<8x256xf32>
    %20 = tpu.matmul %18, %19, %cst_14 {dimension_numbers = #tpu.dot_dimension_numbers<[1], [0], [0], [1], [0, 0, 1, 1], [], []>} : vector<8x8xbf16>, vector<8x256xbf16>, vector<8x256xf32> -> vector<8x256xf32>
    %21 = arith.addf %16, %20 : vector<8x256xf32>
    %c4 = arith.constant 4 : index
    %c0_15 = arith.constant 0 : index
    %c0_16 = arith.constant 0 : index
    %22 = vector.load %arg3[%c4, %c0_15, %c0_16] : memref<27x8x8xbf16, #tpu.memory_space<vmem>>, vector<1x8x8xbf16>
    %23 = vector.shape_cast %22 : vector<1x8x8xbf16> to vector<8x8xbf16>
    %24 = vector.extract_strided_slice %2 {offsets = [0, 7], sizes = [8, 256], strides = [1, 1]} : vector<8x512xbf16> to vector<8x256xbf16>
    %cst_17 = arith.constant dense<0.000000e+00> : vector<8x256xf32>
    %25 = tpu.matmul %23, %24, %cst_17 {dimension_numbers = #tpu.dot_dimension_numbers<[1], [0], [0], [1], [0, 0, 1, 1], [], []>} : vector<8x8xbf16>, vector<8x256xbf16>, vector<8x256xf32> -> vector<8x256xf32>
    %26 = arith.addf %21, %25 : vector<8x256xf32>
    %c5 = arith.constant 5 : index
    %c0_18 = arith.constant 0 : index
    %c0_19 = arith.constant 0 : index
    %27 = vector.load %arg3[%c5, %c0_18, %c0_19] : memref<27x8x8xbf16, #tpu.memory_space<vmem>>, vector<1x8x8xbf16>
    %28 = vector.shape_cast %27 : vector<1x8x8xbf16> to vector<8x8xbf16>
    %29 = vector.extract_strided_slice %2 {offsets = [0, 8], sizes = [8, 256], strides = [1, 1]} : vector<8x512xbf16> to vector<8x256xbf16>
    %cst_20 = arith.constant dense<0.000000e+00> : vector<8x256xf32>
    %30 = tpu.matmul %28, %29, %cst_20 {dimension_numbers = #tpu.dot_dimension_numbers<[1], [0], [0], [1], [0, 0, 1, 1], [], []>} : vector<8x8xbf16>, vector<8x256xbf16>, vector<8x256xf32> -> vector<8x256xf32>
    %31 = arith.addf %26, %30 : vector<8x256xf32>
    %c6 = arith.constant 6 : index
    %c0_21 = arith.constant 0 : index
    %c0_22 = arith.constant 0 : index
    %32 = vector.load %arg3[%c6, %c0_21, %c0_22] : memref<27x8x8xbf16, #tpu.memory_space<vmem>>, vector<1x8x8xbf16>
    %33 = vector.shape_cast %32 : vector<1x8x8xbf16> to vector<8x8xbf16>
    %34 = vector.extract_strided_slice %2 {offsets = [0, 12], sizes = [8, 256], strides = [1, 1]} : vector<8x512xbf16> to vector<8x256xbf16>
    %cst_23 = arith.constant dense<0.000000e+00> : vector<8x256xf32>
    %35 = tpu.matmul %33, %34, %cst_23 {dimension_numbers = #tpu.dot_dimension_numbers<[1], [0], [0], [1], [0, 0, 1, 1], [], []>} : vector<8x8xbf16>, vector<8x256xbf16>, vector<8x256xf32> -> vector<8x256xf32>
    %36 = arith.addf %31, %35 : vector<8x256xf32>
    %c7 = arith.constant 7 : index
    %c0_24 = arith.constant 0 : index
    %c0_25 = arith.constant 0 : index
    %37 = vector.load %arg3[%c7, %c0_24, %c0_25] : memref<27x8x8xbf16, #tpu.memory_space<vmem>>, vector<1x8x8xbf16>
    %38 = vector.shape_cast %37 : vector<1x8x8xbf16> to vector<8x8xbf16>
    %39 = vector.extract_strided_slice %2 {offsets = [0, 13], sizes = [8, 256], strides = [1, 1]} : vector<8x512xbf16> to vector<8x256xbf16>
    %cst_26 = arith.constant dense<0.000000e+00> : vector<8x256xf32>
    %40 = tpu.matmul %38, %39, %cst_26 {dimension_numbers = #tpu.dot_dimension_numbers<[1], [0], [0], [1], [0, 0, 1, 1], [], []>} : vector<8x8xbf16>, vector<8x256xbf16>, vector<8x256xf32> -> vector<8x256xf32>
    %41 = arith.addf %36, %40 : vector<8x256xf32>
    %c8 = arith.constant 8 : index
    %c0_27 = arith.constant 0 : index
    %c0_28 = arith.constant 0 : index
    %42 = vector.load %arg3[%c8, %c0_27, %c0_28] : memref<27x8x8xbf16, #tpu.memory_space<vmem>>, vector<1x8x8xbf16>
    %43 = vector.shape_cast %42 : vector<1x8x8xbf16> to vector<8x8xbf16>
    %44 = vector.extract_strided_slice %2 {offsets = [0, 14], sizes = [8, 256], strides = [1, 1]} : vector<8x512xbf16> to vector<8x256xbf16>
    %cst_29 = arith.constant dense<0.000000e+00> : vector<8x256xf32>
    %45 = tpu.matmul %43, %44, %cst_29 {dimension_numbers = #tpu.dot_dimension_numbers<[1], [0], [0], [1], [0, 0, 1, 1], [], []>} : vector<8x8xbf16>, vector<8x256xbf16>, vector<8x256xf32> -> vector<8x256xf32>
    %46 = arith.addf %41, %45 : vector<8x256xf32>
    %c9 = arith.constant 9 : index
    %c0_30 = arith.constant 0 : index
    %c0_31 = arith.constant 0 : index
    %47 = vector.load %arg3[%c9, %c0_30, %c0_31] : memref<27x8x8xbf16, #tpu.memory_space<vmem>>, vector<1x8x8xbf16>
    %48 = vector.shape_cast %47 : vector<1x8x8xbf16> to vector<8x8xbf16>
    %49 = vector.extract_strided_slice %2 {offsets = [0, 36], sizes = [8, 256], strides = [1, 1]} : vector<8x512xbf16> to vector<8x256xbf16>
    %cst_32 = arith.constant dense<0.000000e+00> : vector<8x256xf32>
    %50 = tpu.matmul %48, %49, %cst_32 {dimension_numbers = #tpu.dot_dimension_numbers<[1], [0], [0], [1], [0, 0, 1, 1], [], []>} : vector<8x8xbf16>, vector<8x256xbf16>, vector<8x256xf32> -> vector<8x256xf32>
    %51 = arith.addf %46, %50 : vector<8x256xf32>
    %c10 = arith.constant 10 : index
    %c0_33 = arith.constant 0 : index
    %c0_34 = arith.constant 0 : index
    %52 = vector.load %arg3[%c10, %c0_33, %c0_34] : memref<27x8x8xbf16, #tpu.memory_space<vmem>>, vector<1x8x8xbf16>
    %53 = vector.shape_cast %52 : vector<1x8x8xbf16> to vector<8x8xbf16>
    %54 = vector.extract_strided_slice %2 {offsets = [0, 37], sizes = [8, 256], strides = [1, 1]} : vector<8x512xbf16> to vector<8x256xbf16>
    %cst_35 = arith.constant dense<0.000000e+00> : vector<8x256xf32>
    %55 = tpu.matmul %53, %54, %cst_35 {dimension_numbers = #tpu.dot_dimension_numbers<[1], [0], [0], [1], [0, 0, 1, 1], [], []>} : vector<8x8xbf16>, vector<8x256xbf16>, vector<8x256xf32> -> vector<8x256xf32>
    %56 = arith.addf %51, %55 : vector<8x256xf32>
    %c11 = arith.constant 11 : index
    %c0_36 = arith.constant 0 : index
    %c0_37 = arith.constant 0 : index
    %57 = vector.load %arg3[%c11, %c0_36, %c0_37] : memref<27x8x8xbf16, #tpu.memory_space<vmem>>, vector<1x8x8xbf16>
    %58 = vector.shape_cast %57 : vector<1x8x8xbf16> to vector<8x8xbf16>
    %59 = vector.extract_strided_slice %2 {offsets = [0, 38], sizes = [8, 256], strides = [1, 1]} : vector<8x512xbf16> to vector<8x256xbf16>
    %cst_38 = arith.constant dense<0.000000e+00> : vector<8x256xf32>
    %60 = tpu.matmul %58, %59, %cst_38 {dimension_numbers = #tpu.dot_dimension_numbers<[1], [0], [0], [1], [0, 0, 1, 1], [], []>} : vector<8x8xbf16>, vector<8x256xbf16>, vector<8x256xf32> -> vector<8x256xf32>
    %61 = arith.addf %56, %60 : vector<8x256xf32>
    %c12 = arith.constant 12 : index
    %c0_39 = arith.constant 0 : index
    %c0_40 = arith.constant 0 : index
    %62 = vector.load %arg3[%c12, %c0_39, %c0_40] : memref<27x8x8xbf16, #tpu.memory_space<vmem>>, vector<1x8x8xbf16>
    %63 = vector.shape_cast %62 : vector<1x8x8xbf16> to vector<8x8xbf16>
    %64 = vector.extract_strided_slice %2 {offsets = [0, 42], sizes = [8, 256], strides = [1, 1]} : vector<8x512xbf16> to vector<8x256xbf16>
    %cst_41 = arith.constant dense<0.000000e+00> : vector<8x256xf32>
    %65 = tpu.matmul %63, %64, %cst_41 {dimension_numbers = #tpu.dot_dimension_numbers<[1], [0], [0], [1], [0, 0, 1, 1], [], []>} : vector<8x8xbf16>, vector<8x256xbf16>, vector<8x256xf32> -> vector<8x256xf32>
    %66 = arith.addf %61, %65 : vector<8x256xf32>
    %c13 = arith.constant 13 : index
    %c0_42 = arith.constant 0 : index
    %c0_43 = arith.constant 0 : index
    %67 = vector.load %arg3[%c13, %c0_42, %c0_43] : memref<27x8x8xbf16, #tpu.memory_space<vmem>>, vector<1x8x8xbf16>
    %68 = vector.shape_cast %67 : vector<1x8x8xbf16> to vector<8x8xbf16>
    %69 = vector.extract_strided_slice %2 {offsets = [0, 43], sizes = [8, 256], strides = [1, 1]} : vector<8x512xbf16> to vector<8x256xbf16>
    %cst_44 = arith.constant dense<0.000000e+00> : vector<8x256xf32>
    %70 = tpu.matmul %68, %69, %cst_44 {dimension_numbers = #tpu.dot_dimension_numbers<[1], [0], [0], [1], [0, 0, 1, 1], [], []>} : vector<8x8xbf16>, vector<8x256xbf16>, vector<8x256xf32> -> vector<8x256xf32>
    %71 = arith.addf %66, %70 : vector<8x256xf32>
    %c14 = arith.constant 14 : index
    %c0_45 = arith.constant 0 : index
    %c0_46 = arith.constant 0 : index
    %72 = vector.load %arg3[%c14, %c0_45, %c0_46] : memref<27x8x8xbf16, #tpu.memory_space<vmem>>, vector<1x8x8xbf16>
    %73 = vector.shape_cast %72 : vector<1x8x8xbf16> to vector<8x8xbf16>
    %74 = vector.extract_strided_slice %2 {offsets = [0, 44], sizes = [8, 256], strides = [1, 1]} : vector<8x512xbf16> to vector<8x256xbf16>
    %cst_47 = arith.constant dense<0.000000e+00> : vector<8x256xf32>
    %75 = tpu.matmul %73, %74, %cst_47 {dimension_numbers = #tpu.dot_dimension_numbers<[1], [0], [0], [1], [0, 0, 1, 1], [], []>} : vector<8x8xbf16>, vector<8x256xbf16>, vector<8x256xf32> -> vector<8x256xf32>
    %76 = arith.addf %71, %75 : vector<8x256xf32>
    %c15 = arith.constant 15 : index
    %c0_48 = arith.constant 0 : index
    %c0_49 = arith.constant 0 : index
    %77 = vector.load %arg3[%c15, %c0_48, %c0_49] : memref<27x8x8xbf16, #tpu.memory_space<vmem>>, vector<1x8x8xbf16>
    %78 = vector.shape_cast %77 : vector<1x8x8xbf16> to vector<8x8xbf16>
    %79 = vector.extract_strided_slice %2 {offsets = [0, 48], sizes = [8, 256], strides = [1, 1]} : vector<8x512xbf16> to vector<8x256xbf16>
    %cst_50 = arith.constant dense<0.000000e+00> : vector<8x256xf32>
    %80 = tpu.matmul %78, %79, %cst_50 {dimension_numbers = #tpu.dot_dimension_numbers<[1], [0], [0], [1], [0, 0, 1, 1], [], []>} : vector<8x8xbf16>, vector<8x256xbf16>, vector<8x256xf32> -> vector<8x256xf32>
    %81 = arith.addf %76, %80 : vector<8x256xf32>
    %c16 = arith.constant 16 : index
    %c0_51 = arith.constant 0 : index
    %c0_52 = arith.constant 0 : index
    %82 = vector.load %arg3[%c16, %c0_51, %c0_52] : memref<27x8x8xbf16, #tpu.memory_space<vmem>>, vector<1x8x8xbf16>
    %83 = vector.shape_cast %82 : vector<1x8x8xbf16> to vector<8x8xbf16>
    %84 = vector.extract_strided_slice %2 {offsets = [0, 49], sizes = [8, 256], strides = [1, 1]} : vector<8x512xbf16> to vector<8x256xbf16>
    %cst_53 = arith.constant dense<0.000000e+00> : vector<8x256xf32>
    %85 = tpu.matmul %83, %84, %cst_53 {dimension_numbers = #tpu.dot_dimension_numbers<[1], [0], [0], [1], [0, 0, 1, 1], [], []>} : vector<8x8xbf16>, vector<8x256xbf16>, vector<8x256xf32> -> vector<8x256xf32>
    %86 = arith.addf %81, %85 : vector<8x256xf32>
    %c17 = arith.constant 17 : index
    %c0_54 = arith.constant 0 : index
    %c0_55 = arith.constant 0 : index
    %87 = vector.load %arg3[%c17, %c0_54, %c0_55] : memref<27x8x8xbf16, #tpu.memory_space<vmem>>, vector<1x8x8xbf16>
    %88 = vector.shape_cast %87 : vector<1x8x8xbf16> to vector<8x8xbf16>
    %89 = vector.extract_strided_slice %2 {offsets = [0, 50], sizes = [8, 256], strides = [1, 1]} : vector<8x512xbf16> to vector<8x256xbf16>
    %cst_56 = arith.constant dense<0.000000e+00> : vector<8x256xf32>
    %90 = tpu.matmul %88, %89, %cst_56 {dimension_numbers = #tpu.dot_dimension_numbers<[1], [0], [0], [1], [0, 0, 1, 1], [], []>} : vector<8x8xbf16>, vector<8x256xbf16>, vector<8x256xf32> -> vector<8x256xf32>
    %91 = arith.addf %86, %90 : vector<8x256xf32>
    %c18 = arith.constant 18 : index
    %c0_57 = arith.constant 0 : index
    %c0_58 = arith.constant 0 : index
    %92 = vector.load %arg3[%c18, %c0_57, %c0_58] : memref<27x8x8xbf16, #tpu.memory_space<vmem>>, vector<1x8x8xbf16>
    %93 = vector.shape_cast %92 : vector<1x8x8xbf16> to vector<8x8xbf16>
    %94 = vector.extract_strided_slice %2 {offsets = [0, 72], sizes = [8, 256], strides = [1, 1]} : vector<8x512xbf16> to vector<8x256xbf16>
    %cst_59 = arith.constant dense<0.000000e+00> : vector<8x256xf32>
    %95 = tpu.matmul %93, %94, %cst_59 {dimension_numbers = #tpu.dot_dimension_numbers<[1], [0], [0], [1], [0, 0, 1, 1], [], []>} : vector<8x8xbf16>, vector<8x256xbf16>, vector<8x256xf32> -> vector<8x256xf32>
    %96 = arith.addf %91, %95 : vector<8x256xf32>
    %c19 = arith.constant 19 : index
    %c0_60 = arith.constant 0 : index
    %c0_61 = arith.constant 0 : index
    %97 = vector.load %arg3[%c19, %c0_60, %c0_61] : memref<27x8x8xbf16, #tpu.memory_space<vmem>>, vector<1x8x8xbf16>
    %98 = vector.shape_cast %97 : vector<1x8x8xbf16> to vector<8x8xbf16>
    %99 = vector.extract_strided_slice %2 {offsets = [0, 73], sizes = [8, 256], strides = [1, 1]} : vector<8x512xbf16> to vector<8x256xbf16>
    %cst_62 = arith.constant dense<0.000000e+00> : vector<8x256xf32>
    %100 = tpu.matmul %98, %99, %cst_62 {dimension_numbers = #tpu.dot_dimension_numbers<[1], [0], [0], [1], [0, 0, 1, 1], [], []>} : vector<8x8xbf16>, vector<8x256xbf16>, vector<8x256xf32> -> vector<8x256xf32>
    %101 = arith.addf %96, %100 : vector<8x256xf32>
    %c20 = arith.constant 20 : index
    %c0_63 = arith.constant 0 : index
    %c0_64 = arith.constant 0 : index
    %102 = vector.load %arg3[%c20, %c0_63, %c0_64] : memref<27x8x8xbf16, #tpu.memory_space<vmem>>, vector<1x8x8xbf16>
    %103 = vector.shape_cast %102 : vector<1x8x8xbf16> to vector<8x8xbf16>
    %104 = vector.extract_strided_slice %2 {offsets = [0, 74], sizes = [8, 256], strides = [1, 1]} : vector<8x512xbf16> to vector<8x256xbf16>
    %cst_65 = arith.constant dense<0.000000e+00> : vector<8x256xf32>
    %105 = tpu.matmul %103, %104, %cst_65 {dimension_numbers = #tpu.dot_dimension_numbers<[1], [0], [0], [1], [0, 0, 1, 1], [], []>} : vector<8x8xbf16>, vector<8x256xbf16>, vector<8x256xf32> -> vector<8x256xf32>
    %106 = arith.addf %101, %105 : vector<8x256xf32>
    %c21 = arith.constant 21 : index
    %c0_66 = arith.constant 0 : index
    %c0_67 = arith.constant 0 : index
    %107 = vector.load %arg3[%c21, %c0_66, %c0_67] : memref<27x8x8xbf16, #tpu.memory_space<vmem>>, vector<1x8x8xbf16>
    %108 = vector.shape_cast %107 : vector<1x8x8xbf16> to vector<8x8xbf16>
    %109 = vector.extract_strided_slice %2 {offsets = [0, 78], sizes = [8, 256], strides = [1, 1]} : vector<8x512xbf16> to vector<8x256xbf16>
    %cst_68 = arith.constant dense<0.000000e+00> : vector<8x256xf32>
    %110 = tpu.matmul %108, %109, %cst_68 {dimension_numbers = #tpu.dot_dimension_numbers<[1], [0], [0], [1], [0, 0, 1, 1], [], []>} : vector<8x8xbf16>, vector<8x256xbf16>, vector<8x256xf32> -> vector<8x256xf32>
    %111 = arith.addf %106, %110 : vector<8x256xf32>
    %c22 = arith.constant 22 : index
    %c0_69 = arith.constant 0 : index
    %c0_70 = arith.constant 0 : index
    %112 = vector.load %arg3[%c22, %c0_69, %c0_70] : memref<27x8x8xbf16, #tpu.memory_space<vmem>>, vector<1x8x8xbf16>
    %113 = vector.shape_cast %112 : vector<1x8x8xbf16> to vector<8x8xbf16>
    %114 = vector.extract_strided_slice %2 {offsets = [0, 79], sizes = [8, 256], strides = [1, 1]} : vector<8x512xbf16> to vector<8x256xbf16>
    %cst_71 = arith.constant dense<0.000000e+00> : vector<8x256xf32>
    %115 = tpu.matmul %113, %114, %cst_71 {dimension_numbers = #tpu.dot_dimension_numbers<[1], [0], [0], [1], [0, 0, 1, 1], [], []>} : vector<8x8xbf16>, vector<8x256xbf16>, vector<8x256xf32> -> vector<8x256xf32>
    %116 = arith.addf %111, %115 : vector<8x256xf32>
    %c23 = arith.constant 23 : index
    %c0_72 = arith.constant 0 : index
    %c0_73 = arith.constant 0 : index
    %117 = vector.load %arg3[%c23, %c0_72, %c0_73] : memref<27x8x8xbf16, #tpu.memory_space<vmem>>, vector<1x8x8xbf16>
    %118 = vector.shape_cast %117 : vector<1x8x8xbf16> to vector<8x8xbf16>
    %119 = vector.extract_strided_slice %2 {offsets = [0, 80], sizes = [8, 256], strides = [1, 1]} : vector<8x512xbf16> to vector<8x256xbf16>
    %cst_74 = arith.constant dense<0.000000e+00> : vector<8x256xf32>
    %120 = tpu.matmul %118, %119, %cst_74 {dimension_numbers = #tpu.dot_dimension_numbers<[1], [0], [0], [1], [0, 0, 1, 1], [], []>} : vector<8x8xbf16>, vector<8x256xbf16>, vector<8x256xf32> -> vector<8x256xf32>
    %121 = arith.addf %116, %120 : vector<8x256xf32>
    %c24 = arith.constant 24 : index
    %c0_75 = arith.constant 0 : index
    %c0_76 = arith.constant 0 : index
    %122 = vector.load %arg3[%c24, %c0_75, %c0_76] : memref<27x8x8xbf16, #tpu.memory_space<vmem>>, vector<1x8x8xbf16>
    %123 = vector.shape_cast %122 : vector<1x8x8xbf16> to vector<8x8xbf16>
    %124 = vector.extract_strided_slice %2 {offsets = [0, 84], sizes = [8, 256], strides = [1, 1]} : vector<8x512xbf16> to vector<8x256xbf16>
    %cst_77 = arith.constant dense<0.000000e+00> : vector<8x256xf32>
    %125 = tpu.matmul %123, %124, %cst_77 {dimension_numbers = #tpu.dot_dimension_numbers<[1], [0], [0], [1], [0, 0, 1, 1], [], []>} : vector<8x8xbf16>, vector<8x256xbf16>, vector<8x256xf32> -> vector<8x256xf32>
    %126 = arith.addf %121, %125 : vector<8x256xf32>
    %c25 = arith.constant 25 : index
    %c0_78 = arith.constant 0 : index
    %c0_79 = arith.constant 0 : index
    %127 = vector.load %arg3[%c25, %c0_78, %c0_79] : memref<27x8x8xbf16, #tpu.memory_space<vmem>>, vector<1x8x8xbf16>
    %128 = vector.shape_cast %127 : vector<1x8x8xbf16> to vector<8x8xbf16>
    %129 = vector.extract_strided_slice %2 {offsets = [0, 85], sizes = [8, 256], strides = [1, 1]} : vector<8x512xbf16> to vector<8x256xbf16>
    %cst_80 = arith.constant dense<0.000000e+00> : vector<8x256xf32>
    %130 = tpu.matmul %128, %129, %cst_80 {dimension_numbers = #tpu.dot_dimension_numbers<[1], [0], [0], [1], [0, 0, 1, 1], [], []>} : vector<8x8xbf16>, vector<8x256xbf16>, vector<8x256xf32> -> vector<8x256xf32>
    %131 = arith.addf %126, %130 : vector<8x256xf32>
    %c26 = arith.constant 26 : index
    %c0_81 = arith.constant 0 : index
    %c0_82 = arith.constant 0 : index
    %132 = vector.load %arg3[%c26, %c0_81, %c0_82] : memref<27x8x8xbf16, #tpu.memory_space<vmem>>, vector<1x8x8xbf16>
    %133 = vector.shape_cast %132 : vector<1x8x8xbf16> to vector<8x8xbf16>
    %134 = vector.extract_strided_slice %2 {offsets = [0, 86], sizes = [8, 256], strides = [1, 1]} : vector<8x512xbf16> to vector<8x256xbf16>
    %cst_83 = arith.constant dense<0.000000e+00> : vector<8x256xf32>
    %135 = tpu.matmul %133, %134, %cst_83 {dimension_numbers = #tpu.dot_dimension_numbers<[1], [0], [0], [1], [0, 0, 1, 1], [], []>} : vector<8x8xbf16>, vector<8x256xbf16>, vector<8x256xf32> -> vector<8x256xf32>
    %136 = arith.addf %131, %135 : vector<8x256xf32>
    %c0_84 = arith.constant 0 : index
    %c0_85 = arith.constant 0 : index
    %137 = vector.load %arg4[%c0_84, %c0_85] : memref<8x1xf32, #tpu.memory_space<vmem>>, vector<8x1xf32>
    %138 = vector.broadcast %137 : vector<8x1xf32> to vector<8x256xf32>
    %139 = arith.addf %136, %138 : vector<8x256xf32>
    %cst_86 = arith.constant 0.000000e+00 : f32
    %140 = vector.broadcast %cst_86 : f32 to vector<8x256xf32>
    %141 = arith.maximumf %139, %140 : vector<8x256xf32>
    %c0_87 = arith.constant 0 : index
    %c0_88 = arith.constant 0 : index
    %142 = vector.load %arg5[%c0_87, %c0_88] : memref<8x256xf32, #tpu.memory_space<vmem>>, vector<8x256xf32>
    tpu.vector_store %arg5[%c0_87, %c0_88], %141 {strides = array<i32>} : memref<8x256xf32, #tpu.memory_space<vmem>>, vector<8x256xf32>,
    return
  }
  func.func @transform_0(%arg0: i32) -> (i32, i32) {
    %c0_i32 = arith.constant 0 : i32
    %c0_i32_0 = arith.constant 0 : i32
    return %c0_i32, %arg0 : i32, i32
  }
  func.func @transform_1(%arg0: i32) -> (i32, i32) {
    %c1_i32 = arith.constant 1 : i32
    %0 = arith.addi %arg0, %c1_i32 : i32
    %c0_i32 = arith.constant 0 : i32
    %c0_i32_0 = arith.constant 0 : i32
    return %c0_i32, %0 : i32, i32
  }
  func.func @transform_2(%arg0: i32) -> (i32, i32, i32) {
    %c0_i32 = arith.constant 0 : i32
    %c0_i32_0 = arith.constant 0 : i32
    %c0_i32_1 = arith.constant 0 : i32
    %c0_i32_2 = arith.constant 0 : i32
    return %c0_i32, %c0_i32_0, %c0_i32_1 : i32, i32, i32
  }
  func.func @transform_3(%arg0: i32) -> (i32, i32) {
    %c0_i32 = arith.constant 0 : i32
    %c0_i32_0 = arith.constant 0 : i32
    %c0_i32_1 = arith.constant 0 : i32
    return %c0_i32, %c0_i32_0 : i32, i32
  }
  func.func @transform_4(%arg0: i32) -> (i32, i32) {
    %c0_i32 = arith.constant 0 : i32
    %c0_i32_0 = arith.constant 0 : i32
    return %c0_i32, %arg0 : i32, i32
  }
}

module attributes {stable_mosaic.version = 11 : i64} {
  func.func @_tap_gemm_kernel(%arg0: i32, %arg1: memref<8x128xbf16, #tpu.memory_space<vmem>>, %arg2: memref<8x128xbf16, #tpu.memory_space<vmem>>, %arg3: memref<8x64x8xbf16, #tpu.memory_space<vmem>>, %arg4: memref<64x1xf32, #tpu.memory_space<vmem>>, %arg5: memref<64x128xf32, #tpu.memory_space<vmem>>) attributes {dimension_semantics = [#tpu.dimension_semantics<parallel>], iteration_bounds = array<i64: 2>, scalar_prefetch = 0 : i64, scratch_operands = 0 : i64, tpu.core_type = #tpu.core_type<tc>, window_params = [{transform_indices = @transform_0, window_bounds = array<i64: 8, 128>}, {transform_indices = @transform_1, window_bounds = array<i64: 8, 128>}, {pipeline_mode = #tpu.pipeline_mode<synchronous>, transform_indices = @transform_2, window_bounds = array<i64: 8, 64, 8>}, {pipeline_mode = #tpu.pipeline_mode<synchronous>, transform_indices = @transform_3, window_bounds = array<i64: 64, 1>}, {transform_indices = @transform_4, window_bounds = array<i64: 64, 128>}]} {
    %c0 = arith.constant 0 : index
    %c0_0 = arith.constant 0 : index
    %0 = vector.load %arg1[%c0, %c0_0] : memref<8x128xbf16, #tpu.memory_space<vmem>>, vector<8x128xbf16>
    %c0_1 = arith.constant 0 : index
    %c0_2 = arith.constant 0 : index
    %1 = vector.load %arg2[%c0_1, %c0_2] : memref<8x128xbf16, #tpu.memory_space<vmem>>, vector<8x128xbf16>
    %2 = tpu.concatenate %0, %1 in 1 : vector<8x128xbf16>, vector<8x128xbf16> -> vector<8x256xbf16>
    %c0_3 = arith.constant 0 : index
    %c0_4 = arith.constant 0 : index
    %c0_5 = arith.constant 0 : index
    %3 = vector.load %arg3[%c0_3, %c0_4, %c0_5] : memref<8x64x8xbf16, #tpu.memory_space<vmem>>, vector<1x64x8xbf16>
    %4 = vector.shape_cast %3 : vector<1x64x8xbf16> to vector<64x8xbf16>
    %5 = vector.extract_strided_slice %2 {offsets = [0, 0], sizes = [8, 128], strides = [1, 1]} : vector<8x256xbf16> to vector<8x128xbf16>
    %cst = arith.constant dense<0.000000e+00> : vector<64x128xf32>
    %6 = tpu.matmul %4, %5, %cst {dimension_numbers = #tpu.dot_dimension_numbers<[1], [0], [0], [1], [0, 0, 1, 1], [], []>} : vector<64x8xbf16>, vector<8x128xbf16>, vector<64x128xf32> -> vector<64x128xf32>
    %c1 = arith.constant 1 : index
    %c0_6 = arith.constant 0 : index
    %c0_7 = arith.constant 0 : index
    %7 = vector.load %arg3[%c1, %c0_6, %c0_7] : memref<8x64x8xbf16, #tpu.memory_space<vmem>>, vector<1x64x8xbf16>
    %8 = vector.shape_cast %7 : vector<1x64x8xbf16> to vector<64x8xbf16>
    %9 = vector.extract_strided_slice %2 {offsets = [0, 1], sizes = [8, 128], strides = [1, 1]} : vector<8x256xbf16> to vector<8x128xbf16>
    %cst_8 = arith.constant dense<0.000000e+00> : vector<64x128xf32>
    %10 = tpu.matmul %8, %9, %cst_8 {dimension_numbers = #tpu.dot_dimension_numbers<[1], [0], [0], [1], [0, 0, 1, 1], [], []>} : vector<64x8xbf16>, vector<8x128xbf16>, vector<64x128xf32> -> vector<64x128xf32>
    %11 = arith.addf %6, %10 : vector<64x128xf32>
    %c2 = arith.constant 2 : index
    %c0_9 = arith.constant 0 : index
    %c0_10 = arith.constant 0 : index
    %12 = vector.load %arg3[%c2, %c0_9, %c0_10] : memref<8x64x8xbf16, #tpu.memory_space<vmem>>, vector<1x64x8xbf16>
    %13 = vector.shape_cast %12 : vector<1x64x8xbf16> to vector<64x8xbf16>
    %14 = vector.extract_strided_slice %2 {offsets = [0, 5], sizes = [8, 128], strides = [1, 1]} : vector<8x256xbf16> to vector<8x128xbf16>
    %cst_11 = arith.constant dense<0.000000e+00> : vector<64x128xf32>
    %15 = tpu.matmul %13, %14, %cst_11 {dimension_numbers = #tpu.dot_dimension_numbers<[1], [0], [0], [1], [0, 0, 1, 1], [], []>} : vector<64x8xbf16>, vector<8x128xbf16>, vector<64x128xf32> -> vector<64x128xf32>
    %16 = arith.addf %11, %15 : vector<64x128xf32>
    %c3 = arith.constant 3 : index
    %c0_12 = arith.constant 0 : index
    %c0_13 = arith.constant 0 : index
    %17 = vector.load %arg3[%c3, %c0_12, %c0_13] : memref<8x64x8xbf16, #tpu.memory_space<vmem>>, vector<1x64x8xbf16>
    %18 = vector.shape_cast %17 : vector<1x64x8xbf16> to vector<64x8xbf16>
    %19 = vector.extract_strided_slice %2 {offsets = [0, 6], sizes = [8, 128], strides = [1, 1]} : vector<8x256xbf16> to vector<8x128xbf16>
    %cst_14 = arith.constant dense<0.000000e+00> : vector<64x128xf32>
    %20 = tpu.matmul %18, %19, %cst_14 {dimension_numbers = #tpu.dot_dimension_numbers<[1], [0], [0], [1], [0, 0, 1, 1], [], []>} : vector<64x8xbf16>, vector<8x128xbf16>, vector<64x128xf32> -> vector<64x128xf32>
    %21 = arith.addf %16, %20 : vector<64x128xf32>
    %c4 = arith.constant 4 : index
    %c0_15 = arith.constant 0 : index
    %c0_16 = arith.constant 0 : index
    %22 = vector.load %arg3[%c4, %c0_15, %c0_16] : memref<8x64x8xbf16, #tpu.memory_space<vmem>>, vector<1x64x8xbf16>
    %23 = vector.shape_cast %22 : vector<1x64x8xbf16> to vector<64x8xbf16>
    %24 = vector.extract_strided_slice %2 {offsets = [0, 25], sizes = [8, 128], strides = [1, 1]} : vector<8x256xbf16> to vector<8x128xbf16>
    %cst_17 = arith.constant dense<0.000000e+00> : vector<64x128xf32>
    %25 = tpu.matmul %23, %24, %cst_17 {dimension_numbers = #tpu.dot_dimension_numbers<[1], [0], [0], [1], [0, 0, 1, 1], [], []>} : vector<64x8xbf16>, vector<8x128xbf16>, vector<64x128xf32> -> vector<64x128xf32>
    %26 = arith.addf %21, %25 : vector<64x128xf32>
    %c5 = arith.constant 5 : index
    %c0_18 = arith.constant 0 : index
    %c0_19 = arith.constant 0 : index
    %27 = vector.load %arg3[%c5, %c0_18, %c0_19] : memref<8x64x8xbf16, #tpu.memory_space<vmem>>, vector<1x64x8xbf16>
    %28 = vector.shape_cast %27 : vector<1x64x8xbf16> to vector<64x8xbf16>
    %29 = vector.extract_strided_slice %2 {offsets = [0, 26], sizes = [8, 128], strides = [1, 1]} : vector<8x256xbf16> to vector<8x128xbf16>
    %cst_20 = arith.constant dense<0.000000e+00> : vector<64x128xf32>
    %30 = tpu.matmul %28, %29, %cst_20 {dimension_numbers = #tpu.dot_dimension_numbers<[1], [0], [0], [1], [0, 0, 1, 1], [], []>} : vector<64x8xbf16>, vector<8x128xbf16>, vector<64x128xf32> -> vector<64x128xf32>
    %31 = arith.addf %26, %30 : vector<64x128xf32>
    %c6 = arith.constant 6 : index
    %c0_21 = arith.constant 0 : index
    %c0_22 = arith.constant 0 : index
    %32 = vector.load %arg3[%c6, %c0_21, %c0_22] : memref<8x64x8xbf16, #tpu.memory_space<vmem>>, vector<1x64x8xbf16>
    %33 = vector.shape_cast %32 : vector<1x64x8xbf16> to vector<64x8xbf16>
    %34 = vector.extract_strided_slice %2 {offsets = [0, 30], sizes = [8, 128], strides = [1, 1]} : vector<8x256xbf16> to vector<8x128xbf16>
    %cst_23 = arith.constant dense<0.000000e+00> : vector<64x128xf32>
    %35 = tpu.matmul %33, %34, %cst_23 {dimension_numbers = #tpu.dot_dimension_numbers<[1], [0], [0], [1], [0, 0, 1, 1], [], []>} : vector<64x8xbf16>, vector<8x128xbf16>, vector<64x128xf32> -> vector<64x128xf32>
    %36 = arith.addf %31, %35 : vector<64x128xf32>
    %c7 = arith.constant 7 : index
    %c0_24 = arith.constant 0 : index
    %c0_25 = arith.constant 0 : index
    %37 = vector.load %arg3[%c7, %c0_24, %c0_25] : memref<8x64x8xbf16, #tpu.memory_space<vmem>>, vector<1x64x8xbf16>
    %38 = vector.shape_cast %37 : vector<1x64x8xbf16> to vector<64x8xbf16>
    %39 = vector.extract_strided_slice %2 {offsets = [0, 31], sizes = [8, 128], strides = [1, 1]} : vector<8x256xbf16> to vector<8x128xbf16>
    %cst_26 = arith.constant dense<0.000000e+00> : vector<64x128xf32>
    %40 = tpu.matmul %38, %39, %cst_26 {dimension_numbers = #tpu.dot_dimension_numbers<[1], [0], [0], [1], [0, 0, 1, 1], [], []>} : vector<64x8xbf16>, vector<8x128xbf16>, vector<64x128xf32> -> vector<64x128xf32>
    %41 = arith.addf %36, %40 : vector<64x128xf32>
    %c0_27 = arith.constant 0 : index
    %c0_28 = arith.constant 0 : index
    %42 = vector.load %arg4[%c0_27, %c0_28] : memref<64x1xf32, #tpu.memory_space<vmem>>, vector<64x1xf32>
    %43 = vector.broadcast %42 : vector<64x1xf32> to vector<64x128xf32>
    %44 = arith.addf %41, %43 : vector<64x128xf32>
    %c0_29 = arith.constant 0 : index
    %c0_30 = arith.constant 0 : index
    %45 = vector.load %arg5[%c0_29, %c0_30] : memref<64x128xf32, #tpu.memory_space<vmem>>, vector<64x128xf32>
    tpu.vector_store %arg5[%c0_29, %c0_30], %44 {strides = array<i32>} : memref<64x128xf32, #tpu.memory_space<vmem>>, vector<64x128xf32>,
    return
  }
  func.func @transform_0(%arg0: i32) -> (i32, i32) {
    %c0_i32 = arith.constant 0 : i32
    %c0_i32_0 = arith.constant 0 : i32
    return %c0_i32, %arg0 : i32, i32
  }
  func.func @transform_1(%arg0: i32) -> (i32, i32) {
    %c1_i32 = arith.constant 1 : i32
    %0 = arith.addi %arg0, %c1_i32 : i32
    %c0_i32 = arith.constant 0 : i32
    %c0_i32_0 = arith.constant 0 : i32
    return %c0_i32, %0 : i32, i32
  }
  func.func @transform_2(%arg0: i32) -> (i32, i32, i32) {
    %c0_i32 = arith.constant 0 : i32
    %c0_i32_0 = arith.constant 0 : i32
    %c0_i32_1 = arith.constant 0 : i32
    %c0_i32_2 = arith.constant 0 : i32
    return %c0_i32, %c0_i32_0, %c0_i32_1 : i32, i32, i32
  }
  func.func @transform_3(%arg0: i32) -> (i32, i32) {
    %c0_i32 = arith.constant 0 : i32
    %c0_i32_0 = arith.constant 0 : i32
    %c0_i32_1 = arith.constant 0 : i32
    return %c0_i32, %c0_i32_0 : i32, i32
  }
  func.func @transform_4(%arg0: i32) -> (i32, i32) {
    %c0_i32 = arith.constant 0 : i32
    %c0_i32_0 = arith.constant 0 : i32
    return %c0_i32, %arg0 : i32, i32
  }
}

module attributes {stable_mosaic.version = 11 : i64} {
  func.func @_tap_gemm_kernel(%arg0: i32, %arg1: memref<8x512xbf16, #tpu.memory_space<vmem>>, %arg2: memref<8x512xbf16, #tpu.memory_space<vmem>>, %arg3: memref<8x32x8xbf16, #tpu.memory_space<vmem>>, %arg4: memref<32x1xf32, #tpu.memory_space<vmem>>, %arg5: memref<32x512xf32, #tpu.memory_space<vmem>>) attributes {dimension_semantics = [#tpu.dimension_semantics<parallel>], iteration_bounds = array<i64: 2>, scalar_prefetch = 0 : i64, scratch_operands = 0 : i64, tpu.core_type = #tpu.core_type<tc>, window_params = [{transform_indices = @transform_0, window_bounds = array<i64: 8, 512>}, {transform_indices = @transform_1, window_bounds = array<i64: 8, 512>}, {pipeline_mode = #tpu.pipeline_mode<synchronous>, transform_indices = @transform_2, window_bounds = array<i64: 8, 32, 8>}, {pipeline_mode = #tpu.pipeline_mode<synchronous>, transform_indices = @transform_3, window_bounds = array<i64: 32, 1>}, {transform_indices = @transform_4, window_bounds = array<i64: 32, 512>}]} {
    %c0 = arith.constant 0 : index
    %c0_0 = arith.constant 0 : index
    %0 = vector.load %arg1[%c0, %c0_0] : memref<8x512xbf16, #tpu.memory_space<vmem>>, vector<8x512xbf16>
    %c0_1 = arith.constant 0 : index
    %c0_2 = arith.constant 0 : index
    %1 = vector.load %arg2[%c0_1, %c0_2] : memref<8x512xbf16, #tpu.memory_space<vmem>>, vector<8x512xbf16>
    %2 = tpu.concatenate %0, %1 in 1 : vector<8x512xbf16>, vector<8x512xbf16> -> vector<8x1024xbf16>
    %c0_3 = arith.constant 0 : index
    %c0_4 = arith.constant 0 : index
    %c0_5 = arith.constant 0 : index
    %3 = vector.load %arg3[%c0_3, %c0_4, %c0_5] : memref<8x32x8xbf16, #tpu.memory_space<vmem>>, vector<1x32x8xbf16>
    %4 = vector.shape_cast %3 : vector<1x32x8xbf16> to vector<32x8xbf16>
    %5 = vector.extract_strided_slice %2 {offsets = [0, 0], sizes = [8, 512], strides = [1, 1]} : vector<8x1024xbf16> to vector<8x512xbf16>
    %cst = arith.constant dense<0.000000e+00> : vector<32x512xf32>
    %6 = tpu.matmul %4, %5, %cst {dimension_numbers = #tpu.dot_dimension_numbers<[1], [0], [0], [1], [0, 0, 1, 1], [], []>} : vector<32x8xbf16>, vector<8x512xbf16>, vector<32x512xf32> -> vector<32x512xf32>
    %c1 = arith.constant 1 : index
    %c0_6 = arith.constant 0 : index
    %c0_7 = arith.constant 0 : index
    %7 = vector.load %arg3[%c1, %c0_6, %c0_7] : memref<8x32x8xbf16, #tpu.memory_space<vmem>>, vector<1x32x8xbf16>
    %8 = vector.shape_cast %7 : vector<1x32x8xbf16> to vector<32x8xbf16>
    %9 = vector.extract_strided_slice %2 {offsets = [0, 1], sizes = [8, 512], strides = [1, 1]} : vector<8x1024xbf16> to vector<8x512xbf16>
    %cst_8 = arith.constant dense<0.000000e+00> : vector<32x512xf32>
    %10 = tpu.matmul %8, %9, %cst_8 {dimension_numbers = #tpu.dot_dimension_numbers<[1], [0], [0], [1], [0, 0, 1, 1], [], []>} : vector<32x8xbf16>, vector<8x512xbf16>, vector<32x512xf32> -> vector<32x512xf32>
    %11 = arith.addf %6, %10 : vector<32x512xf32>
    %c2 = arith.constant 2 : index
    %c0_9 = arith.constant 0 : index
    %c0_10 = arith.constant 0 : index
    %12 = vector.load %arg3[%c2, %c0_9, %c0_10] : memref<8x32x8xbf16, #tpu.memory_space<vmem>>, vector<1x32x8xbf16>
    %13 = vector.shape_cast %12 : vector<1x32x8xbf16> to vector<32x8xbf16>
    %14 = vector.extract_strided_slice %2 {offsets = [0, 9], sizes = [8, 512], strides = [1, 1]} : vector<8x1024xbf16> to vector<8x512xbf16>
    %cst_11 = arith.constant dense<0.000000e+00> : vector<32x512xf32>
    %15 = tpu.matmul %13, %14, %cst_11 {dimension_numbers = #tpu.dot_dimension_numbers<[1], [0], [0], [1], [0, 0, 1, 1], [], []>} : vector<32x8xbf16>, vector<8x512xbf16>, vector<32x512xf32> -> vector<32x512xf32>
    %16 = arith.addf %11, %15 : vector<32x512xf32>
    %c3 = arith.constant 3 : index
    %c0_12 = arith.constant 0 : index
    %c0_13 = arith.constant 0 : index
    %17 = vector.load %arg3[%c3, %c0_12, %c0_13] : memref<8x32x8xbf16, #tpu.memory_space<vmem>>, vector<1x32x8xbf16>
    %18 = vector.shape_cast %17 : vector<1x32x8xbf16> to vector<32x8xbf16>
    %19 = vector.extract_strided_slice %2 {offsets = [0, 10], sizes = [8, 512], strides = [1, 1]} : vector<8x1024xbf16> to vector<8x512xbf16>
    %cst_14 = arith.constant dense<0.000000e+00> : vector<32x512xf32>
    %20 = tpu.matmul %18, %19, %cst_14 {dimension_numbers = #tpu.dot_dimension_numbers<[1], [0], [0], [1], [0, 0, 1, 1], [], []>} : vector<32x8xbf16>, vector<8x512xbf16>, vector<32x512xf32> -> vector<32x512xf32>
    %21 = arith.addf %16, %20 : vector<32x512xf32>
    %c4 = arith.constant 4 : index
    %c0_15 = arith.constant 0 : index
    %c0_16 = arith.constant 0 : index
    %22 = vector.load %arg3[%c4, %c0_15, %c0_16] : memref<8x32x8xbf16, #tpu.memory_space<vmem>>, vector<1x32x8xbf16>
    %23 = vector.shape_cast %22 : vector<1x32x8xbf16> to vector<32x8xbf16>
    %24 = vector.extract_strided_slice %2 {offsets = [0, 81], sizes = [8, 512], strides = [1, 1]} : vector<8x1024xbf16> to vector<8x512xbf16>
    %cst_17 = arith.constant dense<0.000000e+00> : vector<32x512xf32>
    %25 = tpu.matmul %23, %24, %cst_17 {dimension_numbers = #tpu.dot_dimension_numbers<[1], [0], [0], [1], [0, 0, 1, 1], [], []>} : vector<32x8xbf16>, vector<8x512xbf16>, vector<32x512xf32> -> vector<32x512xf32>
    %26 = arith.addf %21, %25 : vector<32x512xf32>
    %c5 = arith.constant 5 : index
    %c0_18 = arith.constant 0 : index
    %c0_19 = arith.constant 0 : index
    %27 = vector.load %arg3[%c5, %c0_18, %c0_19] : memref<8x32x8xbf16, #tpu.memory_space<vmem>>, vector<1x32x8xbf16>
    %28 = vector.shape_cast %27 : vector<1x32x8xbf16> to vector<32x8xbf16>
    %29 = vector.extract_strided_slice %2 {offsets = [0, 82], sizes = [8, 512], strides = [1, 1]} : vector<8x1024xbf16> to vector<8x512xbf16>
    %cst_20 = arith.constant dense<0.000000e+00> : vector<32x512xf32>
    %30 = tpu.matmul %28, %29, %cst_20 {dimension_numbers = #tpu.dot_dimension_numbers<[1], [0], [0], [1], [0, 0, 1, 1], [], []>} : vector<32x8xbf16>, vector<8x512xbf16>, vector<32x512xf32> -> vector<32x512xf32>
    %31 = arith.addf %26, %30 : vector<32x512xf32>
    %c6 = arith.constant 6 : index
    %c0_21 = arith.constant 0 : index
    %c0_22 = arith.constant 0 : index
    %32 = vector.load %arg3[%c6, %c0_21, %c0_22] : memref<8x32x8xbf16, #tpu.memory_space<vmem>>, vector<1x32x8xbf16>
    %33 = vector.shape_cast %32 : vector<1x32x8xbf16> to vector<32x8xbf16>
    %34 = vector.extract_strided_slice %2 {offsets = [0, 90], sizes = [8, 512], strides = [1, 1]} : vector<8x1024xbf16> to vector<8x512xbf16>
    %cst_23 = arith.constant dense<0.000000e+00> : vector<32x512xf32>
    %35 = tpu.matmul %33, %34, %cst_23 {dimension_numbers = #tpu.dot_dimension_numbers<[1], [0], [0], [1], [0, 0, 1, 1], [], []>} : vector<32x8xbf16>, vector<8x512xbf16>, vector<32x512xf32> -> vector<32x512xf32>
    %36 = arith.addf %31, %35 : vector<32x512xf32>
    %c7 = arith.constant 7 : index
    %c0_24 = arith.constant 0 : index
    %c0_25 = arith.constant 0 : index
    %37 = vector.load %arg3[%c7, %c0_24, %c0_25] : memref<8x32x8xbf16, #tpu.memory_space<vmem>>, vector<1x32x8xbf16>
    %38 = vector.shape_cast %37 : vector<1x32x8xbf16> to vector<32x8xbf16>
    %39 = vector.extract_strided_slice %2 {offsets = [0, 91], sizes = [8, 512], strides = [1, 1]} : vector<8x1024xbf16> to vector<8x512xbf16>
    %cst_26 = arith.constant dense<0.000000e+00> : vector<32x512xf32>
    %40 = tpu.matmul %38, %39, %cst_26 {dimension_numbers = #tpu.dot_dimension_numbers<[1], [0], [0], [1], [0, 0, 1, 1], [], []>} : vector<32x8xbf16>, vector<8x512xbf16>, vector<32x512xf32> -> vector<32x512xf32>
    %41 = arith.addf %36, %40 : vector<32x512xf32>
    %c0_27 = arith.constant 0 : index
    %c0_28 = arith.constant 0 : index
    %42 = vector.load %arg4[%c0_27, %c0_28] : memref<32x1xf32, #tpu.memory_space<vmem>>, vector<32x1xf32>
    %43 = vector.broadcast %42 : vector<32x1xf32> to vector<32x512xf32>
    %44 = arith.addf %41, %43 : vector<32x512xf32>
    %c0_29 = arith.constant 0 : index
    %c0_30 = arith.constant 0 : index
    %45 = vector.load %arg5[%c0_29, %c0_30] : memref<32x512xf32, #tpu.memory_space<vmem>>, vector<32x512xf32>
    tpu.vector_store %arg5[%c0_29, %c0_30], %44 {strides = array<i32>} : memref<32x512xf32, #tpu.memory_space<vmem>>, vector<32x512xf32>,
    return
  }
  func.func @transform_0(%arg0: i32) -> (i32, i32) {
    %c0_i32 = arith.constant 0 : i32
    %c0_i32_0 = arith.constant 0 : i32
    return %c0_i32, %arg0 : i32, i32
  }
  func.func @transform_1(%arg0: i32) -> (i32, i32) {
    %c1_i32 = arith.constant 1 : i32
    %0 = arith.addi %arg0, %c1_i32 : i32
    %c0_i32 = arith.constant 0 : i32
    %c0_i32_0 = arith.constant 0 : i32
    return %c0_i32, %0 : i32, i32
  }
  func.func @transform_2(%arg0: i32) -> (i32, i32, i32) {
    %c0_i32 = arith.constant 0 : i32
    %c0_i32_0 = arith.constant 0 : i32
    %c0_i32_1 = arith.constant 0 : i32
    %c0_i32_2 = arith.constant 0 : i32
    return %c0_i32, %c0_i32_0, %c0_i32_1 : i32, i32, i32
  }
  func.func @transform_3(%arg0: i32) -> (i32, i32) {
    %c0_i32 = arith.constant 0 : i32
    %c0_i32_0 = arith.constant 0 : i32
    %c0_i32_1 = arith.constant 0 : i32
    return %c0_i32, %c0_i32_0 : i32, i32
  }
  func.func @transform_4(%arg0: i32) -> (i32, i32) {
    %c0_i32 = arith.constant 0 : i32
    %c0_i32_0 = arith.constant 0 : i32
    return %c0_i32, %arg0 : i32, i32
  }
}

</mosaic_0001>

<bundles_post_ra>
// kernel: tile.18
= control target key start
LH: loop header
LB: loop body
LE: loop exit
PB: predicated region body
PF: predicated region fallthrough
CT: control target
= control target key end

     0   :  { %s22_s0 = inlined_call_operand.vmem [shape: f32[4], index: 0, kind: input, shape index: {}]   ;;  %s23_s1 = inlined_call_operand.vmem [shape: f32[8,4], index: 1, kind: output, shape index: {}]  }
   0x1   :  { %v4_v0 = vld [vmem:[%s22_s0] ss:$0 sm:$0xff] }
   0x2   :  { %5 = vst [vmem:[%s23_s1] sm:$0xff] %v4_v0 }

// kernel: tile.13
= control target key start
LH: loop header
LB: loop body
LE: loop exit
PB: predicated region body
PF: predicated region fallthrough
CT: control target
= control target key end

     0   :  { %s22_s0 = inlined_call_operand.vmem [shape: f32[8], index: 0, kind: input, shape index: {}]   ;;  %s23_s1 = inlined_call_operand.vmem [shape: f32[8,8], index: 1, kind: output, shape index: {}]  }
   0x1   :  { %v4_v0 = vld [vmem:[%s22_s0] ss:$0 sm:$0xff] }
   0x2   :  { %5 = vst [vmem:[%s23_s1] sm:$0xff] %v4_v0 }

// kernel: tile.1
= control target key start
LH: loop header
LB: loop body
LE: loop exit
PB: predicated region body
PF: predicated region fallthrough
CT: control target
= control target key end

     0   :  { %vm3_vm0 = vcmask 7168   ;;  %s30_s8 = smov 125   ;;  %s31_s11 = smov 126   ;;  %s57_s0 = inlined_call_operand.vmem [shape: f32[8,4], index: 0, kind: input, shape index: {}]   ;;  %s58_s1 = inlined_call_operand.vmem [shape: f32[32,1], index: 1, kind: output, shape index: {}]  }
   0x1   :  { %v5_v0 = vld [vmem:[%s57_s0] sm:$0xff]   ;;  %s29_s0 = smov 127  }
   0x2   :  { %6 = vrot.lane.b32.xlu0 %v5_v0, %s29_s0  ;;  %18 = vrot.lane.b32.xlu1 %v5_v0, %s30_s8  ;;  %4 = vst.msk [vmem:[%s58_s1] ss:$4 sm:$0xff] %vm3_vm0, %v5_v0  }
   0x6   :  { %12 = vrot.lane.b32.xlu0 %v5_v0, %s31_s11 }
  0x74   :  { %v7_v1 = vpop.permute.xlu0 %6   ;;  %v19_v2 = vpop.permute.xlu1 %18  }
  0x75   :  { %23 = vst.msk [vmem:[%s58_s1 + $0x1] ss:$4 sm:$0xff] %vm3_vm0, %v7_v1   ;;  %25 = vst.msk [vmem:[%s58_s1 + $0x3] ss:$4 sm:$0xff] %vm3_vm0, %v19_v2  }
  0x78   :  { %v13_v3 = vpop.permute.xlu0 %12  }
  0x79   :  { %24 = vst.msk [vmem:[%s58_s1 + $0x2] ss:$4 sm:$0xff] %vm3_vm0, %v13_v3  }

// kernel: tile.0
= control target key start
LH: loop header
LB: loop body
LE: loop exit
PB: predicated region body
PF: predicated region fallthrough
CT: control target
= control target key end

     0   :  { %vm3_vm0 = vcmask 7168   ;;  %s84_s8 = smov 125   ;;  %s85_s13 = smov 126   ;;  %s167_s0 = inlined_call_operand.vmem [shape: f32[8,8], index: 0, kind: input, shape index: {}]   ;;  %s168_s1 = inlined_call_operand.vmem [shape: f32[64,1], index: 1, kind: output, shape index: {}]  }
   0x1   :  { %v6_v0 = vld [vmem:[%s167_s0] sm:$0xff]   ;;  %s83_s0 = smov 127   ;;  %s86_s14 = smov 124  }
   0x2   :  { %7 = vrot.lane.b32.xlu0 %v6_v0, %s83_s0  ;;  %23 = vrot.lane.b32.xlu1 %v6_v0, %s84_s8  ;;  %4 = vst.msk [vmem:[%s168_s1] ss:$8 sm:$0xf] %vm3_vm0, %v6_v0   ;;  %5 = vst.msk [vmem:[%s168_s1] ss:$8 sm:$0xf0] %vm3_vm0, %v6_v0  }
   0x3   :  { %s87_s15 = smov 123   ;;  %s88_s16 = smov 122  }
   0x4   :  { %s89_s17 = smov 121  }
   0x6   :  { %15 = vrot.lane.b32.xlu0 %v6_v0, %s85_s13  ;;  %31 = vrot.lane.b32.xlu1 %v6_v0, %s86_s14 }
   0xa   :  { %39 = vrot.lane.b32.xlu0 %v6_v0, %s87_s15  ;;  %47 = vrot.lane.b32.xlu1 %v6_v0, %s88_s16 }
   0xe   :  { %55 = vrot.lane.b32.xlu0 %v6_v0, %s89_s17 }
  0x74   :  { %v8_v1 = vpop.permute.xlu0 %7   ;;  %v24_v2 = vpop.permute.xlu1 %23  }
  0x75   :  { %62 = vst.msk [vmem:[%s168_s1 + $0x1] ss:$8 sm:$0xf] %vm3_vm0, %v8_v1   ;;  %63 = vst.msk [vmem:[%s168_s1 + $0x1] ss:$8 sm:$0xf0] %vm3_vm0, %v8_v1  }
  0x76   :  { %66 = vst.msk [vmem:[%s168_s1 + $0x3] ss:$8 sm:$0xf] %vm3_vm0, %v24_v2   ;;  %67 = vst.msk [vmem:[%s168_s1 + $0x3] ss:$8 sm:$0xf0] %vm3_vm0, %v24_v2  }
  0x78   :  { %v16_v3 = vpop.permute.xlu0 %15   ;;  %v32_v4 = vpop.permute.xlu1 %31  }
  0x79   :  { %64 = vst.msk [vmem:[%s168_s1 + $0x2] ss:$8 sm:$0xf] %vm3_vm0, %v16_v3   ;;  %65 = vst.msk [vmem:[%s168_s1 + $0x2] ss:$8 sm:$0xf0] %vm3_vm0, %v16_v3  }
  0x7a   :  { %68 = vst.msk [vmem:[%s168_s1 + $0x4] ss:$8 sm:$0xf] %vm3_vm0, %v32_v4   ;;  %69 = vst.msk [vmem:[%s168_s1 + $0x4] ss:$8 sm:$0xf0] %vm3_vm0, %v32_v4  }
  0x7c   :  { %v40_v5 = vpop.permute.xlu0 %39   ;;  %v48_v6 = vpop.permute.xlu1 %47  }
  0x7d   :  { %70 = vst.msk [vmem:[%s168_s1 + $0x5] ss:$8 sm:$0xf] %vm3_vm0, %v40_v5   ;;  %71 = vst.msk [vmem:[%s168_s1 + $0x5] ss:$8 sm:$0xf0] %vm3_vm0, %v40_v5  }
  0x7e   :  { %72 = vst.msk [vmem:[%s168_s1 + $0x6] ss:$8 sm:$0xf] %vm3_vm0, %v48_v6   ;;  %73 = vst.msk [vmem:[%s168_s1 + $0x6] ss:$8 sm:$0xf0] %vm3_vm0, %v48_v6  }
  0x80   :  { %v56_v7 = vpop.permute.xlu0 %55  }
  0x81   :  { %74 = vst.msk [vmem:[%s168_s1 + $0x7] ss:$8 sm:$0xf] %vm3_vm0, %v56_v7   ;;  %75 = vst.msk [vmem:[%s168_s1 + $0x7] ss:$8 sm:$0xf0] %vm3_vm0, %v56_v7  }

// kernel: hourglass_forward.6
= control target key start
LH: loop header
LB: loop body
LE: loop exit
PB: predicated region body
PF: predicated region fallthrough
CT: control target
= control target key end

     0   :  { %s3414_s15 = smov 0   ;;  %s3416_s16 = smov 0   ;;  %s4188_s0 = inlined_call_operand.vmem [shape: bf16[32,1536], index: 0, kind: input, shape index: {}, may-alias: {0,1}]   ;;  %s4189_s1 = inlined_call_operand.vmem [shape: bf16[32,1536], index: 1, kind: input, shape index: {}, may-alias: {0,1}]   ;;  %s4190_s2 = inlined_call_operand.vmem [shape: bf16[27,8,32], index: 2, kind: input, shape index: {}]   ;;  %s4191_s3 = inlined_call_operand.vmem [shape: f32[8,1], index: 3, kind: input, shape index: {}]   ;;  %s4192_s4 = inlined_call_operand.vmem [shape: f32[8,1024], index: 4, kind: output, shape index: {}]  }
   0x1   :  { %s3418_s17 = smov 0   ;;  %s3420_s18 = smov 0  }
   0x2   :  { %s3422_s19 = smov 0  }
   0x3 LB: > { %s3163_s20 = sadd.s32 4294967295, %s3379_s19   ;;  %s3441_s21 = sadd.s32 1, %s3379_s19   ;;  %s3379_s19 = sphi %s3422_s19, %s4198_s19   ;;  %s3375_s18 = sphi %s3420_s18, %s4197_s18   ;;  %s3371_s17 = sphi %s3418_s17, %s4196_s17   ;;  %s3367_s16 = sphi %s3416_s16, %s4195_s16   ;;  %s3363_s15 = sphi %s3414_s15, %s4194_s15  }
   0x4   : > { %s18_s22 = ssub.s32 %s3379_s19, %s3441_s21  ;;  %s21_s23 = sadd.s32 1, %s3375_s18 }
   0x5   : > { %p19_p0 = scmp.eq.s32.totalorder %s18_s22, 0  ;;  %p28_p1 = scmp.ne.s32.totalorder %s3375_s18, %s3371_s17 }
   0x6   : > { %p29_p2 = scmp.eq.s32.totalorder %s3379_s19, 0  ;;  %s45_s24 = sadd.s32 1, %s3441_s21 }
   0x7   : > { %s3451_s25 = scalar_select %p19_p0, %s3375_s18, %s21_s23  }
   0x8   : > { %p30_p3 = por %p29_p2, %p28_p1  ;;  %s46_s26 = ssub.s32 %s3441_s21, %s45_s24 }
   0x9   : > { %p47_p4 = scmp.eq.s32.totalorder %s46_s26, 0  ;;  %s49_s27 = sadd.s32 1, %s3367_s16 }
   0xa   : > { %p56_p5 = scmp.ne.s32.totalorder %s3367_s16, %s3363_s15  ;;  %p3166_p7 = scmp.ge.s32.totalorder %s3379_s19, 2 }
   0xb   : > { %s3458_s28 = scalar_select %p47_p4, %s3367_s16, %s49_s27  }
   0xc   : > { %p3460_p6 = por %p56_p5, %p29_p2  ;;  %156 = sbr.rel (%p3166_p7) target bundleno = 35 (0x23), region = 24 }
  0x13   : > { %159 = sbr.rel (!%p30_p3) target bundleno = 27 (0x1b), region = 28  ;;  %s161_s30 = sand.u32 (%p30_p3), 1, %s3375_s18  }
  0x14   : > { %s3277_s5 = sshll.u32 (%p30_p3), %s3379_s19, 4  ;;  %s3167_s6 = sshll.u32 (%p30_p3), %s161_s30, 6 }
  0x15   : > { %s166_s9 = scalar_lea.vmem (%p30_p3), %s4188_s0, %s3277_s5  ;;  %s163_s10 = scalar_lea.vmem (%p30_p3), [#allocation2], %s3167_s6 }
  0x16   : > { %v179_v0 = vld [vmem:[%s166_s9] sm:$0xff] (%p30_p3)  ;;  %v181_v1 = vld [vmem:[%s166_s9 + $0x8] sm:$0xff] (%p30_p3)  ;;  %v183_v2 = vld [vmem:[%s166_s9 + $0x30] sm:$0xff] (%p30_p3) }
  0x17   : > { %180 = vst [vmem:[%s163_s10] sm:$0xff] (%p30_p3), %v179_v0  ;;  %182 = vst [vmem:[%s163_s10 + $0x8] sm:$0xff] (%p30_p3), %v181_v1  ;;  %v185_v3 = vld [vmem:[%s166_s9 + $0x38] sm:$0xff] (%p30_p3)  ;;  %v187_v4 = vld [vmem:[%s166_s9 + $0x60] sm:$0xff] (%p30_p3) }
  0x18   : > { %184 = vst [vmem:[%s163_s10 + $0x10] sm:$0xff] (%p30_p3), %v183_v2  ;;  %v189_v5 = vld [vmem:[%s166_s9 + $0x68] sm:$0xff] (%p30_p3)  ;;  %186 = vst [vmem:[%s163_s10 + $0x18] sm:$0xff] (%p30_p3), %v185_v3  ;;  %v191_v6 = vld [vmem:[%s166_s9 + $0x90] sm:$0xff] (%p30_p3) }
  0x19   : > { %188 = vst [vmem:[%s163_s10 + $0x20] sm:$0xff] (%p30_p3), %v187_v4  ;;  %190 = vst [vmem:[%s163_s10 + $0x28] sm:$0xff] (%p30_p3), %v189_v5  ;;  %v193_v7 = vld [vmem:[%s166_s9 + $0x98] sm:$0xff] (%p30_p3) }
  0x1a   : > { %192 = vst [vmem:[%s163_s10 + $0x30] sm:$0xff] %v191_v6  ;;  %194 = vst [vmem:[%s163_s10 + $0x38] sm:$0xff] %v193_v7 }
  0x1b PF: > { %200 = sbr.rel (!%p3460_p6) target bundleno = 35 (0x23), region = 51  ;;  %s202_s11 = sand.u32 (%p3460_p6), 1, %s3367_s16  }
  0x1c   : > { %s3171_s12 = sshll.u32 (%p3460_p6), %s3379_s19, 4  ;;  %s3170_s13 = sshll.u32 (%p3460_p6), %s202_s11, 6 }
  0x1d   : > { %s3111_s23 = scalar_lea.vmem (%p3460_p6), %s4189_s1, %s3171_s12  ;;  %s204_s24 = scalar_lea.vmem (%p3460_p6), [#allocation3], %s3170_s13 }
  0x1e   : > { %v3172_v8 = vld [vmem:[%s3111_s23 + $0x10] sm:$0xff] (%p3460_p6)  ;;  %v3173_v9 = vld [vmem:[%s3111_s23 + $0x18] sm:$0xff] (%p3460_p6)  ;;  %v3174_v10 = vld [vmem:[%s3111_s23 + $0x40] sm:$0xff] (%p3460_p6) }
  0x1f   : > { %222 = vst [vmem:[%s204_s24] sm:$0xff] (%p3460_p6), %v3172_v8  ;;  %224 = vst [vmem:[%s204_s24 + $0x8] sm:$0xff] (%p3460_p6), %v3173_v9  ;;  %v3175_v11 = vld [vmem:[%s3111_s23 + $0x48] sm:$0xff] (%p3460_p6)  ;;  %v3176_v12 = vld [vmem:[%s3111_s23 + $0x70] sm:$0xff] (%p3460_p6) }
  0x20   : > { %226 = vst [vmem:[%s204_s24 + $0x10] sm:$0xff] (%p3460_p6), %v3174_v10  ;;  %v3177_v13 = vld [vmem:[%s3111_s23 + $0x78] sm:$0xff] (%p3460_p6)  ;;  %228 = vst [vmem:[%s204_s24 + $0x18] sm:$0xff] (%p3460_p6), %v3175_v11  ;;  %v3178_v14 = vld [vmem:[%s3111_s23 + $0xa0] sm:$0xff] (%p3460_p6) }
  0x21   : > { %230 = vst [vmem:[%s204_s24 + $0x20] sm:$0xff] (%p3460_p6), %v3176_v12  ;;  %232 = vst [vmem:[%s204_s24 + $0x28] sm:$0xff] (%p3460_p6), %v3177_v13  ;;  %v3179_v15 = vld [vmem:[%s3111_s23 + $0xa8] sm:$0xff] (%p3460_p6) }
  0x22   : > { %234 = vst [vmem:[%s204_s24 + $0x30] sm:$0xff] %v3178_v14  ;;  %236 = vst [vmem:[%s204_s24 + $0x38] sm:$0xff] %v3179_v15 }
  0x23 PF: > { %p3180_p8 = scmp.ge.s32.totalorder %s3379_s19, 1  ;;  %p241_p9 = scmp.lt.s32.totalorder %s3379_s19, 3 }
  0x25   : > { %p242_p10 = pnand %p3180_p8, %p241_p9 }
  0x26   : > { %s248_s26 = sand.u32 (!%p242_p10), 1, %s3371_s17   ;;  %s255_s29 = sand.u32 (!%p242_p10), 1, %s3363_s15   ;;  %v3381_v16 = vmov (!%p242_p10), 0   ;;  %v3195_v26 = vld [vmem:[%s4190_s2 + $0x4] sm:$0xf] (!%p242_p10)  ;;  %vm359_vm0 = vcmask (!%p242_p10), 261120  }
  0x27   : > { %245 = sbr.rel (%p242_p10) target bundleno = 591 (0x24f), region = 74  ;;  %s3181_s27 = sshll.u32 (!%p242_p10), %s248_s26, 6  ;;  %395 = vmatprep.mubr.bf16.mxu0 (!%p242_p10), %v3381_v16  ;;  %436 = vmatprep.mubr.bf16.mxu1 (!%p242_p10), %v3381_v16  ;;  %v356_v28 = vld [vmem:[%s4190_s2] sm:$0xf] (!%p242_p10)  ;;  %vm552_vm1 = vcmask (!%p242_p10), 1039360   ;;  %vm953_vm2 = vcmask (!%p242_p10), 973824  }
  0x28   : > { %s3483_s30 = sshll.u32 (!%p242_p10), %s255_s29, 6  ;;  %3326 = vset.pattern.permute.xlu0 (!%p242_p10), %v3381_v16  ;;  %s250_s5 = scalar_lea.vmem (!%p242_p10), [#allocation2], %s3181_s27  ;;  %v3200_v43 = vld [vmem:[%s4190_s2 + $0x8] sm:$0xf] (!%p242_p10)  ;;  %v3203_v50 = vld [vmem:[%s4190_s2 + $0xc] sm:$0xf] (!%p242_p10) }
  0x29   : > { %v3486_v17 = vld [vmem:[%s250_s5 + $0x4] ss:$16 sps:$4 sm:$0xff] (!%p242_p10)   ;;  %v3488_v18 = vld [vmem:[%s250_s5] ss:$16 sps:$4 sm:$0xff] (!%p242_p10)   ;;  %s3382_s6 = smov (!%p242_p10), 127   ;;  %s257_s15 = scalar_lea.vmem (!%p242_p10), [#allocation3], %s3483_s30 }
  0x2a   : > { %534 = vrot.lane.b32.xlu0 (!%p242_p10), %v3486_v17, %s3382_s6  ;;  %v3492_v19 = vld [vmem:[%s250_s5 + $0x8] ss:$16 sps:$4 sm:$0xff] (!%p242_p10)   ;;  %v3494_v20 = vld [vmem:[%s250_s5 + $0xc] ss:$16 sps:$4 sm:$0xff] (!%p242_p10)   ;;  %363 = vmatprep.subr.bf16.mxu0 (!%p242_p10), %v3486_v17  ;;  %v3501_v21 = vld [vmem:[%s250_s5 + $0x24] ss:$16 sps:$4 sm:$0xff] (!%p242_p10)  }
  0x2b   : > { %532 = vrot.lane.b32.xlu1 (!%p242_p10), %v3488_v18, %s3382_s6  ;;  %364 = vmatpush1.bf16.msra.mxu0 (!%p242_p10), %v3488_v18  ;;  %v3506_v22 = vld [vmem:[%s257_s15] ss:$16 sps:$4 sm:$0xff] (!%p242_p10)   ;;  %v3513_v24 = vld [vmem:[%s250_s5 + $0x2c] ss:$16 sps:$4 sm:$0xff] (!%p242_p10)   ;;  %v3518_v25 = vld [vmem:[%s250_s5 + $0x28] ss:$16 sps:$4 sm:$0xff] (!%p242_p10)  }
  0x2c   : > { %404 = vmatprep.subr.bf16.mxu1 (!%p242_p10), %v3494_v20  ;;  %v3508_v23 = vld [vmem:[%s250_s5 + $0x20] ss:$16 sps:$4 sm:$0xff] (!%p242_p10)   ;;  %365 = vmatprep.subr.bf16.mxu0 (!%p242_p10), %v3501_v21  ;;  %s3383_s10 = smov (!%p242_p10), 119   ;;  %s3384_s11 = smov (!%p242_p10), 118   ;;  %v3209_v61 = vld [vmem:[%s4190_s2 + $0x14] sm:$0xf] (!%p242_p10) }
  0x2d   : > { %405 = vmatpush1.bf16.msra.mxu1 (!%p242_p10), %v3492_v19  ;;  %v3544_v27 = vld [vmem:[%s257_s15 + $0x20] ss:$16 sps:$4 sm:$0xff] (!%p242_p10)   ;;  %s3385_s12 = smov (!%p242_p10), 47   ;;  %s3386_s13 = smov (!%p242_p10), 46   ;;  %v3212_v7 = vld [vmem:[%s4190_s2 + $0x18] sm:$0xf] (!%p242_p10) }
  0x2e   : > { %536 = vrot.lane.b32.xlu0 %v3492_v19, %s3382_s6  ;;  %406 = vmatprep.subr.bf16.mxu1 %v3513_v24  ;;  %s3387_s14 = smov 38   ;;  %s3388_s22 = smov 37   ;;  %v3206_v55 = vld [vmem:[%s4190_s2 + $0x10] sm:$0xf]  ;;  %vm1172_vm3 = vcmask 965632   ;;  %vm2119_vm4 = vcmask 384000  }
  0x2f   : > { %538 = vrot.lane.b32.xlu1 %v3494_v20, %s3382_s6  ;;  %366 = vmatpush1.bf16.msra.mxu0 %v3508_v23  ;;  %v3215_v15 = vld [vmem:[%s4190_s2 + $0x1c] sm:$0xf]  ;;  %vm2338_vm5 = vcmask 375808   ;;  %vm2739_vm6 = vcmask 310272   ;;  %vm2958_vm7 = vcmask 302080  }
  0x30   : > { %448 = vmatprep.subr.bf16.mxu0 %v3486_v17 }
  0x31   : > { %407 = vmatpush1.bf16.msra.mxu1 %v3518_v25 }
  0x32   : > { %540 = vrot.lane.b32.xlu0 %v3506_v22, %s3382_s6  ;;  %3196 = vmatmul.mubr.msk.bf16.vlgmr.msra.gmra.mrb[0].mxu0 %vm359_vm0, %v3195_v26 }
  0x33   : > { %544 = vrot.lane.b32.xlu1 %v3501_v21, %s3382_s6  ;;  %449 = vmatpush1.bf16.msra.mxu0 %v3488_v18 }
  0x34   : > { %3197 = vmatmul.mubr.msk.bf16.vlgmr.msra.gmra.mrb[0].mxu1 %vm359_vm0, %v3195_v26  ;;  %489 = vmatprep.subr.bf16.mxu1 %v3494_v20 }
  0x35   : > { %490 = vmatpush1.bf16.msra.mxu1 %v3492_v19  ;;  %450 = vmatprep.subr.bf16.mxu0 %v3501_v21 }
  0x36   : > { %546 = vrot.lane.b32.xlu0 %v3518_v25, %s3382_s6  ;;  %491 = vmatprep.subr.bf16.mxu1 %v3513_v24 }
  0x37   : > { %542 = vrot.lane.b32.xlu1 %v3508_v23, %s3382_s6  ;;  %451 = vmatpush1.bf16.msra.mxu0 %v3508_v23 }
  0x38   : > { %480 = vmatprep.mubr.bf16.mxu0 %v3381_v16  ;;  %521 = vmatprep.mubr.bf16.mxu1 %v3381_v16 }
  0x39   : > { %492 = vmatpush1.bf16.msra.mxu1 %v3518_v25 }
  0x3a   : > { %548 = vrot.lane.b32.xlu0 %v3513_v24, %s3382_s6  ;;  %3198 = vmatmul.mubr.msk.bf16.vlgmr.msra.gmra.mrb[4].mxu0 %vm359_vm0, %v356_v28 }
  0x3b   : > { %550 = vrot.lane.b32.xlu1 %v3544_v27, %s3382_s6  ;;  %604 = vmatprep.mubr.bf16.mxu0 %v3381_v16 }
  0x3c   : > { %3199 = vmatmul.mubr.msk.bf16.vlgmr.msra.gmra.mrb[4].mxu1 %vm359_vm0, %v356_v28 }
  0x3d   : > { %645 = vmatprep.mubr.bf16.mxu1 %v3381_v16 }
  0x3e   : > { %935 = vrot.lane.b32.xlu0 %v3486_v17, %s3383_s10 }
  0x3f   : > { %937 = vrot.lane.b32.xlu1 %v3492_v19, %s3383_s10 }
  0x42   : > { %933 = vrot.lane.b32.xlu0 %v3488_v18, %s3383_s10 }
  0x43   : > { %939 = vrot.lane.b32.xlu1 %v3494_v20, %s3383_s10 }
  0x46   : > { %941 = vrot.lane.b32.xlu0 %v3506_v22, %s3383_s10 }
  0x47   : > { %945 = vrot.lane.b32.xlu1 %v3501_v21, %s3383_s10 }
  0x4a   : > { %947 = vrot.lane.b32.xlu0 %v3518_v25, %s3383_s10 }
  0x4b   : > { %943 = vrot.lane.b32.xlu1 %v3508_v23, %s3383_s10 }
  0x4e   : > { %949 = vrot.lane.b32.xlu0 %v3513_v24, %s3383_s10 }
  0x4f   : > { %951 = vrot.lane.b32.xlu1 %v3544_v27, %s3383_s10 }
  0x52   : > { %1154 = vrot.lane.b32.xlu0 %v3486_v17, %s3384_s11 }
  0x53   : > { %1156 = vrot.lane.b32.xlu1 %v3492_v19, %s3384_s11 }
  0x56   : > { %1152 = vrot.lane.b32.xlu0 %v3488_v18, %s3384_s11 }
  0x57   : > { %1158 = vrot.lane.b32.xlu1 %v3494_v20, %s3384_s11 }
  0x5a   : > { %1160 = vrot.lane.b32.xlu0 %v3506_v22, %s3384_s11 }
  0x5b   : > { %1164 = vrot.lane.b32.xlu1 %v3501_v21, %s3384_s11 }
  0x5e   : > { %1166 = vrot.lane.b32.xlu0 %v3518_v25, %s3384_s11 }
  0x5f   : > { %1162 = vrot.lane.b32.xlu1 %v3508_v23, %s3384_s11 }
  0x62   : > { %1168 = vrot.lane.b32.xlu0 %v3513_v24, %s3384_s11 }
  0x63   : > { %1170 = vrot.lane.b32.xlu1 %v3544_v27, %s3384_s11  ;;  %s3183_s11 = sshll.u32 %s3163_s20, 2 }
  0x64   : > { %p288_p11 = scmp.lt.s32.totalorder %s3183_s11, 7 }
  0x66   : > { %2101 = vrot.lane.b32.xlu0 %v3486_v17, %s3385_s12  ;;  %s4200_s11 = smov (!%p288_p11, %s3183_s11), 7 }
  0x67   : > { %2103 = vrot.lane.b32.xlu1 %v3492_v19, %s3385_s12  ;;  %s3184_s19 = sshll.u32 %s4200_s11, 3 }
  0x6a   : > { %2099 = vrot.lane.b32.xlu0 %v3488_v18, %s3385_s12 }
  0x6b   : > { %2105 = vrot.lane.b32.xlu1 %v3494_v20, %s3385_s12 }
  0x6e   : > { %2107 = vrot.lane.b32.xlu0 %v3506_v22, %s3385_s12 }
  0x6f   : > { %2111 = vrot.lane.b32.xlu1 %v3501_v21, %s3385_s12 }
  0x72   : > { %2113 = vrot.lane.b32.xlu0 %v3518_v25, %s3385_s12 }
  0x73   : > { %2109 = vrot.lane.b32.xlu1 %v3508_v23, %s3385_s12 }
  0x76   : > { %2115 = vrot.lane.b32.xlu0 %v3513_v24, %s3385_s12 }
  0x77   : > { %2117 = vrot.lane.b32.xlu1 %v3544_v27, %s3385_s12 }
  0x7a   : > { %2320 = vrot.lane.b32.xlu0 %v3486_v17, %s3386_s13 }
  0x7b   : > { %2322 = vrot.lane.b32.xlu1 %v3492_v19, %s3386_s13 }
  0x7e   : > { %2318 = vrot.lane.b32.xlu0 %v3488_v18, %s3386_s13 }
  0x7f   : > { %2324 = vrot.lane.b32.xlu1 %v3494_v20, %s3386_s13 }
  0x82   : > { %2326 = vrot.lane.b32.xlu0 %v3506_v22, %s3386_s13 }
  0x83   : > { %2330 = vrot.lane.b32.xlu1 %v3501_v21, %s3386_s13 }
  0x86   : > { %2332 = vrot.lane.b32.xlu0 %v3518_v25, %s3386_s13 }
  0x87   : > { %2328 = vrot.lane.b32.xlu1 %v3508_v23, %s3386_s13 }
  0x8a   : > { %2334 = vrot.lane.b32.xlu0 %v3513_v24, %s3386_s13 }
  0x8b   : > { %2336 = vrot.lane.b32.xlu1 %v3544_v27, %s3386_s13  ;;  %s291_s13 = scalar_lea.vmem %s4192_s4, %s3184_s19 }
  0x8e   : > { %2721 = vrot.lane.b32.xlu0 %v3486_v17, %s3387_s14 }
  0x8f   : > { %2723 = vrot.lane.b32.xlu1 %v3492_v19, %s3387_s14 }
  0x92   : > { %2719 = vrot.lane.b32.xlu0 %v3488_v18, %s3387_s14 }
  0x93   : > { %2725 = vrot.lane.b32.xlu1 %v3494_v20, %s3387_s14 }
  0x96   : > { %2727 = vrot.lane.b32.xlu0 %v3506_v22, %s3387_s14 }
  0x97   : > { %2731 = vrot.lane.b32.xlu1 %v3501_v21, %s3387_s14 }
  0x9a   : > { %2733 = vrot.lane.b32.xlu0 %v3518_v25, %s3387_s14 }
  0x9b   : > { %2729 = vrot.lane.b32.xlu1 %v3508_v23, %s3387_s14 }
  0x9c   : > { %v535_v29 = vpop.permute.xlu0 %534 }
  0x9d   : > { %v533_v30 = vpop.permute.xlu1 %532 }
  0x9e   : > { %2735 = vrot.lane.b32.xlu0 %v3513_v24, %s3387_s14  ;;  %v3615_v34 = vsel %vm552_vm1, %v533_v30, %v535_v29 }
  0x9f   : > { %2737 = vrot.lane.b32.xlu1 %v3544_v27, %s3387_s14 }
  0xa0   : > { %v537_v31 = vpop.permute.xlu0 %536 }
  0xa1   : > { %v3612_v32 = vsel %vm552_vm1, %v535_v29, %v537_v31  ;;  %v539_v33 = vpop.permute.xlu1 %538 }
  0xa2   : > { %572 = vmatprep.subr.bf16.mxu0 %v3612_v32  ;;  %2940 = vrot.lane.b32.xlu0 %v3486_v17, %s3388_s22  ;;  %v3627_v38 = vsel %vm552_vm1, %v537_v31, %v539_v33 }
  0xa3   : > { %573 = vmatpush1.bf16.msra.mxu0 %v3615_v34  ;;  %2942 = vrot.lane.b32.xlu1 %v3492_v19, %s3388_s22 }
  0xa4   : > { %v541_v35 = vpop.permute.xlu0 %540 }
  0xa5   : > { %v3624_v36 = vsel %vm552_vm1, %v539_v33, %v541_v35  ;;  %v545_v37 = vpop.permute.xlu1 %544  ;;  %v3218_v35 = vld [vmem:[%s4190_s2 + $0x20] sm:$0xf] }
  0xa6   : > { %613 = vmatprep.subr.bf16.mxu1 %v3624_v36  ;;  %2938 = vrot.lane.b32.xlu0 %v3488_v18, %s3388_s22 }
  0xa7   : > { %614 = vmatpush1.bf16.msra.mxu1 %v3627_v38  ;;  %2944 = vrot.lane.b32.xlu1 %v3494_v20, %s3388_s22 }
  0xa8   : > { %v547_v39 = vpop.permute.xlu0 %546 }
  0xa9   : > { %v3636_v40 = vsel %vm552_vm1, %v545_v37, %v547_v39  ;;  %v543_v41 = vpop.permute.xlu1 %542 }
  0xaa   : > { %v3639_v42 = vsel %vm552_vm1, %v543_v41, %v545_v37  ;;  %574 = vmatprep.subr.bf16.mxu0 %v3636_v40  ;;  %2946 = vrot.lane.b32.xlu0 %v3506_v22, %s3388_s22  ;;  %v3224_v41 = vld [vmem:[%s4190_s2 + $0x28] sm:$0xf] }
  0xab   : > { %575 = vmatpush1.bf16.msra.mxu0 %v3639_v42  ;;  %2950 = vrot.lane.b32.xlu1 %v3501_v21, %s3388_s22 }
  0xac   : > { %v549_v44 = vpop.permute.xlu0 %548  ;;  %663 = vmatprep.subr.bf16.mxu0 %v3486_v17 }
  0xad   : > { %v3652_v45 = vsel %vm552_vm1, %v547_v39, %v549_v44  ;;  %v551_v46 = vpop.permute.xlu1 %550  ;;  %v3221_v39 = vld [vmem:[%s4190_s2 + $0x24] sm:$0xf] }
  0xae   : > { %v3655_v47 = vsel %vm552_vm1, %v549_v44, %v551_v46  ;;  %3201 = vmatmul.mubr.msk.bf16.vlgmr.msra.gmra.mrb[8].mxu0 %vm359_vm0, %v3200_v43  ;;  %2952 = vrot.lane.b32.xlu0 %v3518_v25, %s3388_s22 }
  0xaf   : > { %615 = vmatprep.subr.bf16.mxu1 %v3655_v47  ;;  %664 = vmatpush1.bf16.msra.mxu0 %v3488_v18 }
  0xb0   : > { %616 = vmatpush1.bf16.msra.mxu1 %v3652_v45  ;;  %665 = vmatprep.subr.bf16.mxu0 %v3501_v21  ;;  %v936_v48 = vpop.permute.xlu0 %935 }
  0xb1   : > { %704 = vmatprep.subr.bf16.mxu1 %v3494_v20  ;;  %v3665_v49 = vpop.permute.xlu1 %937  ;;  %695 = vmatprep.mubr.bf16.mxu0 %v3381_v16 }
  0xb2   : > { %2948 = vrot.lane.b32.xlu1 %v3508_v23, %s3388_s22  ;;  %2954 = vrot.lane.b32.xlu0 %v3513_v24, %s3388_s22  ;;  %v3706_v60 = vsel %vm953_vm2, %v936_v48, %v3665_v49 }
  0xb3   : > { %3202 = vmatmul.mubr.msk.bf16.vlgmr.msra.gmra.mrb[8].mxu1 %vm359_vm0, %v3200_v43  ;;  %666 = vmatpush1.bf16.msra.mxu0 %v3508_v23  ;;  %v3227_v43 = vld [vmem:[%s4190_s2 + $0x2c] sm:$0xf] }
  0xb4   : > { %705 = vmatpush1.bf16.msra.mxu1 %v3492_v19  ;;  %754 = vmatprep.subr.bf16.mxu0 %v3486_v17  ;;  %v934_v51 = vpop.permute.xlu0 %933 }
  0xb5   : > { %706 = vmatprep.subr.bf16.mxu1 %v3513_v24  ;;  %v940_v52 = vpop.permute.xlu1 %939  ;;  %736 = vmatprep.mubr.bf16.mxu1 %v3381_v16  ;;  %v3718_v0 = vsel %vm953_vm2, %v934_v51, %v936_v48  ;;  %v3230_v48 = vld [vmem:[%s4190_s2 + $0x30] sm:$0xf] }
  0xb6   : > { %3204 = vmatmul.mubr.msk.bf16.vlgmr.msra.gmra.mrb[12].mxu0 %vm359_vm0, %v3203_v50  ;;  %2956 = vrot.lane.b32.xlu1 %v3544_v27, %s3388_s22  ;;  %v3737_v6 = vsel %vm953_vm2, %v3665_v49, %v940_v52 }
  0xb7   : > { %755 = vmatpush1.bf16.msra.mxu0 %v3488_v18  ;;  %786 = vmatprep.mubr.bf16.mxu0 %v3381_v16 }
  0xb8   : > { %707 = vmatpush1.bf16.msra.mxu1 %v3518_v25  ;;  %756 = vmatprep.subr.bf16.mxu0 %v3501_v21  ;;  %v942_v53 = vpop.permute.xlu0 %941 }
  0xb9   : > { %795 = vmatprep.subr.bf16.mxu1 %v3494_v20  ;;  %v946_v54 = vpop.permute.xlu1 %945  ;;  %v3727_v2 = vsel %vm953_vm2, %v940_v52, %v942_v53 }
  0xbb   : > { %3205 = vmatmul.mubr.msk.bf16.vlgmr.msra.gmra.mrb[12].mxu1 %vm359_vm0, %v3203_v50  ;;  %757 = vmatpush1.bf16.msra.mxu0 %v3508_v23 }
  0xbc   : > { %796 = vmatpush1.bf16.msra.mxu1 %v3492_v19  ;;  %845 = vmatprep.subr.bf16.mxu0 %v3612_v32  ;;  %v948_v56 = vpop.permute.xlu0 %947 }
  0xbd   : > { %797 = vmatprep.subr.bf16.mxu1 %v3513_v24  ;;  %v944_v57 = vpop.permute.xlu1 %943  ;;  %827 = vmatprep.mubr.bf16.mxu1 %v3381_v16  ;;  %v3722_v1 = vsel %vm953_vm2, %v946_v54, %v948_v56 }
  0xbe   : > { %3207 = vmatmul.mubr.msk.bf16.vlgmr.msra.gmra.mrb[16].mxu0 %vm359_vm0, %v3206_v55  ;;  %v3733_v5 = vsel %vm953_vm2, %v944_v57, %v946_v54 }
  0xbf   : > { %846 = vmatpush1.bf16.msra.mxu0 %v3615_v34  ;;  %877 = vmatprep.mubr.bf16.mxu0 %v3381_v16 }
  0xc0   : > { %798 = vmatpush1.bf16.msra.mxu1 %v3518_v25  ;;  %847 = vmatprep.subr.bf16.mxu0 %v3636_v40  ;;  %v950_v58 = vpop.permute.xlu0 %949 }
  0xc1   : > { %886 = vmatprep.subr.bf16.mxu1 %v3624_v36  ;;  %v952_v59 = vpop.permute.xlu1 %951  ;;  %v3753_v11 = vsel %vm953_vm2, %v948_v56, %v950_v58 }
  0xc2   : > { %v3745_v8 = vsel %vm953_vm2, %v950_v58, %v952_v59 }
  0xc3   : > { %3208 = vmatmul.mubr.msk.bf16.vlgmr.msra.gmra.mrb[16].mxu1 %vm359_vm0, %v3206_v55  ;;  %848 = vmatpush1.bf16.msra.mxu0 %v3639_v42 }
  0xc4   : > { %887 = vmatpush1.bf16.msra.mxu1 %v3627_v38  ;;  %973 = vmatprep.subr.bf16.mxu0 %v3706_v60  ;;  %v1155_v62 = vpop.permute.xlu0 %1154 }
  0xc5   : > { %888 = vmatprep.subr.bf16.mxu1 %v3655_v47  ;;  %v1157_v63 = vpop.permute.xlu1 %1156  ;;  %918 = vmatprep.mubr.bf16.mxu1 %v3381_v16 }
  0xc6   : > { %3210 = vmatmul.mubr.msk.bf16.vlgmr.msra.gmra.mrb[20].mxu0 %vm359_vm0, %v3209_v61  ;;  %v3763_v14 = vsel %vm1172_vm3, %v1155_v62, %v1157_v63 }
  0xc7   : > { %974 = vmatpush1.bf16.msra.mxu0 %v3718_v0  ;;  %1005 = vmatprep.mubr.bf16.mxu0 %v3381_v16 }
  0xc8   : > { %889 = vmatpush1.bf16.msra.mxu1 %v3652_v45  ;;  %975 = vmatprep.subr.bf16.mxu0 %v3722_v1  ;;  %v1153_v3 = vpop.permute.xlu0 %1152 }
  0xc9   : > { %1014 = vmatprep.subr.bf16.mxu1 %v3727_v2  ;;  %v1159_v4 = vpop.permute.xlu1 %1158  ;;  %v3773_v22 = vsel %vm1172_vm3, %v1153_v3, %v1155_v62 }
  0xca   : > { %v3794_v33 = vsel %vm1172_vm3, %v1157_v63, %v1159_v4 }
  0xcb   : > { %3211 = vmatmul.mubr.msk.bf16.vlgmr.msra.gmra.mrb[20].mxu1 %vm359_vm0, %v3209_v61  ;;  %976 = vmatpush1.bf16.msra.mxu0 %v3733_v5 }
  0xcc   : > { %1015 = vmatpush1.bf16.msra.mxu1 %v3737_v6  ;;  %1064 = vmatprep.subr.bf16.mxu0 %v3706_v60  ;;  %v1161_v9 = vpop.permute.xlu0 %1160 }
  0xcd   : > { %1016 = vmatprep.subr.bf16.mxu1 %v3745_v8  ;;  %v1165_v10 = vpop.permute.xlu1 %1164  ;;  %1046 = vmatprep.mubr.bf16.mxu1 %v3381_v16  ;;  %v3784_v28 = vsel %vm1172_vm3, %v1159_v4, %v1161_v9 }
  0xce   : > { %3213 = vmatmul.mubr.msk.bf16.vlgmr.msra.gmra.mrb[24].mxu0 %vm359_vm0, %v3212_v7 }
  0xcf   : > { %1065 = vmatpush1.bf16.msra.mxu0 %v3718_v0  ;;  %1096 = vmatprep.mubr.bf16.mxu0 %v3381_v16 }
  0xd0   : > { %1017 = vmatpush1.bf16.msra.mxu1 %v3753_v11  ;;  %1066 = vmatprep.subr.bf16.mxu0 %v3722_v1  ;;  %v1167_v12 = vpop.permute.xlu0 %1166 }
  0xd1   : > { %1105 = vmatprep.subr.bf16.mxu1 %v3727_v2  ;;  %v1163_v13 = vpop.permute.xlu1 %1162  ;;  %v3778_v26 = vsel %vm1172_vm3, %v1165_v10, %v1167_v12 }
  0xd2   : > { %v3788_v30 = vsel %vm1172_vm3, %v1163_v13, %v1165_v10 }
  0xd3   : > { %3214 = vmatmul.mubr.msk.bf16.vlgmr.msra.gmra.mrb[24].mxu1 %vm359_vm0, %v3212_v7  ;;  %1067 = vmatpush1.bf16.msra.mxu0 %v3733_v5 }
  0xd4   : > { %1106 = vmatpush1.bf16.msra.mxu1 %v3737_v6  ;;  %1192 = vmatprep.subr.bf16.mxu0 %v3763_v14  ;;  %v1169_v29 = vpop.permute.xlu0 %1168 }
  0xd5   : > { %1107 = vmatprep.subr.bf16.mxu1 %v3745_v8  ;;  %1137 = vmatprep.mubr.bf16.mxu1 %v3381_v16  ;;  %v1171_v27 = vpop.permute.xlu1 %1170  ;;  %v3807_v37 = vsel %vm1172_vm3, %v1167_v12, %v1169_v29 }
  0xd6   : > { %3216 = vmatmul.mubr.msk.bf16.vlgmr.msra.gmra.mrb[28].mxu0 %vm359_vm0, %v3215_v15  ;;  %v3791_v31 = vsel %vm1172_vm3, %v1169_v29, %v1171_v27 }
  0xd7   : > { %1193 = vmatpush1.bf16.msra.mxu0 %v3773_v22  ;;  %1224 = vmatprep.mubr.bf16.mxu0 %v3381_v16 }
  0xd8   : > { %1108 = vmatpush1.bf16.msra.mxu1 %v3753_v11  ;;  %1194 = vmatprep.subr.bf16.mxu0 %v3778_v26  ;;  %v3859_v44 = vpop.permute.xlu0 %2101 }
  0xd9   : > { %1233 = vmatprep.subr.bf16.mxu1 %v3784_v28  ;;  %v3861_v46 = vpop.permute.xlu1 %2103 }
  0xdb   : > { %3217 = vmatmul.mubr.msk.bf16.vlgmr.msra.gmra.mrb[28].mxu1 %vm359_vm0, %v3215_v15  ;;  %1195 = vmatpush1.bf16.msra.mxu0 %v3788_v30  ;;  %v3248_v15 = vld [vmem:[%s4190_s2 + $0x48] sm:$0xf] }
  0xdc   : > { %1234 = vmatpush1.bf16.msra.mxu1 %v3794_v33  ;;  %1283 = vmatprep.subr.bf16.mxu0 %v3486_v17  ;;  %v3875_v49 = vpop.permute.xlu0 %2099 }
  0xdd   : > { %1235 = vmatprep.subr.bf16.mxu1 %v3791_v31  ;;  %1265 = vmatprep.mubr.bf16.mxu1 %v3381_v16  ;;  %v3879_v50 = vpop.permute.xlu1 %2105  ;;  %v3983_v9 = vsel %vm2119_vm4, %v3875_v49, %v3859_v44 }
  0xde   : > { %3219 = vmatmul.mubr.msk.bf16.vlgmr.msra.gmra.mrb[32].mxu0 %vm359_vm0, %v3218_v35 }
  0xdf   : > { %1284 = vmatpush1.bf16.msra.mxu0 %v3488_v18  ;;  %1315 = vmatprep.mubr.bf16.mxu0 %v3381_v16 }
  0xe0   : > { %1236 = vmatpush1.bf16.msra.mxu1 %v3807_v37  ;;  %1285 = vmatprep.subr.bf16.mxu0 %v3501_v21 }
  0xe1   : > { %1324 = vmatprep.subr.bf16.mxu1 %v3494_v20 }
  0xe3   : > { %3220 = vmatmul.mubr.msk.bf16.vlgmr.msra.gmra.mrb[32].mxu1 %vm359_vm0, %v3218_v35  ;;  %1286 = vmatpush1.bf16.msra.mxu0 %v3508_v23 }
  0xe4   : > { %1325 = vmatpush1.bf16.msra.mxu1 %v3492_v19  ;;  %1374 = vmatprep.subr.bf16.mxu0 %v3486_v17 }
  0xe5   : > { %1326 = vmatprep.subr.bf16.mxu1 %v3513_v24  ;;  %1356 = vmatprep.mubr.bf16.mxu1 %v3381_v16 }
  0xe6   : > { %3222 = vmatmul.mubr.msk.bf16.vlgmr.msra.gmra.mrb[36].mxu0 %vm359_vm0, %v3221_v39 }
  0xe7   : > { %1375 = vmatpush1.bf16.msra.mxu0 %v3488_v18  ;;  %1406 = vmatprep.mubr.bf16.mxu0 %v3381_v16 }
  0xe8   : > { %1327 = vmatpush1.bf16.msra.mxu1 %v3518_v25  ;;  %1376 = vmatprep.subr.bf16.mxu0 %v3501_v21 }
  0xe9   : > { %1415 = vmatprep.subr.bf16.mxu1 %v3494_v20 }
  0xeb   : > { %3223 = vmatmul.mubr.msk.bf16.vlgmr.msra.gmra.mrb[36].mxu1 %vm359_vm0, %v3221_v39  ;;  %1377 = vmatpush1.bf16.msra.mxu0 %v3508_v23 }
  0xec   : > { %1416 = vmatpush1.bf16.msra.mxu1 %v3492_v19  ;;  %1465 = vmatprep.subr.bf16.mxu0 %v3612_v32 }
  0xed   : > { %1417 = vmatprep.subr.bf16.mxu1 %v3513_v24  ;;  %1447 = vmatprep.mubr.bf16.mxu1 %v3381_v16 }
  0xee   : > { %3225 = vmatmul.mubr.msk.bf16.vlgmr.msra.gmra.mrb[40].mxu0 %vm359_vm0, %v3224_v41 }
  0xef   : > { %1466 = vmatpush1.bf16.msra.mxu0 %v3615_v34  ;;  %1497 = vmatprep.mubr.bf16.mxu0 %v3381_v16 }
  0xf0   : > { %1418 = vmatpush1.bf16.msra.mxu1 %v3518_v25  ;;  %1467 = vmatprep.subr.bf16.mxu0 %v3636_v40 }
  0xf1   : > { %1506 = vmatprep.subr.bf16.mxu1 %v3624_v36 }
  0xf3   : > { %3226 = vmatmul.mubr.msk.bf16.vlgmr.msra.gmra.mrb[40].mxu1 %vm359_vm0, %v3224_v41  ;;  %1468 = vmatpush1.bf16.msra.mxu0 %v3639_v42 }
  0xf4   : > { %1507 = vmatpush1.bf16.msra.mxu1 %v3627_v38  ;;  %1556 = vmatprep.subr.bf16.mxu0 %v3486_v17 }
  0xf5   : > { %1508 = vmatprep.subr.bf16.mxu1 %v3655_v47  ;;  %1538 = vmatprep.mubr.bf16.mxu1 %v3381_v16 }
  0xf6   : > { %3228 = vmatmul.mubr.msk.bf16.vlgmr.msra.gmra.mrb[44].mxu0 %vm359_vm0, %v3227_v43 }
  0xf7   : > { %1557 = vmatpush1.bf16.msra.mxu0 %v3488_v18  ;;  %1588 = vmatprep.mubr.bf16.mxu0 %v3381_v16 }
  0xf8   : > { %1509 = vmatpush1.bf16.msra.mxu1 %v3652_v45  ;;  %1558 = vmatprep.subr.bf16.mxu0 %v3501_v21 }
  0xf9   : > { %1597 = vmatprep.subr.bf16.mxu1 %v3494_v20 }
  0xfb   : > { %3229 = vmatmul.mubr.msk.bf16.vlgmr.msra.gmra.mrb[44].mxu1 %vm359_vm0, %v3227_v43  ;;  %1559 = vmatpush1.bf16.msra.mxu0 %v3508_v23 }
  0xfc   : > { %1598 = vmatpush1.bf16.msra.mxu1 %v3492_v19  ;;  %1647 = vmatprep.subr.bf16.mxu0 %v3486_v17  ;;  %v3233_v17 = vld [vmem:[%s4190_s2 + $0x34] sm:$0xf] }
  0xfd   : > { %1599 = vmatprep.subr.bf16.mxu1 %v3513_v24  ;;  %1629 = vmatprep.mubr.bf16.mxu1 %v3381_v16 }
  0xfe   : > { %3231 = vmatmul.mubr.msk.bf16.vlgmr.msra.gmra.mrb[48].mxu0 %vm359_vm0, %v3230_v48 }
  0xff   : > { %1648 = vmatpush1.bf16.msra.mxu0 %v3488_v18  ;;  %1679 = vmatprep.mubr.bf16.mxu0 %v3381_v16  ;;  %v3891_v18 = vpop.permute.xlu0 %2107 }
 0x100   : > { %1600 = vmatpush1.bf16.msra.mxu1 %v3518_v25  ;;  %1649 = vmatprep.subr.bf16.mxu0 %v3501_v21 }
 0x101   : > { %1688 = vmatprep.subr.bf16.mxu1 %v3494_v20  ;;  %v3894_v20 = vpop.permute.xlu1 %2111 }
 0x103   : > { %3232 = vmatmul.mubr.msk.bf16.vlgmr.msra.gmra.mrb[48].mxu1 %vm359_vm0, %v3230_v48  ;;  %1650 = vmatpush1.bf16.msra.mxu0 %v3508_v23  ;;  %v3906_v53 = vpop.permute.xlu0 %2113 }
 0x104   : > { %1689 = vmatpush1.bf16.msra.mxu1 %v3492_v19  ;;  %1738 = vmatprep.subr.bf16.mxu0 %v3612_v32  ;;  %v3989_v10 = vsel %vm2119_vm4, %v3894_v20, %v3906_v53 }
 0x105   : > { %1690 = vmatprep.subr.bf16.mxu1 %v3513_v24  ;;  %1720 = vmatprep.mubr.bf16.mxu1 %v3381_v16  ;;  %v397_v21 = vpop.f32.mrb[0].mxu0 }
 0x106   : > { %3234 = vmatmul.mubr.msk.bf16.vlgmr.msra.gmra.mrb[52].mxu0 %vm359_vm0, %v3233_v17  ;;  %v399_v23 = vpop.f32.mrb[1].mxu0 }
 0x107   : > { %1739 = vmatpush1.bf16.msra.mxu0 %v3615_v34  ;;  %1770 = vmatprep.mubr.bf16.mxu0 %v3381_v16  ;;  %v401_v51 = vpop.f32.mrb[2].mxu0  ;;  %v438_v19 = vpop.f32.mrb[0].mxu1  ;;  %v3236_v34 = vld [vmem:[%s4190_s2 + $0x38] sm:$0xf] }
 0x108   : > { %1691 = vmatpush1.bf16.msra.mxu1 %v3518_v25  ;;  %1740 = vmatprep.subr.bf16.mxu0 %v3636_v40  ;;  %v402_v24 = vpop.f32.mrb[3].mxu0  ;;  %v440_v32 = vpop.f32.mrb[1].mxu1 }
 0x109   : > { %1779 = vmatprep.subr.bf16.mxu1 %v3624_v36  ;;  %v442_v52 = vpop.f32.mrb[2].mxu1  ;;  %v3912_v25 = vpop.permute.xlu1 %2109  ;;  %v3260_v24 = vld [vmem:[%s4190_s2 + $0x58] sm:$0xf] }
 0x10a   : > { %v443_v54 = vpop.f32.mrb[3].mxu1  ;;  %v3926_v58 = vpop.permute.xlu0 %2115  ;;  %v4004_v13 = vsel %vm2119_vm4, %v3912_v25, %v3894_v20  ;;  %v3257_v20 = vld [vmem:[%s4190_s2 + $0x54] sm:$0xf]  ;;  %v3263_v25 = vld [vmem:[%s4190_s2 + $0x5c] sm:$0xf] }
 0x10b   : > { %3235 = vmatmul.mubr.msk.bf16.vlgmr.msra.gmra.mrb[52].mxu1 %vm359_vm0, %v3233_v17  ;;  %1741 = vmatpush1.bf16.msra.mxu0 %v3639_v42  ;;  %v4028_v27 = vsel %vm2119_vm4, %v3906_v53, %v3926_v58 }
 0x10c   : > { %1780 = vmatpush1.bf16.msra.mxu1 %v3627_v38  ;;  %1829 = vmatprep.subr.bf16.mxu0 %v3706_v60 }
 0x10d   : > { %1781 = vmatprep.subr.bf16.mxu1 %v3655_v47  ;;  %1811 = vmatprep.mubr.bf16.mxu1 %v3381_v16  ;;  %v482_v36 = vpop.f32.mrb[4].mxu0  ;;  %v2118_v63 = vpop.permute.xlu1 %2117 }
 0x10e   : > { %3237 = vmatmul.mubr.msk.bf16.vlgmr.msra.gmra.mrb[56].mxu0 %vm359_vm0, %v3236_v34  ;;  %v3915_v40 = vadd.f32 %v482_v36, %v397_v21  ;;  %v484_v42 = vpop.f32.mrb[5].mxu0  ;;  %v3942_v4 = vpop.permute.xlu0 %2320 }
 0x10f   : > { %1830 = vmatpush1.bf16.msra.mxu0 %v3718_v0  ;;  %1861 = vmatprep.mubr.bf16.mxu0 %v3381_v16  ;;  %v3919_v55 = vadd.f32 %v484_v42, %v399_v23  ;;  %v523_v38 = vpop.f32.mrb[4].mxu1  ;;  %v486_v56 = vpop.f32.mrb[6].mxu0  ;;  %v3064_v23 = vld [vmem:[%s4191_s3] sm:$0xff] }
 0x110   : > { %1782 = vmatpush1.bf16.msra.mxu1 %v3652_v45  ;;  %1831 = vmatprep.subr.bf16.mxu0 %v3722_v1  ;;  %v3923_v47 = vadd.f32 %v523_v38, %v438_v19  ;;  %v525_v57 = vpop.f32.mrb[5].mxu1  ;;  %v487_v61 = vpop.f32.mrb[7].mxu0  ;;  %v3239_v45 = vld [vmem:[%s4190_s2 + $0x3c] sm:$0xf] }
 0x111   : > { %1870 = vmatprep.subr.bf16.mxu1 %v3727_v2  ;;  %v3928_v59 = vadd.f32 %v525_v57, %v440_v32  ;;  %v527_v62 = vpop.f32.mrb[6].mxu1  ;;  %v3947_v7 = vpop.permute.xlu1 %2322  ;;  %3067 = vperm.xlu0 %3326, %v3064_v23  }
 0x112   : > { %v528_v3 = vpop.f32.mrb[7].mxu1  ;;  %v3266_v62 = vld [vmem:[%s4190_s2 + $0x60] sm:$0xf] }
 0x113   : > { %3238 = vmatmul.mubr.msk.bf16.vlgmr.msra.gmra.mrb[56].mxu1 %vm359_vm0, %v3236_v34  ;;  %1832 = vmatpush1.bf16.msra.mxu0 %v3733_v5 }
 0x114   : > { %1871 = vmatpush1.bf16.msra.mxu1 %v3737_v6  ;;  %1920 = vmatprep.subr.bf16.mxu0 %v3706_v60  ;;  %v3242_v60 = vld [vmem:[%s4190_s2 + $0x40] sm:$0xf] }
 0x115   : > { %1872 = vmatprep.subr.bf16.mxu1 %v3745_v8  ;;  %1902 = vmatprep.mubr.bf16.mxu1 %v3381_v16 }
 0x116   : > { %3240 = vmatmul.mubr.msk.bf16.vlgmr.msra.gmra.mrb[60].mxu0 %vm359_vm0, %v3239_v45 }
 0x117   : > { %1921 = vmatpush1.bf16.msra.mxu0 %v3718_v0  ;;  %1952 = vmatprep.mubr.bf16.mxu0 %v3381_v16  ;;  %v2319_v0 = vpop.permute.xlu0 %2318 }
 0x118   : > { %1873 = vmatpush1.bf16.msra.mxu1 %v3753_v11  ;;  %1922 = vmatprep.subr.bf16.mxu0 %v3722_v1  ;;  %v3961_v1 = vpop.permute.xlu1 %2324 }
 0x119   : > { %1961 = vmatprep.subr.bf16.mxu1 %v3727_v2  ;;  %v3969_v2 = vsel %vm2119_vm4, %v3859_v44, %v3861_v46  ;;  %v2341_v49 = vsel %vm2338_vm5, %v3947_v7, %v3961_v1 }
 0x11b   : > { %3241 = vmatmul.mubr.msk.bf16.vlgmr.msra.gmra.mrb[60].mxu1 %vm359_vm0, %v3239_v45  ;;  %1923 = vmatpush1.bf16.msra.mxu0 %v3733_v5  ;;  %v3245_v5 = vld [vmem:[%s4190_s2 + $0x44] sm:$0xf] }
 0x11c   : > { %1962 = vmatpush1.bf16.msra.mxu1 %v3737_v6  ;;  %2011 = vmatprep.subr.bf16.mxu0 %v3763_v14  ;;  %v2327_v6 = vpop.permute.xlu0 %2326  ;;  %v4009_v14 = vsel %vm2119_vm4, %v3861_v46, %v3879_v50 }
 0x11d   : > { %1963 = vmatprep.subr.bf16.mxu1 %v3745_v8  ;;  %1993 = vmatprep.mubr.bf16.mxu1 %v3381_v16  ;;  %v2331_v8 = vpop.permute.xlu1 %2330  ;;  %v2342_v41 = vsel %vm2338_vm5, %v3961_v1, %v2327_v6  ;;  %v3269_v1 = vld [vmem:[%s4190_s2 + $0x64] sm:$0xf] }
 0x11e   : > { %3243 = vmatmul.mubr.msk.bf16.vlgmr.msra.gmra.mrb[64].mxu0 %vm359_vm0, %v3242_v60 }
 0x11f   : > { %2012 = vmatpush1.bf16.msra.mxu0 %v3773_v22  ;;  %2043 = vmatprep.mubr.bf16.mxu0 %v3381_v16 }
 0x120   : > { %1964 = vmatpush1.bf16.msra.mxu1 %v3753_v11  ;;  %2013 = vmatprep.subr.bf16.mxu0 %v3778_v26  ;;  %v3996_v11 = vsel %vm2119_vm4, %v3879_v50, %v3891_v18  ;;  %v2333_v12 = vpop.permute.xlu0 %2332  ;;  %v4018_v26 = vsel %vm2119_vm4, %v3926_v58, %v2118_v63  ;;  %v3254_v50 = vld [vmem:[%s4190_s2 + $0x50] sm:$0xf] }
 0x121   : > { %2052 = vmatprep.subr.bf16.mxu1 %v3784_v28  ;;  %v2329_v22 = vpop.permute.xlu1 %2328  ;;  %v2344_v39 = vsel %vm2338_vm5, %v2331_v8, %v2333_v12 }
 0x122   : > { %v2343_v46 = vsel %vm2338_vm5, %v2329_v22, %v2331_v8 }
 0x123   : > { %3244 = vmatmul.mubr.msk.bf16.vlgmr.msra.gmra.mrb[64].mxu1 %vm359_vm0, %v3242_v60  ;;  %2014 = vmatpush1.bf16.msra.mxu0 %v3788_v30  ;;  %v2340_v30 = vsel %vm2338_vm5, %v3942_v4, %v3947_v7 }
 0x124   : > { %2053 = vmatpush1.bf16.msra.mxu1 %v3794_v33  ;;  %2139 = vmatprep.subr.bf16.mxu0 %v3969_v2  ;;  %v2335_v28 = vpop.permute.xlu0 %2334 }
 0x125   : > { %2054 = vmatprep.subr.bf16.mxu1 %v3791_v31  ;;  %2084 = vmatprep.mubr.bf16.mxu1 %v3381_v16  ;;  %v2337_v29 = vpop.permute.xlu1 %2336  ;;  %v3251_v31 = vld [vmem:[%s4190_s2 + $0x4c] sm:$0xf]  ;;  %v2345_v17 = vsel %vm2338_vm5, %v2333_v12, %v2335_v28 }
 0x126   : > { %3246 = vmatmul.mubr.msk.bf16.vlgmr.msra.gmra.mrb[68].mxu0 %vm359_vm0, %v3245_v5  ;;  %v2346_v48 = vsel %vm2338_vm5, %v2335_v28, %v2337_v29 }
 0x127   : > { %2140 = vmatpush1.bf16.msra.mxu0 %v3983_v9  ;;  %2171 = vmatprep.mubr.bf16.mxu0 %v3381_v16 }
 0x128   : > { %2055 = vmatpush1.bf16.msra.mxu1 %v3807_v37  ;;  %2141 = vmatprep.subr.bf16.mxu0 %v3989_v10  ;;  %v4043_v33 = vpop.permute.xlu0 %2721  ;;  %v2339_v37 = vsel %vm2338_vm5, %v2319_v0, %v3942_v4 }
 0x129   : > { %2180 = vmatprep.subr.bf16.mxu1 %v3996_v11  ;;  %v4045_v35 = vpop.permute.xlu1 %2723 }
 0x12a   : > { %v2741_v54 = vsel %vm2739_vm6, %v4043_v33, %v4045_v35 }
 0x12b   : > { %3247 = vmatmul.mubr.msk.bf16.vlgmr.msra.gmra.mrb[68].mxu1 %vm359_vm0, %v3245_v5  ;;  %2142 = vmatpush1.bf16.msra.mxu0 %v4004_v13 }
 0x12c   : > { %2181 = vmatpush1.bf16.msra.mxu1 %v4009_v14  ;;  %2230 = vmatprep.subr.bf16.mxu0 %v3969_v2  ;;  %v4058_v43 = vpop.permute.xlu0 %2719 }
 0x12d   : > { %2182 = vmatprep.subr.bf16.mxu1 %v4018_v26  ;;  %2212 = vmatprep.mubr.bf16.mxu1 %v3381_v16  ;;  %v4060_v44 = vpop.permute.xlu1 %2725  ;;  %v2740_v36 = vsel %vm2739_vm6, %v4058_v43, %v4043_v33 }
 0x12e   : > { %3249 = vmatmul.mubr.msk.bf16.vlgmr.msra.gmra.mrb[72].mxu0 %vm359_vm0, %v3248_v15  ;;  %v2742_v61 = vsel %vm2739_vm6, %v4045_v35, %v4060_v44 }
 0x12f   : > { %2231 = vmatpush1.bf16.msra.mxu0 %v3983_v9  ;;  %2262 = vmatprep.mubr.bf16.mxu0 %v3381_v16 }
 0x130   : > { %2183 = vmatpush1.bf16.msra.mxu1 %v4028_v27  ;;  %2232 = vmatprep.subr.bf16.mxu0 %v3989_v10  ;;  %v2728_v18 = vpop.permute.xlu0 %2727 }
 0x131   : > { %2271 = vmatprep.subr.bf16.mxu1 %v3996_v11  ;;  %v2732_v21 = vpop.permute.xlu1 %2731  ;;  %v2743_v57 = vsel %vm2739_vm6, %v4060_v44, %v2728_v18 }
 0x133   : > { %3250 = vmatmul.mubr.msk.bf16.vlgmr.msra.gmra.mrb[72].mxu1 %vm359_vm0, %v3248_v15  ;;  %2233 = vmatpush1.bf16.msra.mxu0 %v4004_v13 }
 0x134   : > { %2272 = vmatpush1.bf16.msra.mxu1 %v4009_v14  ;;  %2358 = vmatprep.subr.bf16.mxu0 %v2340_v30  ;;  %v2734_v51 = vpop.permute.xlu0 %2733 }
 0x135   : > { %2273 = vmatprep.subr.bf16.mxu1 %v4018_v26  ;;  %2303 = vmatprep.mubr.bf16.mxu1 %v3381_v16  ;;  %v2730_v19 = vpop.permute.xlu1 %2729  ;;  %v2745_v42 = vsel %vm2739_vm6, %v2732_v21, %v2734_v51 }
 0x136   : > { %3252 = vmatmul.mubr.msk.bf16.vlgmr.msra.gmra.mrb[76].mxu0 %vm359_vm0, %v3251_v31  ;;  %v2744_v58 = vsel %vm2739_vm6, %v2730_v19, %v2732_v21 }
 0x137   : > { %2359 = vmatpush1.bf16.msra.mxu0 %v2339_v37  ;;  %2390 = vmatprep.mubr.bf16.mxu0 %v3381_v16 }
 0x138   : > { %2274 = vmatpush1.bf16.msra.mxu1 %v4028_v27  ;;  %2360 = vmatprep.subr.bf16.mxu0 %v2344_v39  ;;  %v2736_v32 = vpop.permute.xlu0 %2735 }
 0x139   : > { %2399 = vmatprep.subr.bf16.mxu1 %v2342_v41  ;;  %v2738_v52 = vpop.permute.xlu1 %2737  ;;  %v2746_v4 = vsel %vm2739_vm6, %v2734_v51, %v2736_v32 }
 0x13a   : > { %v2747_v45 = vsel %vm2739_vm6, %v2736_v32, %v2738_v52 }
 0x13b   : > { %3253 = vmatmul.mubr.msk.bf16.vlgmr.msra.gmra.mrb[76].mxu1 %vm359_vm0, %v3251_v31  ;;  %2361 = vmatpush1.bf16.msra.mxu0 %v2343_v46 }
 0x13c   : > { %2400 = vmatpush1.bf16.msra.mxu1 %v2341_v49  ;;  %2449 = vmatprep.subr.bf16.mxu0 %v3969_v2  ;;  %v2941_v34 = vpop.permute.xlu0 %2940 }
 0x13d   : > { %2401 = vmatprep.subr.bf16.mxu1 %v2346_v48  ;;  %2431 = vmatprep.mubr.bf16.mxu1 %v3381_v16  ;;  %v4108_v53 = vpop.permute.xlu1 %2942 }
 0x13e   : > { %3255 = vmatmul.mubr.msk.bf16.vlgmr.msra.gmra.mrb[80].mxu0 %vm359_vm0, %v3254_v50  ;;  %v2960_v0 = vsel %vm2958_vm7, %v2941_v34, %v4108_v53 }
 0x13f   : > { %2450 = vmatpush1.bf16.msra.mxu0 %v3983_v9  ;;  %2481 = vmatprep.mubr.bf16.mxu0 %v3381_v16 }
 0x140   : > { %2402 = vmatpush1.bf16.msra.mxu1 %v2345_v17  ;;  %2451 = vmatprep.subr.bf16.mxu0 %v3989_v10  ;;  %v2939_v38 = vpop.permute.xlu0 %2938 }
 0x141   : > { %2490 = vmatprep.subr.bf16.mxu1 %v3996_v11  ;;  %v2945_v56 = vpop.permute.xlu1 %2944 }
 0x142   : > { %v2961_v12 = vsel %vm2958_vm7, %v4108_v53, %v2945_v56 }
 0x143   : > { %3256 = vmatmul.mubr.msk.bf16.vlgmr.msra.gmra.mrb[80].mxu1 %vm359_vm0, %v3254_v50  ;;  %2452 = vmatpush1.bf16.msra.mxu0 %v4004_v13 }
 0x144   : > { %2491 = vmatpush1.bf16.msra.mxu1 %v4009_v14  ;;  %2540 = vmatprep.subr.bf16.mxu0 %v3969_v2  ;;  %v2947_v63 = vpop.permute.xlu0 %2946  ;;  %v2959_v2 = vsel %vm2958_vm7, %v2939_v38, %v2941_v34 }
 0x145   : > { %2492 = vmatprep.subr.bf16.mxu1 %v4018_v26  ;;  %2522 = vmatprep.mubr.bf16.mxu1 %v3381_v16  ;;  %v2951_v3 = vpop.permute.xlu1 %2950  ;;  %v2962_v8 = vsel %vm2958_vm7, %v2945_v56, %v2947_v63 }
 0x146   : > { %3258 = vmatmul.mubr.msk.bf16.vlgmr.msra.gmra.mrb[84].mxu0 %vm359_vm0, %v3257_v20 }
 0x147   : > { %2541 = vmatpush1.bf16.msra.mxu0 %v3983_v9  ;;  %2572 = vmatprep.mubr.bf16.mxu0 %v3381_v16 }
 0x148   : > { %2493 = vmatpush1.bf16.msra.mxu1 %v4028_v27  ;;  %2542 = vmatprep.subr.bf16.mxu0 %v3989_v10  ;;  %v2953_v7 = vpop.permute.xlu0 %2952 }
 0x149   : > { %2581 = vmatprep.subr.bf16.mxu1 %v3996_v11  ;;  %v2949_v60 = vpop.permute.xlu1 %2948  ;;  %v2964_v5 = vsel %vm2958_vm7, %v2951_v3, %v2953_v7 }
 0x14a   : > { %v2963_v10 = vsel %vm2958_vm7, %v2949_v60, %v2951_v3 }
 0x14b   : > { %3259 = vmatmul.mubr.msk.bf16.vlgmr.msra.gmra.mrb[84].mxu1 %vm359_vm0, %v3257_v20  ;;  %2543 = vmatpush1.bf16.msra.mxu0 %v4004_v13  ;;  %v3272_v13 = vld [vmem:[%s4190_s2 + $0x68] sm:$0xf] }
 0x14c   : > { %2582 = vmatpush1.bf16.msra.mxu1 %v4009_v14  ;;  %2631 = vmatprep.subr.bf16.mxu0 %v2340_v30  ;;  %v2955_v9 = vpop.permute.xlu0 %2954 }
 0x14d   : > { %2583 = vmatprep.subr.bf16.mxu1 %v4018_v26  ;;  %2613 = vmatprep.mubr.bf16.mxu1 %v3381_v16  ;;  %v2957_v6 = vpop.permute.xlu1 %2956  ;;  %v2965_v14 = vsel %vm2958_vm7, %v2953_v7, %v2955_v9 }
 0x14e   : > { %3261 = vmatmul.mubr.msk.bf16.vlgmr.msra.gmra.mrb[88].mxu0 %vm359_vm0, %v3260_v24  ;;  %v2966_v11 = vsel %vm2958_vm7, %v2955_v9, %v2957_v6 }
 0x14f   : > { %2632 = vmatpush1.bf16.msra.mxu0 %v2339_v37  ;;  %2663 = vmatprep.mubr.bf16.mxu0 %v3381_v16 }
 0x150   : > { %2584 = vmatpush1.bf16.msra.mxu1 %v4028_v27  ;;  %2633 = vmatprep.subr.bf16.mxu0 %v2344_v39 }
 0x151   : > { %2672 = vmatprep.subr.bf16.mxu1 %v2342_v41 }
 0x153   : > { %3262 = vmatmul.mubr.msk.bf16.vlgmr.msra.gmra.mrb[88].mxu1 %vm359_vm0, %v3260_v24  ;;  %2634 = vmatpush1.bf16.msra.mxu0 %v2343_v46 }
 0x154   : > { %2673 = vmatpush1.bf16.msra.mxu1 %v2341_v49  ;;  %2759 = vmatprep.subr.bf16.mxu0 %v2741_v54 }
 0x155   : > { %2674 = vmatprep.subr.bf16.mxu1 %v2346_v48  ;;  %2704 = vmatprep.mubr.bf16.mxu1 %v3381_v16 }
 0x156   : > { %3264 = vmatmul.mubr.msk.bf16.vlgmr.msra.gmra.mrb[92].mxu0 %vm359_vm0, %v3263_v25 }
 0x157   : > { %2760 = vmatpush1.bf16.msra.mxu0 %v2740_v36  ;;  %2791 = vmatprep.mubr.bf16.mxu0 %v3381_v16 }
 0x158   : > { %2675 = vmatpush1.bf16.msra.mxu1 %v2345_v17  ;;  %2761 = vmatprep.subr.bf16.mxu0 %v2745_v42 }
 0x159   : > { %2800 = vmatprep.subr.bf16.mxu1 %v2743_v57 }
 0x15b   : > { %3265 = vmatmul.mubr.msk.bf16.vlgmr.msra.gmra.mrb[92].mxu1 %vm359_vm0, %v3263_v25  ;;  %2762 = vmatpush1.bf16.msra.mxu0 %v2744_v58 }
 0x15c   : > { %2801 = vmatpush1.bf16.msra.mxu1 %v2742_v61  ;;  %2850 = vmatprep.subr.bf16.mxu0 %v2741_v54 }
 0x15d   : > { %2802 = vmatprep.subr.bf16.mxu1 %v2747_v45  ;;  %2832 = vmatprep.mubr.bf16.mxu1 %v3381_v16 }
 0x15e   : > { %3267 = vmatmul.mubr.msk.bf16.vlgmr.msra.gmra.mrb[96].mxu0 %vm359_vm0, %v3266_v62 }
 0x15f   : > { %2851 = vmatpush1.bf16.msra.mxu0 %v2740_v36  ;;  %2882 = vmatprep.mubr.bf16.mxu0 %v3381_v16 }
 0x160   : > { %2803 = vmatpush1.bf16.msra.mxu1 %v2746_v4  ;;  %2852 = vmatprep.subr.bf16.mxu0 %v2745_v42 }
 0x161   : > { %2891 = vmatprep.subr.bf16.mxu1 %v2743_v57 }
 0x163   : > { %3268 = vmatmul.mubr.msk.bf16.vlgmr.msra.gmra.mrb[96].mxu1 %vm359_vm0, %v3266_v62  ;;  %2853 = vmatpush1.bf16.msra.mxu0 %v2744_v58 }
 0x164   : > { %2892 = vmatpush1.bf16.msra.mxu1 %v2742_v61  ;;  %2978 = vmatprep.subr.bf16.mxu0 %v2960_v0 }
 0x165   : > { %2893 = vmatprep.subr.bf16.mxu1 %v2747_v45  ;;  %2923 = vmatprep.mubr.bf16.mxu1 %v3381_v16 }
 0x166   : > { %3270 = vmatmul.mubr.msk.bf16.vlgmr.msra.gmra.mrb[100].mxu0 %vm359_vm0, %v3269_v1 }
 0x167   : > { %2979 = vmatpush1.bf16.msra.mxu0 %v2959_v2  ;;  %3010 = vmatprep.mubr.bf16.mxu0 %v3381_v16 }
 0x168   : > { %2894 = vmatpush1.bf16.msra.mxu1 %v2746_v4  ;;  %2980 = vmatprep.subr.bf16.mxu0 %v2964_v5 }
 0x169   : > { %3019 = vmatprep.subr.bf16.mxu1 %v2962_v8 }
 0x16b   : > { %3271 = vmatmul.mubr.msk.bf16.vlgmr.msra.gmra.mrb[100].mxu1 %vm359_vm0, %v3269_v1  ;;  %2981 = vmatpush1.bf16.msra.mxu0 %v2963_v10 }
 0x16c   : > { %3020 = vmatpush1.bf16.msra.mxu1 %v2961_v12  ;;  %3051 = vmatprep.mubr.bf16.mxu1 %v3381_v16 }
 0x16d   : > { %3021 = vmatprep.subr.bf16.mxu1 %v2966_v11 }
 0x16e   : > { %3273 = vmatmul.mubr.msk.bf16.vlgmr.msra.gmra.mrb[104].mxu0 %vm359_vm0, %v3272_v13 }
 0x170   : > { %3022 = vmatpush1.bf16.msra.mxu1 %v2965_v14 }
 0x173   : > { %3274 = vmatmul.mubr.msk.bf16.vlgmr.msra.gmra.mrb[104].mxu1 %vm359_vm0, %v3272_v13 }
 0x181   : > { %v606_v15 = vpop.f32.mrb[8].mxu0 }
 0x182   : > { %v654_v22 = vadd.f32 %v606_v15, %v3915_v40  ;;  %v608_v26 = vpop.f32.mrb[9].mxu0 }
 0x183   : > { %v655_v27 = vadd.f32 %v608_v26, %v3919_v55  ;;  %v610_v28 = vpop.f32.mrb[10].mxu0 }
 0x184   : > { %v611_v29 = vpop.f32.mrb[11].mxu0 }
 0x186   : > { %v647_v30 = vpop.f32.mrb[8].mxu1 }
 0x187   : > { %v656_v31 = vadd.f32 %v647_v30, %v3923_v47  ;;  %v649_v16 = vpop.f32.mrb[9].mxu1 }
 0x188   : > { %v657_v33 = vadd.f32 %v649_v16, %v3928_v59  ;;  %v651_v35 = vpop.f32.mrb[10].mxu1 }
 0x189   : > { %v652_v37 = vpop.f32.mrb[11].mxu1  ;;  %v697_v39 = vpop.f32.mrb[12].mxu0 }
 0x18a   : > { %v745_v41 = vadd.f32 %v697_v39, %v654_v22  ;;  %v699_v43 = vpop.f32.mrb[13].mxu0 }
 0x18b   : > { %v746_v44 = vadd.f32 %v699_v43, %v655_v27  ;;  %v701_v46 = vpop.f32.mrb[14].mxu0 }
 0x18c   : > { %v702_v48 = vpop.f32.mrb[15].mxu0 }
 0x18e   : > { %v738_v40 = vpop.f32.mrb[12].mxu1 }
 0x18f   : > { %v747_v49 = vadd.f32 %v738_v40, %v656_v31  ;;  %v740_v50 = vpop.f32.mrb[13].mxu1 }
 0x190   : > { %v748_v55 = vadd.f32 %v740_v50, %v657_v33  ;;  %v742_v17 = vpop.f32.mrb[14].mxu1 }
 0x191   : > { %v743_v18 = vpop.f32.mrb[15].mxu1  ;;  %v788_v21 = vpop.f32.mrb[16].mxu0 }
 0x192   : > { %v836_v20 = vadd.f32 %v788_v21, %v745_v41  ;;  %v790_v47 = vpop.f32.mrb[17].mxu0 }
 0x193   : > { %v837_v23 = vadd.f32 %v790_v47, %v746_v44  ;;  %v792_v51 = vpop.f32.mrb[18].mxu0 }
 0x194   : > { %v793_v59 = vpop.f32.mrb[19].mxu0 }
 0x196   : > { %v829_v19 = vpop.f32.mrb[16].mxu1 }
 0x197   : > { %v838_v24 = vadd.f32 %v829_v19, %v747_v49  ;;  %v831_v32 = vpop.f32.mrb[17].mxu1 }
 0x198   : > { %v839_v52 = vadd.f32 %v831_v32, %v748_v55  ;;  %v833_v34 = vpop.f32.mrb[18].mxu1 }
 0x199   : > { %v834_v53 = vpop.f32.mrb[19].mxu1  ;;  %v879_v54 = vpop.f32.mrb[20].mxu0 }
 0x19a   : > { %v927_v25 = vadd.f32 %v879_v54, %v836_v20  ;;  %v881_v36 = vpop.f32.mrb[21].mxu0 }
 0x19b   : > { %v928_v42 = vadd.f32 %v881_v36, %v837_v23  ;;  %v883_v38 = vpop.f32.mrb[22].mxu0 }
 0x19c   : > { %v884_v56 = vpop.f32.mrb[23].mxu0 }
 0x19e   : > { %v920_v57 = vpop.f32.mrb[20].mxu1 }
 0x19f   : > { %v929_v58 = vadd.f32 %v920_v57, %v838_v24  ;;  %v922_v61 = vpop.f32.mrb[21].mxu1 }
 0x1a0   : > { %v930_v62 = vadd.f32 %v922_v61, %v839_v52  ;;  %v924_v45 = vpop.f32.mrb[22].mxu1 }
 0x1a1   : > { %v925_v63 = vpop.f32.mrb[23].mxu1  ;;  %v1007_v3 = vpop.f32.mrb[24].mxu0 }
 0x1a2   : > { %v1055_v4 = vadd.f32 %v1007_v3, %v927_v25  ;;  %v1009_v7 = vpop.f32.mrb[25].mxu0 }
 0x1a3   : > { %v1056_v60 = vadd.f32 %v1009_v7, %v928_v42  ;;  %v1011_v0 = vpop.f32.mrb[26].mxu0 }
 0x1a4   : > { %v1012_v1 = vpop.f32.mrb[27].mxu0 }
 0x1a6   : > { %v1048_v2 = vpop.f32.mrb[24].mxu1 }
 0x1a7   : > { %v1057_v5 = vadd.f32 %v1048_v2, %v929_v58  ;;  %v1050_v6 = vpop.f32.mrb[25].mxu1 }
 0x1a8   : > { %v1058_v8 = vadd.f32 %v1050_v6, %v930_v62  ;;  %v1052_v9 = vpop.f32.mrb[26].mxu1 }
 0x1a9   : > { %v1053_v10 = vpop.f32.mrb[27].mxu1  ;;  %v1098_v11 = vpop.f32.mrb[28].mxu0 }
 0x1aa   : > { %v1146_v12 = vadd.f32 %v1098_v11, %v1055_v4  ;;  %v1100_v13 = vpop.f32.mrb[29].mxu0 }
 0x1ab   : > { %v1147_v14 = vadd.f32 %v1100_v13, %v1056_v60  ;;  %v1102_v15 = vpop.f32.mrb[30].mxu0 }
 0x1ac   : > { %v1103_v22 = vpop.f32.mrb[31].mxu0 }
 0x1ae   : > { %v1139_v26 = vpop.f32.mrb[28].mxu1 }
 0x1af   : > { %v1148_v27 = vadd.f32 %v1139_v26, %v1057_v5  ;;  %v1141_v28 = vpop.f32.mrb[29].mxu1 }
 0x1b0   : > { %v1149_v29 = vadd.f32 %v1141_v28, %v1058_v8  ;;  %v1143_v30 = vpop.f32.mrb[30].mxu1 }
 0x1b1   : > { %v1144_v31 = vpop.f32.mrb[31].mxu1  ;;  %v1226_v16 = vpop.f32.mrb[32].mxu0 }
 0x1b2   : > { %v1274_v33 = vadd.f32 %v1226_v16, %v1146_v12  ;;  %v1228_v35 = vpop.f32.mrb[33].mxu0 }
 0x1b3   : > { %v1275_v37 = vadd.f32 %v1228_v35, %v1147_v14  ;;  %v1230_v39 = vpop.f32.mrb[34].mxu0 }
 0x1b4   : > { %v1231_v41 = vpop.f32.mrb[35].mxu0 }
 0x1b6   : > { %v1267_v43 = vpop.f32.mrb[32].mxu1 }
 0x1b7   : > { %v1276_v44 = vadd.f32 %v1267_v43, %v1148_v27  ;;  %v1269_v46 = vpop.f32.mrb[33].mxu1 }
 0x1b8   : > { %v1277_v48 = vadd.f32 %v1269_v46, %v1149_v29  ;;  %v1271_v40 = vpop.f32.mrb[34].mxu1 }
 0x1b9   : > { %v1272_v49 = vpop.f32.mrb[35].mxu1  ;;  %v1317_v50 = vpop.f32.mrb[36].mxu0 }
 0x1ba   : > { %v1365_v55 = vadd.f32 %v1317_v50, %v1274_v33  ;;  %v1319_v17 = vpop.f32.mrb[37].mxu0 }
 0x1bb   : > { %v1366_v18 = vadd.f32 %v1319_v17, %v1275_v37  ;;  %v1321_v21 = vpop.f32.mrb[38].mxu0 }
 0x1bc   : > { %v1322_v20 = vpop.f32.mrb[39].mxu0 }
 0x1be   : > { %v1358_v47 = vpop.f32.mrb[36].mxu1 }
 0x1bf   : > { %v1367_v23 = vadd.f32 %v1358_v47, %v1276_v44  ;;  %v1360_v51 = vpop.f32.mrb[37].mxu1 }
 0x1c0   : > { %v1368_v59 = vadd.f32 %v1360_v51, %v1277_v48  ;;  %v1362_v19 = vpop.f32.mrb[38].mxu1 }
 0x1c1   : > { %v1363_v24 = vpop.f32.mrb[39].mxu1  ;;  %v1408_v32 = vpop.f32.mrb[40].mxu0 }
 0x1c2   : > { %v1456_v52 = vadd.f32 %v1408_v32, %v1365_v55  ;;  %v1410_v34 = vpop.f32.mrb[41].mxu0 }
 0x1c3   : > { %v1457_v53 = vadd.f32 %v1410_v34, %v1366_v18  ;;  %v1412_v54 = vpop.f32.mrb[42].mxu0 }
 0x1c4   : > { %v1413_v25 = vpop.f32.mrb[43].mxu0 }
 0x1c6   : > { %v1449_v36 = vpop.f32.mrb[40].mxu1 }
 0x1c7   : > { %v1458_v42 = vadd.f32 %v1449_v36, %v1367_v23  ;;  %v1451_v38 = vpop.f32.mrb[41].mxu1 }
 0x1c8   : > { %v1459_v56 = vadd.f32 %v1451_v38, %v1368_v59  ;;  %v1453_v57 = vpop.f32.mrb[42].mxu1 }
 0x1c9   : > { %v1454_v58 = vpop.f32.mrb[43].mxu1  ;;  %v1499_v61 = vpop.f32.mrb[44].mxu0 }
 0x1ca   : > { %v1547_v62 = vadd.f32 %v1499_v61, %v1456_v52  ;;  %v1501_v45 = vpop.f32.mrb[45].mxu0 }
 0x1cb   : > { %v1548_v63 = vadd.f32 %v1501_v45, %v1457_v53  ;;  %v1503_v3 = vpop.f32.mrb[46].mxu0 }
 0x1cc   : > { %v1504_v4 = vpop.f32.mrb[47].mxu0 }
 0x1ce   : > { %v1540_v7 = vpop.f32.mrb[44].mxu1 }
 0x1cf   : > { %v1549_v60 = vadd.f32 %v1540_v7, %v1458_v42  ;;  %v1542_v0 = vpop.f32.mrb[45].mxu1 }
 0x1d0   : > { %v1550_v1 = vadd.f32 %v1542_v0, %v1459_v56  ;;  %v1544_v2 = vpop.f32.mrb[46].mxu1 }
 0x1d1   : > { %v1545_v5 = vpop.f32.mrb[47].mxu1  ;;  %v1590_v6 = vpop.f32.mrb[48].mxu0 }
 0x1d2   : > { %v1638_v8 = vadd.f32 %v1590_v6, %v1547_v62  ;;  %v1592_v9 = vpop.f32.mrb[49].mxu0 }
 0x1d3   : > { %v1639_v10 = vadd.f32 %v1592_v9, %v1548_v63  ;;  %v1594_v11 = vpop.f32.mrb[50].mxu0 }
 0x1d4   : > { %v1595_v12 = vpop.f32.mrb[51].mxu0 }
 0x1d6   : > { %v1631_v13 = vpop.f32.mrb[48].mxu1 }
 0x1d7   : > { %v1640_v14 = vadd.f32 %v1631_v13, %v1549_v60  ;;  %v1633_v15 = vpop.f32.mrb[49].mxu1 }
 0x1d8   : > { %v1641_v22 = vadd.f32 %v1633_v15, %v1550_v1  ;;  %v1635_v26 = vpop.f32.mrb[50].mxu1 }
 0x1d9   : > { %v1636_v27 = vpop.f32.mrb[51].mxu1  ;;  %v1681_v28 = vpop.f32.mrb[52].mxu0 }
 0x1da   : > { %v1729_v29 = vadd.f32 %v1681_v28, %v1638_v8  ;;  %v1683_v30 = vpop.f32.mrb[53].mxu0 }
 0x1db   : > { %v1730_v31 = vadd.f32 %v1683_v30, %v1639_v10  ;;  %v1685_v16 = vpop.f32.mrb[54].mxu0 }
 0x1dc   : > { %v1686_v33 = vpop.f32.mrb[55].mxu0 }
 0x1de   : > { %v1722_v35 = vpop.f32.mrb[52].mxu1 }
 0x1df   : > { %v1731_v37 = vadd.f32 %v1722_v35, %v1640_v14  ;;  %v1724_v39 = vpop.f32.mrb[53].mxu1 }
 0x1e0   : > { %v1732_v41 = vadd.f32 %v1724_v39, %v1641_v22  ;;  %v1726_v43 = vpop.f32.mrb[54].mxu1 }
 0x1e1   : > { %v1727_v44 = vpop.f32.mrb[55].mxu1  ;;  %v1772_v46 = vpop.f32.mrb[56].mxu0 }
 0x1e2   : > { %v1820_v48 = vadd.f32 %v1772_v46, %v1729_v29  ;;  %v1774_v40 = vpop.f32.mrb[57].mxu0 }
 0x1e3   : > { %v1821_v49 = vadd.f32 %v1774_v40, %v1730_v31  ;;  %v1776_v50 = vpop.f32.mrb[58].mxu0 }
 0x1e4   : > { %v1777_v55 = vpop.f32.mrb[59].mxu0 }
 0x1e6   : > { %v1813_v17 = vpop.f32.mrb[56].mxu1 }
 0x1e7   : > { %v1822_v18 = vadd.f32 %v1813_v17, %v1731_v37  ;;  %v1815_v21 = vpop.f32.mrb[57].mxu1 }
 0x1e8   : > { %v1823_v20 = vadd.f32 %v1815_v21, %v1732_v41  ;;  %v1817_v47 = vpop.f32.mrb[58].mxu1 }
 0x1e9   : > { %v1818_v23 = vpop.f32.mrb[59].mxu1  ;;  %v1863_v51 = vpop.f32.mrb[60].mxu0 }
 0x1ea   : > { %v1911_v59 = vadd.f32 %v1863_v51, %v1820_v48  ;;  %v1865_v19 = vpop.f32.mrb[61].mxu0 }
 0x1eb   : > { %v1912_v24 = vadd.f32 %v1865_v19, %v1821_v49  ;;  %v1867_v32 = vpop.f32.mrb[62].mxu0 }
 0x1ec   : > { %v1868_v52 = vpop.f32.mrb[63].mxu0 }
 0x1ee   : > { %v1904_v34 = vpop.f32.mrb[60].mxu1 }
 0x1ef   : > { %v1913_v53 = vadd.f32 %v1904_v34, %v1822_v18  ;;  %v1906_v54 = vpop.f32.mrb[61].mxu1 }
 0x1f0   : > { %v1914_v25 = vadd.f32 %v1906_v54, %v1823_v20  ;;  %v1908_v36 = vpop.f32.mrb[62].mxu1 }
 0x1f1   : > { %v1909_v42 = vpop.f32.mrb[63].mxu1  ;;  %v1954_v38 = vpop.f32.mrb[64].mxu0 }
 0x1f2   : > { %v2002_v56 = vadd.f32 %v1954_v38, %v1911_v59  ;;  %v1956_v57 = vpop.f32.mrb[65].mxu0 }
 0x1f3   : > { %v2003_v58 = vadd.f32 %v1956_v57, %v1912_v24  ;;  %v1958_v61 = vpop.f32.mrb[66].mxu0 }
 0x1f4   : > { %v1959_v62 = vpop.f32.mrb[67].mxu0 }
 0x1f6   : > { %v1995_v45 = vpop.f32.mrb[64].mxu1 }
 0x1f7   : > { %v2004_v63 = vadd.f32 %v1995_v45, %v1913_v53  ;;  %v1997_v3 = vpop.f32.mrb[65].mxu1 }
 0x1f8   : > { %v2005_v4 = vadd.f32 %v1997_v3, %v1914_v25  ;;  %v1999_v7 = vpop.f32.mrb[66].mxu1 }
 0x1f9   : > { %v2000_v60 = vpop.f32.mrb[67].mxu1  ;;  %v2045_v0 = vpop.f32.mrb[68].mxu0 }
 0x1fa   : > { %v2093_v1 = vadd.f32 %v2045_v0, %v2002_v56  ;;  %v2047_v2 = vpop.f32.mrb[69].mxu0 }
 0x1fb   : > { %v2094_v5 = vadd.f32 %v2047_v2, %v2003_v58  ;;  %v2049_v6 = vpop.f32.mrb[70].mxu0 }
 0x1fc   : > { %v2050_v8 = vpop.f32.mrb[71].mxu0 }
 0x1fe   : > { %v2086_v9 = vpop.f32.mrb[68].mxu1 }
 0x1ff   : > { %v2095_v10 = vadd.f32 %v2086_v9, %v2004_v63  ;;  %v2088_v11 = vpop.f32.mrb[69].mxu1 }
 0x200   : > { %v2096_v12 = vadd.f32 %v2088_v11, %v2005_v4  ;;  %v2090_v13 = vpop.f32.mrb[70].mxu1 }
 0x201   : > { %v2091_v14 = vpop.f32.mrb[71].mxu1  ;;  %v2173_v15 = vpop.f32.mrb[72].mxu0 }
 0x202   : > { %v2221_v22 = vadd.f32 %v2173_v15, %v2093_v1  ;;  %v2175_v26 = vpop.f32.mrb[73].mxu0 }
 0x203   : > { %v2222_v27 = vadd.f32 %v2175_v26, %v2094_v5  ;;  %v2177_v28 = vpop.f32.mrb[74].mxu0 }
 0x204   : > { %v2178_v29 = vpop.f32.mrb[75].mxu0 }
 0x206   : > { %v2214_v30 = vpop.f32.mrb[72].mxu1 }
 0x207   : > { %v2223_v31 = vadd.f32 %v2214_v30, %v2095_v10  ;;  %v2216_v16 = vpop.f32.mrb[73].mxu1 }
 0x208   : > { %v2224_v33 = vadd.f32 %v2216_v16, %v2096_v12  ;;  %v2218_v35 = vpop.f32.mrb[74].mxu1 }
 0x209   : > { %v2219_v37 = vpop.f32.mrb[75].mxu1  ;;  %v2264_v39 = vpop.f32.mrb[76].mxu0 }
 0x20a   : > { %v2312_v41 = vadd.f32 %v2264_v39, %v2221_v22  ;;  %v2266_v43 = vpop.f32.mrb[77].mxu0 }
 0x20b   : > { %v2313_v44 = vadd.f32 %v2266_v43, %v2222_v27  ;;  %v2268_v46 = vpop.f32.mrb[78].mxu0 }
 0x20c   : > { %v2269_v48 = vpop.f32.mrb[79].mxu0 }
 0x20e   : > { %v2305_v40 = vpop.f32.mrb[76].mxu1 }
 0x20f   : > { %v2314_v49 = vadd.f32 %v2305_v40, %v2223_v31  ;;  %v2307_v50 = vpop.f32.mrb[77].mxu1 }
 0x210   : > { %v2315_v55 = vadd.f32 %v2307_v50, %v2224_v33  ;;  %v2309_v17 = vpop.f32.mrb[78].mxu1 }
 0x211   : > { %v2310_v18 = vpop.f32.mrb[79].mxu1  ;;  %v2392_v21 = vpop.f32.mrb[80].mxu0 }
 0x212   : > { %v2440_v20 = vadd.f32 %v2392_v21, %v2312_v41  ;;  %v2394_v47 = vpop.f32.mrb[81].mxu0 }
 0x213   : > { %v2441_v23 = vadd.f32 %v2394_v47, %v2313_v44  ;;  %v2396_v51 = vpop.f32.mrb[82].mxu0 }
 0x214   : > { %v2397_v59 = vpop.f32.mrb[83].mxu0 }
 0x216   : > { %v2433_v19 = vpop.f32.mrb[80].mxu1 }
 0x217   : > { %v2442_v24 = vadd.f32 %v2433_v19, %v2314_v49  ;;  %v2435_v32 = vpop.f32.mrb[81].mxu1 }
 0x218   : > { %v2443_v52 = vadd.f32 %v2435_v32, %v2315_v55  ;;  %v2437_v34 = vpop.f32.mrb[82].mxu1 }
 0x219   : > { %v2438_v53 = vpop.f32.mrb[83].mxu1  ;;  %v2483_v54 = vpop.f32.mrb[84].mxu0 }
 0x21a   : > { %v2531_v25 = vadd.f32 %v2483_v54, %v2440_v20  ;;  %v2485_v36 = vpop.f32.mrb[85].mxu0 }
 0x21b   : > { %v2532_v42 = vadd.f32 %v2485_v36, %v2441_v23  ;;  %v2487_v38 = vpop.f32.mrb[86].mxu0 }
 0x21c   : > { %v2488_v56 = vpop.f32.mrb[87].mxu0 }
 0x21e   : > { %v2524_v57 = vpop.f32.mrb[84].mxu1 }
 0x21f   : > { %v2533_v58 = vadd.f32 %v2524_v57, %v2442_v24  ;;  %v2526_v61 = vpop.f32.mrb[85].mxu1  ;;  %v3068_v24 = vpop.permute.xlu0 %3067 }
 0x220   : > { %v2534_v62 = vadd.f32 %v2526_v61, %v2443_v52  ;;  %v2528_v45 = vpop.f32.mrb[86].mxu1 }
 0x221   : > { %v2529_v63 = vpop.f32.mrb[87].mxu1  ;;  %v2574_v3 = vpop.f32.mrb[88].mxu0 }
 0x222   : > { %v2622_v4 = vadd.f32 %v2574_v3, %v2531_v25  ;;  %v2576_v7 = vpop.f32.mrb[89].mxu0 }
 0x223   : > { %v2623_v60 = vadd.f32 %v2576_v7, %v2532_v42  ;;  %v2578_v0 = vpop.f32.mrb[90].mxu0 }
 0x224   : > { %v2579_v1 = vpop.f32.mrb[91].mxu0 }
 0x226   : > { %v2615_v2 = vpop.f32.mrb[88].mxu1 }
 0x227   : > { %v2624_v5 = vadd.f32 %v2615_v2, %v2533_v58  ;;  %v2617_v6 = vpop.f32.mrb[89].mxu1 }
 0x228   : > { %v2625_v8 = vadd.f32 %v2617_v6, %v2534_v62  ;;  %v2619_v9 = vpop.f32.mrb[90].mxu1 }
 0x229   : > { %v2620_v10 = vpop.f32.mrb[91].mxu1  ;;  %v2665_v11 = vpop.f32.mrb[92].mxu0 }
 0x22a   : > { %v2713_v12 = vadd.f32 %v2665_v11, %v2622_v4  ;;  %v2667_v13 = vpop.f32.mrb[93].mxu0 }
 0x22b   : > { %v2714_v14 = vadd.f32 %v2667_v13, %v2623_v60  ;;  %v2669_v15 = vpop.f32.mrb[94].mxu0 }
 0x22c   : > { %v2670_v22 = vpop.f32.mrb[95].mxu0 }
 0x22e   : > { %v2706_v26 = vpop.f32.mrb[92].mxu1 }
 0x22f   : > { %v2715_v27 = vadd.f32 %v2706_v26, %v2624_v5  ;;  %v2708_v28 = vpop.f32.mrb[93].mxu1 }
 0x230   : > { %v2716_v29 = vadd.f32 %v2708_v28, %v2625_v8  ;;  %v2710_v30 = vpop.f32.mrb[94].mxu1 }
 0x231   : > { %v2711_v31 = vpop.f32.mrb[95].mxu1  ;;  %v2793_v16 = vpop.f32.mrb[96].mxu0 }
 0x232   : > { %v2841_v33 = vadd.f32 %v2793_v16, %v2713_v12  ;;  %v2795_v35 = vpop.f32.mrb[97].mxu0 }
 0x233   : > { %v2842_v37 = vadd.f32 %v2795_v35, %v2714_v14  ;;  %v2797_v39 = vpop.f32.mrb[98].mxu0 }
 0x234   : > { %v2798_v41 = vpop.f32.mrb[99].mxu0 }
 0x236   : > { %v2834_v43 = vpop.f32.mrb[96].mxu1 }
 0x237   : > { %v2843_v44 = vadd.f32 %v2834_v43, %v2715_v27  ;;  %v2836_v46 = vpop.f32.mrb[97].mxu1 }
 0x238   : > { %v2844_v48 = vadd.f32 %v2836_v46, %v2716_v29  ;;  %v2838_v40 = vpop.f32.mrb[98].mxu1 }
 0x239   : > { %v2839_v49 = vpop.f32.mrb[99].mxu1  ;;  %v2884_v50 = vpop.f32.mrb[100].mxu0 }
 0x23a   : > { %v2932_v55 = vadd.f32 %v2884_v50, %v2841_v33  ;;  %v2886_v17 = vpop.f32.mrb[101].mxu0 }
 0x23b   : > { %v2933_v18 = vadd.f32 %v2886_v17, %v2842_v37  ;;  %v2888_v21 = vpop.f32.mrb[102].mxu0 }
 0x23c   : > { %v2889_v20 = vpop.f32.mrb[103].mxu0 }
 0x23e   : > { %v2925_v47 = vpop.f32.mrb[100].mxu1 }
 0x23f   : > { %v2934_v23 = vadd.f32 %v2925_v47, %v2843_v44  ;;  %v2927_v51 = vpop.f32.mrb[101].mxu1 }
 0x240   : > { %v2935_v59 = vadd.f32 %v2927_v51, %v2844_v48  ;;  %v2929_v19 = vpop.f32.mrb[102].mxu1 }
 0x241   : > { %v2930_v32 = vpop.f32.mrb[103].mxu1  ;;  %v3012_v52 = vpop.f32.mrb[104].mxu0 }
 0x242   : > { %v3060_v34 = vadd.f32 %v3012_v52, %v2932_v55  ;;  %v3014_v53 = vpop.f32.mrb[105].mxu0 }
 0x243   : > { %v3061_v54 = vadd.f32 %v3014_v53, %v2933_v18  ;;  %v3016_v25 = vpop.f32.mrb[106].mxu0 }
 0x244   : > { %v3070_v36 = vadd.f32 %v3068_v24, %v3060_v34  ;;  %v3017_v42 = vpop.f32.mrb[107].mxu0 }
 0x245   : > { %v3071_v38 = vadd.f32 %v3068_v24, %v3061_v54 }
 0x246   : > { %v3074_v56 = vmax.f32 %v3070_v36, 0.0  ;;  %v3053_v57 = vpop.f32.mrb[104].mxu1 }
 0x247   : > { %v3075_v58 = vmax.f32 %v3071_v38, 0.0  ;;  %v3062_v61 = vadd.f32 %v3053_v57, %v2934_v23  ;;  %v3055_v62 = vpop.f32.mrb[105].mxu1 }
 0x248   : > { %3078 = vst [vmem:[%s291_s13] sm:$0xff] %v3074_v56  ;;  %v3063_v45 = vadd.f32 %v3055_v62, %v2935_v59  ;;  %v3057_v63 = vpop.f32.mrb[106].mxu1 }
 0x249   : > { %3079 = vst [vmem:[%s291_s13 + $0x8] sm:$0xff] %v3075_v58  ;;  %v3072_v3 = vadd.f32 %v3068_v24, %v3062_v61  ;;  %v3058_v4 = vpop.f32.mrb[107].mxu1 }
 0x24a   : > { %v3073_v7 = vadd.f32 %v3068_v24, %v3063_v45 }
 0x24b   : > { %v3076_v60 = vmax.f32 %v3072_v3, 0.0 }
 0x24c   : > { %v3077_v0 = vmax.f32 %v3073_v7, 0.0 }
 0x24d   : > { %3080 = vst [vmem:[%s291_s13 + $0x10] sm:$0xff] %v3076_v60 }
 0x24e   : > { %3081 = vst [vmem:[%s291_s13 + $0x18] sm:$0xff] %v3077_v0 }
 0x24f PF: > { %p11_p12 = scmp.ge.s32.totalorder %s3441_s21, 4   ;;  %s4194_s15 = smov %s3367_s16 }
 0x250   : > { %s4195_s16 = smov %s3458_s28  ;;  %s4196_s17 = smov %s3375_s18 }
 0x251   : > { %s4197_s18 = smov %s3451_s25  ;;  %s4198_s19 = smov %s3441_s21 }
 0x252   :  { %13 = sbr.rel (!%p11_p12) target bundleno = 3 (0x3), region = 151 }

// kernel: hourglass_forward.7
= control target key start
LH: loop header
LB: loop body
LE: loop exit
PB: predicated region body
PF: predicated region fallthrough
CT: control target
= control target key end

     0   :  { %s3756_s15 = smov 0   ;;  %s4333_s0 = inlined_call_operand.vmem [shape: bf16[8,2048], index: 0, kind: input, shape index: {}, may-alias: {0,1}]   ;;  %s4334_s1 = inlined_call_operand.vmem [shape: bf16[8,2048], index: 1, kind: input, shape index: {}, may-alias: {0,1}]   ;;  %s4335_s2 = inlined_call_operand.vmem [shape: bf16[27,8,8], index: 2, kind: input, shape index: {}]   ;;  %s4336_s3 = inlined_call_operand.vmem [shape: f32[8,1], index: 3, kind: input, shape index: {}]   ;;  %s4337_s4 = inlined_call_operand.vmem [shape: f32[8,1536], index: 4, kind: output, shape index: {}]  }
   0x1 LB: > { %s3499_s16 = sadd.s32 4294967295, %s3702_s15   ;;  %p3503_p0 = scmp.ge.s32.totalorder %s3702_s15, 1  ;;  %s3702_s15 = sphi %s3756_s15, %s14_s15  }
   0x2   : > { %p178_p1 = scmp.lt.s32.totalorder %s3702_s15, 4 }
   0x4   : > { %p179_p2 = pnand %p3503_p0, %p178_p1 }
   0x5   : > { %s3764_s17 = sshll.u32 (!%p179_p2), %s3499_s16, 2  ;;  %v3704_v0 = vmov (!%p179_p2), 0   ;;  %s3705_s25 = smov (!%p179_p2), 127   ;;  %vm262_vm0 = vcmask (!%p179_p2), 1039360   ;;  %vm271_vm1 = vcmask (!%p179_p2), 1043456   ;;  %vm267_vm2 = vcmask (!%p179_p2), 64512  }
   0x6   : > { %182 = sbr.rel (%p179_p2) target bundleno = 616 (0x268), region = 36  ;;  %p211_p3 = scmp.lt.s32.totalorder (!%p179_p2), %s3764_s17, 15  ;;  %316 = vmatprep.mubr.bf16.mxu0 (!%p179_p2), %v3704_v0  ;;  %357 = vmatprep.mubr.bf16.mxu1 (!%p179_p2), %v3704_v0  ;;  %v3516_v18 = vld [vmem:[%s4335_s2 + $0x4] sm:$0xf] (!%p179_p2)  ;;  %vm475_vm3 = vcmask (!%p179_p2), 1031168   ;;  %vm593_vm4 = vcmask (!%p179_p2), 965632  }
   0x7   : > { %s3653_s18 = sadd.s32 (!%p179_p2), 4, %s3764_s17  ;;  %3689 = vset.pattern.permute.xlu0 (!%p179_p2), %v3704_v0  ;;  %s3706_s29 = smov (!%p179_p2), 126   ;;  %v249_v30 = vld [vmem:[%s4335_s2] sm:$0xf] (!%p179_p2)  ;;  %v3525_v40 = vld [vmem:[%s4335_s2 + $0x8] sm:$0xf] (!%p179_p2) }
   0x8   : > { %p218_p4 = scmp.lt.s32.totalorder (!%p179_p2), %s3653_s18, 15  ;;  %s3707_s30 = smov (!%p179_p2), 118   ;;  %vm711_vm5 = vcmask (!%p179_p2), 957440   ;;  %v3530_v50 = vld [vmem:[%s4335_s2 + $0xc] sm:$0xf] (!%p179_p2)  ;;  %vm829_vm6 = vcmask (!%p179_p2), 949248  }
   0x9   : > { %s3708_s5 = smov (!%p179_p2), 117   ;;  %s3709_s6 = smov (!%p179_p2), 116   ;;  %v3535_v61 = vld [vmem:[%s4335_s2 + $0x10] sm:$0xf] (!%p179_p2)  ;;  %vm947_vm7 = vcmask (!%p179_p2), 883712   ;;  %vm1065_vm8 = vcmask (!%p179_p2), 875520  }
   0xa   : > { %s3710_s7 = smov (!%p179_p2), 108   ;;  %s3711_s8 = smov (!%p179_p2), 107   ;;  %vm1183_vm9 = vcmask (!%p179_p2), 867328   ;;  %vm1301_vm10 = vcmask (!%p179_p2), 228352   ;;  %vm1419_vm11 = vcmask (!%p179_p2), 220160   ;;  %vm1537_vm12 = vcmask (!%p179_p2), 211968  }
   0xb   : > { %s3712_s9 = smov (!%p179_p2), 106   ;;  %s3713_s10 = smov (!%p179_p2), 28   ;;  %vm1655_vm13 = vcmask (!%p179_p2), 146432   ;;  %vm1773_vm14 = vcmask (!%p179_p2), 138240   ;;  %vm1891_vm15 = vcmask (!%p179_p2), 130048  }
   0xc   : > { %s3714_s11 = smov (!%p179_p2), 27   ;;  %s3715_s12 = smov (!%p179_p2), 26  }
   0xd   : > { %s212_s19 = scalar_select %p211_p3, %s3764_s17, 15 }
   0xe   : > { %s4339_s18 = smov (!%p218_p4, %s3653_s18), 15  ;;  %s3716_s13 = smov 18  }
   0xf   : > { %s3505_s20 = sshll.u32 %s212_s19, 2  ;;  %s3507_s24 = sshll.u32 %s4339_s18, 2 }
  0x10   : > { %s214_s23 = scalar_lea.vmem %s4333_s0, %s3505_s20  ;;  %s221_s28 = scalar_lea.vmem %s4334_s1, %s3507_s24 }
  0x11   : > { %v232_v1 = vld [vmem:[%s214_s23 + $0x8] sm:$0xff]  ;;  %v231_v2 = vld [vmem:[%s214_s23] sm:$0xff]  ;;  %s3717_s14 = smov 17   ;;  %s3718_s19 = smov 16  }
  0x12   : > { %v3775_v3 = vcombine.low %v232_v1, %v232_v1  ;;  %v3777_v4 = vcombine.low %v231_v2, %v231_v2  ;;  %v3780_v5 = vcombine.high %v231_v2, %v231_v2  ;;  %v3783_v6 = vcombine.high %v232_v1, %v232_v1  ;;  %v3788_v7 = vld [vmem:[%s221_s28] sm:$0xff]  ;;  %s3719_s24 = smov 8   ;;  %s3720_s27 = smov 7  }
  0x13   : > { %v3794_v8 = vcombine.low %v3788_v7, %v3788_v7  ;;  %s3725_s18 = smov 46   ;;  %s3726_s21 = smov 45  }
  0x14   : > { %256 = vrot.lane.b32.xlu1 %v3775_v3, %s3705_s25  ;;  %252 = vrot.lane.b32.xlu0 %v3777_v4, %s3705_s25  ;;  %v370_v21 = vsel %vm271_vm1, %v3777_v4, 0  ;;  %v376_v26 = vsel %vm271_vm1, %v3775_v3, 0  ;;  %p225_p5 = scmp.lt.s32.totalorder %s3764_s17, 11 }
  0x16   : > { %s4341_s17 = smov (!%p225_p5, %s3764_s17), 11 }
  0x18   : > { %258 = vrot.lane.b32.xlu1 %v3783_v6, %s3705_s25  ;;  %254 = vrot.lane.b32.xlu0 %v3780_v5, %s3705_s25 }
  0x1c   : > { %465 = vrot.lane.b32.xlu1 %v3777_v4, %s3706_s29  ;;  %260 = vrot.lane.b32.xlu0 %v3794_v8, %s3705_s25 }
  0x20   : > { %469 = vrot.lane.b32.xlu1 %v3775_v3, %s3706_s29  ;;  %467 = vrot.lane.b32.xlu0 %v3780_v5, %s3706_s29 }
  0x24   : > { %473 = vrot.lane.b32.xlu1 %v3794_v8, %s3706_s29  ;;  %471 = vrot.lane.b32.xlu0 %v3783_v6, %s3706_s29 }
  0x28   : > { %585 = vrot.lane.b32.xlu1 %v3780_v5, %s3707_s30  ;;  %583 = vrot.lane.b32.xlu0 %v3777_v4, %s3707_s30 }
  0x2c   : > { %589 = vrot.lane.b32.xlu1 %v3783_v6, %s3707_s30  ;;  %587 = vrot.lane.b32.xlu0 %v3775_v3, %s3707_s30 }
  0x30   : > { %701 = vrot.lane.b32.xlu1 %v3777_v4, %s3708_s5  ;;  %591 = vrot.lane.b32.xlu0 %v3794_v8, %s3707_s30  ;;  %s3721_s30 = smov 6  }
  0x34   : > { %705 = vrot.lane.b32.xlu1 %v3775_v3, %s3708_s5  ;;  %703 = vrot.lane.b32.xlu0 %v3780_v5, %s3708_s5 }
  0x38   : > { %709 = vrot.lane.b32.xlu1 %v3794_v8, %s3708_s5  ;;  %707 = vrot.lane.b32.xlu0 %v3783_v6, %s3708_s5 }
  0x3c   : > { %821 = vrot.lane.b32.xlu1 %v3780_v5, %s3709_s6  ;;  %819 = vrot.lane.b32.xlu0 %v3777_v4, %s3709_s6 }
  0x40   : > { %825 = vrot.lane.b32.xlu1 %v3783_v6, %s3709_s6  ;;  %823 = vrot.lane.b32.xlu0 %v3775_v3, %s3709_s6 }
  0x44   : > { %937 = vrot.lane.b32.xlu1 %v3777_v4, %s3710_s7  ;;  %827 = vrot.lane.b32.xlu0 %v3794_v8, %s3709_s6 }
  0x48   : > { %941 = vrot.lane.b32.xlu1 %v3775_v3, %s3710_s7  ;;  %939 = vrot.lane.b32.xlu0 %v3780_v5, %s3710_s7 }
  0x4c   : > { %945 = vrot.lane.b32.xlu1 %v3794_v8, %s3710_s7  ;;  %943 = vrot.lane.b32.xlu0 %v3783_v6, %s3710_s7  ;;  %s3722_s7 = smov 56  }
  0x50   : > { %1057 = vrot.lane.b32.xlu1 %v3780_v5, %s3711_s8  ;;  %1055 = vrot.lane.b32.xlu0 %v3777_v4, %s3711_s8 }
  0x54   : > { %1061 = vrot.lane.b32.xlu1 %v3783_v6, %s3711_s8  ;;  %1059 = vrot.lane.b32.xlu0 %v3775_v3, %s3711_s8 }
  0x58   : > { %1173 = vrot.lane.b32.xlu1 %v3777_v4, %s3712_s9  ;;  %1063 = vrot.lane.b32.xlu0 %v3794_v8, %s3711_s8 }
  0x5c   : > { %1177 = vrot.lane.b32.xlu1 %v3775_v3, %s3712_s9  ;;  %1175 = vrot.lane.b32.xlu0 %v3780_v5, %s3712_s9 }
  0x60   : > { %1181 = vrot.lane.b32.xlu1 %v3794_v8, %s3712_s9  ;;  %1179 = vrot.lane.b32.xlu0 %v3783_v6, %s3712_s9 }
  0x64   : > { %1293 = vrot.lane.b32.xlu1 %v3780_v5, %s3713_s10  ;;  %1291 = vrot.lane.b32.xlu0 %v3777_v4, %s3713_s10 }
  0x68   : > { %1297 = vrot.lane.b32.xlu1 %v3783_v6, %s3713_s10  ;;  %1295 = vrot.lane.b32.xlu0 %v3775_v3, %s3713_s10 }
  0x6c   : > { %1409 = vrot.lane.b32.xlu1 %v3777_v4, %s3714_s11  ;;  %1299 = vrot.lane.b32.xlu0 %v3794_v8, %s3713_s10  ;;  %s3723_s10 = smov 55  }
  0x70   : > { %1413 = vrot.lane.b32.xlu1 %v3775_v3, %s3714_s11  ;;  %1411 = vrot.lane.b32.xlu0 %v3780_v5, %s3714_s11 }
  0x74   : > { %1417 = vrot.lane.b32.xlu1 %v3794_v8, %s3714_s11  ;;  %1415 = vrot.lane.b32.xlu0 %v3783_v6, %s3714_s11 }
  0x78   : > { %1529 = vrot.lane.b32.xlu1 %v3780_v5, %s3715_s12  ;;  %1527 = vrot.lane.b32.xlu0 %v3777_v4, %s3715_s12 }
  0x7c   : > { %1533 = vrot.lane.b32.xlu1 %v3783_v6, %s3715_s12  ;;  %1531 = vrot.lane.b32.xlu0 %v3775_v3, %s3715_s12 }
  0x80   : > { %1645 = vrot.lane.b32.xlu1 %v3777_v4, %s3716_s13  ;;  %1535 = vrot.lane.b32.xlu0 %v3794_v8, %s3715_s12  ;;  %s3509_s12 = sshll.u32 %s4341_s17, 3 }
  0x81   : > { %s228_s16 = scalar_lea.vmem %s4337_s4, %s3509_s12 }
  0x84   : > { %1649 = vrot.lane.b32.xlu1 %v3775_v3, %s3716_s13  ;;  %1647 = vrot.lane.b32.xlu0 %v3780_v5, %s3716_s13 }
  0x86   : > { %v257_v9 = vpop.permute.xlu1 %256  ;;  %v253_v10 = vpop.permute.xlu0 %252 }
  0x88   : > { %1653 = vrot.lane.b32.xlu1 %v3794_v8, %s3716_s13  ;;  %1651 = vrot.lane.b32.xlu0 %v3783_v6, %s3716_s13  ;;  %s3724_s13 = smov 54  }
  0x8a   : > { %v259_v11 = vpop.permute.xlu1 %258  ;;  %v255_v12 = vpop.permute.xlu0 %254 }
  0x8b   : > { %v264_v13 = vsel %vm262_vm0, %v255_v12, %v257_v9  ;;  %v263_v14 = vsel %vm262_vm0, %v253_v10, %v255_v12  ;;  %v265_v19 = vsel %vm262_vm0, %v257_v9, %v259_v11 }
  0x8c   : > { %1765 = vrot.lane.b32.xlu1 %v3780_v5, %s3717_s14  ;;  %1763 = vrot.lane.b32.xlu0 %v3777_v4, %s3717_s14  ;;  %v273_v15 = vsel %vm271_vm1, %v263_v14, 0  ;;  %v279_v22 = vsel %vm271_vm1, %v265_v19, 0 }
  0x8d   : > { %3517 = vmatprep.subr.msk.bf16.mxu0 %vm271_vm1, %v264_v13  ;;  %v3540_v13 = vld [vmem:[%s4335_s2 + $0x14] sm:$0xf] }
  0x8e   : > { %285 = vmatpush1.bf16.msra.mxu0 %v273_v15  ;;  %v466_v16 = vpop.permute.xlu1 %465  ;;  %v261_v17 = vpop.permute.xlu0 %260 }
  0x8f   : > { %v266_v20 = vsel %vm262_vm0, %v259_v11, %v261_v17  ;;  %3521 = vmatprep.subr.msk.bf16.mxu0 %vm271_vm1, %v3780_v5  ;;  %vm2127_vm0 = vcmask 56320  }
  0x90   : > { %1769 = vrot.lane.b32.xlu1 %v3783_v6, %s3717_s14  ;;  %1767 = vrot.lane.b32.xlu0 %v3775_v3, %s3717_s14 }
  0x91   : > { %3518 = vmatmul.mubr.msk.bf16.vlgmr.msra.gmra.mrb[0].mxu0 %vm267_vm2, %v3516_v18  ;;  %3519 = vmatprep.subr.msk.bf16.mxu1 %vm271_vm1, %v266_v20 }
  0x92   : > { %326 = vmatpush1.bf16.msra.mxu1 %v279_v22  ;;  %v470_v23 = vpop.permute.xlu1 %469  ;;  %v468_v24 = vpop.permute.xlu0 %467  ;;  %382 = vmatpush1.bf16.msra.mxu0 %v370_v21  ;;  %v3545_v22 = vld [vmem:[%s4335_s2 + $0x18] sm:$0xf] }
  0x93   : > { %v477_v25 = vsel %vm475_vm3, %v468_v24, %v470_v23  ;;  %3523 = vmatprep.subr.msk.bf16.mxu1 %vm271_vm1, %v3783_v6  ;;  %413 = vmatprep.mubr.bf16.mxu0 %v3704_v0  ;;  %v476_v27 = vsel %vm475_vm3, %v466_v16, %v468_v24 }
  0x94   : > { %1881 = vrot.lane.b32.xlu1 %v3777_v4, %s3718_s19  ;;  %1771 = vrot.lane.b32.xlu0 %v3794_v8, %s3717_s14  ;;  %v484_v32 = vsel %vm271_vm1, %v476_v27, 0 }
  0x95   : > { %3520 = vmatmul.mubr.msk.bf16.vlgmr.msra.gmra.mrb[0].mxu1 %vm267_vm2, %v3516_v18  ;;  %3526 = vmatprep.subr.msk.bf16.mxu0 %vm271_vm1, %v477_v25 }
  0x96   : > { %v474_v28 = vpop.permute.xlu1 %473  ;;  %v472_v29 = vpop.permute.xlu0 %471  ;;  %423 = vmatpush1.bf16.msra.mxu1 %v376_v26  ;;  %454 = vmatprep.mubr.bf16.mxu1 %v3704_v0  ;;  %v3987_v26 = vcombine.high %v3788_v7, %v3788_v7 }
  0x97   : > { %v479_v31 = vsel %vm475_vm3, %v472_v29, %v474_v28  ;;  %v478_v33 = vsel %vm475_vm3, %v470_v23, %v472_v29  ;;  %vm2245_vm3 = vcmask 48128  }
  0x98   : > { %1885 = vrot.lane.b32.xlu1 %v3775_v3, %s3718_s19  ;;  %1883 = vrot.lane.b32.xlu0 %v3780_v5, %s3718_s19  ;;  %v490_v36 = vsel %vm271_vm1, %v478_v33, 0 }
  0x99   : > { %3522 = vmatmul.mubr.msk.bf16.vlgmr.msra.gmra.mrb[4].mxu0 %vm267_vm2, %v249_v30  ;;  %3528 = vmatprep.subr.msk.bf16.mxu1 %vm271_vm1, %v479_v31 }
  0x9a   : > { %496 = vmatpush1.bf16.msra.mxu0 %v484_v32  ;;  %v586_v34 = vpop.permute.xlu1 %585  ;;  %v584_v35 = vpop.permute.xlu0 %583  ;;  %527 = vmatprep.mubr.bf16.mxu0 %v3704_v0 }
  0x9b   : > { %v594_v37 = vsel %vm593_vm4, %v584_v35, %v586_v34 }
  0x9c   : > { %1889 = vrot.lane.b32.xlu1 %v3794_v8, %s3718_s19  ;;  %1887 = vrot.lane.b32.xlu0 %v3783_v6, %s3718_s19  ;;  %v602_v42 = vsel %vm271_vm1, %v594_v37, 0 }
  0x9d   : > { %3524 = vmatmul.mubr.msk.bf16.vlgmr.msra.gmra.mrb[4].mxu1 %vm267_vm2, %v249_v30 }
  0x9e   : > { %537 = vmatpush1.bf16.msra.mxu1 %v490_v36  ;;  %v590_v38 = vpop.permute.xlu1 %589  ;;  %v588_v39 = vpop.permute.xlu0 %587  ;;  %568 = vmatprep.mubr.bf16.mxu1 %v3704_v0  ;;  %v3550_v36 = vld [vmem:[%s4335_s2 + $0x1c] sm:$0xf] }
  0x9f   : > { %v595_v41 = vsel %vm593_vm4, %v586_v34, %v588_v39  ;;  %v596_v43 = vsel %vm593_vm4, %v588_v39, %v590_v38 }
  0xa0   : > { %2001 = vrot.lane.b32.xlu1 %v3780_v5, %s3719_s24  ;;  %1999 = vrot.lane.b32.xlu0 %v3777_v4, %s3719_s24  ;;  %v608_v47 = vsel %vm271_vm1, %v596_v43, 0 }
  0xa1   : > { %3531 = vmatprep.subr.msk.bf16.mxu0 %vm271_vm1, %v595_v41  ;;  %3527 = vmatmul.mubr.msk.bf16.vlgmr.msra.gmra.mrb[8].mxu0 %vm267_vm2, %v3525_v40 }
  0xa2   : > { %614 = vmatpush1.bf16.msra.mxu0 %v602_v42  ;;  %v702_v44 = vpop.permute.xlu1 %701  ;;  %v592_v45 = vpop.permute.xlu0 %591  ;;  %645 = vmatprep.mubr.bf16.mxu0 %v3704_v0 }
  0xa3   : > { %v597_v46 = vsel %vm593_vm4, %v590_v38, %v592_v45  ;;  %vm2363_vm4 = vcmask 457728  }
  0xa4   : > { %2005 = vrot.lane.b32.xlu1 %v3783_v6, %s3719_s24  ;;  %2003 = vrot.lane.b32.xlu0 %v3775_v3, %s3719_s24 }
  0xa5   : > { %3533 = vmatprep.subr.msk.bf16.mxu1 %vm271_vm1, %v597_v46  ;;  %3529 = vmatmul.mubr.msk.bf16.vlgmr.msra.gmra.mrb[8].mxu1 %vm267_vm2, %v3525_v40  ;;  %v3555_v46 = vld [vmem:[%s4335_s2 + $0x20] sm:$0xf] }
  0xa6   : > { %655 = vmatpush1.bf16.msra.mxu1 %v608_v47  ;;  %v706_v48 = vpop.permute.xlu1 %705  ;;  %v704_v49 = vpop.permute.xlu0 %703  ;;  %686 = vmatprep.mubr.bf16.mxu1 %v3704_v0 }
  0xa7   : > { %v712_v51 = vsel %vm711_vm5, %v702_v44, %v704_v49  ;;  %v713_v52 = vsel %vm711_vm5, %v704_v49, %v706_v48 }
  0xa8   : > { %2117 = vrot.lane.b32.xlu1 %v3777_v4, %s3720_s27  ;;  %2007 = vrot.lane.b32.xlu0 %v3794_v8, %s3719_s24  ;;  %v720_v53 = vsel %vm271_vm1, %v712_v51, 0  ;;  %s3727_s24 = smov 44  }
  0xa9   : > { %3536 = vmatprep.subr.msk.bf16.mxu0 %vm271_vm1, %v713_v52  ;;  %3532 = vmatmul.mubr.msk.bf16.vlgmr.msra.gmra.mrb[12].mxu0 %vm267_vm2, %v3530_v50 }
  0xaa   : > { %732 = vmatpush1.bf16.msra.mxu0 %v720_v53  ;;  %v710_v54 = vpop.permute.xlu1 %709  ;;  %v708_v55 = vpop.permute.xlu0 %707  ;;  %763 = vmatprep.mubr.bf16.mxu0 %v3704_v0 }
  0xab   : > { %v714_v56 = vsel %vm711_vm5, %v706_v48, %v708_v55  ;;  %v715_v57 = vsel %vm711_vm5, %v708_v55, %v710_v54  ;;  %vm2481_vm5 = vcmask 449536  }
  0xac   : > { %2121 = vrot.lane.b32.xlu1 %v3775_v3, %s3720_s27  ;;  %2119 = vrot.lane.b32.xlu0 %v3780_v5, %s3720_s27  ;;  %v726_v58 = vsel %vm271_vm1, %v714_v56, 0 }
  0xad   : > { %3538 = vmatprep.subr.msk.bf16.mxu1 %vm271_vm1, %v715_v57  ;;  %3534 = vmatmul.mubr.msk.bf16.vlgmr.msra.gmra.mrb[12].mxu1 %vm267_vm2, %v3530_v50 }
  0xae   : > { %773 = vmatpush1.bf16.msra.mxu1 %v726_v58  ;;  %v822_v59 = vpop.permute.xlu1 %821  ;;  %v820_v60 = vpop.permute.xlu0 %819  ;;  %804 = vmatprep.mubr.bf16.mxu1 %v3704_v0 }
  0xaf   : > { %v830_v62 = vsel %vm829_vm6, %v820_v60, %v822_v59  ;;  %v3560_v60 = vld [vmem:[%s4335_s2 + $0x24] sm:$0xf] }
  0xb0   : > { %2125 = vrot.lane.b32.xlu1 %v3794_v8, %s3720_s27  ;;  %2123 = vrot.lane.b32.xlu0 %v3783_v6, %s3720_s27  ;;  %v838_v9 = vsel %vm271_vm1, %v830_v62, 0  ;;  %s3728_s27 = smov 36  }
  0xb1   : > { %3537 = vmatmul.mubr.msk.bf16.vlgmr.msra.gmra.mrb[16].mxu0 %vm267_vm2, %v3535_v61 }
  0xb2   : > { %v826_v63 = vpop.permute.xlu1 %825  ;;  %v824_v1 = vpop.permute.xlu0 %823  ;;  %881 = vmatprep.mubr.bf16.mxu0 %v3704_v0 }
  0xb3   : > { %v831_v2 = vsel %vm829_vm6, %v822_v59, %v824_v1  ;;  %v832_v10 = vsel %vm829_vm6, %v824_v1, %v826_v63 }
  0xb4   : > { %2237 = vrot.lane.b32.xlu1 %v3780_v5, %s3721_s30  ;;  %2235 = vrot.lane.b32.xlu0 %v3777_v4, %s3721_s30  ;;  %v844_v4 = vsel %vm271_vm1, %v832_v10, 0 }
  0xb5   : > { %3541 = vmatprep.subr.msk.bf16.mxu0 %vm271_vm1, %v831_v2  ;;  %3539 = vmatmul.mubr.msk.bf16.vlgmr.msra.gmra.mrb[16].mxu1 %vm267_vm2, %v3535_v61 }
  0xb6   : > { %850 = vmatpush1.bf16.msra.mxu0 %v838_v9  ;;  %v938_v11 = vpop.permute.xlu1 %937  ;;  %v828_v12 = vpop.permute.xlu0 %827  ;;  %922 = vmatprep.mubr.bf16.mxu1 %v3704_v0 }
  0xb7   : > { %v833_v14 = vsel %vm829_vm6, %v826_v63, %v828_v12  ;;  %vm2599_vm6 = vcmask 441344  }
  0xb8   : > { %2241 = vrot.lane.b32.xlu1 %v3783_v6, %s3721_s30  ;;  %2239 = vrot.lane.b32.xlu0 %v3775_v3, %s3721_s30 }
  0xb9   : > { %3543 = vmatprep.subr.msk.bf16.mxu1 %vm271_vm1, %v833_v14  ;;  %3542 = vmatmul.mubr.msk.bf16.vlgmr.msra.gmra.mrb[20].mxu0 %vm267_vm2, %v3540_v13 }
  0xba   : > { %891 = vmatpush1.bf16.msra.mxu1 %v844_v4  ;;  %v942_v15 = vpop.permute.xlu1 %941  ;;  %v940_v16 = vpop.permute.xlu0 %939  ;;  %999 = vmatprep.mubr.bf16.mxu0 %v3704_v0 }
  0xbb   : > { %v948_v17 = vsel %vm947_vm7, %v938_v11, %v940_v16  ;;  %v949_v18 = vsel %vm947_vm7, %v940_v16, %v942_v15 }
  0xbc   : > { %2353 = vrot.lane.b32.xlu1 %v3780_v5, %s3722_s7  ;;  %2243 = vrot.lane.b32.xlu0 %v3794_v8, %s3721_s30  ;;  %v956_v19 = vsel %vm271_vm1, %v948_v17, 0  ;;  %s3729_s30 = smov 35  }
  0xbd   : > { %3546 = vmatprep.subr.msk.bf16.mxu0 %vm271_vm1, %v949_v18  ;;  %3544 = vmatmul.mubr.msk.bf16.vlgmr.msra.gmra.mrb[20].mxu1 %vm267_vm2, %v3540_v13  ;;  %v3565_v13 = vld [vmem:[%s4335_s2 + $0x28] sm:$0xf] }
  0xbe   : > { %968 = vmatpush1.bf16.msra.mxu0 %v956_v19  ;;  %v946_v20 = vpop.permute.xlu1 %945  ;;  %v944_v21 = vpop.permute.xlu0 %943  ;;  %1040 = vmatprep.mubr.bf16.mxu1 %v3704_v0 }
  0xbf   : > { %v950_v23 = vsel %vm947_vm7, %v942_v15, %v944_v21  ;;  %v951_v24 = vsel %vm947_vm7, %v944_v21, %v946_v20  ;;  %vm2717_vm7 = vcmask 375808  }
  0xc0   : > { %2357 = vrot.lane.b32.xlu1 %v3783_v6, %s3722_s7  ;;  %2355 = vrot.lane.b32.xlu0 %v3775_v3, %s3722_s7  ;;  %v962_v25 = vsel %vm271_vm1, %v950_v23, 0 }
  0xc1   : > { %3548 = vmatprep.subr.msk.bf16.mxu1 %vm271_vm1, %v951_v24  ;;  %3547 = vmatmul.mubr.msk.bf16.vlgmr.msra.gmra.mrb[24].mxu0 %vm267_vm2, %v3545_v22 }
  0xc2   : > { %1009 = vmatpush1.bf16.msra.mxu1 %v962_v25  ;;  %v1058_v27 = vpop.permute.xlu1 %1057  ;;  %v1056_v28 = vpop.permute.xlu0 %1055  ;;  %1117 = vmatprep.mubr.bf16.mxu0 %v3704_v0 }
  0xc3   : > { %v1066_v29 = vsel %vm1065_vm8, %v1056_v28, %v1058_v27 }
  0xc4   : > { %2361 = vrot.lane.b32.xlu1 %v3987_v26, %s3722_s7  ;;  %2359 = vrot.lane.b32.xlu0 %v3794_v8, %s3722_s7  ;;  %v1074_v32 = vsel %vm271_vm1, %v1066_v29, 0  ;;  %s3730_s7 = smov 34  }
  0xc5   : > { %3549 = vmatmul.mubr.msk.bf16.vlgmr.msra.gmra.mrb[24].mxu1 %vm267_vm2, %v3545_v22 }
  0xc6   : > { %v1062_v7 = vpop.permute.xlu1 %1061  ;;  %v1060_v30 = vpop.permute.xlu0 %1059  ;;  %1158 = vmatprep.mubr.bf16.mxu1 %v3704_v0 }
  0xc7   : > { %v1067_v31 = vsel %vm1065_vm8, %v1058_v27, %v1060_v30  ;;  %v1068_v33 = vsel %vm1065_vm8, %v1060_v30, %v1062_v7  ;;  %v3570_v27 = vld [vmem:[%s4335_s2 + $0x2c] sm:$0xf] }
  0xc8   : > { %2473 = vrot.lane.b32.xlu1 %v3775_v3, %s3723_s10  ;;  %2471 = vrot.lane.b32.xlu0 %v3780_v5, %s3723_s10  ;;  %v1080_v38 = vsel %vm271_vm1, %v1068_v33, 0 }
  0xc9   : > { %3551 = vmatprep.subr.msk.bf16.mxu0 %vm271_vm1, %v1067_v31 }
  0xca   : > { %1086 = vmatpush1.bf16.msra.mxu0 %v1074_v32  ;;  %v1174_v34 = vpop.permute.xlu1 %1173  ;;  %v1064_v35 = vpop.permute.xlu0 %1063 }
  0xcb   : > { %v1069_v37 = vsel %vm1065_vm8, %v1062_v7, %v1064_v35  ;;  %vm2835_vm8 = vcmask 367616  }
  0xcc   : > { %2477 = vrot.lane.b32.xlu1 %v3794_v8, %s3723_s10  ;;  %2475 = vrot.lane.b32.xlu0 %v3783_v6, %s3723_s10 }
  0xcd   : > { %3552 = vmatmul.mubr.msk.bf16.vlgmr.msra.gmra.mrb[28].mxu0 %vm267_vm2, %v3550_v36  ;;  %3553 = vmatprep.subr.msk.bf16.mxu1 %vm271_vm1, %v1069_v37 }
  0xce   : > { %1127 = vmatpush1.bf16.msra.mxu1 %v1080_v38  ;;  %v1178_v39 = vpop.permute.xlu1 %1177  ;;  %v1176_v40 = vpop.permute.xlu0 %1175  ;;  %1235 = vmatprep.mubr.bf16.mxu0 %v3704_v0 }
  0xcf   : > { %v1184_v41 = vsel %vm1183_vm9, %v1174_v34, %v1176_v40  ;;  %v1185_v42 = vsel %vm1183_vm9, %v1176_v40, %v1178_v39 }
  0xd0   : > { %v1192_v43 = vsel %vm271_vm1, %v1184_v41, 0  ;;  %2589 = vrot.lane.b32.xlu1 %v3780_v5, %s3724_s13  ;;  %2479 = vrot.lane.b32.xlu0 %v3987_v26, %s3723_s10 }
  0xd1   : > { %3554 = vmatmul.mubr.msk.bf16.vlgmr.msra.gmra.mrb[28].mxu1 %vm267_vm2, %v3550_v36  ;;  %3556 = vmatprep.subr.msk.bf16.mxu0 %vm271_vm1, %v1185_v42  ;;  %v3575_v36 = vld [vmem:[%s4335_s2 + $0x30] sm:$0xf] }
  0xd2   : > { %1204 = vmatpush1.bf16.msra.mxu0 %v1192_v43  ;;  %v1182_v44 = vpop.permute.xlu1 %1181  ;;  %v1180_v45 = vpop.permute.xlu0 %1179  ;;  %1276 = vmatprep.mubr.bf16.mxu1 %v3704_v0 }
  0xd3   : > { %v1186_v47 = vsel %vm1183_vm9, %v1178_v39, %v1180_v45  ;;  %v1187_v48 = vsel %vm1183_vm9, %v1180_v45, %v1182_v44  ;;  %vm2953_vm9 = vcmask 359424  }
  0xd4   : > { %v1198_v49 = vsel %vm271_vm1, %v1186_v47, 0  ;;  %2593 = vrot.lane.b32.xlu1 %v3783_v6, %s3724_s13  ;;  %2591 = vrot.lane.b32.xlu0 %v3775_v3, %s3724_s13 }
  0xd5   : > { %3557 = vmatmul.mubr.msk.bf16.vlgmr.msra.gmra.mrb[32].mxu0 %vm267_vm2, %v3555_v46  ;;  %3558 = vmatprep.subr.msk.bf16.mxu1 %vm271_vm1, %v1187_v48 }
  0xd6   : > { %1245 = vmatpush1.bf16.msra.mxu1 %v1198_v49  ;;  %v1294_v50 = vpop.permute.xlu1 %1293  ;;  %v1292_v51 = vpop.permute.xlu0 %1291  ;;  %1353 = vmatprep.mubr.bf16.mxu0 %v3704_v0 }
  0xd7   : > { %v1302_v52 = vsel %vm1301_vm10, %v1292_v51, %v1294_v50 }
  0xd8   : > { %2597 = vrot.lane.b32.xlu1 %v3987_v26, %s3724_s13  ;;  %2595 = vrot.lane.b32.xlu0 %v3794_v8, %s3724_s13  ;;  %v1310_v56 = vsel %vm271_vm1, %v1302_v52, 0 }
  0xd9   : > { %3559 = vmatmul.mubr.msk.bf16.vlgmr.msra.gmra.mrb[32].mxu1 %vm267_vm2, %v3555_v46 }
  0xda   : > { %v1298_v53 = vpop.permute.xlu1 %1297  ;;  %v1296_v54 = vpop.permute.xlu0 %1295  ;;  %1394 = vmatprep.mubr.bf16.mxu1 %v3704_v0 }
  0xdb   : > { %v1303_v55 = vsel %vm1301_vm10, %v1294_v50, %v1296_v54  ;;  %v1304_v57 = vsel %vm1301_vm10, %v1296_v54, %v1298_v53  ;;  %v3580_v50 = vld [vmem:[%s4335_s2 + $0x34] sm:$0xf] }
  0xdc   : > { %2709 = vrot.lane.b32.xlu1 %v3775_v3, %s3725_s18  ;;  %2707 = vrot.lane.b32.xlu0 %v3780_v5, %s3725_s18  ;;  %v1316_v62 = vsel %vm271_vm1, %v1304_v57, 0 }
  0xdd   : > { %3561 = vmatprep.subr.msk.bf16.mxu0 %vm271_vm1, %v1303_v55 }
  0xde   : > { %1322 = vmatpush1.bf16.msra.mxu0 %v1310_v56  ;;  %v1410_v58 = vpop.permute.xlu1 %1409  ;;  %v1300_v59 = vpop.permute.xlu0 %1299 }
  0xdf   : > { %v1305_v61 = vsel %vm1301_vm10, %v1298_v53, %v1300_v59  ;;  %vm3071_vm10 = vcmask 293888  }
  0xe0   : > { %2713 = vrot.lane.b32.xlu1 %v3794_v8, %s3725_s18  ;;  %2711 = vrot.lane.b32.xlu0 %v3783_v6, %s3725_s18 }
  0xe1   : > { %3562 = vmatmul.mubr.msk.bf16.vlgmr.msra.gmra.mrb[36].mxu0 %vm267_vm2, %v3560_v60  ;;  %3563 = vmatprep.subr.msk.bf16.mxu1 %vm271_vm1, %v1305_v61 }
  0xe2   : > { %1363 = vmatpush1.bf16.msra.mxu1 %v1316_v62  ;;  %v1414_v63 = vpop.permute.xlu1 %1413  ;;  %v1412_v1 = vpop.permute.xlu0 %1411  ;;  %1471 = vmatprep.mubr.bf16.mxu0 %v3704_v0 }
  0xe3   : > { %v1420_v2 = vsel %vm1419_vm11, %v1410_v58, %v1412_v1  ;;  %v1421_v9 = vsel %vm1419_vm11, %v1412_v1, %v1414_v63 }
  0xe4   : > { %v1428_v10 = vsel %vm271_vm1, %v1420_v2, 0  ;;  %2825 = vrot.lane.b32.xlu1 %v3780_v5, %s3726_s21  ;;  %2715 = vrot.lane.b32.xlu0 %v3987_v26, %s3725_s18 }
  0xe5   : > { %3564 = vmatmul.mubr.msk.bf16.vlgmr.msra.gmra.mrb[36].mxu1 %vm267_vm2, %v3560_v60  ;;  %3566 = vmatprep.subr.msk.bf16.mxu0 %vm271_vm1, %v1421_v9  ;;  %v3585_v60 = vld [vmem:[%s4335_s2 + $0x38] sm:$0xf] }
  0xe6   : > { %1440 = vmatpush1.bf16.msra.mxu0 %v1428_v10  ;;  %v1418_v11 = vpop.permute.xlu1 %1417  ;;  %v1416_v12 = vpop.permute.xlu0 %1415  ;;  %1512 = vmatprep.mubr.bf16.mxu1 %v3704_v0 }
  0xe7   : > { %v1422_v14 = vsel %vm1419_vm11, %v1414_v63, %v1416_v12  ;;  %v1423_v4 = vsel %vm1419_vm11, %v1416_v12, %v1418_v11  ;;  %vm3189_vm11 = vcmask 285696  }
  0xe8   : > { %v1434_v15 = vsel %vm271_vm1, %v1422_v14, 0  ;;  %2829 = vrot.lane.b32.xlu1 %v3783_v6, %s3726_s21  ;;  %2827 = vrot.lane.b32.xlu0 %v3775_v3, %s3726_s21 }
  0xe9   : > { %3567 = vmatmul.mubr.msk.bf16.vlgmr.msra.gmra.mrb[40].mxu0 %vm267_vm2, %v3565_v13  ;;  %3568 = vmatprep.subr.msk.bf16.mxu1 %vm271_vm1, %v1423_v4 }
  0xea   : > { %1481 = vmatpush1.bf16.msra.mxu1 %v1434_v15  ;;  %v1530_v16 = vpop.permute.xlu1 %1529  ;;  %v1528_v17 = vpop.permute.xlu0 %1527  ;;  %1589 = vmatprep.mubr.bf16.mxu0 %v3704_v0 }
  0xeb   : > { %v1538_v18 = vsel %vm1537_vm12, %v1528_v17, %v1530_v16 }
  0xec   : > { %2833 = vrot.lane.b32.xlu1 %v3987_v26, %s3726_s21  ;;  %2831 = vrot.lane.b32.xlu0 %v3794_v8, %s3726_s21  ;;  %v1546_v22 = vsel %vm271_vm1, %v1538_v18, 0 }
  0xed   : > { %3569 = vmatmul.mubr.msk.bf16.vlgmr.msra.gmra.mrb[40].mxu1 %vm267_vm2, %v3565_v13 }
  0xee   : > { %v1534_v19 = vpop.permute.xlu1 %1533  ;;  %v1532_v20 = vpop.permute.xlu0 %1531  ;;  %1630 = vmatprep.mubr.bf16.mxu1 %v3704_v0 }
  0xef   : > { %v1539_v21 = vsel %vm1537_vm12, %v1530_v16, %v1532_v20  ;;  %v1540_v23 = vsel %vm1537_vm12, %v1532_v20, %v1534_v19 }
  0xf0   : > { %2945 = vrot.lane.b32.xlu1 %v3775_v3, %s3727_s24  ;;  %2943 = vrot.lane.b32.xlu0 %v3780_v5, %s3727_s24  ;;  %v1552_v29 = vsel %vm271_vm1, %v1540_v23, 0 }
  0xf1   : > { %3571 = vmatprep.subr.msk.bf16.mxu0 %vm271_vm1, %v1539_v21 }
  0xf2   : > { %1558 = vmatpush1.bf16.msra.mxu0 %v1546_v22  ;;  %v1646_v24 = vpop.permute.xlu1 %1645  ;;  %v1536_v25 = vpop.permute.xlu0 %1535 }
  0xf3   : > { %v1541_v28 = vsel %vm1537_vm12, %v1534_v19, %v1536_v25  ;;  %v3595_v19 = vld [vmem:[%s4335_s2 + $0x40] sm:$0xf]  ;;  %vm3307_vm12 = vcmask 277504  }
  0xf4   : > { %2949 = vrot.lane.b32.xlu1 %v3794_v8, %s3727_s24  ;;  %2947 = vrot.lane.b32.xlu0 %v3783_v6, %s3727_s24 }
  0xf5   : > { %3572 = vmatmul.mubr.msk.bf16.vlgmr.msra.gmra.mrb[44].mxu0 %vm267_vm2, %v3570_v27  ;;  %3573 = vmatprep.subr.msk.bf16.mxu1 %vm271_vm1, %v1541_v28 }
  0xf6   : > { %1599 = vmatpush1.bf16.msra.mxu1 %v1552_v29  ;;  %v1650_v7 = vpop.permute.xlu1 %1649  ;;  %v1648_v30 = vpop.permute.xlu0 %1647  ;;  %1707 = vmatprep.mubr.bf16.mxu0 %v3704_v0 }
  0xf7   : > { %v1656_v31 = vsel %vm1655_vm13, %v1646_v24, %v1648_v30  ;;  %v1657_v32 = vsel %vm1655_vm13, %v1648_v30, %v1650_v7 }
  0xf8   : > { %v1664_v33 = vsel %vm271_vm1, %v1656_v31, 0  ;;  %3061 = vrot.lane.b32.xlu1 %v3780_v5, %s3728_s27  ;;  %2951 = vrot.lane.b32.xlu0 %v3987_v26, %s3727_s24 }
  0xf9   : > { %3574 = vmatmul.mubr.msk.bf16.vlgmr.msra.gmra.mrb[44].mxu1 %vm267_vm2, %v3570_v27  ;;  %3576 = vmatprep.subr.msk.bf16.mxu0 %vm271_vm1, %v1657_v32 }
  0xfa   : > { %1676 = vmatpush1.bf16.msra.mxu0 %v1664_v33  ;;  %v1654_v34 = vpop.permute.xlu1 %1653  ;;  %v1652_v35 = vpop.permute.xlu0 %1651  ;;  %1748 = vmatprep.mubr.bf16.mxu1 %v3704_v0  ;;  %v3600_v33 = vld [vmem:[%s4335_s2 + $0x44] sm:$0xf] }
  0xfb   : > { %v1658_v37 = vsel %vm1655_vm13, %v1650_v7, %v1652_v35  ;;  %v1659_v38 = vsel %vm1655_vm13, %v1652_v35, %v1654_v34 }
  0xfc   : > { %v1670_v39 = vsel %vm271_vm1, %v1658_v37, 0  ;;  %3065 = vrot.lane.b32.xlu1 %v3783_v6, %s3728_s27  ;;  %3063 = vrot.lane.b32.xlu0 %v3775_v3, %s3728_s27 }
  0xfd   : > { %3577 = vmatmul.mubr.msk.bf16.vlgmr.msra.gmra.mrb[48].mxu0 %vm267_vm2, %v3575_v36  ;;  %3578 = vmatprep.subr.msk.bf16.mxu1 %vm271_vm1, %v1659_v38 }
  0xfe   : > { %1717 = vmatpush1.bf16.msra.mxu1 %v1670_v39  ;;  %v1766_v40 = vpop.permute.xlu1 %1765  ;;  %v1764_v41 = vpop.permute.xlu0 %1763  ;;  %1825 = vmatprep.mubr.bf16.mxu0 %v3704_v0 }
  0xff   : > { %v1774_v42 = vsel %vm1773_vm14, %v1764_v41, %v1766_v40 }
 0x100   : > { %3069 = vrot.lane.b32.xlu1 %v3987_v26, %s3728_s27  ;;  %3067 = vrot.lane.b32.xlu0 %v3794_v8, %s3728_s27  ;;  %v1782_v46 = vsel %vm271_vm1, %v1774_v42, 0 }
 0x101   : > { %3579 = vmatmul.mubr.msk.bf16.vlgmr.msra.gmra.mrb[48].mxu1 %vm267_vm2, %v3575_v36 }
 0x102   : > { %v1770_v43 = vpop.permute.xlu1 %1769  ;;  %v1768_v44 = vpop.permute.xlu0 %1767  ;;  %1866 = vmatprep.mubr.bf16.mxu1 %v3704_v0 }
 0x103   : > { %v1775_v45 = vsel %vm1773_vm14, %v1766_v40, %v1768_v44  ;;  %v1776_v47 = vsel %vm1773_vm14, %v1768_v44, %v1770_v43 }
 0x104   : > { %3181 = vrot.lane.b32.xlu1 %v3775_v3, %s3729_s30  ;;  %3179 = vrot.lane.b32.xlu0 %v3780_v5, %s3729_s30  ;;  %v1788_v52 = vsel %vm271_vm1, %v1776_v47, 0 }
 0x105   : > { %3581 = vmatprep.subr.msk.bf16.mxu0 %vm271_vm1, %v1775_v45 }
 0x106   : > { %1794 = vmatpush1.bf16.msra.mxu0 %v1782_v46  ;;  %v1882_v48 = vpop.permute.xlu1 %1881  ;;  %v1772_v49 = vpop.permute.xlu0 %1771 }
 0x107   : > { %v1777_v51 = vsel %vm1773_vm14, %v1770_v43, %v1772_v49  ;;  %v3605_v43 = vld [vmem:[%s4335_s2 + $0x48] sm:$0xf] }
 0x108   : > { %3185 = vrot.lane.b32.xlu1 %v3794_v8, %s3729_s30  ;;  %3183 = vrot.lane.b32.xlu0 %v3783_v6, %s3729_s30 }
 0x109   : > { %3582 = vmatmul.mubr.msk.bf16.vlgmr.msra.gmra.mrb[52].mxu0 %vm267_vm2, %v3580_v50  ;;  %3583 = vmatprep.subr.msk.bf16.mxu1 %vm271_vm1, %v1777_v51 }
 0x10a   : > { %1835 = vmatpush1.bf16.msra.mxu1 %v1788_v52  ;;  %v1886_v53 = vpop.permute.xlu1 %1885  ;;  %v1884_v54 = vpop.permute.xlu0 %1883  ;;  %1943 = vmatprep.mubr.bf16.mxu0 %v3704_v0 }
 0x10b   : > { %v1892_v55 = vsel %vm1891_vm15, %v1882_v48, %v1884_v54  ;;  %v1893_v56 = vsel %vm1891_vm15, %v1884_v54, %v1886_v53 }
 0x10c   : > { %v1900_v57 = vsel %vm271_vm1, %v1892_v55, 0  ;;  %3297 = vrot.lane.b32.xlu1 %v3780_v5, %s3730_s7  ;;  %3187 = vrot.lane.b32.xlu0 %v3987_v26, %s3729_s30 }
 0x10d   : > { %3584 = vmatmul.mubr.msk.bf16.vlgmr.msra.gmra.mrb[52].mxu1 %vm267_vm2, %v3580_v50  ;;  %3586 = vmatprep.subr.msk.bf16.mxu0 %vm271_vm1, %v1893_v56 }
 0x10e   : > { %1912 = vmatpush1.bf16.msra.mxu0 %v1900_v57  ;;  %v1890_v58 = vpop.permute.xlu1 %1889  ;;  %v1888_v59 = vpop.permute.xlu0 %1887  ;;  %1984 = vmatprep.mubr.bf16.mxu1 %v3704_v0  ;;  %v3610_v57 = vld [vmem:[%s4335_s2 + $0x4c] sm:$0xf] }
 0x10f   : > { %v1894_v61 = vsel %vm1891_vm15, %v1886_v53, %v1888_v59  ;;  %v1895_v62 = vsel %vm1891_vm15, %v1888_v59, %v1890_v58 }
 0x110   : > { %v1906_v5 = vsel %vm271_vm1, %v1894_v61, 0  ;;  %3301 = vrot.lane.b32.xlu1 %v3783_v6, %s3730_s7  ;;  %3299 = vrot.lane.b32.xlu0 %v3775_v3, %s3730_s7 }
 0x111   : > { %3587 = vmatmul.mubr.msk.bf16.vlgmr.msra.gmra.mrb[56].mxu0 %vm267_vm2, %v3585_v60  ;;  %3588 = vmatprep.subr.msk.bf16.mxu1 %vm271_vm1, %v1895_v62 }
 0x112   : > { %1953 = vmatpush1.bf16.msra.mxu1 %v1906_v5  ;;  %v2002_v63 = vpop.permute.xlu1 %2001  ;;  %v2000_v1 = vpop.permute.xlu0 %1999  ;;  %2061 = vmatprep.mubr.bf16.mxu0 %v3704_v0 }
 0x113   : > { %v2010_v2 = vsel %vm267_vm2, %v2000_v1, %v2002_v63 }
 0x114   : > { %3305 = vrot.lane.b32.xlu1 %v3987_v26, %s3730_s7  ;;  %3303 = vrot.lane.b32.xlu0 %v3794_v8, %s3730_s7  ;;  %v2018_v10 = vsel %vm271_vm1, %v2010_v2, 0  ;;  %v3590_v8 = vld [vmem:[%s4335_s2 + $0x3c] sm:$0xf] }
 0x115   : > { %3589 = vmatmul.mubr.msk.bf16.vlgmr.msra.gmra.mrb[56].mxu1 %vm267_vm2, %v3585_v60 }
 0x116   : > { %v2006_v6 = vpop.permute.xlu1 %2005  ;;  %v2004_v9 = vpop.permute.xlu0 %2003  ;;  %2102 = vmatprep.mubr.bf16.mxu1 %v3704_v0 }
 0x117   : > { %v2011_v3 = vsel %vm267_vm2, %v2002_v63, %v2004_v9  ;;  %v2012_v11 = vsel %vm267_vm2, %v2004_v9, %v2006_v6 }
 0x118   : > { %3591 = vmatprep.subr.msk.bf16.mxu0 %vm271_vm1, %v2011_v3  ;;  %v2024_v14 = vsel %vm271_vm1, %v2012_v11, 0 }
 0x119   : > { %2030 = vmatpush1.bf16.msra.mxu0 %v2018_v10 }
 0x11a   : > { %v2118_v26 = vpop.permute.xlu1 %2117  ;;  %v2008_v12 = vpop.permute.xlu0 %2007 }
 0x11b   : > { %v2013_v13 = vsel %vm267_vm2, %v2006_v6, %v2008_v12  ;;  %v3615_v6 = vld [vmem:[%s4335_s2 + $0x50] sm:$0xf] }
 0x11c   : > { %3592 = vmatmul.mubr.msk.bf16.vlgmr.msra.gmra.mrb[60].mxu0 %vm267_vm2, %v3590_v8  ;;  %3593 = vmatprep.subr.msk.bf16.mxu1 %vm271_vm1, %v2013_v13 }
 0x11d   : > { %2071 = vmatpush1.bf16.msra.mxu1 %v2024_v14  ;;  %2179 = vmatprep.mubr.bf16.mxu0 %v3704_v0 }
 0x11e   : > { %v2122_v4 = vpop.permute.xlu1 %2121  ;;  %v2120_v15 = vpop.permute.xlu0 %2119 }
 0x11f   : > { %v2128_v16 = vsel %vm2127_vm0, %v2118_v26, %v2120_v15  ;;  %v2129_v17 = vsel %vm2127_vm0, %v2120_v15, %v2122_v4 }
 0x120   : > { %v2136_v18 = vsel %vm271_vm1, %v2128_v16, 0  ;;  %3594 = vmatmul.mubr.msk.bf16.vlgmr.msra.gmra.mrb[60].mxu1 %vm267_vm2, %v3590_v8  ;;  %3596 = vmatprep.subr.msk.bf16.mxu0 %vm271_vm1, %v2129_v17 }
 0x121   : > { %2148 = vmatpush1.bf16.msra.mxu0 %v2136_v18  ;;  %2220 = vmatprep.mubr.bf16.mxu1 %v3704_v0  ;;  %v3620_v18 = vld [vmem:[%s4335_s2 + $0x54] sm:$0xf] }
 0x122   : > { %v2126_v20 = vpop.permute.xlu1 %2125  ;;  %v2124_v21 = vpop.permute.xlu0 %2123 }
 0x123   : > { %v2130_v22 = vsel %vm2127_vm0, %v2122_v4, %v2124_v21  ;;  %v2131_v23 = vsel %vm2127_vm0, %v2124_v21, %v2126_v20 }
 0x124   : > { %v2142_v24 = vsel %vm271_vm1, %v2130_v22, 0  ;;  %3597 = vmatmul.mubr.msk.bf16.vlgmr.msra.gmra.mrb[64].mxu0 %vm267_vm2, %v3595_v19  ;;  %3598 = vmatprep.subr.msk.bf16.mxu1 %vm271_vm1, %v2131_v23 }
 0x125   : > { %2189 = vmatpush1.bf16.msra.mxu1 %v2142_v24  ;;  %2297 = vmatprep.mubr.bf16.mxu0 %v3704_v0 }
 0x126   : > { %v2238_v25 = vpop.permute.xlu1 %2237  ;;  %v2236_v27 = vpop.permute.xlu0 %2235 }
 0x127   : > { %v2246_v28 = vsel %vm2245_vm3, %v2236_v27, %v2238_v25 }
 0x128   : > { %3599 = vmatmul.mubr.msk.bf16.vlgmr.msra.gmra.mrb[64].mxu1 %vm267_vm2, %v3595_v19  ;;  %v2254_v31 = vsel %vm271_vm1, %v2246_v28, 0 }
 0x129   : > { %2338 = vmatprep.mubr.bf16.mxu1 %v3704_v0 }
 0x12a   : > { %v2242_v29 = vpop.permute.xlu1 %2241  ;;  %v2240_v7 = vpop.permute.xlu0 %2239 }
 0x12b   : > { %v2247_v30 = vsel %vm2245_vm3, %v2238_v25, %v2240_v7  ;;  %v2248_v32 = vsel %vm2245_vm3, %v2240_v7, %v2242_v29 }
 0x12c   : > { %3601 = vmatprep.subr.msk.bf16.mxu0 %vm271_vm1, %v2247_v30  ;;  %v2260_v37 = vsel %vm271_vm1, %v2248_v32, 0 }
 0x12d   : > { %2266 = vmatpush1.bf16.msra.mxu0 %v2254_v31  ;;  %v3413_v31 = vld [vmem:[%s4336_s3] sm:$0xff] }
 0x12e   : > { %v2354_v34 = vpop.permute.xlu1 %2353  ;;  %v2244_v35 = vpop.permute.xlu0 %2243  ;;  %3416 = vperm.xlu0 %3689, %v3413_v31  }
 0x12f   : > { %v2249_v36 = vsel %vm2245_vm3, %v2242_v29, %v2244_v35  ;;  %v3625_v29 = vld [vmem:[%s4335_s2 + $0x58] sm:$0xf] }
 0x130   : > { %3602 = vmatmul.mubr.msk.bf16.vlgmr.msra.gmra.mrb[68].mxu0 %vm267_vm2, %v3600_v33  ;;  %3603 = vmatprep.subr.msk.bf16.mxu1 %vm271_vm1, %v2249_v36 }
 0x131   : > { %2307 = vmatpush1.bf16.msra.mxu1 %v2260_v37  ;;  %2415 = vmatprep.mubr.bf16.mxu0 %v3704_v0 }
 0x132   : > { %v2358_v38 = vpop.permute.xlu1 %2357  ;;  %v2356_v39 = vpop.permute.xlu0 %2355 }
 0x133   : > { %v2364_v40 = vsel %vm2363_vm4, %v2354_v34, %v2356_v39  ;;  %v2365_v41 = vsel %vm2363_vm4, %v2356_v39, %v2358_v38 }
 0x134   : > { %v2372_v42 = vsel %vm271_vm1, %v2364_v40, 0  ;;  %3604 = vmatmul.mubr.msk.bf16.vlgmr.msra.gmra.mrb[68].mxu1 %vm267_vm2, %v3600_v33  ;;  %3606 = vmatprep.subr.msk.bf16.mxu0 %vm271_vm1, %v2365_v41 }
 0x135   : > { %2384 = vmatpush1.bf16.msra.mxu0 %v2372_v42  ;;  %2456 = vmatprep.mubr.bf16.mxu1 %v3704_v0 }
 0x136   : > { %v2362_v44 = vpop.permute.xlu1 %2361  ;;  %v2360_v45 = vpop.permute.xlu0 %2359 }
 0x137   : > { %v2366_v46 = vsel %vm2363_vm4, %v2358_v38, %v2360_v45  ;;  %v2367_v47 = vsel %vm2363_vm4, %v2360_v45, %v2362_v44 }
 0x138   : > { %v2378_v48 = vsel %vm271_vm1, %v2366_v46, 0  ;;  %3607 = vmatmul.mubr.msk.bf16.vlgmr.msra.gmra.mrb[72].mxu0 %vm267_vm2, %v3605_v43  ;;  %3608 = vmatprep.subr.msk.bf16.mxu1 %vm271_vm1, %v2367_v47 }
 0x139   : > { %2425 = vmatpush1.bf16.msra.mxu1 %v2378_v48  ;;  %2533 = vmatprep.mubr.bf16.mxu0 %v3704_v0  ;;  %v3630_v48 = vld [vmem:[%s4335_s2 + $0x5c] sm:$0xf] }
 0x13a   : > { %v2474_v49 = vpop.permute.xlu1 %2473  ;;  %v2472_v50 = vpop.permute.xlu0 %2471 }
 0x13b   : > { %v2482_v51 = vsel %vm2481_vm5, %v2472_v50, %v2474_v49 }
 0x13c   : > { %3609 = vmatmul.mubr.msk.bf16.vlgmr.msra.gmra.mrb[72].mxu1 %vm267_vm2, %v3605_v43  ;;  %v2490_v55 = vsel %vm271_vm1, %v2482_v51, 0 }
 0x13d   : > { %2574 = vmatprep.mubr.bf16.mxu1 %v3704_v0 }
 0x13e   : > { %v2478_v52 = vpop.permute.xlu1 %2477  ;;  %v2476_v53 = vpop.permute.xlu0 %2475 }
 0x13f   : > { %v2483_v54 = vsel %vm2481_vm5, %v2474_v49, %v2476_v53  ;;  %v2484_v56 = vsel %vm2481_vm5, %v2476_v53, %v2478_v52 }
 0x140   : > { %3611 = vmatprep.subr.msk.bf16.mxu0 %vm271_vm1, %v2483_v54  ;;  %v2496_v61 = vsel %vm271_vm1, %v2484_v56, 0 }
 0x141   : > { %2502 = vmatpush1.bf16.msra.mxu0 %v2490_v55 }
 0x142   : > { %v2590_v58 = vpop.permute.xlu1 %2589  ;;  %v2480_v59 = vpop.permute.xlu0 %2479 }
 0x143   : > { %v2485_v60 = vsel %vm2481_vm5, %v2478_v52, %v2480_v59 }
 0x144   : > { %3612 = vmatmul.mubr.msk.bf16.vlgmr.msra.gmra.mrb[76].mxu0 %vm267_vm2, %v3610_v57  ;;  %3613 = vmatprep.subr.msk.bf16.mxu1 %vm271_vm1, %v2485_v60 }
 0x145   : > { %2543 = vmatpush1.bf16.msra.mxu1 %v2496_v61  ;;  %2651 = vmatprep.mubr.bf16.mxu0 %v3704_v0 }
 0x146   : > { %v2594_v62 = vpop.permute.xlu1 %2593  ;;  %v2592_v5 = vpop.permute.xlu0 %2591 }
 0x147   : > { %v2600_v63 = vsel %vm2599_vm6, %v2590_v58, %v2592_v5  ;;  %v2601_v1 = vsel %vm2599_vm6, %v2592_v5, %v2594_v62 }
 0x148   : > { %v2608_v2 = vsel %vm271_vm1, %v2600_v63, 0  ;;  %3614 = vmatmul.mubr.msk.bf16.vlgmr.msra.gmra.mrb[76].mxu1 %vm267_vm2, %v3610_v57  ;;  %3616 = vmatprep.subr.msk.bf16.mxu0 %vm271_vm1, %v2601_v1 }
 0x149   : > { %2620 = vmatpush1.bf16.msra.mxu0 %v2608_v2  ;;  %2692 = vmatprep.mubr.bf16.mxu1 %v3704_v0 }
 0x14a   : > { %v2598_v9 = vpop.permute.xlu1 %2597  ;;  %v2596_v3 = vpop.permute.xlu0 %2595 }
 0x14b   : > { %v2602_v10 = vsel %vm2599_vm6, %v2594_v62, %v2596_v3  ;;  %v2603_v11 = vsel %vm2599_vm6, %v2596_v3, %v2598_v9  ;;  %v3635_v9 = vld [vmem:[%s4335_s2 + $0x60] sm:$0xf] }
 0x14c   : > { %v2614_v8 = vsel %vm271_vm1, %v2602_v10, 0  ;;  %3617 = vmatmul.mubr.msk.bf16.vlgmr.msra.gmra.mrb[80].mxu0 %vm267_vm2, %v3615_v6  ;;  %3618 = vmatprep.subr.msk.bf16.mxu1 %vm271_vm1, %v2603_v11 }
 0x14d   : > { %2661 = vmatpush1.bf16.msra.mxu1 %v2614_v8  ;;  %2769 = vmatprep.mubr.bf16.mxu0 %v3704_v0 }
 0x14e   : > { %v2710_v26 = vpop.permute.xlu1 %2709  ;;  %v2708_v12 = vpop.permute.xlu0 %2707 }
 0x14f   : > { %v2718_v13 = vsel %vm2717_vm7, %v2708_v12, %v2710_v26 }
 0x150   : > { %3619 = vmatmul.mubr.msk.bf16.vlgmr.msra.gmra.mrb[80].mxu1 %vm267_vm2, %v3615_v6  ;;  %v2726_v16 = vsel %vm271_vm1, %v2718_v13, 0 }
 0x151   : > { %2810 = vmatprep.mubr.bf16.mxu1 %v3704_v0 }
 0x152   : > { %v2714_v14 = vpop.permute.xlu1 %2713  ;;  %v2712_v4 = vpop.permute.xlu0 %2711 }
 0x153   : > { %v2719_v15 = vsel %vm2717_vm7, %v2710_v26, %v2712_v4  ;;  %v2720_v17 = vsel %vm2717_vm7, %v2712_v4, %v2714_v14 }
 0x154   : > { %3621 = vmatprep.subr.msk.bf16.mxu0 %vm271_vm1, %v2719_v15  ;;  %v2732_v22 = vsel %vm271_vm1, %v2720_v17, 0 }
 0x155   : > { %2738 = vmatpush1.bf16.msra.mxu0 %v2726_v16 }
 0x156   : > { %v2826_v19 = vpop.permute.xlu1 %2825  ;;  %v2716_v20 = vpop.permute.xlu0 %2715 }
 0x157   : > { %v2721_v21 = vsel %vm2717_vm7, %v2714_v14, %v2716_v20 }
 0x158   : > { %3622 = vmatmul.mubr.msk.bf16.vlgmr.msra.gmra.mrb[84].mxu0 %vm267_vm2, %v3620_v18  ;;  %3623 = vmatprep.subr.msk.bf16.mxu1 %vm271_vm1, %v2721_v21 }
 0x159   : > { %2779 = vmatpush1.bf16.msra.mxu1 %v2732_v22  ;;  %2887 = vmatprep.mubr.bf16.mxu0 %v3704_v0 }
 0x15a   : > { %v2830_v23 = vpop.permute.xlu1 %2829  ;;  %v2828_v24 = vpop.permute.xlu0 %2827 }
 0x15b   : > { %v2836_v25 = vsel %vm2835_vm8, %v2826_v19, %v2828_v24  ;;  %v2837_v27 = vsel %vm2835_vm8, %v2828_v24, %v2830_v23 }
 0x15c   : > { %v2844_v28 = vsel %vm271_vm1, %v2836_v25, 0  ;;  %3624 = vmatmul.mubr.msk.bf16.vlgmr.msra.gmra.mrb[84].mxu1 %vm267_vm2, %v3620_v18  ;;  %3626 = vmatprep.subr.msk.bf16.mxu0 %vm271_vm1, %v2837_v27 }
 0x15d   : > { %2856 = vmatpush1.bf16.msra.mxu0 %v2844_v28  ;;  %2928 = vmatprep.mubr.bf16.mxu1 %v3704_v0 }
 0x15e   : > { %v2834_v7 = vpop.permute.xlu1 %2833  ;;  %v2832_v30 = vpop.permute.xlu0 %2831 }
 0x15f   : > { %v2838_v32 = vsel %vm2835_vm8, %v2830_v23, %v2832_v30  ;;  %v2839_v33 = vsel %vm2835_vm8, %v2832_v30, %v2834_v7 }
 0x160   : > { %v2850_v34 = vsel %vm271_vm1, %v2838_v32, 0  ;;  %3627 = vmatmul.mubr.msk.bf16.vlgmr.msra.gmra.mrb[88].mxu0 %vm267_vm2, %v3625_v29  ;;  %3628 = vmatprep.subr.msk.bf16.mxu1 %vm271_vm1, %v2839_v33 }
 0x161   : > { %2897 = vmatpush1.bf16.msra.mxu1 %v2850_v34  ;;  %3005 = vmatprep.mubr.bf16.mxu0 %v3704_v0 }
 0x162   : > { %v2946_v35 = vpop.permute.xlu1 %2945  ;;  %v2944_v36 = vpop.permute.xlu0 %2943 }
 0x163   : > { %v2954_v38 = vsel %vm2953_vm9, %v2944_v36, %v2946_v35 }
 0x164   : > { %3629 = vmatmul.mubr.msk.bf16.vlgmr.msra.gmra.mrb[88].mxu1 %vm267_vm2, %v3625_v29  ;;  %v318_v37 = vpop.f32.mrb[0].mxu0  ;;  %v2962_v44 = vsel %vm271_vm1, %v2954_v38, 0 }
 0x165   : > { %3046 = vmatprep.mubr.bf16.mxu1 %v3704_v0  ;;  %v320_v39 = vpop.f32.mrb[1].mxu0 }
 0x166   : > { %v2950_v40 = vpop.permute.xlu1 %2949  ;;  %v2948_v41 = vpop.permute.xlu0 %2947 }
 0x167   : > { %v2955_v42 = vsel %vm2953_vm9, %v2946_v35, %v2948_v41  ;;  %v322_v43 = vpop.f32.mrb[2].mxu0  ;;  %v2956_v47 = vsel %vm2953_vm9, %v2948_v41, %v2950_v40 }
 0x168   : > { %3631 = vmatprep.subr.msk.bf16.mxu0 %vm271_vm1, %v2955_v42  ;;  %v359_v45 = vpop.f32.mrb[0].mxu1  ;;  %v323_v46 = vpop.f32.mrb[3].mxu0  ;;  %v2968_v54 = vsel %vm271_vm1, %v2956_v47, 0 }
 0x169   : > { %2974 = vmatpush1.bf16.msra.mxu0 %v2962_v44  ;;  %v361_v49 = vpop.f32.mrb[1].mxu1 }
 0x16a   : > { %v3062_v50 = vpop.permute.xlu1 %3061  ;;  %v2952_v51 = vpop.permute.xlu0 %2951 }
 0x16b   : > { %v2957_v52 = vsel %vm2953_vm9, %v2950_v40, %v2952_v51  ;;  %v363_v53 = vpop.f32.mrb[2].mxu1 }
 0x16c   : > { %3632 = vmatmul.mubr.msk.bf16.vlgmr.msra.gmra.mrb[92].mxu0 %vm267_vm2, %v3630_v48  ;;  %3633 = vmatprep.subr.msk.bf16.mxu1 %vm271_vm1, %v2957_v52  ;;  %v415_v55 = vpop.f32.mrb[4].mxu0  ;;  %v364_v56 = vpop.f32.mrb[3].mxu1 }
 0x16d   : > { %3015 = vmatpush1.bf16.msra.mxu1 %v2968_v54  ;;  %3123 = vmatprep.mubr.bf16.mxu0 %v3704_v0  ;;  %v416_v57 = vadd.f32 %v415_v55, %v318_v37  ;;  %v417_v58 = vpop.f32.mrb[5].mxu0  ;;  %v3640_v37 = vld [vmem:[%s4335_s2 + $0x64] sm:$0xf] }
 0x16e   : > { %v3066_v59 = vpop.permute.xlu1 %3065  ;;  %v3064_v60 = vpop.permute.xlu0 %3063  ;;  %v418_v61 = vadd.f32 %v417_v58, %v320_v39 }
 0x16f   : > { %v3072_v62 = vsel %vm3071_vm10, %v3062_v50, %v3064_v60  ;;  %v3073_v5 = vsel %vm3071_vm10, %v3064_v60, %v3066_v59  ;;  %v419_v63 = vpop.f32.mrb[6].mxu0 }
 0x170   : > { %v3080_v1 = vsel %vm271_vm1, %v3072_v62, 0  ;;  %3634 = vmatmul.mubr.msk.bf16.vlgmr.msra.gmra.mrb[92].mxu1 %vm267_vm2, %v3630_v48  ;;  %3636 = vmatprep.subr.msk.bf16.mxu0 %vm271_vm1, %v3073_v5  ;;  %v456_v2 = vpop.f32.mrb[4].mxu1  ;;  %v420_v6 = vpop.f32.mrb[7].mxu0 }
 0x171   : > { %3092 = vmatpush1.bf16.msra.mxu0 %v3080_v1  ;;  %3164 = vmatprep.mubr.bf16.mxu1 %v3704_v0  ;;  %v457_v3 = vadd.f32 %v456_v2, %v359_v45  ;;  %v458_v10 = vpop.f32.mrb[5].mxu1 }
 0x172   : > { %v3070_v11 = vpop.permute.xlu1 %3069  ;;  %v3068_v8 = vpop.permute.xlu0 %3067  ;;  %v459_v26 = vadd.f32 %v458_v10, %v361_v49 }
 0x173   : > { %v3074_v12 = vsel %vm3071_vm10, %v3066_v59, %v3068_v8  ;;  %v3075_v13 = vsel %vm3071_vm10, %v3068_v8, %v3070_v11  ;;  %v460_v14 = vpop.f32.mrb[6].mxu1  ;;  %v3645_v59 = vld [vmem:[%s4335_s2 + $0x68] sm:$0xf] }
 0x174   : > { %v3086_v4 = vsel %vm271_vm1, %v3074_v12, 0  ;;  %3637 = vmatmul.mubr.msk.bf16.vlgmr.msra.gmra.mrb[96].mxu0 %vm267_vm2, %v3635_v9  ;;  %3638 = vmatprep.subr.msk.bf16.mxu1 %vm271_vm1, %v3075_v13  ;;  %v529_v15 = vpop.f32.mrb[8].mxu0  ;;  %v461_v16 = vpop.f32.mrb[7].mxu1 }
 0x175   : > { %3133 = vmatpush1.bf16.msra.mxu1 %v3086_v4  ;;  %3241 = vmatprep.mubr.bf16.mxu0 %v3704_v0  ;;  %v577_v17 = vadd.f32 %v529_v15, %v416_v57  ;;  %v531_v18 = vpop.f32.mrb[9].mxu0 }
 0x176   : > { %v3182_v19 = vpop.permute.xlu1 %3181  ;;  %v3180_v20 = vpop.permute.xlu0 %3179  ;;  %v578_v21 = vadd.f32 %v531_v18, %v418_v61 }
 0x177   : > { %v533_v22 = vpop.f32.mrb[10].mxu0  ;;  %v3190_v25 = vsel %vm3189_vm11, %v3180_v20, %v3182_v19 }
 0x178   : > { %3639 = vmatmul.mubr.msk.bf16.vlgmr.msra.gmra.mrb[96].mxu1 %vm267_vm2, %v3635_v9  ;;  %v570_v23 = vpop.f32.mrb[8].mxu1  ;;  %v534_v24 = vpop.f32.mrb[11].mxu0  ;;  %v3198_v33 = vsel %vm271_vm1, %v3190_v25, 0 }
 0x179   : > { %3282 = vmatprep.mubr.bf16.mxu1 %v3704_v0  ;;  %v579_v27 = vadd.f32 %v570_v23, %v457_v3  ;;  %v572_v28 = vpop.f32.mrb[9].mxu1 }
 0x17a   : > { %v3186_v29 = vpop.permute.xlu1 %3185  ;;  %v3184_v7 = vpop.permute.xlu0 %3183  ;;  %v580_v30 = vadd.f32 %v572_v28, %v459_v26 }
 0x17b   : > { %v3191_v31 = vsel %vm3189_vm11, %v3182_v19, %v3184_v7  ;;  %v574_v32 = vpop.f32.mrb[10].mxu1  ;;  %v3192_v36 = vsel %vm3189_vm11, %v3184_v7, %v3186_v29 }
 0x17c   : > { %3641 = vmatprep.subr.msk.bf16.mxu0 %vm271_vm1, %v3191_v31  ;;  %v647_v34 = vpop.f32.mrb[12].mxu0  ;;  %v575_v35 = vpop.f32.mrb[11].mxu1  ;;  %v3204_v45 = vsel %vm271_vm1, %v3192_v36, 0 }
 0x17d   : > { %3210 = vmatpush1.bf16.msra.mxu0 %v3198_v33  ;;  %v695_v38 = vadd.f32 %v647_v34, %v577_v17  ;;  %v649_v39 = vpop.f32.mrb[13].mxu0 }
 0x17e   : > { %v3298_v40 = vpop.permute.xlu1 %3297  ;;  %v3188_v41 = vpop.permute.xlu0 %3187  ;;  %v696_v42 = vadd.f32 %v649_v39, %v578_v21 }
 0x17f   : > { %v3193_v43 = vsel %vm3189_vm11, %v3186_v29, %v3188_v41  ;;  %v651_v44 = vpop.f32.mrb[14].mxu0 }
 0x180   : > { %3642 = vmatmul.mubr.msk.bf16.vlgmr.msra.gmra.mrb[100].mxu0 %vm267_vm2, %v3640_v37  ;;  %3643 = vmatprep.subr.msk.bf16.mxu1 %vm271_vm1, %v3193_v43  ;;  %v688_v46 = vpop.f32.mrb[12].mxu1  ;;  %v652_v47 = vpop.f32.mrb[15].mxu0 }
 0x181   : > { %3251 = vmatpush1.bf16.msra.mxu1 %v3204_v45  ;;  %3359 = vmatprep.mubr.bf16.mxu0 %v3704_v0  ;;  %v697_v48 = vadd.f32 %v688_v46, %v579_v27  ;;  %v690_v49 = vpop.f32.mrb[13].mxu1 }
 0x182   : > { %v3302_v50 = vpop.permute.xlu1 %3301  ;;  %v3300_v51 = vpop.permute.xlu0 %3299  ;;  %v698_v52 = vadd.f32 %v690_v49, %v580_v30 }
 0x183   : > { %v3308_v53 = vsel %vm3307_vm12, %v3298_v40, %v3300_v51  ;;  %v3309_v54 = vsel %vm3307_vm12, %v3300_v51, %v3302_v50  ;;  %v692_v55 = vpop.f32.mrb[14].mxu1 }
 0x184   : > { %v3316_v56 = vsel %vm271_vm1, %v3308_v53, 0  ;;  %3644 = vmatmul.mubr.msk.bf16.vlgmr.msra.gmra.mrb[100].mxu1 %vm267_vm2, %v3640_v37  ;;  %3646 = vmatprep.subr.msk.bf16.mxu0 %vm271_vm1, %v3309_v54  ;;  %v765_v57 = vpop.f32.mrb[16].mxu0  ;;  %v693_v58 = vpop.f32.mrb[15].mxu1 }
 0x185   : > { %3328 = vmatpush1.bf16.msra.mxu0 %v3316_v56  ;;  %3400 = vmatprep.mubr.bf16.mxu1 %v3704_v0  ;;  %v813_v60 = vadd.f32 %v765_v57, %v695_v38  ;;  %v767_v61 = vpop.f32.mrb[17].mxu0 }
 0x186   : > { %v3306_v62 = vpop.permute.xlu1 %3305  ;;  %v3304_v5 = vpop.permute.xlu0 %3303  ;;  %v814_v63 = vadd.f32 %v767_v61, %v696_v42 }
 0x187   : > { %v3310_v1 = vsel %vm3307_vm12, %v3302_v50, %v3304_v5  ;;  %v3311_v2 = vsel %vm3307_vm12, %v3304_v5, %v3306_v62  ;;  %v769_v6 = vpop.f32.mrb[18].mxu0 }
 0x188   : > { %v3322_v9 = vsel %vm271_vm1, %v3310_v1, 0  ;;  %3647 = vmatmul.mubr.msk.bf16.vlgmr.msra.gmra.mrb[104].mxu0 %vm267_vm2, %v3645_v59  ;;  %3648 = vmatprep.subr.msk.bf16.mxu1 %vm271_vm1, %v3311_v2  ;;  %v806_v3 = vpop.f32.mrb[16].mxu1  ;;  %v770_v10 = vpop.f32.mrb[19].mxu0 }
 0x189   : > { %3369 = vmatpush1.bf16.msra.mxu1 %v3322_v9  ;;  %v815_v0 = vadd.f32 %v806_v3, %v697_v48  ;;  %v808_v11 = vpop.f32.mrb[17].mxu1 }
 0x18a   : > { %v816_v8 = vadd.f32 %v808_v11, %v698_v52  ;;  %v810_v26 = vpop.f32.mrb[18].mxu1 }
 0x18b   : > { %v811_v12 = vpop.f32.mrb[19].mxu1 }
 0x18c   : > { %3649 = vmatmul.mubr.msk.bf16.vlgmr.msra.gmra.mrb[104].mxu1 %vm267_vm2, %v3645_v59  ;;  %v883_v13 = vpop.f32.mrb[20].mxu0 }
 0x18d   : > { %v931_v14 = vadd.f32 %v883_v13, %v813_v60  ;;  %v885_v4 = vpop.f32.mrb[21].mxu0 }
 0x18e   : > { %v932_v15 = vadd.f32 %v885_v4, %v814_v63  ;;  %v887_v16 = vpop.f32.mrb[22].mxu0 }
 0x18f   : > { %v888_v17 = vpop.f32.mrb[23].mxu0 }
 0x190   : > { %v924_v18 = vpop.f32.mrb[20].mxu1 }
 0x191   : > { %v933_v19 = vadd.f32 %v924_v18, %v815_v0  ;;  %v926_v20 = vpop.f32.mrb[21].mxu1 }
 0x192   : > { %v934_v21 = vadd.f32 %v926_v20, %v816_v8  ;;  %v928_v22 = vpop.f32.mrb[22].mxu1 }
 0x193   : > { %v929_v23 = vpop.f32.mrb[23].mxu1 }
 0x194   : > { %v1001_v24 = vpop.f32.mrb[24].mxu0 }
 0x195   : > { %v1049_v25 = vadd.f32 %v1001_v24, %v931_v14  ;;  %v1003_v27 = vpop.f32.mrb[25].mxu0 }
 0x196   : > { %v1050_v28 = vadd.f32 %v1003_v27, %v932_v15  ;;  %v1005_v29 = vpop.f32.mrb[26].mxu0 }
 0x197   : > { %v1006_v7 = vpop.f32.mrb[27].mxu0 }
 0x198   : > { %v1042_v30 = vpop.f32.mrb[24].mxu1 }
 0x199   : > { %v1051_v31 = vadd.f32 %v1042_v30, %v933_v19  ;;  %v1044_v32 = vpop.f32.mrb[25].mxu1 }
 0x19a   : > { %v1052_v33 = vadd.f32 %v1044_v32, %v934_v21  ;;  %v1046_v34 = vpop.f32.mrb[26].mxu1 }
 0x19b   : > { %v1047_v35 = vpop.f32.mrb[27].mxu1 }
 0x1a0   : > { %v1119_v36 = vpop.f32.mrb[28].mxu0 }
 0x1a1   : > { %v1167_v37 = vadd.f32 %v1119_v36, %v1049_v25  ;;  %v1121_v38 = vpop.f32.mrb[29].mxu0 }
 0x1a2   : > { %v1168_v39 = vadd.f32 %v1121_v38, %v1050_v28  ;;  %v1123_v40 = vpop.f32.mrb[30].mxu0 }
 0x1a3   : > { %v1124_v41 = vpop.f32.mrb[31].mxu0 }
 0x1a4   : > { %v1160_v42 = vpop.f32.mrb[28].mxu1 }
 0x1a5   : > { %v1169_v43 = vadd.f32 %v1160_v42, %v1051_v31  ;;  %v1162_v44 = vpop.f32.mrb[29].mxu1 }
 0x1a6   : > { %v1170_v45 = vadd.f32 %v1162_v44, %v1052_v33  ;;  %v1164_v46 = vpop.f32.mrb[30].mxu1 }
 0x1a7   : > { %v1165_v47 = vpop.f32.mrb[31].mxu1 }
 0x1a8   : > { %v1237_v48 = vpop.f32.mrb[32].mxu0 }
 0x1a9   : > { %v1285_v49 = vadd.f32 %v1237_v48, %v1167_v37  ;;  %v1239_v50 = vpop.f32.mrb[33].mxu0 }
 0x1aa   : > { %v1286_v51 = vadd.f32 %v1239_v50, %v1168_v39  ;;  %v1241_v52 = vpop.f32.mrb[34].mxu0 }
 0x1ab   : > { %v1242_v53 = vpop.f32.mrb[35].mxu0 }
 0x1ac   : > { %v1278_v54 = vpop.f32.mrb[32].mxu1 }
 0x1ad   : > { %v1287_v55 = vadd.f32 %v1278_v54, %v1169_v43  ;;  %v1280_v56 = vpop.f32.mrb[33].mxu1 }
 0x1ae   : > { %v1288_v57 = vadd.f32 %v1280_v56, %v1170_v45  ;;  %v1282_v58 = vpop.f32.mrb[34].mxu1 }
 0x1af   : > { %v1283_v59 = vpop.f32.mrb[35].mxu1 }
 0x1b4   : > { %v1355_v60 = vpop.f32.mrb[36].mxu0 }
 0x1b5   : > { %v1403_v61 = vadd.f32 %v1355_v60, %v1285_v49  ;;  %v1357_v62 = vpop.f32.mrb[37].mxu0 }
 0x1b6   : > { %v1404_v5 = vadd.f32 %v1357_v62, %v1286_v51  ;;  %v1359_v63 = vpop.f32.mrb[38].mxu0 }
 0x1b7   : > { %v1360_v1 = vpop.f32.mrb[39].mxu0 }
 0x1b8   : > { %v1396_v2 = vpop.f32.mrb[36].mxu1 }
 0x1b9   : > { %v1405_v6 = vadd.f32 %v1396_v2, %v1287_v55  ;;  %v1398_v9 = vpop.f32.mrb[37].mxu1 }
 0x1ba   : > { %v1406_v3 = vadd.f32 %v1398_v9, %v1288_v57  ;;  %v1400_v10 = vpop.f32.mrb[38].mxu1 }
 0x1bb   : > { %v1401_v0 = vpop.f32.mrb[39].mxu1 }
 0x1bc   : > { %v1473_v11 = vpop.f32.mrb[40].mxu0 }
 0x1bd   : > { %v1521_v8 = vadd.f32 %v1473_v11, %v1403_v61  ;;  %v1475_v26 = vpop.f32.mrb[41].mxu0 }
 0x1be   : > { %v1522_v12 = vadd.f32 %v1475_v26, %v1404_v5  ;;  %v1477_v13 = vpop.f32.mrb[42].mxu0 }
 0x1bf   : > { %v1478_v14 = vpop.f32.mrb[43].mxu0 }
 0x1c0   : > { %v1514_v4 = vpop.f32.mrb[40].mxu1 }
 0x1c1   : > { %v1523_v15 = vadd.f32 %v1514_v4, %v1405_v6  ;;  %v1516_v16 = vpop.f32.mrb[41].mxu1 }
 0x1c2   : > { %v1524_v17 = vadd.f32 %v1516_v16, %v1406_v3  ;;  %v1518_v18 = vpop.f32.mrb[42].mxu1 }
 0x1c3   : > { %v1519_v19 = vpop.f32.mrb[43].mxu1 }
 0x1c8   : > { %v1591_v20 = vpop.f32.mrb[44].mxu0 }
 0x1c9   : > { %v1639_v21 = vadd.f32 %v1591_v20, %v1521_v8  ;;  %v1593_v22 = vpop.f32.mrb[45].mxu0 }
 0x1ca   : > { %v1640_v23 = vadd.f32 %v1593_v22, %v1522_v12  ;;  %v1595_v24 = vpop.f32.mrb[46].mxu0 }
 0x1cb   : > { %v1596_v25 = vpop.f32.mrb[47].mxu0 }
 0x1cc   : > { %v1632_v27 = vpop.f32.mrb[44].mxu1 }
 0x1cd   : > { %v1641_v28 = vadd.f32 %v1632_v27, %v1523_v15  ;;  %v1634_v29 = vpop.f32.mrb[45].mxu1 }
 0x1ce   : > { %v1642_v7 = vadd.f32 %v1634_v29, %v1524_v17  ;;  %v1636_v30 = vpop.f32.mrb[46].mxu1 }
 0x1cf   : > { %v1637_v31 = vpop.f32.mrb[47].mxu1 }
 0x1d0   : > { %v1709_v32 = vpop.f32.mrb[48].mxu0 }
 0x1d1   : > { %v1757_v33 = vadd.f32 %v1709_v32, %v1639_v21  ;;  %v1711_v34 = vpop.f32.mrb[49].mxu0 }
 0x1d2   : > { %v1758_v35 = vadd.f32 %v1711_v34, %v1640_v23  ;;  %v1713_v36 = vpop.f32.mrb[50].mxu0 }
 0x1d3   : > { %v1714_v37 = vpop.f32.mrb[51].mxu0 }
 0x1d4   : > { %v1750_v38 = vpop.f32.mrb[48].mxu1 }
 0x1d5   : > { %v1759_v39 = vadd.f32 %v1750_v38, %v1641_v28  ;;  %v1752_v40 = vpop.f32.mrb[49].mxu1 }
 0x1d6   : > { %v1760_v41 = vadd.f32 %v1752_v40, %v1642_v7  ;;  %v1754_v42 = vpop.f32.mrb[50].mxu1 }
 0x1d7   : > { %v1755_v43 = vpop.f32.mrb[51].mxu1 }
 0x1dc   : > { %v1827_v44 = vpop.f32.mrb[52].mxu0 }
 0x1dd   : > { %v1875_v45 = vadd.f32 %v1827_v44, %v1757_v33  ;;  %v1829_v46 = vpop.f32.mrb[53].mxu0 }
 0x1de   : > { %v1876_v47 = vadd.f32 %v1829_v46, %v1758_v35  ;;  %v1831_v48 = vpop.f32.mrb[54].mxu0 }
 0x1df   : > { %v1832_v49 = vpop.f32.mrb[55].mxu0 }
 0x1e0   : > { %v1868_v50 = vpop.f32.mrb[52].mxu1 }
 0x1e1   : > { %v1877_v51 = vadd.f32 %v1868_v50, %v1759_v39  ;;  %v1870_v52 = vpop.f32.mrb[53].mxu1 }
 0x1e2   : > { %v1878_v53 = vadd.f32 %v1870_v52, %v1760_v41  ;;  %v1872_v54 = vpop.f32.mrb[54].mxu1 }
 0x1e3   : > { %v1873_v55 = vpop.f32.mrb[55].mxu1 }
 0x1e4   : > { %v1945_v56 = vpop.f32.mrb[56].mxu0 }
 0x1e5   : > { %v1993_v57 = vadd.f32 %v1945_v56, %v1875_v45  ;;  %v1947_v58 = vpop.f32.mrb[57].mxu0 }
 0x1e6   : > { %v1994_v59 = vadd.f32 %v1947_v58, %v1876_v47  ;;  %v1949_v60 = vpop.f32.mrb[58].mxu0 }
 0x1e7   : > { %v1950_v61 = vpop.f32.mrb[59].mxu0 }
 0x1e8   : > { %v1986_v62 = vpop.f32.mrb[56].mxu1 }
 0x1e9   : > { %v1995_v5 = vadd.f32 %v1986_v62, %v1877_v51  ;;  %v1988_v63 = vpop.f32.mrb[57].mxu1 }
 0x1ea   : > { %v1996_v1 = vadd.f32 %v1988_v63, %v1878_v53  ;;  %v1990_v2 = vpop.f32.mrb[58].mxu1 }
 0x1eb   : > { %v1991_v6 = vpop.f32.mrb[59].mxu1 }
 0x1ef   : > { %v2063_v9 = vpop.f32.mrb[60].mxu0 }
 0x1f0   : > { %v2111_v3 = vadd.f32 %v2063_v9, %v1993_v57  ;;  %v2065_v10 = vpop.f32.mrb[61].mxu0 }
 0x1f1   : > { %v2112_v0 = vadd.f32 %v2065_v10, %v1994_v59  ;;  %v2067_v11 = vpop.f32.mrb[62].mxu0 }
 0x1f2   : > { %v2068_v8 = vpop.f32.mrb[63].mxu0 }
 0x1f3   : > { %v2104_v26 = vpop.f32.mrb[60].mxu1 }
 0x1f4   : > { %v2113_v12 = vadd.f32 %v2104_v26, %v1995_v5  ;;  %v2106_v13 = vpop.f32.mrb[61].mxu1 }
 0x1f5   : > { %v2114_v14 = vadd.f32 %v2106_v13, %v1996_v1  ;;  %v2108_v4 = vpop.f32.mrb[62].mxu1 }
 0x1f6   : > { %v2109_v15 = vpop.f32.mrb[63].mxu1 }
 0x1f7   : > { %v2181_v16 = vpop.f32.mrb[64].mxu0 }
 0x1f8   : > { %v2229_v17 = vadd.f32 %v2181_v16, %v2111_v3  ;;  %v2183_v18 = vpop.f32.mrb[65].mxu0 }
 0x1f9   : > { %v2230_v19 = vadd.f32 %v2183_v18, %v2112_v0  ;;  %v2185_v20 = vpop.f32.mrb[66].mxu0 }
 0x1fa   : > { %v2186_v21 = vpop.f32.mrb[67].mxu0 }
 0x1fb   : > { %v2222_v22 = vpop.f32.mrb[64].mxu1 }
 0x1fc   : > { %v2231_v23 = vadd.f32 %v2222_v22, %v2113_v12  ;;  %v2224_v24 = vpop.f32.mrb[65].mxu1 }
 0x1fd   : > { %v2232_v25 = vadd.f32 %v2224_v24, %v2114_v14  ;;  %v2226_v27 = vpop.f32.mrb[66].mxu1 }
 0x1fe   : > { %v2227_v28 = vpop.f32.mrb[67].mxu1 }
 0x203   : > { %v2299_v29 = vpop.f32.mrb[68].mxu0 }
 0x204   : > { %v2347_v7 = vadd.f32 %v2299_v29, %v2229_v17  ;;  %v2301_v30 = vpop.f32.mrb[69].mxu0 }
 0x205   : > { %v2348_v31 = vadd.f32 %v2301_v30, %v2230_v19  ;;  %v2303_v32 = vpop.f32.mrb[70].mxu0 }
 0x206   : > { %v2304_v33 = vpop.f32.mrb[71].mxu0 }
 0x207   : > { %v2340_v34 = vpop.f32.mrb[68].mxu1 }
 0x208   : > { %v2349_v35 = vadd.f32 %v2340_v34, %v2231_v23  ;;  %v2342_v36 = vpop.f32.mrb[69].mxu1 }
 0x209   : > { %v2350_v37 = vadd.f32 %v2342_v36, %v2232_v25  ;;  %v2344_v38 = vpop.f32.mrb[70].mxu1 }
 0x20a   : > { %v2345_v39 = vpop.f32.mrb[71].mxu1 }
 0x20b   : > { %v2417_v40 = vpop.f32.mrb[72].mxu0 }
 0x20c   : > { %v2465_v41 = vadd.f32 %v2417_v40, %v2347_v7  ;;  %v2419_v42 = vpop.f32.mrb[73].mxu0 }
 0x20d   : > { %v2466_v43 = vadd.f32 %v2419_v42, %v2348_v31  ;;  %v2421_v44 = vpop.f32.mrb[74].mxu0 }
 0x20e   : > { %v2422_v45 = vpop.f32.mrb[75].mxu0 }
 0x20f   : > { %v2458_v46 = vpop.f32.mrb[72].mxu1 }
 0x210   : > { %v2467_v47 = vadd.f32 %v2458_v46, %v2349_v35  ;;  %v2460_v48 = vpop.f32.mrb[73].mxu1 }
 0x211   : > { %v2468_v49 = vadd.f32 %v2460_v48, %v2350_v37  ;;  %v2462_v50 = vpop.f32.mrb[74].mxu1 }
 0x212   : > { %v2463_v51 = vpop.f32.mrb[75].mxu1 }
 0x217   : > { %v2535_v52 = vpop.f32.mrb[76].mxu0 }
 0x218   : > { %v2583_v53 = vadd.f32 %v2535_v52, %v2465_v41  ;;  %v2537_v54 = vpop.f32.mrb[77].mxu0 }
 0x219   : > { %v2584_v55 = vadd.f32 %v2537_v54, %v2466_v43  ;;  %v2539_v56 = vpop.f32.mrb[78].mxu0 }
 0x21a   : > { %v2540_v57 = vpop.f32.mrb[79].mxu0 }
 0x21b   : > { %v2576_v58 = vpop.f32.mrb[76].mxu1 }
 0x21c   : > { %v2585_v59 = vadd.f32 %v2576_v58, %v2467_v47  ;;  %v2578_v60 = vpop.f32.mrb[77].mxu1 }
 0x21d   : > { %v2586_v61 = vadd.f32 %v2578_v60, %v2468_v49  ;;  %v2580_v62 = vpop.f32.mrb[78].mxu1 }
 0x21e   : > { %v2581_v5 = vpop.f32.mrb[79].mxu1 }
 0x21f   : > { %v2653_v63 = vpop.f32.mrb[80].mxu0 }
 0x220   : > { %v2701_v1 = vadd.f32 %v2653_v63, %v2583_v53  ;;  %v2655_v2 = vpop.f32.mrb[81].mxu0 }
 0x221   : > { %v2702_v6 = vadd.f32 %v2655_v2, %v2584_v55  ;;  %v2657_v9 = vpop.f32.mrb[82].mxu0 }
 0x222   : > { %v2658_v3 = vpop.f32.mrb[83].mxu0 }
 0x223   : > { %v2694_v10 = vpop.f32.mrb[80].mxu1 }
 0x224   : > { %v2703_v0 = vadd.f32 %v2694_v10, %v2585_v59  ;;  %v2696_v11 = vpop.f32.mrb[81].mxu1 }
 0x225   : > { %v2704_v8 = vadd.f32 %v2696_v11, %v2586_v61  ;;  %v2698_v26 = vpop.f32.mrb[82].mxu1 }
 0x226   : > { %v2699_v12 = vpop.f32.mrb[83].mxu1 }
 0x22b   : > { %v2771_v13 = vpop.f32.mrb[84].mxu0 }
 0x22c   : > { %v2819_v14 = vadd.f32 %v2771_v13, %v2701_v1  ;;  %v2773_v4 = vpop.f32.mrb[85].mxu0 }
 0x22d   : > { %v2820_v15 = vadd.f32 %v2773_v4, %v2702_v6  ;;  %v2775_v16 = vpop.f32.mrb[86].mxu0 }
 0x22e   : > { %v2776_v17 = vpop.f32.mrb[87].mxu0 }
 0x22f   : > { %v2812_v18 = vpop.f32.mrb[84].mxu1 }
 0x230   : > { %v2821_v19 = vadd.f32 %v2812_v18, %v2703_v0  ;;  %v2814_v20 = vpop.f32.mrb[85].mxu1 }
 0x231   : > { %v2822_v21 = vadd.f32 %v2814_v20, %v2704_v8  ;;  %v2816_v22 = vpop.f32.mrb[86].mxu1  ;;  %v3417_v8 = vpop.permute.xlu0 %3416 }
 0x232   : > { %v2817_v23 = vpop.f32.mrb[87].mxu1 }
 0x233   : > { %v2889_v24 = vpop.f32.mrb[88].mxu0 }
 0x234   : > { %v2937_v25 = vadd.f32 %v2889_v24, %v2819_v14  ;;  %v2891_v27 = vpop.f32.mrb[89].mxu0 }
 0x235   : > { %v2938_v28 = vadd.f32 %v2891_v27, %v2820_v15  ;;  %v2893_v29 = vpop.f32.mrb[90].mxu0 }
 0x236   : > { %v2894_v7 = vpop.f32.mrb[91].mxu0 }
 0x237   : > { %v2930_v30 = vpop.f32.mrb[88].mxu1 }
 0x238   : > { %v2939_v31 = vadd.f32 %v2930_v30, %v2821_v19  ;;  %v2932_v32 = vpop.f32.mrb[89].mxu1 }
 0x239   : > { %v2940_v33 = vadd.f32 %v2932_v32, %v2822_v21  ;;  %v2934_v34 = vpop.f32.mrb[90].mxu1 }
 0x23a   : > { %v2935_v35 = vpop.f32.mrb[91].mxu1 }
 0x23f   : > { %v3007_v36 = vpop.f32.mrb[92].mxu0 }
 0x240   : > { %v3055_v37 = vadd.f32 %v3007_v36, %v2937_v25  ;;  %v3009_v38 = vpop.f32.mrb[93].mxu0 }
 0x241   : > { %v3056_v39 = vadd.f32 %v3009_v38, %v2938_v28  ;;  %v3011_v40 = vpop.f32.mrb[94].mxu0 }
 0x242   : > { %v3012_v41 = vpop.f32.mrb[95].mxu0 }
 0x243   : > { %v3048_v42 = vpop.f32.mrb[92].mxu1 }
 0x244   : > { %v3057_v43 = vadd.f32 %v3048_v42, %v2939_v31  ;;  %v3050_v44 = vpop.f32.mrb[93].mxu1 }
 0x245   : > { %v3058_v45 = vadd.f32 %v3050_v44, %v2940_v33  ;;  %v3052_v46 = vpop.f32.mrb[94].mxu1 }
 0x246   : > { %v3053_v47 = vpop.f32.mrb[95].mxu1 }
 0x247   : > { %v3125_v48 = vpop.f32.mrb[96].mxu0 }
 0x248   : > { %v3173_v49 = vadd.f32 %v3125_v48, %v3055_v37  ;;  %v3127_v50 = vpop.f32.mrb[97].mxu0 }
 0x249   : > { %v3174_v51 = vadd.f32 %v3127_v50, %v3056_v39  ;;  %v3129_v52 = vpop.f32.mrb[98].mxu0 }
 0x24a   : > { %v3130_v53 = vpop.f32.mrb[99].mxu0 }
 0x24b   : > { %v3166_v54 = vpop.f32.mrb[96].mxu1 }
 0x24c   : > { %v3175_v55 = vadd.f32 %v3166_v54, %v3057_v43  ;;  %v3168_v56 = vpop.f32.mrb[97].mxu1 }
 0x24d   : > { %v3176_v57 = vadd.f32 %v3168_v56, %v3058_v45  ;;  %v3170_v58 = vpop.f32.mrb[98].mxu1 }
 0x24e   : > { %v3171_v59 = vpop.f32.mrb[99].mxu1 }
 0x253   : > { %v3243_v60 = vpop.f32.mrb[100].mxu0 }
 0x254   : > { %v3291_v61 = vadd.f32 %v3243_v60, %v3173_v49  ;;  %v3245_v62 = vpop.f32.mrb[101].mxu0 }
 0x255   : > { %v3292_v5 = vadd.f32 %v3245_v62, %v3174_v51  ;;  %v3247_v63 = vpop.f32.mrb[102].mxu0 }
 0x256   : > { %v3248_v1 = vpop.f32.mrb[103].mxu0 }
 0x257   : > { %v3284_v2 = vpop.f32.mrb[100].mxu1 }
 0x258   : > { %v3293_v6 = vadd.f32 %v3284_v2, %v3175_v55  ;;  %v3286_v9 = vpop.f32.mrb[101].mxu1 }
 0x259   : > { %v3294_v3 = vadd.f32 %v3286_v9, %v3176_v57  ;;  %v3288_v10 = vpop.f32.mrb[102].mxu1 }
 0x25a   : > { %v3289_v0 = vpop.f32.mrb[103].mxu1 }
 0x25b   : > { %v3361_v11 = vpop.f32.mrb[104].mxu0 }
 0x25c   : > { %v3409_v26 = vadd.f32 %v3361_v11, %v3291_v61  ;;  %v3363_v12 = vpop.f32.mrb[105].mxu0 }
 0x25d   : > { %v3410_v13 = vadd.f32 %v3363_v12, %v3292_v5  ;;  %v3365_v14 = vpop.f32.mrb[106].mxu0 }
 0x25e   : > { %v3419_v4 = vadd.f32 %v3417_v8, %v3409_v26  ;;  %v3366_v15 = vpop.f32.mrb[107].mxu0 }
 0x25f   : > { %v3420_v16 = vadd.f32 %v3417_v8, %v3410_v13  ;;  %v3402_v17 = vpop.f32.mrb[104].mxu1 }
 0x260   : > { %v3423_v18 = vmax.f32 %v3419_v4, 0.0  ;;  %v3411_v19 = vadd.f32 %v3402_v17, %v3293_v6  ;;  %v3404_v20 = vpop.f32.mrb[105].mxu1 }
 0x261   : > { %v3424_v21 = vmax.f32 %v3420_v16, 0.0  ;;  %v3412_v22 = vadd.f32 %v3404_v20, %v3294_v3  ;;  %v3406_v23 = vpop.f32.mrb[106].mxu1 }
 0x262   : > { %3427 = vst [vmem:[%s228_s16] sm:$0xff] %v3423_v18  ;;  %v3421_v24 = vadd.f32 %v3417_v8, %v3411_v19  ;;  %v3407_v25 = vpop.f32.mrb[107].mxu1 }
 0x263   : > { %3428 = vst [vmem:[%s228_s16 + $0x8] sm:$0xff] %v3424_v21  ;;  %v3422_v27 = vadd.f32 %v3417_v8, %v3412_v22 }
 0x264   : > { %v3425_v28 = vmax.f32 %v3421_v24, 0.0 }
 0x265   : > { %v3426_v29 = vmax.f32 %v3422_v27, 0.0 }
 0x266   : > { %3429 = vst [vmem:[%s228_s16 + $0x10] sm:$0xff] %v3425_v28 }
 0x267   : > { %3430 = vst [vmem:[%s228_s16 + $0x18] sm:$0xff] %v3426_v29 }
 0x268 PF: > { %s14_s15 = sadd.s32 1, %s3702_s15  }
 0x269   : > { %p11_p6 = scmp.ge.s32.totalorder %s14_s15, 5  }
 0x26b   :  { %13 = sbr.rel (!%p11_p6) target bundleno = 1 (0x1), region = 95 }

// kernel: hourglass_forward.8
= control target key start
LH: loop header
LB: loop body
LE: loop exit
PB: predicated region body
PF: predicated region fallthrough
CT: control target
= control target key end

     0   :  { %s2597_s15 = smov 0   ;;  %s2599_s16 = smov 0   ;;  %s3186_s0 = inlined_call_operand.vmem [shape: bf16[64,384], index: 0, kind: input, shape index: {}, may-alias: {0,1}]   ;;  %s3187_s1 = inlined_call_operand.vmem [shape: bf16[64,384], index: 1, kind: input, shape index: {}, may-alias: {0,1}]   ;;  %s3188_s2 = inlined_call_operand.vmem [shape: bf16[27,8,64], index: 2, kind: input, shape index: {}]   ;;  %s3189_s3 = inlined_call_operand.vmem [shape: f32[8,1], index: 3, kind: input, shape index: {}]   ;;  %s3190_s4 = inlined_call_operand.vmem [shape: f32[8,256], index: 4, kind: output, shape index: {}]  }
   0x1   :  { %s2601_s17 = smov 0   ;;  %s2603_s18 = smov 0  }
   0x2   :  { %s2605_s19 = smov 0  }
   0x3 LB: > { %s1921_s20 = sadd.s32 4294967295, %s2560_s19   ;;  %s2624_s21 = sadd.s32 1, %s2560_s19   ;;  %s2560_s19 = sphi %s2605_s19, %s3196_s19   ;;  %s2556_s18 = sphi %s2603_s18, %s3195_s18   ;;  %s2552_s17 = sphi %s2601_s17, %s3194_s17   ;;  %s2548_s16 = sphi %s2599_s16, %s3193_s16   ;;  %s2544_s15 = sphi %s2597_s15, %s3192_s15  }
   0x4   : > { %s18_s22 = ssub.s32 %s2560_s19, %s2624_s21  ;;  %s21_s23 = sadd.s32 1, %s2556_s18 }
   0x5   : > { %p19_p0 = scmp.eq.s32.totalorder %s18_s22, 0  ;;  %p28_p1 = scmp.ne.s32.totalorder %s2556_s18, %s2552_s17 }
   0x6   : > { %p29_p2 = scmp.eq.s32.totalorder %s2560_s19, 0  ;;  %s45_s24 = sadd.s32 1, %s2624_s21 }
   0x7   : > { %s2634_s25 = scalar_select %p19_p0, %s2556_s18, %s21_s23  }
   0x8   : > { %p30_p3 = por %p29_p2, %p28_p1  ;;  %s46_s26 = ssub.s32 %s2624_s21, %s45_s24 }
   0x9   : > { %p47_p4 = scmp.eq.s32.totalorder %s46_s26, 0  ;;  %s49_s27 = sadd.s32 1, %s2548_s16 }
   0xa   : > { %p56_p5 = scmp.ne.s32.totalorder %s2548_s16, %s2544_s15  ;;  %p1924_p7 = scmp.ge.s32.totalorder %s2560_s19, 2 }
   0xb   : > { %s2641_s28 = scalar_select %p47_p4, %s2548_s16, %s49_s27  }
   0xc   : > { %p2643_p6 = por %p56_p5, %p29_p2  ;;  %156 = sbr.rel (%p1924_p7) target bundleno = 37 (0x25), region = 24 }
  0x13   : > { %159 = sbr.rel (!%p30_p3) target bundleno = 28 (0x1c), region = 28  ;;  %s161_s30 = sand.u32 (%p30_p3), 1, %s2556_s18  }
  0x14   : > { %s1926_s5 = sshll.u32 (%p30_p3), %s2560_s19, 2  ;;  %s1925_s6 = sshll.u32 (%p30_p3), %s161_s30, 5 }
  0x15   : > { %s165_s9 = scalar_lea.vmem (%p30_p3), %s3186_s0, %s1926_s5  ;;  %s163_s10 = scalar_lea.vmem (%p30_p3), [#allocation2], %s1925_s6 }
  0x16   : > { %v181_v0 = vld [vmem:[%s165_s9] sm:$0xf] (%p30_p3)  ;;  %v183_v1 = vld [vmem:[%s165_s9 + $0xc] sm:$0xf] (%p30_p3)  ;;  %v185_v2 = vld [vmem:[%s165_s9 + $0x18] sm:$0xf] (%p30_p3) }
  0x17   : > { %182 = vst [vmem:[%s163_s10] sm:$0xf] (%p30_p3), %v181_v0  ;;  %184 = vst [vmem:[%s163_s10 + $0x4] sm:$0xf] (%p30_p3), %v183_v1  ;;  %v187_v3 = vld [vmem:[%s165_s9 + $0x24] sm:$0xf] (%p30_p3) }
  0x18   : > { %v189_v4 = vld [vmem:[%s165_s9 + $0x30] sm:$0xf] (%p30_p3)  ;;  %186 = vst [vmem:[%s163_s10 + $0x8] sm:$0xf] (%p30_p3), %v185_v2  ;;  %188 = vst [vmem:[%s163_s10 + $0xc] sm:$0xf] (%p30_p3), %v187_v3 }
  0x19   : > { %190 = vst [vmem:[%s163_s10 + $0x10] sm:$0xf] (%p30_p3), %v189_v4  ;;  %v191_v5 = vld [vmem:[%s165_s9 + $0x3c] sm:$0xf] (%p30_p3)  ;;  %v193_v6 = vld [vmem:[%s165_s9 + $0x48] sm:$0xf] (%p30_p3) }
  0x1a   : > { %v195_v7 = vld [vmem:[%s165_s9 + $0x54] sm:$0xf]  ;;  %192 = vst [vmem:[%s163_s10 + $0x14] sm:$0xf] %v191_v5  ;;  %194 = vst [vmem:[%s163_s10 + $0x18] sm:$0xf] %v193_v6 }
  0x1b   : > { %196 = vst [vmem:[%s163_s10 + $0x1c] sm:$0xf] %v195_v7 }
  0x1c PF: > { %235 = sbr.rel (!%p2643_p6) target bundleno = 37 (0x25), region = 69  ;;  %s237_s11 = sand.u32 (%p2643_p6), 1, %s2548_s16  }
  0x1d   : > { %s1928_s12 = sshll.u32 (%p2643_p6), %s2560_s19, 2  ;;  %s1927_s13 = sshll.u32 (%p2643_p6), %s237_s11, 5 }
  0x1e   : > { %s1869_s23 = scalar_lea.vmem (%p2643_p6), %s3187_s1, %s1928_s12  ;;  %s239_s24 = scalar_lea.vmem (%p2643_p6), [#allocation3], %s1927_s13 }
  0x1f   : > { %v1929_v8 = vld [vmem:[%s1869_s23 + $0x4] sm:$0xf] (%p2643_p6)  ;;  %v1930_v9 = vld [vmem:[%s1869_s23 + $0x10] sm:$0xf] (%p2643_p6)  ;;  %v1931_v10 = vld [vmem:[%s1869_s23 + $0x1c] sm:$0xf] (%p2643_p6) }
  0x20   : > { %259 = vst [vmem:[%s239_s24] sm:$0xf] (%p2643_p6), %v1929_v8  ;;  %261 = vst [vmem:[%s239_s24 + $0x4] sm:$0xf] (%p2643_p6), %v1930_v9  ;;  %v1932_v11 = vld [vmem:[%s1869_s23 + $0x28] sm:$0xf] (%p2643_p6) }
  0x21   : > { %v1933_v12 = vld [vmem:[%s1869_s23 + $0x34] sm:$0xf] (%p2643_p6)  ;;  %263 = vst [vmem:[%s239_s24 + $0x8] sm:$0xf] (%p2643_p6), %v1931_v10  ;;  %265 = vst [vmem:[%s239_s24 + $0xc] sm:$0xf] (%p2643_p6), %v1932_v11 }
  0x22   : > { %267 = vst [vmem:[%s239_s24 + $0x10] sm:$0xf] (%p2643_p6), %v1933_v12  ;;  %v1934_v13 = vld [vmem:[%s1869_s23 + $0x40] sm:$0xf] (%p2643_p6)  ;;  %v1935_v14 = vld [vmem:[%s1869_s23 + $0x4c] sm:$0xf] (%p2643_p6) }
  0x23   : > { %v1936_v15 = vld [vmem:[%s1869_s23 + $0x58] sm:$0xf]  ;;  %269 = vst [vmem:[%s239_s24 + $0x14] sm:$0xf] %v1934_v13  ;;  %271 = vst [vmem:[%s239_s24 + $0x18] sm:$0xf] %v1935_v14 }
  0x24   : > { %273 = vst [vmem:[%s239_s24 + $0x1c] sm:$0xf] %v1936_v15 }
  0x25 PF: > { %p1937_p8 = scmp.ge.s32.totalorder %s2560_s19, 1  ;;  %p311_p9 = scmp.lt.s32.totalorder %s2560_s19, 3 }
  0x27   : > { %p312_p10 = pnand %p1937_p8, %p311_p9 }
  0x28   : > { %s318_s26 = sand.u32 (!%p312_p10), 1, %s2552_s17   ;;  %s325_s29 = sand.u32 (!%p312_p10), 1, %s2544_s15   ;;  %v2562_v16 = vmov (!%p312_p10), 0.0   ;;  %vm2563_vm0 = vmmov (!%p312_p10), 0   ;;  %v419_v25 = vld [vmem:[%s3188_s2] sm:$0xf] (!%p312_p10) }
  0x29   : > { %315 = sbr.rel (%p312_p10) target bundleno = 590 (0x24e), region = 110  ;;  %s1938_s27 = sshll.u32 (!%p312_p10), %s318_s26, 5  ;;  %2151 = vmatprep.subr.bf16.mxu1 (!%p312_p10), %v2562_v16  ;;  %2139 = vmatprep.subr.bf16.mxu0 (!%p312_p10), %v2562_v16  ;;  %vm422_vm1 = vcmask (!%p312_p10), 523264   ;;  %v1949_v26 = vld [vmem:[%s3188_s2 + $0x4] sm:$0xf] (!%p312_p10)  ;;  %vm527_vm2 = vcmask (!%p312_p10), 1039360  }
  0x2a   : > { %s1939_s30 = sshll.u32 (!%p312_p10), %s325_s29, 5  ;;  %2159 = vmatprep.mubr.msk.bf16.mxu1 (!%p312_p10), %vm2563_vm0, %v2562_v16  ;;  %2147 = vmatprep.mubr.msk.bf16.mxu0 (!%p312_p10), %vm2563_vm0, %v2562_v16  ;;  %s320_s5 = scalar_lea.vmem (!%p312_p10), [#allocation2], %s1938_s27  ;;  %v1954_v27 = vld [vmem:[%s3188_s2 + $0xc] sm:$0xf] (!%p312_p10)  ;;  %vm736_vm3 = vcmask (!%p312_p10), 1006592   ;;  %vm853_vm4 = vcmask (!%p312_p10), 998400  }
  0x2b   : > { %v2670_v17 = vld [vmem:[%s320_s5 + $0x8] sm:$0xff] (!%p312_p10)   ;;  %v2672_v18 = vld [vmem:[%s320_s5] sm:$0xff] (!%p312_p10)   ;;  %s2564_s17 = smov (!%p312_p10), 127   ;;  %s327_s15 = scalar_lea.vmem (!%p312_p10), [#allocation3], %s1939_s30  ;;  %v2688_v22 = vld [vmem:[%s320_s5 + $0x10] sm:$0xff] (!%p312_p10)   ;;  %vm1338_vm5 = vcmask (!%p312_p10), 842752  }
  0x2c   : > { %515 = vrot.lane.b32.xlu1 (!%p312_p10), %v2670_v17, %s2564_s17  ;;  %v2675_v19 = vld [vmem:[%s327_s15 + $0x8] sm:$0xff] (!%p312_p10)   ;;  %511 = vrot.lane.b32.xlu0 (!%p312_p10), %v2672_v18, %s2564_s17  ;;  %v2678_v20 = vld [vmem:[%s327_s15] sm:$0xff] (!%p312_p10)   ;;  %s2565_s10 = smov (!%p312_p10), 123   ;;  %s2566_s13 = smov (!%p312_p10), 122   ;;  %vm1455_vm6 = vcmask (!%p312_p10), 834560   ;;  %vm1664_vm7 = vcmask (!%p312_p10), 801792  }
  0x2d   : > { %2152 = vmatpush3.bf16.msra.mxu1 (!%p312_p10), %v2672_v18  ;;  %2140 = vmatpush3.bf16.msra.mxu0 (!%p312_p10), %v2672_v18  ;;  %v2685_v21 = vld [vmem:[%s327_s15 + $0x10] sm:$0xff] (!%p312_p10)   ;;  %v2695_v23 = vld [vmem:[%s327_s15 + $0x18] sm:$0xff] (!%p312_p10)   ;;  %s2567_s14 = smov (!%p312_p10), 103   ;;  %s2568_s22 = smov (!%p312_p10), 102   ;;  %v1952_v42 = vld [vmem:[%s3188_s2 + $0x8] sm:$0xf] (!%p312_p10) }
  0x2e   : > { %2153 = vmatprep.subr.bf16.mxu1 (!%p312_p10), %v2562_v16  ;;  %2141 = vmatprep.subr.bf16.mxu0 (!%p312_p10), %v2562_v16  ;;  %v2698_v24 = vld [vmem:[%s320_s5 + $0x18] sm:$0xff] (!%p312_p10)   ;;  %s2569_s23 = smov (!%p312_p10), 98   ;;  %s2570_s24 = smov (!%p312_p10), 97   ;;  %v1958_v43 = vld [vmem:[%s3188_s2 + $0x14] sm:$0xf] (!%p312_p10)  ;;  %vm1781_vm8 = vcmask (!%p312_p10), 793600  }
  0x2f   : > { %v1956_v54 = vld [vmem:[%s3188_s2 + $0x10] sm:$0xf] (!%p312_p10)  ;;  %v1962_v55 = vld [vmem:[%s3188_s2 + $0x1c] sm:$0xf] (!%p312_p10)  ;;  %v1960_v60 = vld [vmem:[%s3188_s2 + $0x18] sm:$0xf] (!%p312_p10) }
  0x30   : > { %517 = vrot.lane.b32.xlu1 %v2675_v19, %s2564_s17  ;;  %513 = vrot.lane.b32.xlu0 %v2678_v20, %s2564_s17  ;;  %v1966_v61 = vld [vmem:[%s3188_s2 + $0x24] sm:$0xf]  ;;  %v1964_v6 = vld [vmem:[%s3188_s2 + $0x20] sm:$0xf]  ;;  %p354_p11 = scmp.lt.s32.totalorder %s1921_s20, 1 }
  0x31   : > { %2154 = vmatpush3.bf16.msra.mxu1 %v2670_v17  ;;  %2142 = vmatpush3.bf16.msra.mxu0 %v2670_v17  ;;  %v1970_v7 = vld [vmem:[%s3188_s2 + $0x2c] sm:$0xf]  ;;  %v1968_v8 = vld [vmem:[%s3188_s2 + $0x28] sm:$0xf]  ;;  %v1974_v9 = vld [vmem:[%s3188_s2 + $0x34] sm:$0xf] }
  0x32   : > { %2155 = vmatprep.subr.bf16.mxu1 %v2562_v16  ;;  %2143 = vmatprep.subr.bf16.mxu0 %v2562_v16  ;;  %v1972_v10 = vld [vmem:[%s3188_s2 + $0x30] sm:$0xf]  ;;  %v1978_v11 = vld [vmem:[%s3188_s2 + $0x3c] sm:$0xf]  ;;  %s3198_s20 = smov (!%p354_p11, %s1921_s20), 1 }
  0x33   : > { %s1940_s11 = sshll.u32 %s3198_s20, 3 }
  0x34   : > { %521 = vrot.lane.b32.xlu1 %v2685_v21, %s2564_s17  ;;  %519 = vrot.lane.b32.xlu0 %v2688_v22, %s2564_s17 }
  0x35   : > { %2156 = vmatpush3.bf16.msra.mxu1 %v2688_v22  ;;  %2144 = vmatpush3.bf16.msra.mxu0 %v2688_v22 }
  0x36   : > { %2157 = vmatprep.subr.bf16.mxu1 %v2562_v16  ;;  %2145 = vmatprep.subr.bf16.mxu0 %v2562_v16 }
  0x38   : > { %525 = vrot.lane.b32.xlu1 %v2695_v23, %s2564_s17  ;;  %523 = vrot.lane.b32.xlu0 %v2698_v24, %s2564_s17 }
  0x39   : > { %2158 = vmatpush3.bf16.msra.mxu1 %v2698_v24  ;;  %2146 = vmatpush3.bf16.msra.mxu0 %v2698_v24 }
  0x3a   : > { %2175 = vmatprep.subr.bf16.mxu1 %v2562_v16  ;;  %2163 = vmatprep.subr.bf16.mxu0 %v2562_v16 }
  0x3c   : > { %722 = vrot.lane.b32.xlu1 %v2678_v20, %s2565_s10  ;;  %2160 = vmatmul.mubr.msk.bf16.vlgmr.msra.gmra.mrb[0].mxu1 %vm422_vm1, %v419_v25 }
  0x3d   : > { %720 = vrot.lane.b32.xlu0 %v2672_v18, %s2565_s10  ;;  %2176 = vmatpush3.bf16.msra.mxu1 %v2672_v18 }
  0x3e   : > { %2177 = vmatprep.subr.bf16.mxu1 %v2562_v16  ;;  %2148 = vmatmul.mubr.msk.bf16.vlgmr.msra.gmra.mrb[0].mxu0 %vm422_vm1, %v1949_v26 }
  0x3f   : > { %2183 = vmatprep.mubr.msk.bf16.mxu1 %vm2563_vm0, %v2562_v16  ;;  %2171 = vmatprep.mubr.msk.bf16.mxu0 %vm2563_vm0, %v2562_v16 }
  0x40   : > { %726 = vrot.lane.b32.xlu1 %v2675_v19, %s2565_s10 }
  0x41   : > { %724 = vrot.lane.b32.xlu0 %v2670_v17, %s2565_s10  ;;  %2178 = vmatpush3.bf16.msra.mxu1 %v2670_v17 }
  0x42   : > { %2179 = vmatprep.subr.bf16.mxu1 %v2562_v16 }
  0x44   : > { %730 = vrot.lane.b32.xlu1 %v2685_v21, %s2565_s10 }
  0x45   : > { %728 = vrot.lane.b32.xlu0 %v2688_v22, %s2565_s10  ;;  %2180 = vmatpush3.bf16.msra.mxu1 %v2688_v22 }
  0x46   : > { %2181 = vmatprep.subr.bf16.mxu1 %v2562_v16 }
  0x48   : > { %734 = vrot.lane.b32.xlu1 %v2695_v23, %s2565_s10 }
  0x49   : > { %732 = vrot.lane.b32.xlu0 %v2698_v24, %s2565_s10  ;;  %2182 = vmatpush3.bf16.msra.mxu1 %v2698_v24 }
  0x4a   : > { %2199 = vmatprep.subr.bf16.mxu1 %v2562_v16 }
  0x4c   : > { %839 = vrot.lane.b32.xlu1 %v2678_v20, %s2566_s13  ;;  %2184 = vmatmul.mubr.msk.bf16.vlgmr.msra.gmra.mrb[4].mxu1 %vm422_vm1, %v1954_v27 }
  0x4d   : > { %837 = vrot.lane.b32.xlu0 %v2672_v18, %s2566_s13  ;;  %2207 = vmatprep.mubr.msk.bf16.mxu1 %vm2563_vm0, %v2562_v16 }
  0x50   : > { %843 = vrot.lane.b32.xlu1 %v2675_v19, %s2566_s13 }
  0x51   : > { %841 = vrot.lane.b32.xlu0 %v2670_v17, %s2566_s13 }
  0x54   : > { %847 = vrot.lane.b32.xlu1 %v2685_v21, %s2566_s13 }
  0x55   : > { %845 = vrot.lane.b32.xlu0 %v2688_v22, %s2566_s13 }
  0x58   : > { %851 = vrot.lane.b32.xlu1 %v2695_v23, %s2566_s13 }
  0x59   : > { %849 = vrot.lane.b32.xlu0 %v2698_v24, %s2566_s13 }
  0x5c   : > { %1324 = vrot.lane.b32.xlu1 %v2678_v20, %s2567_s14 }
  0x5d   : > { %1322 = vrot.lane.b32.xlu0 %v2672_v18, %s2567_s14 }
  0x60   : > { %1328 = vrot.lane.b32.xlu1 %v2675_v19, %s2567_s14 }
  0x61   : > { %1326 = vrot.lane.b32.xlu0 %v2670_v17, %s2567_s14 }
  0x64   : > { %1332 = vrot.lane.b32.xlu1 %v2685_v21, %s2567_s14 }
  0x65   : > { %1330 = vrot.lane.b32.xlu0 %v2688_v22, %s2567_s14 }
  0x68   : > { %1336 = vrot.lane.b32.xlu1 %v2695_v23, %s2567_s14 }
  0x69   : > { %1334 = vrot.lane.b32.xlu0 %v2698_v24, %s2567_s14  ;;  %s357_s14 = scalar_lea.vmem %s3190_s4, %s1940_s11 }
  0x6c   : > { %1441 = vrot.lane.b32.xlu1 %v2678_v20, %s2568_s22 }
  0x6d   : > { %1439 = vrot.lane.b32.xlu0 %v2672_v18, %s2568_s22 }
  0x70   : > { %1445 = vrot.lane.b32.xlu1 %v2675_v19, %s2568_s22 }
  0x71   : > { %1443 = vrot.lane.b32.xlu0 %v2670_v17, %s2568_s22 }
  0x74   : > { %1449 = vrot.lane.b32.xlu1 %v2685_v21, %s2568_s22 }
  0x75   : > { %1447 = vrot.lane.b32.xlu0 %v2688_v22, %s2568_s22 }
  0x78   : > { %1453 = vrot.lane.b32.xlu1 %v2695_v23, %s2568_s22 }
  0x79   : > { %1451 = vrot.lane.b32.xlu0 %v2698_v24, %s2568_s22 }
  0x7c   : > { %1650 = vrot.lane.b32.xlu1 %v2678_v20, %s2569_s23 }
  0x7d   : > { %1648 = vrot.lane.b32.xlu0 %v2672_v18, %s2569_s23 }
  0x80   : > { %1654 = vrot.lane.b32.xlu1 %v2675_v19, %s2569_s23 }
  0x81   : > { %1652 = vrot.lane.b32.xlu0 %v2670_v17, %s2569_s23 }
  0x84   : > { %1658 = vrot.lane.b32.xlu1 %v2685_v21, %s2569_s23 }
  0x85   : > { %1656 = vrot.lane.b32.xlu0 %v2688_v22, %s2569_s23 }
  0x88   : > { %1662 = vrot.lane.b32.xlu1 %v2695_v23, %s2569_s23 }
  0x89   : > { %1660 = vrot.lane.b32.xlu0 %v2698_v24, %s2569_s23 }
  0x8c   : > { %1767 = vrot.lane.b32.xlu1 %v2678_v20, %s2570_s24  ;;  %v1982_v20 = vld [vmem:[%s3188_s2 + $0x44] sm:$0xf] }
  0x8d   : > { %1765 = vrot.lane.b32.xlu0 %v2672_v18, %s2570_s24 }
  0x90   : > { %1771 = vrot.lane.b32.xlu1 %v2675_v19, %s2570_s24  ;;  %v1976_v19 = vld [vmem:[%s3188_s2 + $0x38] sm:$0xf] }
  0x91   : > { %1769 = vrot.lane.b32.xlu0 %v2670_v17, %s2570_s24 }
  0x94   : > { %1775 = vrot.lane.b32.xlu1 %v2685_v21, %s2570_s24 }
  0x95   : > { %1773 = vrot.lane.b32.xlu0 %v2688_v22, %s2570_s24 }
  0x98   : > { %1779 = vrot.lane.b32.xlu1 %v2695_v23, %s2570_s24 }
  0x99   : > { %1777 = vrot.lane.b32.xlu0 %v2698_v24, %s2570_s24 }
  0x9e   : > { %v516_v28 = vpop.permute.xlu1 %515  ;;  %v512_v29 = vpop.permute.xlu0 %511 }
  0xa2   : > { %v518_v30 = vpop.permute.xlu1 %517  ;;  %v514_v31 = vpop.permute.xlu0 %513 }
  0xa3   : > { %v2785_v32 = vsel %vm527_vm2, %v512_v29, %v514_v31  ;;  %v2792_v35 = vsel %vm527_vm2, %v516_v28, %v518_v30 }
  0xa4   : > { %2164 = vmatpush3.bf16.msra.mxu0 %v2785_v32  ;;  %2200 = vmatpush3.bf16.msra.mxu1 %v2785_v32 }
  0xa5   : > { %2165 = vmatprep.subr.bf16.mxu0 %v2562_v16  ;;  %2201 = vmatprep.subr.bf16.mxu1 %v2562_v16 }
  0xa6   : > { %v522_v33 = vpop.permute.xlu1 %521  ;;  %v520_v34 = vpop.permute.xlu0 %519 }
  0xa7   : > { %v2797_v36 = vsel %vm527_vm2, %v520_v34, %v522_v33 }
  0xa8   : > { %2166 = vmatpush3.bf16.msra.mxu0 %v2792_v35  ;;  %2202 = vmatpush3.bf16.msra.mxu1 %v2792_v35 }
  0xa9   : > { %2167 = vmatprep.subr.bf16.mxu0 %v2562_v16  ;;  %2203 = vmatprep.subr.bf16.mxu1 %v2562_v16 }
  0xaa   : > { %v526_v37 = vpop.permute.xlu1 %525  ;;  %v524_v38 = vpop.permute.xlu0 %523 }
  0xab   : > { %v2804_v39 = vsel %vm527_vm2, %v524_v38, %v526_v37  ;;  %v1980_v38 = vld [vmem:[%s3188_s2 + $0x40] sm:$0xf] }
  0xac   : > { %2168 = vmatpush3.bf16.msra.mxu0 %v2797_v36  ;;  %2204 = vmatpush3.bf16.msra.mxu1 %v2797_v36 }
  0xad   : > { %2169 = vmatprep.subr.bf16.mxu0 %v2562_v16  ;;  %2205 = vmatprep.subr.bf16.mxu1 %v2562_v16 }
  0xae   : > { %v723_v40 = vpop.permute.xlu1 %722 }
  0xaf   : > { %v721_v41 = vpop.permute.xlu0 %720 }
  0xb0   : > { %2170 = vmatpush3.bf16.msra.mxu0 %v2804_v39  ;;  %2206 = vmatpush3.bf16.msra.mxu1 %v2804_v39  ;;  %v2817_v44 = vsel %vm736_vm3, %v721_v41, %v723_v40 }
  0xb1   : > { %2187 = vmatprep.subr.bf16.mxu0 %v2562_v16  ;;  %2223 = vmatprep.subr.bf16.mxu1 %v2562_v16 }
  0xb2   : > { %v727_v45 = vpop.permute.xlu1 %726 }
  0xb3   : > { %v725_v46 = vpop.permute.xlu0 %724  ;;  %2172 = vmatmul.mubr.msk.bf16.vlgmr.msra.gmra.mrb[4].mxu0 %vm422_vm1, %v1952_v42  ;;  %2208 = vmatmul.mubr.msk.bf16.vlgmr.msra.gmra.mrb[8].mxu1 %vm422_vm1, %v1958_v43 }
  0xb4   : > { %2188 = vmatpush3.bf16.msra.mxu0 %v2672_v18  ;;  %2224 = vmatpush3.bf16.msra.mxu1 %v2817_v44  ;;  %v2826_v47 = vsel %vm736_vm3, %v725_v46, %v727_v45 }
  0xb5   : > { %2189 = vmatprep.subr.bf16.mxu0 %v2562_v16  ;;  %2225 = vmatprep.subr.bf16.mxu1 %v2562_v16 }
  0xb6   : > { %v731_v48 = vpop.permute.xlu1 %730  ;;  %2195 = vmatprep.mubr.msk.bf16.mxu0 %vm2563_vm0, %v2562_v16  ;;  %2231 = vmatprep.mubr.msk.bf16.mxu1 %vm2563_vm0, %v2562_v16 }
  0xb7   : > { %v729_v49 = vpop.permute.xlu0 %728 }
  0xb8   : > { %2190 = vmatpush3.bf16.msra.mxu0 %v2670_v17  ;;  %2226 = vmatpush3.bf16.msra.mxu1 %v2826_v47  ;;  %v2837_v50 = vsel %vm736_vm3, %v729_v49, %v731_v48  ;;  %v1984_v48 = vld [vmem:[%s3188_s2 + $0x48] sm:$0xf]  ;;  %v1990_v49 = vld [vmem:[%s3188_s2 + $0x54] sm:$0xf] }
  0xb9   : > { %2191 = vmatprep.subr.bf16.mxu0 %v2562_v16  ;;  %2227 = vmatprep.subr.bf16.mxu1 %v2562_v16 }
  0xba   : > { %v735_v51 = vpop.permute.xlu1 %734 }
  0xbb   : > { %v733_v52 = vpop.permute.xlu0 %732 }
  0xbc   : > { %2192 = vmatpush3.bf16.msra.mxu0 %v2688_v22  ;;  %2228 = vmatpush3.bf16.msra.mxu1 %v2837_v50  ;;  %v2844_v53 = vsel %vm736_vm3, %v733_v52, %v735_v51 }
  0xbd   : > { %2193 = vmatprep.subr.bf16.mxu0 %v2562_v16  ;;  %2229 = vmatprep.subr.bf16.mxu1 %v2562_v16 }
  0xbe   : > { %v840_v56 = vpop.permute.xlu1 %839 }
  0xbf   : > { %v838_v57 = vpop.permute.xlu0 %837 }
  0xc0   : > { %2194 = vmatpush3.bf16.msra.mxu0 %v2698_v24  ;;  %2230 = vmatpush3.bf16.msra.mxu1 %v2844_v53  ;;  %v2885_v62 = vsel %vm853_vm4, %v838_v57, %v840_v56 }
  0xc1   : > { %2211 = vmatprep.subr.bf16.mxu0 %v2562_v16  ;;  %2247 = vmatprep.subr.bf16.mxu1 %v2562_v16 }
  0xc2   : > { %v844_v58 = vpop.permute.xlu1 %843 }
  0xc3   : > { %2196 = vmatmul.mubr.msk.bf16.vlgmr.msra.gmra.mrb[8].mxu0 %vm422_vm1, %v1956_v54  ;;  %2232 = vmatmul.mubr.msk.bf16.vlgmr.msra.gmra.mrb[12].mxu1 %vm422_vm1, %v1962_v55  ;;  %v842_v59 = vpop.permute.xlu0 %841 }
  0xc4   : > { %2212 = vmatpush3.bf16.msra.mxu0 %v2817_v44  ;;  %2248 = vmatpush3.bf16.msra.mxu1 %v2672_v18  ;;  %v2894_v1 = vsel %vm853_vm4, %v842_v59, %v844_v58 }
  0xc5   : > { %2213 = vmatprep.subr.bf16.mxu0 %v2562_v16  ;;  %2249 = vmatprep.subr.bf16.mxu1 %v2562_v16 }
  0xc6   : > { %2219 = vmatprep.mubr.msk.bf16.mxu0 %vm2563_vm0, %v2562_v16  ;;  %2255 = vmatprep.mubr.msk.bf16.mxu1 %vm2563_vm0, %v2562_v16  ;;  %v848_v63 = vpop.permute.xlu1 %847 }
  0xc7   : > { %v846_v0 = vpop.permute.xlu0 %845 }
  0xc8   : > { %2214 = vmatpush3.bf16.msra.mxu0 %v2826_v47  ;;  %2250 = vmatpush3.bf16.msra.mxu1 %v2670_v17  ;;  %v2905_v2 = vsel %vm853_vm4, %v846_v0, %v848_v63 }
  0xc9   : > { %2215 = vmatprep.subr.bf16.mxu0 %v2562_v16  ;;  %2251 = vmatprep.subr.bf16.mxu1 %v2562_v16 }
  0xca   : > { %v852_v3 = vpop.permute.xlu1 %851 }
  0xcb   : > { %v850_v4 = vpop.permute.xlu0 %849 }
  0xcc   : > { %2216 = vmatpush3.bf16.msra.mxu0 %v2837_v50  ;;  %2252 = vmatpush3.bf16.msra.mxu1 %v2688_v22  ;;  %v2912_v5 = vsel %vm853_vm4, %v850_v4, %v852_v3  ;;  %v1834_v3 = vld [vmem:[%s3189_s3] sm:$0xff] }
  0xcd   : > { %2217 = vmatprep.subr.bf16.mxu0 %v2562_v16  ;;  %2253 = vmatprep.subr.bf16.mxu1 %v2562_v16 }
  0xce   : > { %v1325_v12 = vpop.permute.xlu1 %1324 }
  0xcf   : > { %v1323_v13 = vpop.permute.xlu0 %1322 }
  0xd0   : > { %2218 = vmatpush3.bf16.msra.mxu0 %v2844_v53  ;;  %2254 = vmatpush3.bf16.msra.mxu1 %v2698_v24  ;;  %v3009_v23 = vsel %vm1338_vm5, %v1323_v13, %v1325_v12 }
  0xd1   : > { %2235 = vmatprep.subr.bf16.mxu0 %v2562_v16  ;;  %2271 = vmatprep.subr.bf16.mxu1 %v2562_v16 }
  0xd2   : > { %v1329_v14 = vpop.permute.xlu1 %1328 }
  0xd3   : > { %2220 = vmatmul.mubr.msk.bf16.vlgmr.msra.gmra.mrb[12].mxu0 %vm422_vm1, %v1960_v60  ;;  %2256 = vmatmul.mubr.msk.bf16.vlgmr.msra.gmra.mrb[16].mxu1 %vm422_vm1, %v1966_v61  ;;  %v1327_v15 = vpop.permute.xlu0 %1326  ;;  %v1988_v60 = vld [vmem:[%s3188_s2 + $0x50] sm:$0xf]  ;;  %v1994_v61 = vld [vmem:[%s3188_s2 + $0x5c] sm:$0xf] }
  0xd4   : > { %2236 = vmatpush3.bf16.msra.mxu0 %v2885_v62  ;;  %2272 = vmatpush3.bf16.msra.mxu1 %v2785_v32  ;;  %v3020_v31 = vsel %vm1338_vm5, %v1327_v15, %v1329_v14  ;;  %v1996_v14 = vld [vmem:[%s3188_s2 + $0x60] sm:$0xf] }
  0xd5   : > { %2237 = vmatprep.subr.bf16.mxu0 %v2562_v16  ;;  %2273 = vmatprep.subr.bf16.mxu1 %v2562_v16 }
  0xd6   : > { %2243 = vmatprep.mubr.msk.bf16.mxu0 %vm2563_vm0, %v2562_v16  ;;  %2279 = vmatprep.mubr.msk.bf16.mxu1 %vm2563_vm0, %v2562_v16  ;;  %v1333_v29 = vpop.permute.xlu1 %1332 }
  0xd7   : > { %v1331_v30 = vpop.permute.xlu0 %1330 }
  0xd8   : > { %2238 = vmatpush3.bf16.msra.mxu0 %v2894_v1  ;;  %2274 = vmatpush3.bf16.msra.mxu1 %v2792_v35 }
  0xd9   : > { %2239 = vmatprep.subr.bf16.mxu0 %v2562_v16  ;;  %2275 = vmatprep.subr.bf16.mxu1 %v2562_v16 }
  0xda   : > { %v1337_v33 = vpop.permute.xlu1 %1336 }
  0xdb   : > { %v1335_v34 = vpop.permute.xlu0 %1334 }
  0xdc   : > { %2240 = vmatpush3.bf16.msra.mxu0 %v2905_v2  ;;  %2276 = vmatpush3.bf16.msra.mxu1 %v2797_v36 }
  0xdd   : > { %2241 = vmatprep.subr.bf16.mxu0 %v2562_v16  ;;  %2277 = vmatprep.subr.bf16.mxu1 %v2562_v16 }
  0xde   : > { %v1442_v42 = vpop.permute.xlu1 %1441 }
  0xdf   : > { %v1440_v43 = vpop.permute.xlu0 %1439 }
  0xe0   : > { %2242 = vmatpush3.bf16.msra.mxu0 %v2912_v5  ;;  %2278 = vmatpush3.bf16.msra.mxu1 %v2804_v39 }
  0xe1   : > { %2259 = vmatprep.subr.bf16.mxu0 %v2562_v16  ;;  %2295 = vmatprep.subr.bf16.mxu1 %v2562_v16 }
  0xe3   : > { %2244 = vmatmul.mubr.msk.bf16.vlgmr.msra.gmra.mrb[16].mxu0 %vm422_vm1, %v1964_v6  ;;  %2280 = vmatmul.mubr.msk.bf16.vlgmr.msra.gmra.mrb[20].mxu1 %vm422_vm1, %v1970_v7  ;;  %v1444_v45 = vpop.permute.xlu0 %1443 }
  0xe4   : > { %2260 = vmatpush3.bf16.msra.mxu0 %v2672_v18  ;;  %2296 = vmatpush3.bf16.msra.mxu1 %v2672_v18 }
  0xe5   : > { %2261 = vmatprep.subr.bf16.mxu0 %v2562_v16  ;;  %2297 = vmatprep.subr.bf16.mxu1 %v2562_v16 }
  0xe6   : > { %2267 = vmatprep.mubr.msk.bf16.mxu0 %vm2563_vm0, %v2562_v16  ;;  %2303 = vmatprep.mubr.msk.bf16.mxu1 %vm2563_vm0, %v2562_v16 }
  0xe8   : > { %2262 = vmatpush3.bf16.msra.mxu0 %v2670_v17  ;;  %2298 = vmatpush3.bf16.msra.mxu1 %v2670_v17 }
  0xe9   : > { %2263 = vmatprep.subr.bf16.mxu0 %v2562_v16  ;;  %2299 = vmatprep.subr.bf16.mxu1 %v2562_v16 }
  0xec   : > { %2264 = vmatpush3.bf16.msra.mxu0 %v2688_v22  ;;  %2300 = vmatpush3.bf16.msra.mxu1 %v2688_v22 }
  0xed   : > { %2265 = vmatprep.subr.bf16.mxu0 %v2562_v16  ;;  %2301 = vmatprep.subr.bf16.mxu1 %v2562_v16 }
  0xf0   : > { %2266 = vmatpush3.bf16.msra.mxu0 %v2698_v24  ;;  %2302 = vmatpush3.bf16.msra.mxu1 %v2698_v24 }
  0xf1   : > { %2283 = vmatprep.subr.bf16.mxu0 %v2562_v16  ;;  %2319 = vmatprep.subr.bf16.mxu1 %v2562_v16 }
  0xf3   : > { %2268 = vmatmul.mubr.msk.bf16.vlgmr.msra.gmra.mrb[20].mxu0 %vm422_vm1, %v1968_v8  ;;  %2304 = vmatmul.mubr.msk.bf16.vlgmr.msra.gmra.mrb[24].mxu1 %vm422_vm1, %v1974_v9  ;;  %v1992_v8 = vld [vmem:[%s3188_s2 + $0x58] sm:$0xf]  ;;  %v1998_v9 = vld [vmem:[%s3188_s2 + $0x64] sm:$0xf] }
  0xf4   : > { %2284 = vmatpush3.bf16.msra.mxu0 %v2672_v18  ;;  %2320 = vmatpush3.bf16.msra.mxu1 %v2817_v44 }
  0xf5   : > { %2285 = vmatprep.subr.bf16.mxu0 %v2562_v16  ;;  %2321 = vmatprep.subr.bf16.mxu1 %v2562_v16 }
  0xf6   : > { %2291 = vmatprep.mubr.msk.bf16.mxu0 %vm2563_vm0, %v2562_v16  ;;  %2327 = vmatprep.mubr.msk.bf16.mxu1 %vm2563_vm0, %v2562_v16 }
  0xf8   : > { %2286 = vmatpush3.bf16.msra.mxu0 %v2670_v17  ;;  %2322 = vmatpush3.bf16.msra.mxu1 %v2826_v47 }
  0xf9   : > { %2287 = vmatprep.subr.bf16.mxu0 %v2562_v16  ;;  %2323 = vmatprep.subr.bf16.mxu1 %v2562_v16 }
  0xfc   : > { %2288 = vmatpush3.bf16.msra.mxu0 %v2688_v22  ;;  %2324 = vmatpush3.bf16.msra.mxu1 %v2837_v50 }
  0xfd   : > { %2289 = vmatprep.subr.bf16.mxu0 %v2562_v16  ;;  %2325 = vmatprep.subr.bf16.mxu1 %v2562_v16 }
 0x100   : > { %2290 = vmatpush3.bf16.msra.mxu0 %v2698_v24  ;;  %2326 = vmatpush3.bf16.msra.mxu1 %v2844_v53 }
 0x101   : > { %2307 = vmatprep.subr.bf16.mxu0 %v2562_v16  ;;  %2343 = vmatprep.subr.bf16.mxu1 %v2562_v16 }
 0x103   : > { %2292 = vmatmul.mubr.msk.bf16.vlgmr.msra.gmra.mrb[24].mxu0 %vm422_vm1, %v1972_v10  ;;  %2328 = vmatmul.mubr.msk.bf16.vlgmr.msra.gmra.mrb[28].mxu1 %vm422_vm1, %v1978_v11 }
 0x104   : > { %2308 = vmatpush3.bf16.msra.mxu0 %v2785_v32  ;;  %2344 = vmatpush3.bf16.msra.mxu1 %v2885_v62  ;;  %v3031_v32 = vsel %vm1338_vm5, %v1331_v30, %v1333_v29 }
 0x105   : > { %2309 = vmatprep.subr.bf16.mxu0 %v2562_v16  ;;  %2345 = vmatprep.subr.bf16.mxu1 %v2562_v16 }
 0x106   : > { %2315 = vmatprep.mubr.msk.bf16.mxu0 %vm2563_vm0, %v2562_v16  ;;  %2351 = vmatprep.mubr.msk.bf16.mxu1 %vm2563_vm0, %v2562_v16 }
 0x108   : > { %2310 = vmatpush3.bf16.msra.mxu0 %v2792_v35  ;;  %2346 = vmatpush3.bf16.msra.mxu1 %v2894_v1  ;;  %v3038_v35 = vsel %vm1338_vm5, %v1335_v34, %v1337_v33 }
 0x109   : > { %2311 = vmatprep.subr.bf16.mxu0 %v2562_v16  ;;  %2347 = vmatprep.subr.bf16.mxu1 %v2562_v16 }
 0x10c   : > { %2312 = vmatpush3.bf16.msra.mxu0 %v2797_v36  ;;  %2348 = vmatpush3.bf16.msra.mxu1 %v2905_v2  ;;  %v2571_v2 = vmov 0  }
 0x10d   : > { %2313 = vmatprep.subr.bf16.mxu0 %v2562_v16  ;;  %2349 = vmatprep.subr.bf16.mxu1 %v2562_v16 }
 0x10e   : > { %2513 = vset.pattern.permute.xlu0 %v2571_v2 }
 0x10f   : > { %v503_v17 = vpop.f32.mrb[0].mxu1  ;;  %1837 = vperm.xlu0 %2513, %v1834_v3  }
 0x110   : > { %v2161_v18 = vpop.f32.mrb[1].mxu1  ;;  %2314 = vmatpush3.bf16.msra.mxu0 %v2804_v39  ;;  %2350 = vmatpush3.bf16.msra.mxu1 %v2912_v5  ;;  %v1986_v39 = vld [vmem:[%s3188_s2 + $0x4c] sm:$0xf] }
 0x111   : > { %v460_v21 = vpop.f32.mrb[0].mxu0  ;;  %v506_v22 = vpop.f32.mrb[2].mxu1  ;;  %2331 = vmatprep.subr.bf16.mxu0 %v2562_v16  ;;  %2367 = vmatprep.subr.bf16.mxu1 %v2562_v16 }
 0x112   : > { %v2149_v24 = vpop.f32.mrb[1].mxu0  ;;  %v3013_v25 = vadd.f32 %v503_v17, %v460_v21  ;;  %v2162_v26 = vpop.f32.mrb[3].mxu1 }
 0x113   : > { %v463_v27 = vpop.f32.mrb[2].mxu0  ;;  %2316 = vmatmul.mubr.msk.bf16.vlgmr.msra.gmra.mrb[28].mxu0 %vm422_vm1, %v1976_v19  ;;  %2352 = vmatmul.mubr.msk.bf16.vlgmr.msra.gmra.mrb[32].mxu1 %vm422_vm1, %v1982_v20  ;;  %v2000_v24 = vld [vmem:[%s3188_s2 + $0x68] sm:$0xf] }
 0x114   : > { %v2150_v28 = vpop.f32.mrb[3].mxu0  ;;  %2332 = vmatpush3.bf16.msra.mxu0 %v2817_v44  ;;  %2368 = vmatpush3.bf16.msra.mxu1 %v3009_v23  ;;  %v1446_v44 = vpop.permute.xlu1 %1445 }
 0x115   : > { %2333 = vmatprep.subr.bf16.mxu0 %v2562_v16  ;;  %2369 = vmatprep.subr.bf16.mxu1 %v2562_v16  ;;  %v1457_v51 = vsel %vm1455_vm6, %v1444_v45, %v1446_v44 }
 0x116   : > { %2339 = vmatprep.mubr.msk.bf16.mxu0 %vm2563_vm0, %v2562_v16  ;;  %2375 = vmatprep.mubr.msk.bf16.mxu1 %vm2563_vm0, %v2562_v16 }
 0x118   : > { %2334 = vmatpush3.bf16.msra.mxu0 %v2826_v47  ;;  %2370 = vmatpush3.bf16.msra.mxu1 %v3020_v31  ;;  %v1450_v46 = vpop.permute.xlu1 %1449  ;;  %v1448_v47 = vpop.permute.xlu0 %1447 }
 0x119   : > { %2335 = vmatprep.subr.bf16.mxu0 %v2562_v16  ;;  %2371 = vmatprep.subr.bf16.mxu1 %v2562_v16  ;;  %v1458_v54 = vsel %vm1455_vm6, %v1448_v47, %v1450_v46 }
 0x11c   : > { %2336 = vmatpush3.bf16.msra.mxu0 %v2837_v50  ;;  %2372 = vmatpush3.bf16.msra.mxu1 %v3031_v32  ;;  %v1456_v50 = vsel %vm1455_vm6, %v1440_v43, %v1442_v42  ;;  %v1454_v52 = vpop.permute.xlu1 %1453 }
 0x11d   : > { %2337 = vmatprep.subr.bf16.mxu0 %v2562_v16  ;;  %2373 = vmatprep.subr.bf16.mxu1 %v2562_v16 }
 0x11f   : > { %v3042_v36 = vpop.f32.mrb[4].mxu1 }
 0x120   : > { %v2185_v37 = vpop.f32.mrb[5].mxu1  ;;  %2338 = vmatpush3.bf16.msra.mxu0 %v2844_v53  ;;  %2374 = vmatpush3.bf16.msra.mxu1 %v3038_v35  ;;  %v1452_v53 = vpop.permute.xlu0 %1451 }
 0x121   : > { %v622_v40 = vpop.f32.mrb[6].mxu1  ;;  %2355 = vmatprep.subr.bf16.mxu0 %v2562_v16  ;;  %2391 = vmatprep.subr.bf16.mxu1 %v2562_v16  ;;  %v1651_v55 = vpop.permute.xlu1 %1650  ;;  %v1459_v57 = vsel %vm1455_vm6, %v1452_v53, %v1454_v52 }
 0x122   : > { %v2186_v41 = vpop.f32.mrb[7].mxu1 }
 0x123   : > { %2340 = vmatmul.mubr.msk.bf16.vlgmr.msra.gmra.mrb[32].mxu0 %vm422_vm1, %v1980_v38  ;;  %2376 = vmatmul.mubr.msk.bf16.vlgmr.msra.gmra.mrb[36].mxu1 %vm422_vm1, %v1986_v39 }
 0x124   : > { %2356 = vmatpush3.bf16.msra.mxu0 %v3009_v23  ;;  %2392 = vmatpush3.bf16.msra.mxu1 %v3009_v23  ;;  %v1649_v56 = vpop.permute.xlu0 %1648 }
 0x125   : > { %2357 = vmatprep.subr.bf16.mxu0 %v2562_v16  ;;  %2393 = vmatprep.subr.bf16.mxu1 %v2562_v16  ;;  %v1655_v58 = vpop.permute.xlu1 %1654  ;;  %v1665_v62 = vsel %vm1664_vm7, %v1649_v56, %v1651_v55 }
 0x126   : > { %2363 = vmatprep.mubr.msk.bf16.mxu0 %vm2563_vm0, %v2562_v16  ;;  %2399 = vmatprep.mubr.msk.bf16.mxu1 %vm2563_vm0, %v2562_v16 }
 0x128   : > { %2358 = vmatpush3.bf16.msra.mxu0 %v3020_v31  ;;  %2394 = vmatpush3.bf16.msra.mxu1 %v3020_v31  ;;  %v1653_v59 = vpop.permute.xlu0 %1652 }
 0x129   : > { %2359 = vmatprep.subr.bf16.mxu0 %v2562_v16  ;;  %2395 = vmatprep.subr.bf16.mxu1 %v2562_v16  ;;  %v1659_v63 = vpop.permute.xlu1 %1658  ;;  %v1666_v1 = vsel %vm1664_vm7, %v1653_v59, %v1655_v58 }
 0x12c   : > { %2360 = vmatpush3.bf16.msra.mxu0 %v3031_v32  ;;  %2396 = vmatpush3.bf16.msra.mxu1 %v3031_v32  ;;  %v1657_v0 = vpop.permute.xlu0 %1656 }
 0x12d   : > { %2361 = vmatprep.subr.bf16.mxu0 %v2562_v16  ;;  %2397 = vmatprep.subr.bf16.mxu1 %v2562_v16  ;;  %v1667_v4 = vsel %vm1664_vm7, %v1657_v0, %v1659_v63  ;;  %v1663_v5 = vpop.permute.xlu1 %1662 }
 0x130   : > { %2362 = vmatpush3.bf16.msra.mxu0 %v3038_v35  ;;  %2398 = vmatpush3.bf16.msra.mxu1 %v3038_v35  ;;  %v1661_v6 = vpop.permute.xlu0 %1660 }
 0x131   : > { %2379 = vmatprep.subr.bf16.mxu0 %v2562_v16  ;;  %2415 = vmatprep.subr.bf16.mxu1 %v2562_v16  ;;  %v1668_v7 = vsel %vm1664_vm7, %v1661_v6, %v1663_v5  ;;  %v1768_v10 = vpop.permute.xlu1 %1767 }
 0x133   : > { %2364 = vmatmul.mubr.msk.bf16.vlgmr.msra.gmra.mrb[36].mxu0 %vm422_vm1, %v1984_v48  ;;  %2400 = vmatmul.mubr.msk.bf16.vlgmr.msra.gmra.mrb[40].mxu1 %vm422_vm1, %v1990_v49 }
 0x134   : > { %2380 = vmatpush3.bf16.msra.mxu0 %v1456_v50  ;;  %2416 = vmatpush3.bf16.msra.mxu1 %v1456_v50  ;;  %v1766_v11 = vpop.permute.xlu0 %1765 }
 0x135   : > { %2381 = vmatprep.subr.bf16.mxu0 %v2562_v16  ;;  %2417 = vmatprep.subr.bf16.mxu1 %v2562_v16  ;;  %v1772_v12 = vpop.permute.xlu1 %1771  ;;  %v1782_v15 = vsel %vm1781_vm8, %v1766_v11, %v1768_v10 }
 0x136   : > { %2387 = vmatprep.mubr.msk.bf16.mxu0 %vm2563_vm0, %v2562_v16  ;;  %2423 = vmatprep.mubr.msk.bf16.mxu1 %vm2563_vm0, %v2562_v16 }
 0x138   : > { %2382 = vmatpush3.bf16.msra.mxu0 %v1457_v51  ;;  %2418 = vmatpush3.bf16.msra.mxu1 %v1457_v51  ;;  %v1770_v13 = vpop.permute.xlu0 %1769 }
 0x139   : > { %2383 = vmatprep.subr.bf16.mxu0 %v2562_v16  ;;  %2419 = vmatprep.subr.bf16.mxu1 %v2562_v16  ;;  %v1776_v17 = vpop.permute.xlu1 %1775  ;;  %v1783_v19 = vsel %vm1781_vm8, %v1770_v13, %v1772_v12 }
 0x13c   : > { %2384 = vmatpush3.bf16.msra.mxu0 %v1458_v54  ;;  %2420 = vmatpush3.bf16.msra.mxu1 %v1458_v54  ;;  %v1774_v18 = vpop.permute.xlu0 %1773 }
 0x13d   : > { %2385 = vmatprep.subr.bf16.mxu0 %v2562_v16  ;;  %2421 = vmatprep.subr.bf16.mxu1 %v2562_v16  ;;  %v1784_v20 = vsel %vm1781_vm8, %v1774_v18, %v1776_v17  ;;  %v1780_v21 = vpop.permute.xlu1 %1779 }
 0x140   : > { %2386 = vmatpush3.bf16.msra.mxu0 %v1459_v57  ;;  %2422 = vmatpush3.bf16.msra.mxu1 %v1459_v57  ;;  %v1778_v22 = vpop.permute.xlu0 %1777 }
 0x141   : > { %2403 = vmatprep.subr.bf16.mxu0 %v2562_v16  ;;  %2439 = vmatprep.subr.bf16.mxu1 %v2562_v16 }
 0x143   : > { %2388 = vmatmul.mubr.msk.bf16.vlgmr.msra.gmra.mrb[40].mxu0 %vm422_vm1, %v1988_v60  ;;  %2424 = vmatmul.mubr.msk.bf16.vlgmr.msra.gmra.mrb[44].mxu1 %vm422_vm1, %v1994_v61 }
 0x144   : > { %2404 = vmatpush3.bf16.msra.mxu0 %v3009_v23  ;;  %2411 = vmatprep.mubr.msk.bf16.mxu0 %vm2563_vm0, %v2562_v16  ;;  %v1785_v23 = vsel %vm1781_vm8, %v1778_v22, %v1780_v21 }
 0x145   : > { %2405 = vmatprep.subr.bf16.mxu0 %v2562_v16  ;;  %2440 = vmatpush3.bf16.msra.mxu1 %v1665_v62 }
 0x146   : > { %2441 = vmatprep.subr.bf16.mxu1 %v2562_v16  ;;  %2447 = vmatprep.mubr.msk.bf16.mxu1 %vm2563_vm0, %v2562_v16 }
 0x148   : > { %2406 = vmatpush3.bf16.msra.mxu0 %v3020_v31 }
 0x149   : > { %2407 = vmatprep.subr.bf16.mxu0 %v2562_v16  ;;  %2442 = vmatpush3.bf16.msra.mxu1 %v1666_v1 }
 0x14a   : > { %2443 = vmatprep.subr.bf16.mxu1 %v2562_v16 }
 0x14c   : > { %2408 = vmatpush3.bf16.msra.mxu0 %v3031_v32 }
 0x14d   : > { %2409 = vmatprep.subr.bf16.mxu0 %v2562_v16  ;;  %2444 = vmatpush3.bf16.msra.mxu1 %v1667_v4 }
 0x14e   : > { %2445 = vmatprep.subr.bf16.mxu1 %v2562_v16 }
 0x150   : > { %2410 = vmatpush3.bf16.msra.mxu0 %v3038_v35 }
 0x151   : > { %2427 = vmatprep.subr.bf16.mxu0 %v2562_v16  ;;  %2446 = vmatpush3.bf16.msra.mxu1 %v1668_v7 }
 0x153   : > { %2412 = vmatmul.mubr.msk.bf16.vlgmr.msra.gmra.mrb[44].mxu0 %vm422_vm1, %v1992_v8 }
 0x154   : > { %2428 = vmatpush3.bf16.msra.mxu0 %v1665_v62  ;;  %2435 = vmatprep.mubr.msk.bf16.mxu0 %vm2563_vm0, %v2562_v16 }
 0x155   : > { %2429 = vmatprep.subr.bf16.mxu0 %v2562_v16  ;;  %2448 = vmatmul.mubr.msk.bf16.vlgmr.msra.gmra.mrb[48].mxu1 %vm422_vm1, %v1998_v9 }
 0x158   : > { %2430 = vmatpush3.bf16.msra.mxu0 %v1666_v1 }
 0x159   : > { %2431 = vmatprep.subr.bf16.mxu0 %v2562_v16 }
 0x15c   : > { %2432 = vmatpush3.bf16.msra.mxu0 %v1667_v4 }
 0x15d   : > { %2433 = vmatprep.subr.bf16.mxu0 %v2562_v16 }
 0x160   : > { %2434 = vmatpush3.bf16.msra.mxu0 %v1668_v7 }
 0x161   : > { %2451 = vmatprep.subr.bf16.mxu0 %v2562_v16 }
 0x163   : > { %2436 = vmatmul.mubr.msk.bf16.vlgmr.msra.gmra.mrb[48].mxu0 %vm422_vm1, %v1996_v14 }
 0x164   : > { %2452 = vmatpush3.bf16.msra.mxu0 %v1782_v15  ;;  %2459 = vmatprep.mubr.msk.bf16.mxu0 %vm2563_vm0, %v2562_v16 }
 0x165   : > { %2453 = vmatprep.subr.bf16.mxu0 %v2562_v16 }
 0x168   : > { %2454 = vmatpush3.bf16.msra.mxu0 %v1783_v19 }
 0x169   : > { %2455 = vmatprep.subr.bf16.mxu0 %v2562_v16 }
 0x16c   : > { %2456 = vmatpush3.bf16.msra.mxu0 %v1784_v20 }
 0x16d   : > { %2457 = vmatprep.subr.bf16.mxu0 %v2562_v16 }
 0x170   : > { %2458 = vmatpush3.bf16.msra.mxu0 %v1785_v23 }
 0x173   : > { %2460 = vmatmul.mubr.msk.bf16.vlgmr.msra.gmra.mrb[52].mxu0 %vm422_vm1, %v2000_v24 }
 0x186   : > { %v573_v26 = vpop.f32.mrb[4].mxu0  ;;  %v711_v27 = vpop.f32.mrb[8].mxu1 }
 0x187   : > { %v579_v28 = vadd.f32 %v573_v26, %v3013_v25  ;;  %v2173_v29 = vpop.f32.mrb[5].mxu0  ;;  %v2209_v30 = vpop.f32.mrb[9].mxu1 }
 0x188   : > { %v576_v31 = vpop.f32.mrb[6].mxu0  ;;  %v714_v32 = vpop.f32.mrb[10].mxu1 }
 0x189   : > { %v625_v33 = vadd.f32 %v3042_v36, %v579_v28  ;;  %v2174_v34 = vpop.f32.mrb[7].mxu0  ;;  %v2210_v35 = vpop.f32.mrb[11].mxu1 }
 0x196   : > { %v665_v16 = vpop.f32.mrb[8].mxu0  ;;  %v828_v37 = vpop.f32.mrb[12].mxu1 }
 0x197   : > { %v671_v38 = vadd.f32 %v665_v16, %v625_v33  ;;  %v2197_v39 = vpop.f32.mrb[9].mxu0  ;;  %v2233_v40 = vpop.f32.mrb[13].mxu1 }
 0x198   : > { %v668_v41 = vpop.f32.mrb[10].mxu0  ;;  %v831_v42 = vpop.f32.mrb[14].mxu1 }
 0x199   : > { %v717_v43 = vadd.f32 %v711_v27, %v671_v38  ;;  %v2198_v44 = vpop.f32.mrb[11].mxu0  ;;  %v2234_v45 = vpop.f32.mrb[15].mxu1 }
 0x1a6   : > { %v782_v46 = vpop.f32.mrb[12].mxu0  ;;  %v945_v25 = vpop.f32.mrb[16].mxu1 }
 0x1a7   : > { %v788_v47 = vadd.f32 %v782_v46, %v717_v43  ;;  %v2221_v48 = vpop.f32.mrb[13].mxu0  ;;  %v2257_v49 = vpop.f32.mrb[17].mxu1 }
 0x1a8   : > { %v785_v50 = vpop.f32.mrb[14].mxu0  ;;  %v948_v51 = vpop.f32.mrb[18].mxu1 }
 0x1a9   : > { %v834_v36 = vadd.f32 %v828_v37, %v788_v47  ;;  %v2222_v52 = vpop.f32.mrb[15].mxu0  ;;  %v2258_v53 = vpop.f32.mrb[19].mxu1 }
 0x1b6   : > { %v899_v54 = vpop.f32.mrb[16].mxu0  ;;  %v1037_v55 = vpop.f32.mrb[20].mxu1 }
 0x1b7   : > { %v905_v56 = vadd.f32 %v899_v54, %v834_v36  ;;  %v2245_v57 = vpop.f32.mrb[17].mxu0  ;;  %v2281_v58 = vpop.f32.mrb[21].mxu1 }
 0x1b8   : > { %v902_v59 = vpop.f32.mrb[18].mxu0  ;;  %v1040_v60 = vpop.f32.mrb[22].mxu1 }
 0x1b9   : > { %v951_v61 = vadd.f32 %v945_v25, %v905_v56  ;;  %v2246_v62 = vpop.f32.mrb[19].mxu0  ;;  %v2282_v63 = vpop.f32.mrb[23].mxu1 }
 0x1c6   : > { %v991_v0 = vpop.f32.mrb[20].mxu0  ;;  %v1129_v1 = vpop.f32.mrb[24].mxu1 }
 0x1c7   : > { %v997_v2 = vadd.f32 %v991_v0, %v951_v61  ;;  %v2269_v3 = vpop.f32.mrb[21].mxu0  ;;  %v2305_v4 = vpop.f32.mrb[25].mxu1 }
 0x1c8   : > { %v994_v5 = vpop.f32.mrb[22].mxu0  ;;  %v1132_v6 = vpop.f32.mrb[26].mxu1 }
 0x1c9   : > { %v1043_v7 = vadd.f32 %v1037_v55, %v997_v2  ;;  %v2270_v8 = vpop.f32.mrb[23].mxu0  ;;  %v2306_v9 = vpop.f32.mrb[27].mxu1 }
 0x1d6   : > { %v1083_v10 = vpop.f32.mrb[24].mxu0  ;;  %v1221_v11 = vpop.f32.mrb[28].mxu1 }
 0x1d7   : > { %v1089_v12 = vadd.f32 %v1083_v10, %v1043_v7  ;;  %v2293_v13 = vpop.f32.mrb[25].mxu0  ;;  %v2329_v14 = vpop.f32.mrb[29].mxu1 }
 0x1d8   : > { %v1086_v15 = vpop.f32.mrb[26].mxu0  ;;  %v1224_v17 = vpop.f32.mrb[30].mxu1 }
 0x1d9   : > { %v1135_v18 = vadd.f32 %v1129_v1, %v1089_v12  ;;  %v2294_v19 = vpop.f32.mrb[27].mxu0  ;;  %v2330_v20 = vpop.f32.mrb[31].mxu1 }
 0x1da   : > { %v1838_v13 = vpop.permute.xlu0 %1837 }
 0x1e6   : > { %v1175_v21 = vpop.f32.mrb[28].mxu0  ;;  %v1313_v22 = vpop.f32.mrb[32].mxu1 }
 0x1e7   : > { %v1181_v23 = vadd.f32 %v1175_v21, %v1135_v18  ;;  %v2317_v24 = vpop.f32.mrb[29].mxu0  ;;  %v2353_v26 = vpop.f32.mrb[33].mxu1 }
 0x1e8   : > { %v1178_v27 = vpop.f32.mrb[30].mxu0  ;;  %v1316_v28 = vpop.f32.mrb[34].mxu1 }
 0x1e9   : > { %v1227_v29 = vadd.f32 %v1221_v11, %v1181_v23  ;;  %v2318_v30 = vpop.f32.mrb[31].mxu0  ;;  %v2354_v31 = vpop.f32.mrb[35].mxu1 }
 0x1f6   : > { %v1267_v32 = vpop.f32.mrb[32].mxu0  ;;  %v1430_v33 = vpop.f32.mrb[36].mxu1 }
 0x1f7   : > { %v1273_v34 = vadd.f32 %v1267_v32, %v1227_v29  ;;  %v2341_v35 = vpop.f32.mrb[33].mxu0  ;;  %v2377_v16 = vpop.f32.mrb[37].mxu1 }
 0x1f8   : > { %v1270_v37 = vpop.f32.mrb[34].mxu0  ;;  %v1433_v38 = vpop.f32.mrb[38].mxu1 }
 0x1f9   : > { %v1319_v39 = vadd.f32 %v1313_v22, %v1273_v34  ;;  %v2342_v40 = vpop.f32.mrb[35].mxu0  ;;  %v2378_v41 = vpop.f32.mrb[39].mxu1 }
 0x206   : > { %v1384_v42 = vpop.f32.mrb[36].mxu0  ;;  %v1547_v43 = vpop.f32.mrb[40].mxu1 }
 0x207   : > { %v1390_v44 = vadd.f32 %v1384_v42, %v1319_v39  ;;  %v2365_v45 = vpop.f32.mrb[37].mxu0  ;;  %v2401_v46 = vpop.f32.mrb[41].mxu1 }
 0x208   : > { %v1387_v25 = vpop.f32.mrb[38].mxu0  ;;  %v1550_v47 = vpop.f32.mrb[42].mxu1 }
 0x209   : > { %v1436_v48 = vadd.f32 %v1430_v33, %v1390_v44  ;;  %v2366_v49 = vpop.f32.mrb[39].mxu0  ;;  %v2402_v50 = vpop.f32.mrb[43].mxu1 }
 0x216   : > { %v1501_v51 = vpop.f32.mrb[40].mxu0  ;;  %v1639_v36 = vpop.f32.mrb[44].mxu1 }
 0x217   : > { %v1507_v52 = vadd.f32 %v1501_v51, %v1436_v48  ;;  %v2389_v53 = vpop.f32.mrb[41].mxu0  ;;  %v2425_v54 = vpop.f32.mrb[45].mxu1 }
 0x218   : > { %v1504_v55 = vpop.f32.mrb[42].mxu0  ;;  %v1642_v56 = vpop.f32.mrb[46].mxu1 }
 0x219   : > { %v1553_v57 = vadd.f32 %v1547_v43, %v1507_v52  ;;  %v2390_v58 = vpop.f32.mrb[43].mxu0  ;;  %v2426_v59 = vpop.f32.mrb[47].mxu1 }
 0x226   : > { %v1593_v60 = vpop.f32.mrb[44].mxu0 }
 0x227   : > { %v1599_v61 = vadd.f32 %v1593_v60, %v1553_v57  ;;  %v2413_v62 = vpop.f32.mrb[45].mxu0 }
 0x228   : > { %v1596_v63 = vpop.f32.mrb[46].mxu0  ;;  %v1756_v0 = vpop.f32.mrb[48].mxu1 }
 0x229   : > { %v1645_v1 = vadd.f32 %v1639_v36, %v1599_v61  ;;  %v2414_v2 = vpop.f32.mrb[47].mxu0  ;;  %v2449_v3 = vpop.f32.mrb[49].mxu1 }
 0x22a   : > { %v1759_v4 = vpop.f32.mrb[50].mxu1 }
 0x22b   : > { %v2450_v5 = vpop.f32.mrb[51].mxu1 }
 0x236   : > { %v1710_v6 = vpop.f32.mrb[48].mxu0 }
 0x237   : > { %v1716_v7 = vadd.f32 %v1710_v6, %v1645_v1  ;;  %v2437_v8 = vpop.f32.mrb[49].mxu0 }
 0x238   : > { %v1713_v9 = vpop.f32.mrb[50].mxu0 }
 0x239   : > { %v1762_v10 = vadd.f32 %v1756_v0, %v1716_v7  ;;  %v2438_v11 = vpop.f32.mrb[51].mxu0 }
 0x246   : > { %v1827_v12 = vpop.f32.mrb[52].mxu0 }
 0x247   : > { %v1833_v14 = vadd.f32 %v1827_v12, %v1762_v10  ;;  %v2461_v15 = vpop.f32.mrb[53].mxu0 }
 0x248   : > { %v1830_v17 = vpop.f32.mrb[54].mxu0 }
 0x249   : > { %v1840_v18 = vadd.f32 %v1838_v13, %v1833_v14  ;;  %v2462_v19 = vpop.f32.mrb[55].mxu0 }
 0x24b   : > { %v1841_v20 = vmax.f32 %v1840_v18, 0.0 }
 0x24d   : > { %1842 = vst [vmem:[%s357_s14] sm:$0xff] %v1841_v20 }
 0x24e PF: > { %p11_p12 = scmp.ge.s32.totalorder %s2624_s21, 4   ;;  %s3192_s15 = smov %s2548_s16 }
 0x24f   : > { %s3193_s16 = smov %s2641_s28  ;;  %s3194_s17 = smov %s2556_s18 }
 0x250   : > { %s3195_s18 = smov %s2634_s25  ;;  %s3196_s19 = smov %s2624_s21 }
 0x251   :  { %13 = sbr.rel (!%p11_p12) target bundleno = 3 (0x3), region = 187 }

// kernel: hourglass_forward.9
= control target key start
LH: loop header
LB: loop body
LE: loop exit
PB: predicated region body
PF: predicated region fallthrough
CT: control target
= control target key end

     0   :  { %s2207_s15 = smov 0   ;;  %s2519_s0 = inlined_call_operand.vmem [shape: bf16[8,768], index: 0, kind: input, shape index: {}, may-alias: {0,1}]   ;;  %s2520_s1 = inlined_call_operand.vmem [shape: bf16[8,768], index: 1, kind: input, shape index: {}, may-alias: {0,1}]   ;;  %s2521_s2 = inlined_call_operand.vmem [shape: bf16[27,8,8], index: 2, kind: input, shape index: {}]   ;;  %s2522_s3 = inlined_call_operand.vmem [shape: f32[8,1], index: 3, kind: input, shape index: {}]   ;;  %s2523_s4 = inlined_call_operand.vmem [shape: f32[8,512], index: 4, kind: output, shape index: {}]  }
   0x1 LB: > { %s2010_s16 = sadd.s32 4294967295, %s2153_s15   ;;  %p2014_p0 = scmp.ge.s32.totalorder %s2153_s15, 1  ;;  %s2153_s15 = sphi %s2207_s15, %s14_s15  }
   0x2   : > { %p178_p1 = scmp.lt.s32.totalorder %s2153_s15, 3 }
   0x4   : > { %p179_p2 = pnand %p2014_p0, %p178_p1 }
   0x5   : > { %s2215_s17 = sshll.u32 (!%p179_p2), %s2010_s16, 1  ;;  %v2155_v1 = vmov (!%p179_p2), 0   ;;  %vm257_vm0 = vcmask (!%p179_p2), 1043456   ;;  %s2156_s25 = smov (!%p179_p2), 126   ;;  %vm253_vm1 = vcmask (!%p179_p2), 64512   ;;  %vm250_vm2 = vcmask (!%p179_p2), 1039360  }
   0x6   : > { %182 = sbr.rel (%p179_p2) target bundleno = 512 (0x200), region = 36  ;;  %p211_p3 = scmp.lt.s32.totalorder (!%p179_p2), %s2215_s17, 5  ;;  %296 = vmatprep.mubr.bf16.mxu0 (!%p179_p2), %v2155_v1  ;;  %346 = vmatprep.mubr.bf16.mxu1 (!%p179_p2), %v2155_v1  ;;  %v241_v6 = vld [vmem:[%s2521_s2] sm:$0xf] (!%p179_p2)  ;;  %vm363_vm3 = vcmask (!%p179_p2), 1031168   ;;  %vm426_vm4 = vcmask (!%p179_p2), 998400  }
   0x7   : > { %s2107_s18 = sadd.s32 (!%p179_p2), 2, %s2215_s17  ;;  %2143 = vset.pattern.permute.xlu0 (!%p179_p2), %v2155_v1  ;;  %s2157_s26 = smov (!%p179_p2), 127   ;;  %v2024_v16 = vld [vmem:[%s2521_s2 + $0x4] sm:$0xf] (!%p179_p2)  ;;  %v2029_v25 = vld [vmem:[%s2521_s2 + $0x8] sm:$0xf] (!%p179_p2) }
   0x8   : > { %p218_p4 = scmp.lt.s32.totalorder (!%p179_p2), %s2107_s18, 5  ;;  %s2158_s6 = smov (!%p179_p2), 122   ;;  %vm489_vm5 = vcmask (!%p179_p2), 990208   ;;  %v2032_v30 = vld [vmem:[%s2521_s2 + $0xc] sm:$0xf] (!%p179_p2)  ;;  %vm552_vm6 = vcmask (!%p179_p2), 982016  }
   0x9   : > { %s2159_s7 = smov (!%p179_p2), 121   ;;  %s2160_s8 = smov (!%p179_p2), 120   ;;  %v2035_v36 = vld [vmem:[%s2521_s2 + $0x10] sm:$0xf] (!%p179_p2)  ;;  %vm615_vm7 = vcmask (!%p179_p2), 949248   ;;  %vm678_vm8 = vcmask (!%p179_p2), 941056  }
   0xa   : > { %s2161_s9 = smov (!%p179_p2), 116   ;;  %s2162_s10 = smov (!%p179_p2), 115   ;;  %v2038_v44 = vld [vmem:[%s2521_s2 + $0x14] sm:$0xf] (!%p179_p2)  ;;  %v2041_v50 = vld [vmem:[%s2521_s2 + $0x18] sm:$0xf] (!%p179_p2) }
   0xb   : > { %s2163_s11 = smov (!%p179_p2), 114   ;;  %s2164_s12 = smov (!%p179_p2), 92   ;;  %v1930_v52 = vld [vmem:[%s2522_s3] sm:$0xff] (!%p179_p2)  ;;  %vm741_vm9 = vcmask (!%p179_p2), 932864   ;;  %v2044_v57 = vld [vmem:[%s2521_s2 + $0x1c] sm:$0xf] (!%p179_p2) }
   0xc   : > { %s2165_s13 = smov (!%p179_p2), 91   ;;  %s2166_s14 = smov (!%p179_p2), 90   ;;  %v2047_v63 = vld [vmem:[%s2521_s2 + $0x20] sm:$0xf] (!%p179_p2)  ;;  %vm804_vm10 = vcmask (!%p179_p2), 752640   ;;  %vm867_vm11 = vcmask (!%p179_p2), 744448  }
   0xd   : > { %s212_s19 = scalar_select %p211_p3, %s2215_s17, 5  ;;  %vm930_vm12 = vcmask 736256   ;;  %vm993_vm13 = vcmask 703488   ;;  %vm1056_vm14 = vcmask 695296   ;;  %vm1119_vm15 = vcmask 687104  }
   0xe   : > { %s2525_s18 = smov (!%p218_p4, %s2107_s18), 5  ;;  %s2167_s16 = smov 86  }
   0xf   : > { %s2016_s20 = sshll.u32 %s212_s19, 2  ;;  %s2018_s24 = sshll.u32 %s2525_s18, 2 }
  0x10   : > { %s214_s23 = scalar_lea.vmem %s2519_s0, %s2016_s20  ;;  %s221_s29 = scalar_lea.vmem %s2520_s1, %s2018_s24 }
  0x11   : > { %v231_v0 = vld [vmem:[%s214_s23] sm:$0xff]  ;;  %s2168_s18 = smov 85   ;;  %s2169_s19 = smov 84  }
  0x12   : > { %v2225_v2 = vcombine.low %v231_v0, %v231_v0  ;;  %v2228_v3 = vcombine.high %v231_v0, %v231_v0  ;;  %v2237_v5 = vld [vmem:[%s221_s29] ss:$0 sps:$4 sm:$0xff]   ;;  %s2170_s20 = smov 80   ;;  %s2171_s21 = smov 79  }
  0x13   : > { %s2172_s22 = smov 78   ;;  %s2173_s23 = smov 56  }
  0x14   : > { %357 = vrot.lane.b32.xlu1 %v2225_v2, %s2156_s25  ;;  %244 = vrot.lane.b32.xlu0 %v2225_v2, %s2157_s26  ;;  %v309_v4 = vsel %vm257_vm0, %v2225_v2, 0  ;;  %s2174_s24 = smov 55   ;;  %s2177_s29 = smov 49  }
  0x15   : > { %2027 = vmatprep.subr.msk.bf16.mxu1 %vm257_vm0, %v2228_v3  ;;  %p225_p5 = scmp.lt.s32.totalorder %s2215_s17, 3 }
  0x16   : > { %315 = vmatpush1.bf16.msra.mxu1 %v309_v4 }
  0x17   : > { %s2527_s17 = smov (!%p225_p5, %s2215_s17), 3 }
  0x18   : > { %248 = vrot.lane.b32.xlu1 %v2237_v5, %s2157_s26  ;;  %246 = vrot.lane.b32.xlu0 %v2228_v3, %s2157_s26  ;;  %s2176_s26 = smov 50  }
  0x19   : > { %2028 = vmatmul.mubr.msk.bf16.vlgmr.msra.gmra.mrb[0].mxu1 %vm253_vm1, %v241_v6 }
  0x1a   : > { %470 = vmatprep.mubr.bf16.mxu1 %v2155_v1 }
  0x1c   : > { %361 = vrot.lane.b32.xlu1 %v2237_v5, %s2156_s25  ;;  %359 = vrot.lane.b32.xlu0 %v2228_v3, %s2156_s25  ;;  %s2175_s25 = smov 54  }
  0x20   : > { %422 = vrot.lane.b32.xlu1 %v2228_v3, %s2158_s6  ;;  %420 = vrot.lane.b32.xlu0 %v2225_v2, %s2158_s6 }
  0x24   : > { %483 = vrot.lane.b32.xlu1 %v2225_v2, %s2159_s7  ;;  %424 = vrot.lane.b32.xlu0 %v2237_v5, %s2158_s6  ;;  %s2178_s6 = smov 48  }
  0x28   : > { %487 = vrot.lane.b32.xlu1 %v2237_v5, %s2159_s7  ;;  %485 = vrot.lane.b32.xlu0 %v2228_v3, %s2159_s7 }
  0x2c   : > { %548 = vrot.lane.b32.xlu1 %v2228_v3, %s2160_s8  ;;  %546 = vrot.lane.b32.xlu0 %v2225_v2, %s2160_s8 }
  0x30   : > { %609 = vrot.lane.b32.xlu1 %v2225_v2, %s2161_s9  ;;  %550 = vrot.lane.b32.xlu0 %v2237_v5, %s2160_s8 }
  0x34   : > { %613 = vrot.lane.b32.xlu1 %v2237_v5, %s2161_s9  ;;  %611 = vrot.lane.b32.xlu0 %v2228_v3, %s2161_s9  ;;  %s2179_s9 = smov 44  }
  0x38   : > { %674 = vrot.lane.b32.xlu1 %v2228_v3, %s2162_s10  ;;  %672 = vrot.lane.b32.xlu0 %v2225_v2, %s2162_s10 }
  0x3c   : > { %735 = vrot.lane.b32.xlu1 %v2225_v2, %s2163_s11  ;;  %676 = vrot.lane.b32.xlu0 %v2237_v5, %s2162_s10 }
  0x40   : > { %739 = vrot.lane.b32.xlu1 %v2237_v5, %s2163_s11  ;;  %737 = vrot.lane.b32.xlu0 %v2228_v3, %s2163_s11 }
  0x44   : > { %800 = vrot.lane.b32.xlu1 %v2228_v3, %s2164_s12  ;;  %798 = vrot.lane.b32.xlu0 %v2225_v2, %s2164_s12 }
  0x48   : > { %861 = vrot.lane.b32.xlu1 %v2225_v2, %s2165_s13  ;;  %802 = vrot.lane.b32.xlu0 %v2237_v5, %s2164_s12  ;;  %s2180_s12 = smov 43  }
  0x4c   : > { %865 = vrot.lane.b32.xlu1 %v2237_v5, %s2165_s13  ;;  %863 = vrot.lane.b32.xlu0 %v2228_v3, %s2165_s13 }
  0x50   : > { %926 = vrot.lane.b32.xlu1 %v2228_v3, %s2166_s14  ;;  %924 = vrot.lane.b32.xlu0 %v2225_v2, %s2166_s14 }
  0x54   : > { %987 = vrot.lane.b32.xlu1 %v2225_v2, %s2167_s16  ;;  %928 = vrot.lane.b32.xlu0 %v2237_v5, %s2166_s14 }
  0x58   : > { %991 = vrot.lane.b32.xlu1 %v2237_v5, %s2167_s16  ;;  %989 = vrot.lane.b32.xlu0 %v2228_v3, %s2167_s16  ;;  %s2181_s16 = smov 42  }
  0x5c   : > { %1052 = vrot.lane.b32.xlu1 %v2228_v3, %s2168_s18  ;;  %1050 = vrot.lane.b32.xlu0 %v2225_v2, %s2168_s18 }
  0x60   : > { %1113 = vrot.lane.b32.xlu1 %v2225_v2, %s2169_s19  ;;  %1054 = vrot.lane.b32.xlu0 %v2237_v5, %s2168_s18 }
  0x64   : > { %1117 = vrot.lane.b32.xlu1 %v2237_v5, %s2169_s19  ;;  %1115 = vrot.lane.b32.xlu0 %v2228_v3, %s2169_s19 }
  0x68   : > { %1178 = vrot.lane.b32.xlu1 %v2228_v3, %s2170_s20  ;;  %1176 = vrot.lane.b32.xlu0 %v2225_v2, %s2170_s20 }
  0x6c   : > { %1239 = vrot.lane.b32.xlu1 %v2225_v2, %s2171_s21  ;;  %1180 = vrot.lane.b32.xlu0 %v2237_v5, %s2170_s20 }
  0x70   : > { %1243 = vrot.lane.b32.xlu1 %v2237_v5, %s2171_s21  ;;  %1241 = vrot.lane.b32.xlu0 %v2228_v3, %s2171_s21 }
  0x74   : > { %1304 = vrot.lane.b32.xlu1 %v2228_v3, %s2172_s22  ;;  %1302 = vrot.lane.b32.xlu0 %v2225_v2, %s2172_s22 }
  0x78   : > { %1365 = vrot.lane.b32.xlu1 %v2225_v2, %s2173_s23  ;;  %1306 = vrot.lane.b32.xlu0 %v2237_v5, %s2172_s22 }
  0x7c   : > { %1369 = vrot.lane.b32.xlu1 %v2237_v5, %s2173_s23  ;;  %1367 = vrot.lane.b32.xlu0 %v2228_v3, %s2173_s23 }
  0x80   : > { %1430 = vrot.lane.b32.xlu1 %v2228_v3, %s2174_s24  ;;  %1428 = vrot.lane.b32.xlu0 %v2225_v2, %s2174_s24 }
  0x84   : > { %1491 = vrot.lane.b32.xlu1 %v2225_v2, %s2175_s25  ;;  %1432 = vrot.lane.b32.xlu0 %v2237_v5, %s2174_s24 }
  0x86   : > { %v358_v7 = vpop.permute.xlu1 %357  ;;  %v245_v8 = vpop.permute.xlu0 %244 }
  0x88   : > { %1495 = vrot.lane.b32.xlu1 %v2237_v5, %s2175_s25  ;;  %1493 = vrot.lane.b32.xlu0 %v2228_v3, %s2175_s25 }
  0x8a   : > { %v249_v9 = vpop.permute.xlu1 %248  ;;  %v247_v10 = vpop.permute.xlu0 %246 }
  0x8b   : > { %v252_v11 = vsel %vm250_vm2, %v247_v10, %v249_v9  ;;  %v251_v12 = vsel %vm250_vm2, %v245_v8, %v247_v10  ;;  %v2050_v8 = vld [vmem:[%s2521_s2 + $0x24] sm:$0xf]  ;;  %vm1182_vm2 = vcmask 654336  }
  0x8c   : > { %1556 = vrot.lane.b32.xlu1 %v2228_v3, %s2176_s26  ;;  %1554 = vrot.lane.b32.xlu0 %v2225_v2, %s2176_s26  ;;  %v259_v13 = vsel %vm257_vm0, %v251_v12, 0 }
  0x8d   : > { %2025 = vmatprep.subr.msk.bf16.mxu0 %vm257_vm0, %v252_v11 }
  0x8e   : > { %265 = vmatpush1.bf16.msra.mxu0 %v259_v13  ;;  %v362_v14 = vpop.permute.xlu1 %361  ;;  %v360_v15 = vpop.permute.xlu0 %359 }
  0x8f   : > { %v364_v17 = vsel %vm363_vm3, %v358_v7, %v360_v15  ;;  %v365_v18 = vsel %vm363_vm3, %v360_v15, %v362_v14  ;;  %v2053_v14 = vld [vmem:[%s2521_s2 + $0x28] sm:$0xf]  ;;  %vm1245_vm3 = vcmask 646144  }
  0x90   : > { %v370_v19 = vsel %vm257_vm0, %v364_v17, 0  ;;  %1617 = vrot.lane.b32.xlu1 %v2225_v2, %s2177_s29  ;;  %1558 = vrot.lane.b32.xlu0 %v2237_v5, %s2176_s26 }
  0x91   : > { %2030 = vmatprep.subr.msk.bf16.mxu0 %vm257_vm0, %v365_v18  ;;  %2026 = vmatmul.mubr.msk.bf16.vlgmr.msra.gmra.mrb[0].mxu0 %vm253_vm1, %v2024_v16 }
  0x92   : > { %376 = vmatpush1.bf16.msra.mxu0 %v370_v19  ;;  %v423_v20 = vpop.permute.xlu1 %422  ;;  %v421_v21 = vpop.permute.xlu0 %420  ;;  %407 = vmatprep.mubr.bf16.mxu0 %v2155_v1 }
  0x93   : > { %v427_v22 = vsel %vm426_vm4, %v421_v21, %v423_v20 }
  0x94   : > { %1621 = vrot.lane.b32.xlu1 %v2237_v5, %s2177_s29  ;;  %1619 = vrot.lane.b32.xlu0 %v2228_v3, %s2177_s29  ;;  %v433_v27 = vsel %vm257_vm0, %v427_v22, 0  ;;  %v2056_v22 = vld [vmem:[%s2521_s2 + $0x2c] sm:$0xf] }
  0x96   : > { %v484_v23 = vpop.permute.xlu1 %483  ;;  %v425_v24 = vpop.permute.xlu0 %424 }
  0x97   : > { %v428_v26 = vsel %vm426_vm4, %v423_v20, %v425_v24  ;;  %vm1308_vm4 = vcmask 637952  }
  0x98   : > { %1682 = vrot.lane.b32.xlu1 %v2228_v3, %s2178_s6  ;;  %1680 = vrot.lane.b32.xlu0 %v2225_v2, %s2178_s6 }
  0x99   : > { %2033 = vmatprep.subr.msk.bf16.mxu1 %vm257_vm0, %v428_v26  ;;  %2031 = vmatmul.mubr.msk.bf16.vlgmr.msra.gmra.mrb[4].mxu0 %vm253_vm1, %v2029_v25 }
  0x9a   : > { %439 = vmatpush1.bf16.msra.mxu1 %v433_v27  ;;  %v488_v28 = vpop.permute.xlu1 %487  ;;  %v486_v29 = vpop.permute.xlu0 %485  ;;  %533 = vmatprep.mubr.bf16.mxu0 %v2155_v1 }
  0x9b   : > { %v490_v31 = vsel %vm489_vm5, %v484_v23, %v486_v29  ;;  %v491_v32 = vsel %vm489_vm5, %v486_v29, %v488_v28  ;;  %v2059_v28 = vld [vmem:[%s2521_s2 + $0x30] sm:$0xf]  ;;  %vm1371_vm5 = vcmask 457728  }
  0x9c   : > { %v496_v33 = vsel %vm257_vm0, %v490_v31, 0  ;;  %1743 = vrot.lane.b32.xlu1 %v2225_v2, %s2179_s9  ;;  %1684 = vrot.lane.b32.xlu0 %v2237_v5, %s2178_s6 }
  0x9d   : > { %2036 = vmatprep.subr.msk.bf16.mxu0 %vm257_vm0, %v491_v32  ;;  %2034 = vmatmul.mubr.msk.bf16.vlgmr.msra.gmra.mrb[4].mxu1 %vm253_vm1, %v2032_v30 }
  0x9e   : > { %502 = vmatpush1.bf16.msra.mxu0 %v496_v33  ;;  %v549_v34 = vpop.permute.xlu1 %548  ;;  %v547_v35 = vpop.permute.xlu0 %546  ;;  %596 = vmatprep.mubr.bf16.mxu1 %v2155_v1 }
  0x9f   : > { %v553_v37 = vsel %vm552_vm6, %v547_v35, %v549_v34 }
  0xa0   : > { %1747 = vrot.lane.b32.xlu1 %v2237_v5, %s2179_s9  ;;  %1745 = vrot.lane.b32.xlu0 %v2228_v3, %s2179_s9  ;;  %v559_v41 = vsel %vm257_vm0, %v553_v37, 0 }
  0xa1   : > { %2037 = vmatmul.mubr.msk.bf16.vlgmr.msra.gmra.mrb[8].mxu0 %vm253_vm1, %v2035_v36  ;;  %v2062_v36 = vld [vmem:[%s2521_s2 + $0x34] sm:$0xf] }
  0xa2   : > { %v610_v38 = vpop.permute.xlu1 %609  ;;  %v551_v39 = vpop.permute.xlu0 %550  ;;  %659 = vmatprep.mubr.bf16.mxu0 %v2155_v1 }
  0xa3   : > { %v554_v40 = vsel %vm552_vm6, %v549_v34, %v551_v39  ;;  %vm1434_vm6 = vcmask 449536  }
  0xa4   : > { %1808 = vrot.lane.b32.xlu1 %v2228_v3, %s2180_s12  ;;  %1806 = vrot.lane.b32.xlu0 %v2225_v2, %s2180_s12 }
  0xa5   : > { %2039 = vmatprep.subr.msk.bf16.mxu1 %vm257_vm0, %v554_v40 }
  0xa6   : > { %565 = vmatpush1.bf16.msra.mxu1 %v559_v41  ;;  %v614_v42 = vpop.permute.xlu1 %613  ;;  %v612_v43 = vpop.permute.xlu0 %611 }
  0xa7   : > { %v616_v45 = vsel %vm615_vm7, %v610_v38, %v612_v43  ;;  %v617_v46 = vsel %vm615_vm7, %v612_v43, %v614_v42  ;;  %v2065_v42 = vld [vmem:[%s2521_s2 + $0x38] sm:$0xf]  ;;  %vm1497_vm7 = vcmask 441344  }
  0xa8   : > { %v622_v47 = vsel %vm257_vm0, %v616_v45, 0  ;;  %1869 = vrot.lane.b32.xlu1 %v2225_v2, %s2181_s16  ;;  %1810 = vrot.lane.b32.xlu0 %v2237_v5, %s2180_s12  ;;  %s2020_s12 = sshll.u32 %s2527_s17, 3 }
  0xa9   : > { %2042 = vmatprep.subr.msk.bf16.mxu0 %vm257_vm0, %v617_v46  ;;  %2040 = vmatmul.mubr.msk.bf16.vlgmr.msra.gmra.mrb[8].mxu1 %vm253_vm1, %v2038_v44 }
  0xaa   : > { %628 = vmatpush1.bf16.msra.mxu0 %v622_v47  ;;  %v675_v48 = vpop.permute.xlu1 %674  ;;  %v673_v49 = vpop.permute.xlu0 %672  ;;  %722 = vmatprep.mubr.bf16.mxu1 %v2155_v1 }
  0xab   : > { %v679_v51 = vsel %vm678_vm8, %v673_v49, %v675_v48 }
  0xac   : > { %1873 = vrot.lane.b32.xlu1 %v2237_v5, %s2181_s16  ;;  %1871 = vrot.lane.b32.xlu0 %v2228_v3, %s2181_s16  ;;  %v685_v56 = vsel %vm257_vm0, %v679_v51, 0  ;;  %s228_s16 = scalar_lea.vmem %s2523_s4, %s2020_s12 }
  0xad   : > { %2043 = vmatmul.mubr.msk.bf16.vlgmr.msra.gmra.mrb[12].mxu0 %vm253_vm1, %v2041_v50  ;;  %v2068_v50 = vld [vmem:[%s2521_s2 + $0x3c] sm:$0xf] }
  0xae   : > { %v736_v53 = vpop.permute.xlu1 %735  ;;  %v677_v54 = vpop.permute.xlu0 %676  ;;  %785 = vmatprep.mubr.bf16.mxu0 %v2155_v1 }
  0xaf   : > { %v680_v55 = vsel %vm678_vm8, %v675_v48, %v677_v54  ;;  %vm1560_vm8 = vcmask 408576  }
  0xb0   : > { %2045 = vmatprep.subr.msk.bf16.mxu1 %vm257_vm0, %v680_v55  ;;  %1933 = vperm.xlu0 %2143, %v1930_v52  }
  0xb1   : > { %691 = vmatpush1.bf16.msra.mxu1 %v685_v56  ;;  %v2071_v56 = vld [vmem:[%s2521_s2 + $0x40] sm:$0xf] }
  0xb2   : > { %v740_v58 = vpop.permute.xlu1 %739  ;;  %v738_v59 = vpop.permute.xlu0 %737 }
  0xb3   : > { %v742_v60 = vsel %vm741_vm9, %v736_v53, %v738_v59  ;;  %v743_v61 = vsel %vm741_vm9, %v738_v59, %v740_v58  ;;  %vm1623_vm9 = vcmask 400384  }
  0xb4   : > { %v748_v62 = vsel %vm257_vm0, %v742_v60, 0  ;;  %2048 = vmatprep.subr.msk.bf16.mxu0 %vm257_vm0, %v743_v61  ;;  %2046 = vmatmul.mubr.msk.bf16.vlgmr.msra.gmra.mrb[12].mxu1 %vm253_vm1, %v2044_v57 }
  0xb5   : > { %754 = vmatpush1.bf16.msra.mxu0 %v748_v62  ;;  %848 = vmatprep.mubr.bf16.mxu1 %v2155_v1 }
  0xb6   : > { %v801_v0 = vpop.permute.xlu1 %800  ;;  %v799_v2 = vpop.permute.xlu0 %798 }
  0xb7   : > { %v805_v3 = vsel %vm804_vm10, %v799_v2, %v801_v0 }
  0xb8   : > { %2049 = vmatmul.mubr.msk.bf16.vlgmr.msra.gmra.mrb[16].mxu0 %vm253_vm1, %v2047_v63  ;;  %v811_v7 = vsel %vm257_vm0, %v805_v3, 0 }
  0xb9   : > { %911 = vmatprep.mubr.bf16.mxu0 %v2155_v1 }
  0xba   : > { %v862_v4 = vpop.permute.xlu1 %861  ;;  %v803_v5 = vpop.permute.xlu0 %802 }
  0xbb   : > { %v806_v6 = vsel %vm804_vm10, %v801_v0, %v803_v5  ;;  %v2074_v0 = vld [vmem:[%s2521_s2 + $0x44] sm:$0xf]  ;;  %vm1686_vm10 = vcmask 392192  }
  0xbc   : > { %2051 = vmatprep.subr.msk.bf16.mxu1 %vm257_vm0, %v806_v6 }
  0xbd   : > { %817 = vmatpush1.bf16.msra.mxu1 %v811_v7 }
  0xbe   : > { %v866_v9 = vpop.permute.xlu1 %865  ;;  %v864_v10 = vpop.permute.xlu0 %863 }
  0xbf   : > { %v868_v11 = vsel %vm867_vm11, %v862_v4, %v864_v10  ;;  %v869_v12 = vsel %vm867_vm11, %v864_v10, %v866_v9  ;;  %v2077_v10 = vld [vmem:[%s2521_s2 + $0x48] sm:$0xf]  ;;  %vm1749_vm11 = vcmask 359424  }
  0xc0   : > { %v874_v13 = vsel %vm257_vm0, %v868_v11, 0  ;;  %2054 = vmatprep.subr.msk.bf16.mxu0 %vm257_vm0, %v869_v12  ;;  %2052 = vmatmul.mubr.msk.bf16.vlgmr.msra.gmra.mrb[16].mxu1 %vm253_vm1, %v2050_v8 }
  0xc1   : > { %880 = vmatpush1.bf16.msra.mxu0 %v874_v13  ;;  %974 = vmatprep.mubr.bf16.mxu1 %v2155_v1 }
  0xc2   : > { %v927_v15 = vpop.permute.xlu1 %926  ;;  %v925_v16 = vpop.permute.xlu0 %924 }
  0xc3   : > { %v931_v17 = vsel %vm930_vm12, %v925_v16, %v927_v15 }
  0xc4   : > { %2055 = vmatmul.mubr.msk.bf16.vlgmr.msra.gmra.mrb[20].mxu0 %vm253_vm1, %v2053_v14  ;;  %v937_v21 = vsel %vm257_vm0, %v931_v17, 0 }
  0xc5   : > { %1037 = vmatprep.mubr.bf16.mxu0 %v2155_v1 }
  0xc6   : > { %v988_v18 = vpop.permute.xlu1 %987  ;;  %v929_v19 = vpop.permute.xlu0 %928 }
  0xc7   : > { %v932_v20 = vsel %vm930_vm12, %v927_v15, %v929_v19  ;;  %v2080_v19 = vld [vmem:[%s2521_s2 + $0x4c] sm:$0xf]  ;;  %vm1812_vm12 = vcmask 351232  }
  0xc8   : > { %2057 = vmatprep.subr.msk.bf16.mxu1 %vm257_vm0, %v932_v20 }
  0xc9   : > { %943 = vmatpush1.bf16.msra.mxu1 %v937_v21 }
  0xca   : > { %v992_v23 = vpop.permute.xlu1 %991  ;;  %v990_v24 = vpop.permute.xlu0 %989 }
  0xcb   : > { %v994_v25 = vsel %vm993_vm13, %v988_v18, %v990_v24  ;;  %v995_v26 = vsel %vm993_vm13, %v990_v24, %v992_v23  ;;  %vm1875_vm13 = vcmask 343040  }
  0xcc   : > { %v1000_v27 = vsel %vm257_vm0, %v994_v25, 0  ;;  %2060 = vmatprep.subr.msk.bf16.mxu0 %vm257_vm0, %v995_v26  ;;  %2058 = vmatmul.mubr.msk.bf16.vlgmr.msra.gmra.mrb[20].mxu1 %vm253_vm1, %v2056_v22  ;;  %v2083_v25 = vld [vmem:[%s2521_s2 + $0x50] sm:$0xf] }
  0xcd   : > { %1006 = vmatpush1.bf16.msra.mxu0 %v1000_v27  ;;  %1100 = vmatprep.mubr.bf16.mxu1 %v2155_v1 }
  0xce   : > { %v1053_v29 = vpop.permute.xlu1 %1052  ;;  %v1051_v30 = vpop.permute.xlu0 %1050 }
  0xcf   : > { %v1057_v31 = vsel %vm1056_vm14, %v1051_v30, %v1053_v29 }
  0xd0   : > { %2061 = vmatmul.mubr.msk.bf16.vlgmr.msra.gmra.mrb[24].mxu0 %vm253_vm1, %v2059_v28  ;;  %v1063_v35 = vsel %vm257_vm0, %v1057_v31, 0 }
  0xd1   : > { %1163 = vmatprep.mubr.bf16.mxu0 %v2155_v1 }
  0xd2   : > { %v1114_v32 = vpop.permute.xlu1 %1113  ;;  %v1055_v33 = vpop.permute.xlu0 %1054 }
  0xd3   : > { %v1058_v34 = vsel %vm1056_vm14, %v1053_v29, %v1055_v33  ;;  %v2086_v33 = vld [vmem:[%s2521_s2 + $0x54] sm:$0xf] }
  0xd4   : > { %2063 = vmatprep.subr.msk.bf16.mxu1 %vm257_vm0, %v1058_v34 }
  0xd5   : > { %1069 = vmatpush1.bf16.msra.mxu1 %v1063_v35 }
  0xd6   : > { %v1118_v37 = vpop.permute.xlu1 %1117  ;;  %v1116_v38 = vpop.permute.xlu0 %1115 }
  0xd7   : > { %v1120_v39 = vsel %vm1119_vm15, %v1114_v32, %v1116_v38  ;;  %v1121_v40 = vsel %vm1119_vm15, %v1116_v38, %v1118_v37 }
  0xd8   : > { %v1126_v41 = vsel %vm257_vm0, %v1120_v39, 0  ;;  %2064 = vmatmul.mubr.msk.bf16.vlgmr.msra.gmra.mrb[24].mxu1 %vm253_vm1, %v2062_v36  ;;  %2066 = vmatprep.subr.msk.bf16.mxu0 %vm257_vm0, %v1121_v40  ;;  %v2089_v39 = vld [vmem:[%s2521_s2 + $0x58] sm:$0xf] }
  0xd9   : > { %1132 = vmatpush1.bf16.msra.mxu0 %v1126_v41  ;;  %1226 = vmatprep.mubr.bf16.mxu1 %v2155_v1 }
  0xda   : > { %v1179_v43 = vpop.permute.xlu1 %1178  ;;  %v1177_v44 = vpop.permute.xlu0 %1176 }
  0xdb   : > { %v1183_v45 = vsel %vm1182_vm2, %v1177_v44, %v1179_v43 }
  0xdc   : > { %2067 = vmatmul.mubr.msk.bf16.vlgmr.msra.gmra.mrb[28].mxu0 %vm253_vm1, %v2065_v42  ;;  %v1189_v49 = vsel %vm257_vm0, %v1183_v45, 0 }
  0xdd   : > { %1289 = vmatprep.mubr.bf16.mxu0 %v2155_v1 }
  0xde   : > { %v1240_v46 = vpop.permute.xlu1 %1239  ;;  %v1181_v47 = vpop.permute.xlu0 %1180 }
  0xdf   : > { %v1184_v48 = vsel %vm1182_vm2, %v1179_v43, %v1181_v47  ;;  %v2092_v47 = vld [vmem:[%s2521_s2 + $0x5c] sm:$0xf] }
  0xe0   : > { %2069 = vmatprep.subr.msk.bf16.mxu1 %vm257_vm0, %v1184_v48 }
  0xe1   : > { %1195 = vmatpush1.bf16.msra.mxu1 %v1189_v49 }
  0xe2   : > { %v1244_v51 = vpop.permute.xlu1 %1243  ;;  %v1242_v52 = vpop.permute.xlu0 %1241 }
  0xe3   : > { %v1246_v53 = vsel %vm1245_vm3, %v1240_v46, %v1242_v52  ;;  %v1247_v54 = vsel %vm1245_vm3, %v1242_v52, %v1244_v51 }
  0xe4   : > { %v1252_v55 = vsel %vm257_vm0, %v1246_v53, 0  ;;  %2070 = vmatmul.mubr.msk.bf16.vlgmr.msra.gmra.mrb[28].mxu1 %vm253_vm1, %v2068_v50  ;;  %2072 = vmatprep.subr.msk.bf16.mxu0 %vm257_vm0, %v1247_v54  ;;  %v2095_v53 = vld [vmem:[%s2521_s2 + $0x60] sm:$0xf] }
  0xe5   : > { %1258 = vmatpush1.bf16.msra.mxu0 %v1252_v55  ;;  %1352 = vmatprep.mubr.bf16.mxu1 %v2155_v1 }
  0xe6   : > { %v1305_v57 = vpop.permute.xlu1 %1304  ;;  %v1303_v58 = vpop.permute.xlu0 %1302 }
  0xe7   : > { %v1309_v59 = vsel %vm1308_vm4, %v1303_v58, %v1305_v57 }
  0xe8   : > { %2073 = vmatmul.mubr.msk.bf16.vlgmr.msra.gmra.mrb[32].mxu0 %vm253_vm1, %v2071_v56  ;;  %v1315_v63 = vsel %vm257_vm0, %v1309_v59, 0 }
  0xe9   : > { %1415 = vmatprep.mubr.bf16.mxu0 %v2155_v1 }
  0xea   : > { %v1366_v60 = vpop.permute.xlu1 %1365  ;;  %v1307_v61 = vpop.permute.xlu0 %1306 }
  0xeb   : > { %v1310_v62 = vsel %vm1308_vm4, %v1305_v57, %v1307_v61  ;;  %v2098_v61 = vld [vmem:[%s2521_s2 + $0x64] sm:$0xf] }
  0xec   : > { %2075 = vmatprep.subr.msk.bf16.mxu1 %vm257_vm0, %v1310_v62  ;;  %v2442_v2 = vpop.f32.mrb[0].mxu1 }
  0xed   : > { %1321 = vmatpush1.bf16.msra.mxu1 %v1315_v63  ;;  %v2444_v7 = vpop.f32.mrb[1].mxu1 }
  0xee   : > { %v1370_v3 = vpop.permute.xlu1 %1369  ;;  %v1368_v4 = vpop.permute.xlu0 %1367 }
  0xef   : > { %v1372_v5 = vsel %vm1371_vm5, %v1366_v60, %v1368_v4  ;;  %v1373_v6 = vsel %vm1371_vm5, %v1368_v4, %v1370_v3  ;;  %v352_v9 = vpop.f32.mrb[2].mxu1 }
  0xf0   : > { %v1378_v8 = vsel %vm257_vm0, %v1372_v5, 0  ;;  %2076 = vmatmul.mubr.msk.bf16.vlgmr.msra.gmra.mrb[32].mxu1 %vm253_vm1, %v2074_v0  ;;  %2078 = vmatprep.subr.msk.bf16.mxu0 %vm257_vm0, %v1373_v6  ;;  %v353_v11 = vpop.f32.mrb[3].mxu1 }
  0xf1   : > { %1384 = vmatpush1.bf16.msra.mxu0 %v1378_v8  ;;  %1478 = vmatprep.mubr.bf16.mxu1 %v2155_v1 }
  0xf2   : > { %v1431_v12 = vpop.permute.xlu1 %1430  ;;  %v1429_v13 = vpop.permute.xlu0 %1428 }
  0xf3   : > { %v1435_v14 = vsel %vm1434_vm6, %v1429_v13, %v1431_v12 }
  0xf4   : > { %2079 = vmatmul.mubr.msk.bf16.vlgmr.msra.gmra.mrb[36].mxu0 %vm253_vm1, %v2077_v10  ;;  %v1441_v18 = vsel %vm257_vm0, %v1435_v14, 0 }
  0xf5   : > { %1541 = vmatprep.mubr.bf16.mxu0 %v2155_v1 }
  0xf6   : > { %v1492_v15 = vpop.permute.xlu1 %1491  ;;  %v1433_v16 = vpop.permute.xlu0 %1432 }
  0xf7   : > { %v1436_v17 = vsel %vm1434_vm6, %v1431_v12, %v1433_v16 }
  0xf8   : > { %2081 = vmatprep.subr.msk.bf16.mxu1 %vm257_vm0, %v1436_v17 }
  0xf9   : > { %1447 = vmatpush1.bf16.msra.mxu1 %v1441_v18 }
  0xfa   : > { %v1496_v20 = vpop.permute.xlu1 %1495  ;;  %v1494_v21 = vpop.permute.xlu0 %1493 }
  0xfb   : > { %v1498_v22 = vsel %vm1497_vm7, %v1492_v15, %v1494_v21  ;;  %v1499_v23 = vsel %vm1497_vm7, %v1494_v21, %v1496_v20 }
  0xfc   : > { %v1504_v24 = vsel %vm257_vm0, %v1498_v22, 0  ;;  %2082 = vmatmul.mubr.msk.bf16.vlgmr.msra.gmra.mrb[36].mxu1 %vm253_vm1, %v2080_v19  ;;  %2084 = vmatprep.subr.msk.bf16.mxu0 %vm257_vm0, %v1499_v23 }
  0xfd   : > { %1510 = vmatpush1.bf16.msra.mxu0 %v1504_v24  ;;  %1604 = vmatprep.mubr.bf16.mxu1 %v2155_v1 }
  0xfe   : > { %v1557_v26 = vpop.permute.xlu1 %1556  ;;  %v1555_v27 = vpop.permute.xlu0 %1554 }
  0xff   : > { %v1561_v28 = vsel %vm1560_vm8, %v1555_v27, %v1557_v26 }
 0x100   : > { %2085 = vmatmul.mubr.msk.bf16.vlgmr.msra.gmra.mrb[40].mxu0 %vm253_vm1, %v2083_v25  ;;  %v1567_v32 = vsel %vm257_vm0, %v1561_v28, 0 }
 0x101   : > { %1667 = vmatprep.mubr.bf16.mxu0 %v2155_v1 }
 0x102   : > { %v1618_v29 = vpop.permute.xlu1 %1617  ;;  %v1559_v30 = vpop.permute.xlu0 %1558 }
 0x103   : > { %v1562_v31 = vsel %vm1560_vm8, %v1557_v26, %v1559_v30 }
 0x104   : > { %2087 = vmatprep.subr.msk.bf16.mxu1 %vm257_vm0, %v1562_v31 }
 0x105   : > { %1573 = vmatpush1.bf16.msra.mxu1 %v1567_v32 }
 0x106   : > { %v1622_v34 = vpop.permute.xlu1 %1621  ;;  %v1620_v35 = vpop.permute.xlu0 %1619 }
 0x107   : > { %v1624_v36 = vsel %vm1623_vm9, %v1618_v29, %v1620_v35  ;;  %v1625_v37 = vsel %vm1623_vm9, %v1620_v35, %v1622_v34 }
 0x108   : > { %v1630_v38 = vsel %vm257_vm0, %v1624_v36, 0  ;;  %2088 = vmatmul.mubr.msk.bf16.vlgmr.msra.gmra.mrb[40].mxu1 %vm253_vm1, %v2086_v33  ;;  %2090 = vmatprep.subr.msk.bf16.mxu0 %vm257_vm0, %v1625_v37 }
 0x109   : > { %1636 = vmatpush1.bf16.msra.mxu0 %v1630_v38  ;;  %1730 = vmatprep.mubr.bf16.mxu1 %v2155_v1 }
 0x10a   : > { %v1683_v40 = vpop.permute.xlu1 %1682  ;;  %v1681_v41 = vpop.permute.xlu0 %1680 }
 0x10b   : > { %v1687_v42 = vsel %vm1686_vm10, %v1681_v41, %v1683_v40 }
 0x10c   : > { %2091 = vmatmul.mubr.msk.bf16.vlgmr.msra.gmra.mrb[44].mxu0 %vm253_vm1, %v2089_v39  ;;  %v1693_v46 = vsel %vm257_vm0, %v1687_v42, 0 }
 0x10d   : > { %1793 = vmatprep.mubr.bf16.mxu0 %v2155_v1 }
 0x10e   : > { %v1744_v43 = vpop.permute.xlu1 %1743  ;;  %v1685_v44 = vpop.permute.xlu0 %1684 }
 0x10f   : > { %v1688_v45 = vsel %vm1686_vm10, %v1683_v40, %v1685_v44 }
 0x110   : > { %2093 = vmatprep.subr.msk.bf16.mxu1 %vm257_vm0, %v1688_v45 }
 0x111   : > { %1699 = vmatpush1.bf16.msra.mxu1 %v1693_v46 }
 0x112   : > { %v1748_v48 = vpop.permute.xlu1 %1747  ;;  %v1746_v49 = vpop.permute.xlu0 %1745 }
 0x113   : > { %v1750_v50 = vsel %vm1749_vm11, %v1744_v43, %v1746_v49  ;;  %v1751_v51 = vsel %vm1749_vm11, %v1746_v49, %v1748_v48 }
 0x114   : > { %v1756_v52 = vsel %vm257_vm0, %v1750_v50, 0  ;;  %2094 = vmatmul.mubr.msk.bf16.vlgmr.msra.gmra.mrb[44].mxu1 %vm253_vm1, %v2092_v47  ;;  %2096 = vmatprep.subr.msk.bf16.mxu0 %vm257_vm0, %v1751_v51 }
 0x115   : > { %1762 = vmatpush1.bf16.msra.mxu0 %v1756_v52  ;;  %1856 = vmatprep.mubr.bf16.mxu1 %v2155_v1 }
 0x116   : > { %v1809_v54 = vpop.permute.xlu1 %1808  ;;  %v1807_v55 = vpop.permute.xlu0 %1806 }
 0x117   : > { %v1813_v56 = vsel %vm1812_vm12, %v1807_v55, %v1809_v54 }
 0x118   : > { %2097 = vmatmul.mubr.msk.bf16.vlgmr.msra.gmra.mrb[48].mxu0 %vm253_vm1, %v2095_v53  ;;  %v1819_v60 = vsel %vm257_vm0, %v1813_v56, 0 }
 0x119   : > { %1919 = vmatprep.mubr.bf16.mxu0 %v2155_v1  ;;  %v2101_v1 = vld [vmem:[%s2521_s2 + $0x68] sm:$0xf] }
 0x11a   : > { %v1870_v57 = vpop.permute.xlu1 %1869  ;;  %v1811_v58 = vpop.permute.xlu0 %1810 }
 0x11b   : > { %v1814_v59 = vsel %vm1812_vm12, %v1809_v54, %v1811_v58 }
 0x11c   : > { %2099 = vmatprep.subr.msk.bf16.mxu1 %vm257_vm0, %v1814_v59 }
 0x11d   : > { %1825 = vmatpush1.bf16.msra.mxu1 %v1819_v60 }
 0x11e   : > { %v1874_v62 = vpop.permute.xlu1 %1873  ;;  %v1872_v63 = vpop.permute.xlu0 %1871 }
 0x11f   : > { %v1876_v0 = vsel %vm1875_vm13, %v1870_v57, %v1872_v63  ;;  %v1877_v3 = vsel %vm1875_vm13, %v1872_v63, %v1874_v62 }
 0x120   : > { %v1882_v4 = vsel %vm257_vm0, %v1876_v0, 0  ;;  %2100 = vmatmul.mubr.msk.bf16.vlgmr.msra.gmra.mrb[48].mxu1 %vm253_vm1, %v2098_v61  ;;  %2102 = vmatprep.subr.msk.bf16.mxu0 %vm257_vm0, %v1877_v3 }
 0x121   : > { %1888 = vmatpush1.bf16.msra.mxu0 %v1882_v4 }
 0x124   : > { %2103 = vmatmul.mubr.msk.bf16.vlgmr.msra.gmra.mrb[52].mxu0 %vm253_vm1, %v2101_v1 }
 0x164   : > { %v298_v5 = vpop.f32.mrb[0].mxu0 }
 0x165   : > { %v300_v6 = vpop.f32.mrb[1].mxu0  ;;  %v349_v8 = vadd.f32 %v2442_v2, %v298_v5 }
 0x166   : > { %v302_v9 = vpop.f32.mrb[2].mxu0  ;;  %v351_v10 = vadd.f32 %v2444_v7, %v300_v6 }
 0x167   : > { %v303_v11 = vpop.f32.mrb[3].mxu0 }
 0x16c   : > { %v409_v12 = vpop.f32.mrb[4].mxu0 }
 0x16d   : > { %v416_v13 = vadd.f32 %v409_v12, %v349_v8  ;;  %v411_v14 = vpop.f32.mrb[5].mxu0 }
 0x16e   : > { %v417_v15 = vadd.f32 %v411_v14, %v351_v10  ;;  %v413_v16 = vpop.f32.mrb[6].mxu0 }
 0x16f   : > { %v414_v17 = vpop.f32.mrb[7].mxu0 }
 0x170   : > { %v472_v18 = vpop.f32.mrb[4].mxu1 }
 0x171   : > { %v479_v19 = vadd.f32 %v472_v18, %v416_v13  ;;  %v474_v20 = vpop.f32.mrb[5].mxu1 }
 0x172   : > { %v480_v21 = vadd.f32 %v474_v20, %v417_v15  ;;  %v476_v22 = vpop.f32.mrb[6].mxu1 }
 0x173   : > { %v477_v23 = vpop.f32.mrb[7].mxu1 }
 0x174   : > { %v535_v24 = vpop.f32.mrb[8].mxu0 }
 0x175   : > { %v542_v25 = vadd.f32 %v535_v24, %v479_v19  ;;  %v537_v26 = vpop.f32.mrb[9].mxu0 }
 0x176   : > { %v543_v2 = vadd.f32 %v537_v26, %v480_v21  ;;  %v539_v27 = vpop.f32.mrb[10].mxu0 }
 0x177   : > { %v540_v28 = vpop.f32.mrb[11].mxu0 }
 0x17c   : > { %v598_v7 = vpop.f32.mrb[8].mxu1 }
 0x17d   : > { %v605_v29 = vadd.f32 %v598_v7, %v542_v25  ;;  %v600_v30 = vpop.f32.mrb[9].mxu1 }
 0x17e   : > { %v606_v31 = vadd.f32 %v600_v30, %v543_v2  ;;  %v602_v32 = vpop.f32.mrb[10].mxu1 }
 0x17f   : > { %v603_v33 = vpop.f32.mrb[11].mxu1 }
 0x180   : > { %v661_v34 = vpop.f32.mrb[12].mxu0 }
 0x181   : > { %v668_v35 = vadd.f32 %v661_v34, %v605_v29  ;;  %v663_v36 = vpop.f32.mrb[13].mxu0 }
 0x182   : > { %v669_v37 = vadd.f32 %v663_v36, %v606_v31  ;;  %v665_v38 = vpop.f32.mrb[14].mxu0 }
 0x183   : > { %v666_v39 = vpop.f32.mrb[15].mxu0 }
 0x187   : > { %v724_v40 = vpop.f32.mrb[12].mxu1 }
 0x188   : > { %v731_v41 = vadd.f32 %v724_v40, %v668_v35  ;;  %v726_v42 = vpop.f32.mrb[13].mxu1 }
 0x189   : > { %v732_v43 = vadd.f32 %v726_v42, %v669_v37  ;;  %v728_v44 = vpop.f32.mrb[14].mxu1 }
 0x18a   : > { %v729_v45 = vpop.f32.mrb[15].mxu1 }
 0x18b   : > { %v787_v46 = vpop.f32.mrb[16].mxu0 }
 0x18c   : > { %v794_v47 = vadd.f32 %v787_v46, %v731_v41  ;;  %v789_v48 = vpop.f32.mrb[17].mxu0 }
 0x18d   : > { %v795_v49 = vadd.f32 %v789_v48, %v732_v43  ;;  %v791_v50 = vpop.f32.mrb[18].mxu0 }
 0x18e   : > { %v792_v51 = vpop.f32.mrb[19].mxu0 }
 0x193   : > { %v850_v52 = vpop.f32.mrb[16].mxu1 }
 0x194   : > { %v857_v53 = vadd.f32 %v850_v52, %v794_v47  ;;  %v852_v54 = vpop.f32.mrb[17].mxu1 }
 0x195   : > { %v858_v55 = vadd.f32 %v852_v54, %v795_v49  ;;  %v854_v56 = vpop.f32.mrb[18].mxu1 }
 0x196   : > { %v855_v57 = vpop.f32.mrb[19].mxu1 }
 0x197   : > { %v913_v58 = vpop.f32.mrb[20].mxu0 }
 0x198   : > { %v920_v59 = vadd.f32 %v913_v58, %v857_v53  ;;  %v915_v60 = vpop.f32.mrb[21].mxu0 }
 0x199   : > { %v921_v61 = vadd.f32 %v915_v60, %v858_v55  ;;  %v917_v62 = vpop.f32.mrb[22].mxu0 }
 0x19a   : > { %v918_v63 = vpop.f32.mrb[23].mxu0 }
 0x19f   : > { %v976_v0 = vpop.f32.mrb[20].mxu1 }
 0x1a0   : > { %v983_v3 = vadd.f32 %v976_v0, %v920_v59  ;;  %v978_v4 = vpop.f32.mrb[21].mxu1 }
 0x1a1   : > { %v984_v1 = vadd.f32 %v978_v4, %v921_v61  ;;  %v980_v5 = vpop.f32.mrb[22].mxu1 }
 0x1a2   : > { %v981_v6 = vpop.f32.mrb[23].mxu1 }
 0x1a3   : > { %v1039_v8 = vpop.f32.mrb[24].mxu0 }
 0x1a4   : > { %v1046_v9 = vadd.f32 %v1039_v8, %v983_v3  ;;  %v1041_v10 = vpop.f32.mrb[25].mxu0 }
 0x1a5   : > { %v1047_v11 = vadd.f32 %v1041_v10, %v984_v1  ;;  %v1043_v12 = vpop.f32.mrb[26].mxu0 }
 0x1a6   : > { %v1044_v13 = vpop.f32.mrb[27].mxu0 }
 0x1ab   : > { %v1102_v14 = vpop.f32.mrb[24].mxu1 }
 0x1ac   : > { %v1109_v15 = vadd.f32 %v1102_v14, %v1046_v9  ;;  %v1104_v16 = vpop.f32.mrb[25].mxu1 }
 0x1ad   : > { %v1110_v17 = vadd.f32 %v1104_v16, %v1047_v11  ;;  %v1106_v18 = vpop.f32.mrb[26].mxu1 }
 0x1ae   : > { %v1107_v19 = vpop.f32.mrb[27].mxu1 }
 0x1af   : > { %v1165_v20 = vpop.f32.mrb[28].mxu0 }
 0x1b0   : > { %v1172_v21 = vadd.f32 %v1165_v20, %v1109_v15  ;;  %v1167_v22 = vpop.f32.mrb[29].mxu0 }
 0x1b1   : > { %v1173_v23 = vadd.f32 %v1167_v22, %v1110_v17  ;;  %v1169_v24 = vpop.f32.mrb[30].mxu0 }
 0x1b2   : > { %v1170_v25 = vpop.f32.mrb[31].mxu0 }
 0x1b7   : > { %v1228_v26 = vpop.f32.mrb[28].mxu1 }
 0x1b8   : > { %v1235_v2 = vadd.f32 %v1228_v26, %v1172_v21  ;;  %v1230_v27 = vpop.f32.mrb[29].mxu1 }
 0x1b9   : > { %v1236_v28 = vadd.f32 %v1230_v27, %v1173_v23  ;;  %v1232_v7 = vpop.f32.mrb[30].mxu1 }
 0x1ba   : > { %v1233_v29 = vpop.f32.mrb[31].mxu1 }
 0x1bb   : > { %v1291_v30 = vpop.f32.mrb[32].mxu0 }
 0x1bc   : > { %v1298_v31 = vadd.f32 %v1291_v30, %v1235_v2  ;;  %v1293_v32 = vpop.f32.mrb[33].mxu0 }
 0x1bd   : > { %v1299_v33 = vadd.f32 %v1293_v32, %v1236_v28  ;;  %v1295_v34 = vpop.f32.mrb[34].mxu0  ;;  %v1934_v28 = vpop.permute.xlu0 %1933 }
 0x1be   : > { %v1296_v35 = vpop.f32.mrb[35].mxu0 }
 0x1c3   : > { %v1354_v36 = vpop.f32.mrb[32].mxu1 }
 0x1c4   : > { %v1361_v37 = vadd.f32 %v1354_v36, %v1298_v31  ;;  %v1356_v38 = vpop.f32.mrb[33].mxu1 }
 0x1c5   : > { %v1362_v39 = vadd.f32 %v1356_v38, %v1299_v33  ;;  %v1358_v40 = vpop.f32.mrb[34].mxu1 }
 0x1c6   : > { %v1359_v41 = vpop.f32.mrb[35].mxu1 }
 0x1c7   : > { %v1417_v42 = vpop.f32.mrb[36].mxu0 }
 0x1c8   : > { %v1424_v43 = vadd.f32 %v1417_v42, %v1361_v37  ;;  %v1419_v44 = vpop.f32.mrb[37].mxu0 }
 0x1c9   : > { %v1425_v45 = vadd.f32 %v1419_v44, %v1362_v39  ;;  %v1421_v46 = vpop.f32.mrb[38].mxu0 }
 0x1ca   : > { %v1422_v47 = vpop.f32.mrb[39].mxu0 }
 0x1cf   : > { %v1480_v48 = vpop.f32.mrb[36].mxu1 }
 0x1d0   : > { %v1487_v49 = vadd.f32 %v1480_v48, %v1424_v43  ;;  %v1482_v50 = vpop.f32.mrb[37].mxu1 }
 0x1d1   : > { %v1488_v51 = vadd.f32 %v1482_v50, %v1425_v45  ;;  %v1484_v52 = vpop.f32.mrb[38].mxu1 }
 0x1d2   : > { %v1485_v53 = vpop.f32.mrb[39].mxu1 }
 0x1d3   : > { %v1543_v54 = vpop.f32.mrb[40].mxu0 }
 0x1d4   : > { %v1550_v55 = vadd.f32 %v1543_v54, %v1487_v49  ;;  %v1545_v56 = vpop.f32.mrb[41].mxu0 }
 0x1d5   : > { %v1551_v57 = vadd.f32 %v1545_v56, %v1488_v51  ;;  %v1547_v58 = vpop.f32.mrb[42].mxu0 }
 0x1d6   : > { %v1548_v59 = vpop.f32.mrb[43].mxu0 }
 0x1db   : > { %v1606_v60 = vpop.f32.mrb[40].mxu1 }
 0x1dc   : > { %v1613_v61 = vadd.f32 %v1606_v60, %v1550_v55  ;;  %v1608_v62 = vpop.f32.mrb[41].mxu1 }
 0x1dd   : > { %v1614_v63 = vadd.f32 %v1608_v62, %v1551_v57  ;;  %v1610_v0 = vpop.f32.mrb[42].mxu1 }
 0x1de   : > { %v1611_v3 = vpop.f32.mrb[43].mxu1 }
 0x1df   : > { %v1669_v4 = vpop.f32.mrb[44].mxu0 }
 0x1e0   : > { %v1676_v1 = vadd.f32 %v1669_v4, %v1613_v61  ;;  %v1671_v5 = vpop.f32.mrb[45].mxu0 }
 0x1e1   : > { %v1677_v6 = vadd.f32 %v1671_v5, %v1614_v63  ;;  %v1673_v8 = vpop.f32.mrb[46].mxu0 }
 0x1e2   : > { %v1674_v9 = vpop.f32.mrb[47].mxu0 }
 0x1e7   : > { %v1732_v10 = vpop.f32.mrb[44].mxu1 }
 0x1e8   : > { %v1739_v11 = vadd.f32 %v1732_v10, %v1676_v1  ;;  %v1734_v12 = vpop.f32.mrb[45].mxu1 }
 0x1e9   : > { %v1740_v13 = vadd.f32 %v1734_v12, %v1677_v6  ;;  %v1736_v14 = vpop.f32.mrb[46].mxu1 }
 0x1ea   : > { %v1737_v15 = vpop.f32.mrb[47].mxu1 }
 0x1eb   : > { %v1795_v16 = vpop.f32.mrb[48].mxu0 }
 0x1ec   : > { %v1802_v17 = vadd.f32 %v1795_v16, %v1739_v11  ;;  %v1797_v18 = vpop.f32.mrb[49].mxu0 }
 0x1ed   : > { %v1803_v19 = vadd.f32 %v1797_v18, %v1740_v13  ;;  %v1799_v20 = vpop.f32.mrb[50].mxu0 }
 0x1ee   : > { %v1800_v21 = vpop.f32.mrb[51].mxu0 }
 0x1f3   : > { %v1858_v22 = vpop.f32.mrb[48].mxu1 }
 0x1f4   : > { %v1865_v23 = vadd.f32 %v1858_v22, %v1802_v17  ;;  %v1860_v24 = vpop.f32.mrb[49].mxu1 }
 0x1f5   : > { %v1866_v25 = vadd.f32 %v1860_v24, %v1803_v19  ;;  %v1862_v26 = vpop.f32.mrb[50].mxu1 }
 0x1f6   : > { %v1863_v2 = vpop.f32.mrb[51].mxu1 }
 0x1f7   : > { %v1921_v27 = vpop.f32.mrb[52].mxu0 }
 0x1f8   : > { %v1928_v7 = vadd.f32 %v1921_v27, %v1865_v23  ;;  %v1923_v29 = vpop.f32.mrb[53].mxu0 }
 0x1f9   : > { %v1929_v30 = vadd.f32 %v1923_v29, %v1866_v25  ;;  %v1925_v31 = vpop.f32.mrb[54].mxu0 }
 0x1fa   : > { %v1936_v32 = vadd.f32 %v1934_v28, %v1928_v7  ;;  %v1926_v33 = vpop.f32.mrb[55].mxu0 }
 0x1fb   : > { %v1937_v34 = vadd.f32 %v1934_v28, %v1929_v30 }
 0x1fc   : > { %v1938_v35 = vmax.f32 %v1936_v32, 0.0 }
 0x1fd   : > { %v1939_v36 = vmax.f32 %v1937_v34, 0.0 }
 0x1fe   : > { %1940 = vst [vmem:[%s228_s16] sm:$0xff] %v1938_v35 }
 0x1ff   : > { %1941 = vst [vmem:[%s228_s16 + $0x8] sm:$0xff] %v1939_v36 }
 0x200 PF: > { %s14_s15 = sadd.s32 1, %s2153_s15  }
 0x201   : > { %p11_p6 = scmp.ge.s32.totalorder %s14_s15, 4  }
 0x203   :  { %13 = sbr.rel (!%p11_p6) target bundleno = 1 (0x1), region = 95 }

// kernel: hourglass_forward.10
= control target key start
LH: loop header
LB: loop body
LE: loop exit
PB: predicated region body
PF: predicated region fallthrough
CT: control target
= control target key end

     0   :  { %s1815_s15 = smov 0   ;;  %s1817_s16 = smov 0   ;;  %s2067_s0 = inlined_call_operand.vmem [shape: bf16[8,384], index: 0, kind: input, shape index: {}, may-alias: {0,1}]   ;;  %s2068_s1 = inlined_call_operand.vmem [shape: bf16[8,384], index: 1, kind: input, shape index: {}, may-alias: {0,1}]   ;;  %s2069_s2 = inlined_call_operand.vmem [shape: bf16[8,64,8], index: 2, kind: input, shape index: {}]   ;;  %s2070_s3 = inlined_call_operand.vmem [shape: f32[64,1], index: 3, kind: input, shape index: {}]   ;;  %s2071_s4 = inlined_call_operand.vmem [shape: f32[64,256], index: 4, kind: output, shape index: {}]  }
   0x1   :  { %s1819_s17 = smov 0  }
   0x2 LB: > { %s1828_s18 = sadd.s32 4294967295, %s1780_s17   ;;  %s1830_s19 = sadd.s32 1, %s1780_s17   ;;  %s1780_s17 = sphi %s1819_s17, %s2075_s17   ;;  %s1776_s16 = sphi %s1817_s16, %s2074_s16   ;;  %s1772_s15 = sphi %s1815_s15, %s2073_s15  }
   0x3   : > { %s114_s20 = ssub.s32 %s1780_s17, %s1830_s19  ;;  %s117_s21 = sadd.s32 1, %s1776_s16 }
   0x4   : > { %p115_p0 = scmp.eq.s32.totalorder %s114_s20, 0  ;;  %p127_p1 = scmp.ne.s32.totalorder %s1776_s16, %s1772_s15 }
   0x5   : > { %p128_p2 = scmp.eq.s32.totalorder %s1828_s18, 1  ;;  %p1380_p3 = scmp.ge.s32.totalorder %s1780_s17, 1 }
   0x6   : > { %s1838_s22 = scalar_select %p115_p0, %s1776_s16, %s117_s21  }
   0x7   : > { %p1840_p4 = por %p128_p2, %p127_p1  ;;  %p174_p5 = scmp.lt.s32.totalorder %s1780_s17, 3 }
   0x9   : > { %p175_p6 = pnand %p1380_p3, %p174_p5 }
   0xa   : > { %p203_p7 = scmp.lt.s32.totalorder (!%p175_p6), %s1828_s18, 2  ;;  %v1726_v0 = vld [vmem:[%s2069_s2 + $0x20] sm:$0xff] (!%p175_p6)   ;;  %s207_s26 = sadd.s32 (!%p175_p6), 1, %s1828_s18  ;;  %vm261_vm0 = vcmask (!%p175_p6), 64512   ;;  %v1182_v4 = vld [vmem:[%s2070_s3 + $0x8] sm:$0xff] (!%p175_p6)  ;;  %v1789_v6 = vmov (!%p175_p6), 0  }
   0xb   : > { %178 = sbr.rel (%p175_p6) target bundleno = 431 (0x1af), region = 36  ;;  %1550 = vmatprep.mubr.msk.bf16.mxu1 (!%p175_p6), %vm261_vm0, %v1726_v0  ;;  %v1727_v1 = vld [vmem:[%s2069_s2 + $0x80] sm:$0xff] (!%p175_p6)   ;;  %p208_p8 = scmp.lt.s32.totalorder (!%p175_p6), %s207_s26, 2  ;;  %1725 = vset.pattern.permute.xlu1 (!%p175_p6), %v1789_v6  ;;  %v1183_v7 = vld [vmem:[%s2070_s3 + $0x10] sm:$0xff] (!%p175_p6)  ;;  %v1184_v8 = vld [vmem:[%s2070_s3 + $0x18] sm:$0xff] (!%p175_p6)  ;;  %vm259_vm1 = vcmask (!%p175_p6), 1039360  }
   0xc   : > { %1590 = vmatprep.mubr.msk.bf16.mxu0 (!%p175_p6), %vm261_vm0, %v1727_v1  ;;  %s1782_s8 = smov (!%p175_p6), 103   ;;  %s1783_s9 = smov (!%p175_p6), 127   ;;  %v1181_v5 = vld [vmem:[%s2070_s3] sm:$0xff] (!%p175_p6)  ;;  %1724 = vset.pattern.permute.xlu0 (!%p175_p6), %v1789_v6  ;;  %v1186_v10 = vld [vmem:[%s2070_s3 + $0x28] sm:$0xff] (!%p175_p6)  ;;  %v1187_v11 = vld [vmem:[%s2070_s3 + $0x30] sm:$0xff] (!%p175_p6)  ;;  %vm722_vm2 = vcmask (!%p175_p6), 842752  }
   0xd   : > { %s1784_s14 = smov (!%p175_p6), 102   ;;  %s1785_s17 = smov (!%p175_p6), 123   ;;  %v1185_v9 = vld [vmem:[%s2070_s3 + $0x20] sm:$0xff] (!%p175_p6)  ;;  %v1188_v12 = vld [vmem:[%s2070_s3 + $0x38] sm:$0xff] (!%p175_p6)  ;;  %vm274_vm3 = vcmask (!%p175_p6), 1043456   ;;  %vm845_vm4 = vcmask (!%p175_p6), 834560  }
   0xe   : > { %s1786_s20 = smov (!%p175_p6), 98   ;;  %s1787_s21 = smov (!%p175_p6), 122   ;;  %v1728_v21 = vld [vmem:[%s2069_s2 + $0x28] sm:$0xff] (!%p175_p6)   ;;  %v1730_v26 = vld [vmem:[%s2069_s2 + $0x30] sm:$0xff] (!%p175_p6)   ;;  %vm476_vm5 = vcmask (!%p175_p6), 1006592   ;;  %v1732_v33 = vld [vmem:[%s2069_s2 + $0x38] sm:$0xff] (!%p175_p6)  }
   0xf   : > { %s1788_s24 = smov (!%p175_p6), 97   ;;  %v1729_v22 = vld [vmem:[%s2069_s2 + $0x88] sm:$0xff] (!%p175_p6)   ;;  %v1731_v28 = vld [vmem:[%s2069_s2 + $0x90] sm:$0xff] (!%p175_p6)   ;;  %v1733_v34 = vld [vmem:[%s2069_s2 + $0x98] sm:$0xff] (!%p175_p6)   ;;  %vm968_vm6 = vcmask (!%p175_p6), 801792   ;;  %vm599_vm7 = vcmask (!%p175_p6), 998400  }
  0x10   : > { %v1734_v35 = vld [vmem:[%s2069_s2] sm:$0xff] (!%p175_p6)   ;;  %v1736_v42 = vld [vmem:[%s2069_s2 + $0x8] sm:$0xff] (!%p175_p6)   ;;  %vm1091_vm8 = vcmask (!%p175_p6), 793600   ;;  %v1738_v46 = vld [vmem:[%s2069_s2 + $0x10] sm:$0xff] (!%p175_p6)  }
  0x11   : > { %v1735_v36 = vld [vmem:[%s2069_s2 + $0xa0] sm:$0xff] (!%p175_p6)   ;;  %v1737_v43 = vld [vmem:[%s2069_s2 + $0xa8] sm:$0xff] (!%p175_p6)   ;;  %v1739_v47 = vld [vmem:[%s2069_s2 + $0xb0] sm:$0xff] (!%p175_p6)  }
  0x12   : > { %s204_s27 = scalar_select %p203_p7, %s1828_s18, 2  ;;  %v1740_v52 = vld [vmem:[%s2069_s2 + $0x18] sm:$0xff]   ;;  %v1742_v54 = vld [vmem:[%s2069_s2 + $0x40] sm:$0xff]   ;;  %v1744_v56 = vld [vmem:[%s2069_s2 + $0x48] sm:$0xff]  }
  0x13   : > { %s2077_s26 = smov (!%p208_p8, %s207_s26), 2  ;;  %v1741_v53 = vld [vmem:[%s2069_s2 + $0xb8] sm:$0xff]   ;;  %v1743_v55 = vld [vmem:[%s2069_s2 + $0xc0] sm:$0xff]   ;;  %v1745_v57 = vld [vmem:[%s2069_s2 + $0xc8] sm:$0xff]  }
  0x14   : > { %s1382_s30 = sshll.u32 %s204_s27, 2  ;;  %s1383_s10 = sshll.u32 %s2077_s26, 2  ;;  %v1746_v60 = vld [vmem:[%s2069_s2 + $0x50] sm:$0xff]   ;;  %v1748_v62 = vld [vmem:[%s2069_s2 + $0x58] sm:$0xff]   ;;  %v1750_v0 = vld [vmem:[%s2069_s2 + $0x60] sm:$0xff]  }
  0x15   : > { %s206_s7 = scalar_lea.vmem %s2067_s0, %s1382_s30  ;;  %s211_s13 = scalar_lea.vmem %s2068_s1, %s1383_s10  ;;  %v1747_v61 = vld [vmem:[%s2069_s2 + $0xd0] sm:$0xff]   ;;  %v1749_v63 = vld [vmem:[%s2069_s2 + $0xd8] sm:$0xff]   ;;  %v1751_v1 = vld [vmem:[%s2069_s2 + $0xe0] sm:$0xff]  }
  0x16   : > { %v1858_v2 = vld [vmem:[%s206_s7] sm:$0xf]  ;;  %v1756_v6 = vld [vmem:[%s2069_s2 + $0x78] sm:$0xff]  }
  0x17   : > { %718 = vrot.lane.b32.xlu1 %v1858_v2, %s1782_s8  ;;  %255 = vrot.lane.b32.xlu0 %v1858_v2, %s1783_s9  ;;  %v215_v3 = vld [vmem:[%s211_s13] sm:$0xf]  ;;  %v376_v25 = vsel %vm274_vm3, %v1858_v2, 0 }
  0x1b   : > { %720 = vrot.lane.b32.xlu1 %v215_v3, %s1782_s8  ;;  %257 = vrot.lane.b32.xlu0 %v215_v3, %s1783_s9 }
  0x1f   : > { %843 = vrot.lane.b32.xlu1 %v215_v3, %s1784_s14  ;;  %841 = vrot.lane.b32.xlu0 %v1858_v2, %s1784_s14 }
  0x23   : > { %474 = vrot.lane.b32.xlu1 %v215_v3, %s1785_s17  ;;  %472 = vrot.lane.b32.xlu0 %v1858_v2, %s1785_s17  ;;  %s200_s17 = sand.u32 1, %s1772_s15   ;;  %s1505_s15 = sshll.u32 (%p1840_p4), %s1828_s18, 3 }
  0x24   : > { %s1253_s26 = scalar_lea.vmem (%p1840_p4), %s2071_s4, %s1505_s15 }
  0x27   : > { %966 = vrot.lane.b32.xlu1 %v215_v3, %s1786_s20  ;;  %964 = vrot.lane.b32.xlu0 %v1858_v2, %s1786_s20  ;;  %s1381_s20 = sshll.u32 %s200_s17, 6 }
  0x2b   : > { %597 = vrot.lane.b32.xlu1 %v215_v3, %s1787_s21  ;;  %595 = vrot.lane.b32.xlu0 %v1858_v2, %s1787_s21  ;;  %s2033_s21 = scalar_lea.vmem [#allocation2], %s1381_s20 }
  0x2f   : > { %1089 = vrot.lane.b32.xlu1 %v215_v3, %s1788_s24  ;;  %1087 = vrot.lane.b32.xlu0 %v1858_v2, %s1788_s24  ;;  %v1753_v3 = vld [vmem:[%s2069_s2 + $0xe8] sm:$0xff]  }
  0x33   : > { %1196 = vperm.xlu1 %1725, %v1182_v4   ;;  %1191 = vperm.xlu0 %1724, %v1181_v5   ;;  %v1754_v4 = vld [vmem:[%s2069_s2 + $0x70] sm:$0xff]  }
  0x34   : > { %v1755_v5 = vld [vmem:[%s2069_s2 + $0xf0] sm:$0xff]  }
  0x37   : > { %1201 = vperm.xlu1 %1725, %v1183_v7   ;;  %1206 = vperm.xlu0 %1724, %v1184_v8   ;;  %v1757_v7 = vld [vmem:[%s2069_s2 + $0xf8] sm:$0xff]  }
  0x3b   : > { %1211 = vperm.xlu1 %1725, %v1185_v9   ;;  %1216 = vperm.xlu0 %1724, %v1186_v10  }
  0x3f   : > { %1221 = vperm.xlu1 %1725, %v1187_v11   ;;  %1226 = vperm.xlu0 %1724, %v1188_v12  }
  0x89   : > { %v719_v13 = vpop.permute.xlu1 %718  ;;  %v256_v14 = vpop.permute.xlu0 %255 }
  0x8d   : > { %v721_v15 = vpop.permute.xlu1 %720  ;;  %v258_v16 = vpop.permute.xlu0 %257 }
  0x8e   : > { %v260_v17 = vsel %vm259_vm1, %v256_v14, %v258_v16  ;;  %v723_v18 = vsel %vm722_vm2, %v719_v13, %v721_v15 }
  0x8f   : > { %1684 = vmatprep.subr.msk.bf16.mxu1 %vm274_vm3, %v260_v17  ;;  %1688 = vmatprep.subr.msk.bf16.mxu0 %vm274_vm3, %v723_v18  ;;  %v276_v19 = vsel %vm274_vm3, %v260_v17, 0  ;;  %v737_v20 = vsel %vm274_vm3, %v723_v18, 0 }
  0x90   : > { %1549 = vmatpush3.bf16.msra.mxu1 %v276_v19  ;;  %1589 = vmatpush3.bf16.msra.mxu0 %v737_v20 }
  0x91   : > { %v844_v23 = vpop.permute.xlu1 %843  ;;  %v842_v24 = vpop.permute.xlu0 %841  ;;  %1685 = vmatprep.subr.msk.bf16.mxu1 %vm274_vm3, %v1858_v2  ;;  %v1752_v2 = vld [vmem:[%s2069_s2 + $0x68] sm:$0xff]  }
  0x92   : > { %v846_v27 = vsel %vm845_vm4, %v842_v24, %v844_v23 }
  0x93   : > { %v860_v29 = vsel %vm274_vm3, %v846_v27, 0  ;;  %1551 = vmatmul.mubr.msk.bf16.vlgmr.msra.gmra.mrb[0].mxu1 %vm261_vm0, %v1728_v21  ;;  %1591 = vmatmul.mubr.msk.bf16.vlgmr.msra.gmra.mrb[0].mxu0 %vm261_vm0, %v1729_v22 }
  0x94   : > { %1689 = vmatprep.subr.msk.bf16.mxu0 %vm274_vm3, %v846_v27  ;;  %1559 = vmatpush3.bf16.msra.mxu1 %v376_v25 }
  0x95   : > { %1599 = vmatpush3.bf16.msra.mxu0 %v860_v29  ;;  %1554 = vmatprep.mubr.msk.bf16.mxu1 %vm261_vm0, %v1730_v26  ;;  %v475_v30 = vpop.permute.xlu1 %474  ;;  %v473_v31 = vpop.permute.xlu0 %472 }
  0x96   : > { %1594 = vmatprep.mubr.msk.bf16.mxu0 %vm261_vm0, %v1731_v28  ;;  %v477_v32 = vsel %vm476_vm5, %v473_v31, %v475_v30 }
  0x97   : > { %1686 = vmatprep.subr.msk.bf16.mxu1 %vm274_vm3, %v477_v32  ;;  %v491_v44 = vsel %vm274_vm3, %v477_v32, 0 }
  0x99   : > { %v967_v37 = vpop.permute.xlu1 %966  ;;  %v965_v38 = vpop.permute.xlu0 %964 }
  0x9a   : > { %v969_v39 = vsel %vm968_vm6, %v965_v38, %v967_v37 }
  0x9b   : > { %1555 = vmatmul.mubr.msk.bf16.gmra.mrb[4].mxu1 %vm261_vm0, %v1732_v33  ;;  %1595 = vmatmul.mubr.msk.bf16.gmra.mrb[4].mxu0 %vm261_vm0, %v1733_v34  ;;  %v983_v45 = vsel %vm274_vm3, %v969_v39, 0 }
  0x9c   : > { %1560 = vmatprep.mubr.msk.bf16.mxu1 %vm261_vm0, %v1734_v35  ;;  %1600 = vmatprep.mubr.msk.bf16.mxu0 %vm261_vm0, %v1735_v36 }
  0x9d   : > { %1690 = vmatprep.subr.msk.bf16.mxu0 %vm274_vm3, %v969_v39  ;;  %v598_v40 = vpop.permute.xlu1 %597  ;;  %v596_v41 = vpop.permute.xlu0 %595 }
  0x9e   : > { %v600_v50 = vsel %vm599_vm7, %v596_v41, %v598_v40 }
  0x9f   : > { %v614_v58 = vsel %vm274_vm3, %v600_v50, 0 }
  0xa1   : > { %v1090_v48 = vpop.permute.xlu1 %1089  ;;  %v1088_v49 = vpop.permute.xlu0 %1087 }
  0xa2   : > { %v1092_v51 = vsel %vm1091_vm8, %v1088_v49, %v1090_v48 }
  0xa3   : > { %1561 = vmatmul.mubr.msk.bf16.vlgmr.msra.gmra.mrb[0].mxu1 %vm261_vm0, %v1736_v42  ;;  %1601 = vmatmul.mubr.msk.bf16.vlgmr.msra.gmra.mrb[0].mxu0 %vm261_vm0, %v1737_v43  ;;  %v1106_v59 = vsel %vm274_vm3, %v1092_v51, 0 }
  0xa4   : > { %1569 = vmatpush3.bf16.msra.mxu1 %v491_v44  ;;  %1609 = vmatpush3.bf16.msra.mxu0 %v983_v45 }
  0xa5   : > { %1564 = vmatprep.mubr.msk.bf16.mxu1 %vm261_vm0, %v1738_v46  ;;  %1604 = vmatprep.mubr.msk.bf16.mxu0 %vm261_vm0, %v1739_v47 }
  0xa6   : > { %1687 = vmatprep.subr.msk.bf16.mxu1 %vm274_vm3, %v600_v50  ;;  %1691 = vmatprep.subr.msk.bf16.mxu0 %vm274_vm3, %v1092_v51 }
  0xab   : > { %1565 = vmatmul.mubr.msk.bf16.gmra.mrb[4].mxu1 %vm261_vm0, %v1740_v52  ;;  %1605 = vmatmul.mubr.msk.bf16.gmra.mrb[4].mxu0 %vm261_vm0, %v1741_v53 }
  0xac   : > { %1570 = vmatprep.mubr.msk.bf16.mxu1 %vm261_vm0, %v1742_v54  ;;  %1610 = vmatprep.mubr.msk.bf16.mxu0 %vm261_vm0, %v1743_v55 }
  0xb2   : > { %v1197_v8 = vpop.permute.xlu1 %1196  ;;  %v1192_v9 = vpop.permute.xlu0 %1191 }
  0xb3   : > { %1571 = vmatmul.mubr.msk.bf16.vlgmr.msra.gmra.mrb[0].mxu1 %vm261_vm0, %v1744_v56  ;;  %1611 = vmatmul.mubr.msk.bf16.vlgmr.msra.gmra.mrb[0].mxu0 %vm261_vm0, %v1745_v57 }
  0xb4   : > { %1579 = vmatpush3.bf16.msra.mxu1 %v614_v58  ;;  %1619 = vmatpush3.bf16.msra.mxu0 %v1106_v59 }
  0xb5   : > { %1574 = vmatprep.mubr.msk.bf16.mxu1 %vm261_vm0, %v1746_v60  ;;  %1614 = vmatprep.mubr.msk.bf16.mxu0 %vm261_vm0, %v1747_v61 }
  0xb6   : > { %v1202_v10 = vpop.permute.xlu1 %1201  ;;  %v1207_v11 = vpop.permute.xlu0 %1206 }
  0xba   : > { %v1212_v12 = vpop.permute.xlu1 %1211  ;;  %v1217_v28 = vpop.permute.xlu0 %1216 }
  0xbb   : > { %1575 = vmatmul.mubr.msk.bf16.gmra.mrb[4].mxu1 %vm261_vm0, %v1748_v62  ;;  %1615 = vmatmul.mubr.msk.bf16.gmra.mrb[4].mxu0 %vm261_vm0, %v1749_v63 }
  0xbc   : > { %1580 = vmatprep.mubr.msk.bf16.mxu1 %vm261_vm0, %v1750_v0  ;;  %1620 = vmatprep.mubr.msk.bf16.mxu0 %vm261_vm0, %v1751_v1 }
  0xbe   : > { %v1222_v30 = vpop.permute.xlu1 %1221  ;;  %v1227_v43 = vpop.permute.xlu0 %1226 }
  0xc3   : > { %1581 = vmatmul.mubr.msk.bf16.vlgmr.msra.gmra.mrb[0].mxu1 %vm261_vm0, %v1752_v2  ;;  %1621 = vmatmul.mubr.msk.bf16.vlgmr.msra.gmra.mrb[0].mxu0 %vm261_vm0, %v1753_v3 }
  0xc4   : > { %1584 = vmatprep.mubr.msk.bf16.mxu1 %vm261_vm0, %v1754_v4  ;;  %1624 = vmatprep.mubr.msk.bf16.mxu0 %vm261_vm0, %v1755_v5 }
  0xcb   : > { %1585 = vmatmul.mubr.msk.bf16.gmra.mrb[4].mxu1 %vm261_vm0, %v1756_v6  ;;  %1625 = vmatmul.mubr.msk.bf16.gmra.mrb[4].mxu0 %vm261_vm0, %v1757_v7 }
 0x196   : > { %v1582_v13 = vpop.f32.mrb[0].mxu1  ;;  %v1622_v14 = vpop.f32.mrb[0].mxu0 }
 0x197   : > { %v1628_v15 = vadd.f32 %v1622_v14, %v1582_v13  ;;  %v650_v16 = vpop.f32.mrb[1].mxu1  ;;  %v1142_v17 = vpop.f32.mrb[1].mxu0 }
 0x198   : > { %v1629_v18 = vadd.f32 %v1142_v17, %v650_v16  ;;  %v1623_v19 = vpop.f32.mrb[2].mxu0  ;;  %v1583_v20 = vpop.f32.mrb[2].mxu1 }
 0x199   : > { %v1231_v21 = vadd.f32 %v1628_v15, %v1202_v10  ;;  %v1630_v22 = vadd.f32 %v1623_v19, %v1583_v20  ;;  %v653_v23 = vpop.f32.mrb[3].mxu1  ;;  %v1145_v24 = vpop.f32.mrb[3].mxu0 }
 0x19a   : > { %v1229_v25 = vadd.f32 %v1629_v18, %v1192_v9  ;;  %v1631_v26 = vadd.f32 %v1145_v24, %v653_v23 }
 0x19b   : > { %1239 = vst [vmem:[%s2033_s21 + $0x10] sm:$0xff] %v1231_v21  ;;  %v1232_v27 = vadd.f32 %v1630_v22, %v1207_v11 }
 0x19c   : > { %1237 = vst [vmem:[%s2033_s21] sm:$0xff] %v1229_v25  ;;  %v1230_v29 = vadd.f32 %v1631_v26, %v1197_v8 }
 0x19d   : > { %1240 = vst [vmem:[%s2033_s21 + $0x18] sm:$0xff] %v1232_v27 }
 0x19e   : > { %1238 = vst [vmem:[%s2033_s21 + $0x8] sm:$0xff] %v1230_v29  ;;  %v1586_v31 = vpop.f32.mrb[4].mxu1  ;;  %v1626_v32 = vpop.f32.mrb[4].mxu0 }
 0x19f   : > { %v1632_v33 = vadd.f32 %v1626_v32, %v1586_v31  ;;  %v666_v34 = vpop.f32.mrb[5].mxu1  ;;  %v1158_v35 = vpop.f32.mrb[5].mxu0 }
 0x1a0   : > { %v1633_v36 = vadd.f32 %v1158_v35, %v666_v34  ;;  %v1587_v37 = vpop.f32.mrb[6].mxu1  ;;  %v1627_v38 = vpop.f32.mrb[6].mxu0  ;;  %1251 = sbr.rel (!%p1840_p4) target bundleno = 431 (0x1af), region = 40 }
 0x1a1   : > { %v1235_v39 = vadd.f32 %v1632_v33, %v1222_v30  ;;  %v1634_v40 = vadd.f32 %v1627_v38, %v1587_v37  ;;  %v669_v41 = vpop.f32.mrb[7].mxu1  ;;  %v1161_v42 = vpop.f32.mrb[7].mxu0 }
 0x1a2   : > { %v1233_v44 = vadd.f32 %v1633_v36, %v1212_v12  ;;  %v1635_v45 = vadd.f32 %v1161_v42, %v669_v41  ;;  %v1299_v50 = vld [vmem:[%s2033_s21 + $0x10] sm:$0xff] (%p1840_p4) }
 0x1a3   : > { %1243 = vst [vmem:[%s2033_s21 + $0x30] sm:$0xff] %v1235_v39  ;;  %v1236_v46 = vadd.f32 %v1634_v40, %v1227_v43  ;;  %v1295_v48 = vld [vmem:[%s2033_s21] sm:$0xff] (%p1840_p4)  ;;  %1300 = vst [vmem:[%s1253_s26 + $0x20] sm:$0xff] (%p1840_p4), %v1299_v50 }
 0x1a4   : > { %1241 = vst [vmem:[%s2033_s21 + $0x20] sm:$0xff] %v1233_v44  ;;  %v1234_v47 = vadd.f32 %v1635_v45, %v1217_v28  ;;  %v1301_v51 = vld [vmem:[%s2033_s21 + $0x18] sm:$0xff] (%p1840_p4)  ;;  %1296 = vst [vmem:[%s1253_s26] sm:$0xff] (%p1840_p4), %v1295_v48 }
 0x1a5   : > { %1244 = vst [vmem:[%s2033_s21 + $0x38] sm:$0xff] %v1236_v46  ;;  %v1297_v49 = vld [vmem:[%s2033_s21 + $0x8] sm:$0xff] (%p1840_p4)  ;;  %1302 = vst [vmem:[%s1253_s26 + $0x30] sm:$0xff] (%p1840_p4), %v1301_v51 }
 0x1a6   : > { %1242 = vst [vmem:[%s2033_s21 + $0x28] sm:$0xff] %v1234_v47  ;;  %1298 = vst [vmem:[%s1253_s26 + $0x10] sm:$0xff] (%p1840_p4), %v1297_v49 }
 0x1aa   : > { %v1307_v54 = vld [vmem:[%s2033_s21 + $0x30] sm:$0xff] }
 0x1ab   : > { %v1303_v52 = vld [vmem:[%s2033_s21 + $0x20] sm:$0xff]  ;;  %1308 = vst [vmem:[%s1253_s26 + $0x60] sm:$0xff] %v1307_v54 }
 0x1ac   : > { %1304 = vst [vmem:[%s1253_s26 + $0x40] sm:$0xff] %v1303_v52  ;;  %v1309_v55 = vld [vmem:[%s2033_s21 + $0x38] sm:$0xff] }
 0x1ad   : > { %v1305_v53 = vld [vmem:[%s2033_s21 + $0x28] sm:$0xff]  ;;  %1310 = vst [vmem:[%s1253_s26 + $0x70] sm:$0xff] %v1309_v55 }
 0x1ae   : > { %1306 = vst [vmem:[%s1253_s26 + $0x50] sm:$0xff] %v1305_v53 }
 0x1af PF: > { %p11_p9 = scmp.ge.s32.totalorder %s1830_s19, 4   ;;  %s2073_s15 = smov %s1776_s16 }
 0x1b0   : > { %s2074_s16 = smov %s1838_s22  ;;  %s2075_s17 = smov %s1830_s19 }
 0x1b1   :  { %13 = sbr.rel (!%p11_p9) target bundleno = 2 (0x2), region = 114 }

// kernel: hourglass_forward.11
= control target key start
LH: loop header
LB: loop body
LE: loop exit
PB: predicated region body
PF: predicated region fallthrough
CT: control target
= control target key end

     0   :  { %s2069_s15 = smov 0   ;;  %s2071_s16 = smov 0   ;;  %s2372_s0 = inlined_call_operand.vmem [shape: bf16[8,1536], index: 0, kind: input, shape index: {}, may-alias: {0,1}]   ;;  %s2373_s1 = inlined_call_operand.vmem [shape: bf16[8,1536], index: 1, kind: input, shape index: {}, may-alias: {0,1}]   ;;  %s2374_s2 = inlined_call_operand.vmem [shape: bf16[8,32,8], index: 2, kind: input, shape index: {}]   ;;  %s2375_s3 = inlined_call_operand.vmem [shape: f32[32,1], index: 3, kind: input, shape index: {}]   ;;  %s2376_s4 = inlined_call_operand.vmem [shape: f32[32,1024], index: 4, kind: output, shape index: {}]  }
   0x1   :  { %s2073_s17 = smov 0  }
   0x2 LB: > { %s2082_s18 = sadd.s32 4294967295, %s2034_s17   ;;  %s2084_s19 = sadd.s32 1, %s2034_s17   ;;  %s2034_s17 = sphi %s2073_s17, %s2380_s17   ;;  %s2030_s16 = sphi %s2071_s16, %s2379_s16   ;;  %s2026_s15 = sphi %s2069_s15, %s2378_s15  }
   0x3   : > { %s114_s20 = ssub.s32 %s2034_s17, %s2084_s19  ;;  %s117_s21 = sadd.s32 1, %s2030_s16 }
   0x4   : > { %p115_p0 = scmp.eq.s32.totalorder %s114_s20, 0  ;;  %p127_p1 = scmp.ne.s32.totalorder %s2030_s16, %s2026_s15 }
   0x5   : > { %p128_p2 = scmp.eq.s32.totalorder %s2082_s18, 1  ;;  %p1734_p3 = scmp.ge.s32.totalorder %s2034_s17, 1 }
   0x6   : > { %s2092_s22 = scalar_select %p115_p0, %s2030_s16, %s117_s21  }
   0x7   : > { %p2094_p4 = por %p128_p2, %p127_p1  ;;  %p178_p5 = scmp.lt.s32.totalorder %s2034_s17, 3 }
   0x9   : > { %p179_p6 = pnand %p1734_p3, %p178_p5 }
   0xa   : > { %s1736_s24 = sshll.u32 (!%p179_p6), %s2082_s18, 2  ;;  %v2036_v0 = vmov (!%p179_p6), 0   ;;  %s2037_s8 = smov (!%p179_p6), 127   ;;  %vm270_vm0 = vcmask (!%p179_p6), 1039360   ;;  %vm282_vm1 = vcmask (!%p179_p6), 1043456   ;;  %v1996_v15 = vld [vmem:[%s2374_s2 + $0x10] sm:$0xff] (!%p179_p6)  }
   0xb   : > { %182 = sbr.rel (%p179_p6) target bundleno = 498 (0x1f2), region = 36  ;;  %p210_p7 = scmp.lt.s32.totalorder (!%p179_p6), %s1736_s24, 11  ;;  %327 = vmatprep.mubr.bf16.mxu0 (!%p179_p6), %v2036_v0  ;;  %380 = vmatprep.mubr.bf16.mxu1 (!%p179_p6), %v2036_v0  ;;  %v1555_v16 = vld [vmem:[%s2375_s3] sm:$0xff] (!%p179_p6)  ;;  %v1556_v17 = vld [vmem:[%s2375_s3 + $0x8] sm:$0xff] (!%p179_p6)  ;;  %vm275_vm2 = vcmask (!%p179_p6), 64512   ;;  %vm560_vm3 = vcmask (!%p179_p6), 973824  }
   0xc   : > { %s1843_s25 = sadd.s32 (!%p179_p6), 4, %s1736_s24  ;;  %1989 = vset.pattern.permute.xlu1 (!%p179_p6), %v2036_v0  ;;  %1990 = vset.pattern.permute.xlu0 (!%p179_p6), %v2036_v0  ;;  %s2038_s9 = smov (!%p179_p6), 119   ;;  %v1557_v24 = vld [vmem:[%s2375_s3 + $0x10] sm:$0xff] (!%p179_p6)  ;;  %v1997_v29 = vld [vmem:[%s2374_s2 + $0x18] sm:$0xff] (!%p179_p6)   ;;  %v1998_v37 = vld [vmem:[%s2374_s2] sm:$0xff] (!%p179_p6)   ;;  %vm730_vm4 = vcmask (!%p179_p6), 965632  }
   0xd   : > { %p217_p8 = scmp.lt.s32.totalorder (!%p179_p6), %s1843_s25, 11  ;;  %s2039_s10 = smov (!%p179_p6), 118   ;;  %v1558_v30 = vld [vmem:[%s2375_s3 + $0x18] sm:$0xff] (!%p179_p6)  ;;  %v1999_v46 = vld [vmem:[%s2374_s2 + $0x8] sm:$0xff] (!%p179_p6)   ;;  %v2000_v51 = vld [vmem:[%s2374_s2 + $0x20] sm:$0xff] (!%p179_p6)   ;;  %vm900_vm5 = vcmask (!%p179_p6), 384000  }
   0xe   : > { %s2040_s11 = smov (!%p179_p6), 47   ;;  %s2041_s12 = smov (!%p179_p6), 46   ;;  %v2001_v59 = vld [vmem:[%s2374_s2 + $0x28] sm:$0xff] (!%p179_p6)   ;;  %vm1070_vm6 = vcmask (!%p179_p6), 375808   ;;  %vm1240_vm7 = vcmask (!%p179_p6), 310272   ;;  %vm1410_vm8 = vcmask (!%p179_p6), 302080  }
   0xf   : > { %s2042_s13 = smov (!%p179_p6), 38   ;;  %s2043_s14 = smov (!%p179_p6), 37  }
  0x10   : > { %s206_s17 = sand.u32 (!%p179_p6), 1, %s2026_s15  }
  0x11   : > { %s1735_s20 = sshll.u32 (!%p179_p6), %s206_s17, 7 }
  0x12   : > { %s2382_s24 = smov (!%p210_p7, %s1736_s24), 11  ;;  %s2384_s25 = smov (!%p217_p8, %s1843_s25), 11 }
  0x13   : > { %s1737_s26 = sshll.u32 %s2382_s24, 2  ;;  %s1739_s30 = sshll.u32 %s2384_s25, 2 }
  0x14   : > { %s213_s29 = scalar_lea.vmem %s2372_s0, %s1737_s26  ;;  %s220_s7 = scalar_lea.vmem %s2373_s1, %s1739_s30 }
  0x15   : > { %v226_v1 = vld [vmem:[%s213_s29 + $0x8] sm:$0xff]  ;;  %v225_v2 = vld [vmem:[%s213_s29] sm:$0xff]  ;;  %s2322_s21 = scalar_lea.vmem [#allocation2], %s1735_s20  ;;  %s1844_s15 = sshll.u32 (%p2094_p4), %s2082_s18, 5 }
  0x16   : > { %v2109_v3 = vcombine.low %v226_v1, %v226_v1  ;;  %v2111_v4 = vcombine.low %v225_v2, %v225_v2  ;;  %v2115_v5 = vcombine.high %v226_v1, %v226_v1  ;;  %v1741_v6 = vcombine.high %v225_v2, %v225_v2  ;;  %v1995_v7 = vld [vmem:[%s220_s7] ss:$0 sps:$4 sm:$0xff]   ;;  %v2002_v1 = vld [vmem:[%s2374_s2 + $0x30] sm:$0xff]   ;;  %s1620_s26 = scalar_lea.vmem (%p2094_p4), %s2376_s4, %s1844_s15 }
  0x18   : > { %264 = vrot.lane.b32.xlu1 %v2109_v3, %s2037_s8  ;;  %260 = vrot.lane.b32.xlu0 %v2111_v4, %s2037_s8  ;;  %v418_v20 = vsel %vm282_vm1, %v2111_v4, 0  ;;  %v424_v25 = vsel %vm282_vm1, %v2109_v3, 0 }
  0x1c   : > { %266 = vrot.lane.b32.xlu1 %v2115_v5, %s2037_s8  ;;  %262 = vrot.lane.b32.xlu0 %v1741_v6, %s2037_s8 }
  0x20   : > { %268 = vrot.lane.b32.xlu0 %v1995_v7, %s2037_s8  ;;  %550 = vrot.lane.b32.xlu1 %v2111_v4, %s2038_s9 }
  0x24   : > { %552 = vrot.lane.b32.xlu0 %v1741_v6, %s2038_s9  ;;  %554 = vrot.lane.b32.xlu1 %v2109_v3, %s2038_s9 }
  0x28   : > { %556 = vrot.lane.b32.xlu0 %v2115_v5, %s2038_s9  ;;  %558 = vrot.lane.b32.xlu1 %v1995_v7, %s2038_s9 }
  0x2c   : > { %720 = vrot.lane.b32.xlu0 %v2111_v4, %s2039_s10  ;;  %722 = vrot.lane.b32.xlu1 %v1741_v6, %s2039_s10 }
  0x30   : > { %724 = vrot.lane.b32.xlu0 %v2109_v3, %s2039_s10  ;;  %726 = vrot.lane.b32.xlu1 %v2115_v5, %s2039_s10 }
  0x34   : > { %728 = vrot.lane.b32.xlu0 %v1995_v7, %s2039_s10  ;;  %890 = vrot.lane.b32.xlu1 %v2111_v4, %s2040_s11 }
  0x38   : > { %892 = vrot.lane.b32.xlu0 %v1741_v6, %s2040_s11  ;;  %894 = vrot.lane.b32.xlu1 %v2109_v3, %s2040_s11 }
  0x3c   : > { %896 = vrot.lane.b32.xlu0 %v2115_v5, %s2040_s11  ;;  %898 = vrot.lane.b32.xlu1 %v1995_v7, %s2040_s11 }
  0x40   : > { %1060 = vrot.lane.b32.xlu0 %v2111_v4, %s2041_s12  ;;  %1062 = vrot.lane.b32.xlu1 %v1741_v6, %s2041_s12 }
  0x44   : > { %1064 = vrot.lane.b32.xlu0 %v2109_v3, %s2041_s12  ;;  %1066 = vrot.lane.b32.xlu1 %v2115_v5, %s2041_s12 }
  0x48   : > { %1068 = vrot.lane.b32.xlu0 %v1995_v7, %s2041_s12  ;;  %1230 = vrot.lane.b32.xlu1 %v2111_v4, %s2042_s13 }
  0x4c   : > { %1232 = vrot.lane.b32.xlu0 %v1741_v6, %s2042_s13  ;;  %1234 = vrot.lane.b32.xlu1 %v2109_v3, %s2042_s13 }
  0x50   : > { %1236 = vrot.lane.b32.xlu0 %v2115_v5, %s2042_s13  ;;  %1238 = vrot.lane.b32.xlu1 %v1995_v7, %s2042_s13 }
  0x54   : > { %1400 = vrot.lane.b32.xlu0 %v2111_v4, %s2043_s14  ;;  %1402 = vrot.lane.b32.xlu1 %v1741_v6, %s2043_s14 }
  0x58   : > { %1404 = vrot.lane.b32.xlu0 %v2109_v3, %s2043_s14  ;;  %1406 = vrot.lane.b32.xlu1 %v2115_v5, %s2043_s14 }
  0x5c   : > { %1408 = vrot.lane.b32.xlu0 %v1995_v7, %s2043_s14  ;;  %1561 = vperm.xlu1 %1989, %v1555_v16  }
  0x60   : > { %1566 = vperm.xlu0 %1990, %v1556_v17   ;;  %1571 = vperm.xlu1 %1989, %v1557_v24  }
  0x64   : > { %1576 = vperm.xlu1 %1989, %v1558_v30  }
  0x8a   : > { %v265_v8 = vpop.permute.xlu1 %264  ;;  %v261_v9 = vpop.permute.xlu0 %260 }
  0x8e   : > { %v267_v10 = vpop.permute.xlu1 %266  ;;  %v263_v11 = vpop.permute.xlu0 %262 }
  0x8f   : > { %v272_v12 = vsel %vm270_vm0, %v263_v11, %v265_v8  ;;  %v271_v13 = vsel %vm270_vm0, %v261_v9, %v263_v11  ;;  %v273_v18 = vsel %vm270_vm0, %v265_v8, %v267_v10  ;;  %v2003_v9 = vld [vmem:[%s2374_s2 + $0x38] sm:$0xff]  }
  0x90   : > { %1751 = vmatprep.subr.msk.bf16.mxu0 %vm282_vm1, %v272_v12  ;;  %v284_v14 = vsel %vm282_vm1, %v271_v13, 0  ;;  %v290_v23 = vsel %vm282_vm1, %v273_v18, 0 }
  0x91   : > { %296 = vmatpush1.bf16.msra.mxu0 %v284_v14  ;;  %v2004_v14 = vld [vmem:[%s2374_s2 + $0x40] sm:$0xff]  }
  0x92   : > { %v269_v19 = vpop.permute.xlu0 %268  ;;  %1759 = vmatprep.subr.msk.bf16.mxu0 %vm282_vm1, %v1741_v6  ;;  %v551_v21 = vpop.permute.xlu1 %550 }
  0x93   : > { %v274_v22 = vsel %vm270_vm0, %v267_v10, %v269_v19 }
  0x94   : > { %1752 = vmatmul.mubr.msk.bf16.vlgmr.msra.gmra.mrb[0].mxu0 %vm275_vm2, %v1996_v15  ;;  %1754 = vmatprep.subr.msk.bf16.mxu1 %vm282_vm1, %v274_v22  ;;  %v2005_v22 = vld [vmem:[%s2374_s2 + $0x48] sm:$0xff]  }
  0x95   : > { %349 = vmatpush1.bf16.msra.mxu1 %v290_v23  ;;  %430 = vmatpush1.bf16.msra.mxu0 %v418_v20 }
  0x96   : > { %1762 = vmatprep.subr.msk.bf16.mxu1 %vm282_vm1, %v2115_v5  ;;  %337 = vmatprep.mubr.bf16.mxu0 %v2036_v0  ;;  %v553_v26 = vpop.permute.xlu0 %552  ;;  %v555_v27 = vpop.permute.xlu1 %554 }
  0x97   : > { %v562_v28 = vsel %vm560_vm3, %v553_v26, %v555_v27  ;;  %v561_v36 = vsel %vm560_vm3, %v551_v21, %v553_v26 }
  0x98   : > { %1755 = vmatmul.mubr.msk.bf16.vlgmr.msra.gmra.mrb[0].mxu1 %vm275_vm2, %v1996_v15  ;;  %1771 = vmatprep.subr.msk.bf16.mxu0 %vm282_vm1, %v562_v28  ;;  %v572_v38 = vsel %vm282_vm1, %v561_v36, 0 }
  0x99   : > { %483 = vmatpush1.bf16.msra.mxu1 %v424_v25  ;;  %390 = vmatprep.mubr.bf16.mxu1 %v2036_v0 }
  0x9a   : > { %v557_v31 = vpop.permute.xlu0 %556  ;;  %v559_v32 = vpop.permute.xlu1 %558 }
  0x9b   : > { %v564_v33 = vsel %vm560_vm3, %v557_v31, %v559_v32  ;;  %v563_v40 = vsel %vm560_vm3, %v555_v27, %v557_v31  ;;  %v2006_v27 = vld [vmem:[%s2374_s2 + $0x50] sm:$0xff]  }
  0x9c   : > { %1753 = vmatmul.mubr.msk.bf16.gmra.mrb[4].mxu0 %vm275_vm2, %v1997_v29  ;;  %1774 = vmatprep.subr.msk.bf16.mxu1 %vm282_vm1, %v564_v33  ;;  %v578_v43 = vsel %vm282_vm1, %v563_v40, 0 }
  0x9d   : > { %461 = vmatprep.mubr.bf16.mxu0 %v2036_v0 }
  0x9e   : > { %v721_v34 = vpop.permute.xlu0 %720  ;;  %v723_v35 = vpop.permute.xlu1 %722 }
  0x9f   : > { %v731_v50 = vsel %vm730_vm4, %v721_v34, %v723_v35 }
  0xa0   : > { %1756 = vmatmul.mubr.msk.bf16.gmra.mrb[4].mxu1 %vm275_vm2, %v1997_v29  ;;  %v742_v52 = vsel %vm282_vm1, %v731_v50, 0 }
  0xa1   : > { %514 = vmatprep.mubr.bf16.mxu1 %v2036_v0 }
  0xa2   : > { %v725_v39 = vpop.permute.xlu0 %724  ;;  %v727_v42 = vpop.permute.xlu1 %726 }
  0xa3   : > { %v732_v41 = vsel %vm730_vm4, %v723_v35, %v725_v39  ;;  %v733_v53 = vsel %vm730_vm4, %v725_v39, %v727_v42  ;;  %v2007_v35 = vld [vmem:[%s2374_s2 + $0x58] sm:$0xff]  }
  0xa4   : > { %1760 = vmatmul.mubr.msk.bf16.vlgmr.msra.gmra.mrb[0].mxu0 %vm275_vm2, %v1998_v37  ;;  %v748_v57 = vsel %vm282_vm1, %v733_v53, 0 }
  0xa5   : > { %584 = vmatpush1.bf16.msra.mxu0 %v572_v38  ;;  %471 = vmatprep.mubr.bf16.mxu0 %v2036_v0 }
  0xa6   : > { %1783 = vmatprep.subr.msk.bf16.mxu0 %vm282_vm1, %v732_v41  ;;  %v729_v44 = vpop.permute.xlu0 %728  ;;  %v891_v47 = vpop.permute.xlu1 %890  ;;  %v2009_v41 = vld [vmem:[%s2374_s2 + $0x68] sm:$0xff]  }
  0xa7   : > { %v734_v45 = vsel %vm730_vm4, %v727_v42, %v729_v44  ;;  %v2010_v42 = vld [vmem:[%s2374_s2 + $0x70] sm:$0xff]  }
  0xa8   : > { %1763 = vmatmul.mubr.msk.bf16.vlgmr.msra.gmra.mrb[0].mxu1 %vm275_vm2, %v1998_v37  ;;  %v2008_v37 = vld [vmem:[%s2374_s2 + $0x60] sm:$0xff]  }
  0xa9   : > { %637 = vmatpush1.bf16.msra.mxu1 %v578_v43  ;;  %524 = vmatprep.mubr.bf16.mxu1 %v2036_v0  ;;  %v2011_v43 = vld [vmem:[%s2374_s2 + $0x78] sm:$0xff]  }
  0xaa   : > { %1786 = vmatprep.subr.msk.bf16.mxu1 %vm282_vm1, %v734_v45  ;;  %v893_v48 = vpop.permute.xlu0 %892  ;;  %v895_v49 = vpop.permute.xlu1 %894 }
  0xab   : > { %v902_v54 = vsel %vm900_vm5, %v893_v48, %v895_v49  ;;  %v901_v63 = vsel %vm900_vm5, %v891_v47, %v893_v48 }
  0xac   : > { %1761 = vmatmul.mubr.msk.bf16.gmra.mrb[4].mxu0 %vm275_vm2, %v1999_v46  ;;  %v912_v2 = vsel %vm282_vm1, %v901_v63, 0 }
  0xad   : > { %615 = vmatprep.mubr.bf16.mxu0 %v2036_v0 }
  0xae   : > { %v897_v55 = vpop.permute.xlu0 %896  ;;  %v899_v56 = vpop.permute.xlu1 %898 }
  0xaf   : > { %v904_v58 = vsel %vm900_vm5, %v897_v55, %v899_v56  ;;  %v903_v3 = vsel %vm900_vm5, %v895_v49, %v897_v55 }
  0xb0   : > { %1764 = vmatmul.mubr.msk.bf16.gmra.mrb[4].mxu1 %vm275_vm2, %v1999_v46  ;;  %v918_v7 = vsel %vm282_vm1, %v903_v3, 0 }
  0xb1   : > { %668 = vmatprep.mubr.bf16.mxu1 %v2036_v0 }
  0xb2   : > { %v1061_v60 = vpop.permute.xlu0 %1060  ;;  %v1063_v61 = vpop.permute.xlu1 %1062 }
  0xb3   : > { %v1071_v13 = vsel %vm1070_vm6, %v1061_v60, %v1063_v61 }
  0xb4   : > { %1772 = vmatmul.mubr.msk.bf16.vlgmr.msra.gmra.mrb[0].mxu0 %vm275_vm2, %v2000_v51  ;;  %v1082_v15 = vsel %vm282_vm1, %v1071_v13, 0 }
  0xb5   : > { %754 = vmatpush1.bf16.msra.mxu0 %v742_v52  ;;  %625 = vmatprep.mubr.bf16.mxu0 %v2036_v0 }
  0xb6   : > { %1795 = vmatprep.subr.msk.bf16.mxu0 %vm282_vm1, %v902_v54  ;;  %v1065_v62 = vpop.permute.xlu0 %1064  ;;  %v1067_v5 = vpop.permute.xlu1 %1066 }
  0xb7   : > { %v1072_v4 = vsel %vm1070_vm6, %v1063_v61, %v1065_v62  ;;  %v1073_v16 = vsel %vm1070_vm6, %v1065_v62, %v1067_v5 }
  0xb8   : > { %1775 = vmatmul.mubr.msk.bf16.vlgmr.msra.gmra.mrb[0].mxu1 %vm275_vm2, %v2000_v51  ;;  %v1088_v20 = vsel %vm282_vm1, %v1073_v16, 0 }
  0xb9   : > { %807 = vmatpush1.bf16.msra.mxu1 %v748_v57  ;;  %678 = vmatprep.mubr.bf16.mxu1 %v2036_v0 }
  0xba   : > { %1798 = vmatprep.subr.msk.bf16.mxu1 %vm282_vm1, %v904_v58  ;;  %v1069_v6 = vpop.permute.xlu0 %1068  ;;  %v1231_v10 = vpop.permute.xlu1 %1230 }
  0xbb   : > { %v1074_v8 = vsel %vm1070_vm6, %v1067_v5, %v1069_v6 }
  0xbc   : > { %1773 = vmatmul.mubr.msk.bf16.gmra.mrb[4].mxu0 %vm275_vm2, %v2001_v59 }
  0xbd   : > { %785 = vmatprep.mubr.bf16.mxu0 %v2036_v0 }
  0xbe   : > { %v1233_v11 = vpop.permute.xlu0 %1232  ;;  %v1235_v12 = vpop.permute.xlu1 %1234 }
  0xbf   : > { %v1242_v17 = vsel %vm1240_vm7, %v1233_v11, %v1235_v12  ;;  %v1241_v26 = vsel %vm1240_vm7, %v1231_v10, %v1233_v11 }
  0xc0   : > { %1776 = vmatmul.mubr.msk.bf16.gmra.mrb[4].mxu1 %vm275_vm2, %v2001_v59  ;;  %v1252_v28 = vsel %vm282_vm1, %v1241_v26, 0 }
  0xc1   : > { %838 = vmatprep.mubr.bf16.mxu1 %v2036_v0 }
  0xc2   : > { %v1237_v18 = vpop.permute.xlu0 %1236  ;;  %v1239_v19 = vpop.permute.xlu1 %1238 }
  0xc3   : > { %v1244_v21 = vsel %vm1240_vm7, %v1237_v18, %v1239_v19  ;;  %v1243_v29 = vsel %vm1240_vm7, %v1235_v12, %v1237_v18 }
  0xc4   : > { %1784 = vmatmul.mubr.msk.bf16.vlgmr.msra.gmra.mrb[0].mxu0 %vm275_vm2, %v2002_v1  ;;  %v1258_v33 = vsel %vm282_vm1, %v1243_v29, 0 }
  0xc5   : > { %924 = vmatpush1.bf16.msra.mxu0 %v912_v2  ;;  %795 = vmatprep.mubr.bf16.mxu0 %v2036_v0 }
  0xc6   : > { %1807 = vmatprep.subr.msk.bf16.mxu0 %vm282_vm1, %v1072_v4  ;;  %v1401_v23 = vpop.permute.xlu0 %1400  ;;  %v1403_v24 = vpop.permute.xlu1 %1402 }
  0xc7   : > { %v1411_v36 = vsel %vm1410_vm8, %v1401_v23, %v1403_v24 }
  0xc8   : > { %1787 = vmatmul.mubr.msk.bf16.vlgmr.msra.gmra.mrb[0].mxu1 %vm275_vm2, %v2002_v1  ;;  %v1422_v38 = vsel %vm282_vm1, %v1411_v36, 0 }
  0xc9   : > { %977 = vmatpush1.bf16.msra.mxu1 %v918_v7  ;;  %848 = vmatprep.mubr.bf16.mxu1 %v2036_v0 }
  0xca   : > { %1810 = vmatprep.subr.msk.bf16.mxu1 %vm282_vm1, %v1074_v8  ;;  %v1405_v25 = vpop.permute.xlu0 %1404  ;;  %v1407_v31 = vpop.permute.xlu1 %1406 }
  0xcb   : > { %v1412_v30 = vsel %vm1410_vm8, %v1403_v24, %v1405_v25  ;;  %v1413_v39 = vsel %vm1410_vm8, %v1405_v25, %v1407_v31 }
  0xcc   : > { %1785 = vmatmul.mubr.msk.bf16.gmra.mrb[4].mxu0 %vm275_vm2, %v2003_v9  ;;  %v1428_v40 = vsel %vm282_vm1, %v1413_v39, 0 }
  0xcd   : > { %955 = vmatprep.mubr.bf16.mxu0 %v2036_v0 }
  0xce   : > { %v1409_v32 = vpop.permute.xlu0 %1408 }
  0xcf   : > { %v1414_v34 = vsel %vm1410_vm8, %v1407_v31, %v1409_v32 }
  0xd0   : > { %1788 = vmatmul.mubr.msk.bf16.gmra.mrb[4].mxu1 %vm275_vm2, %v2003_v9 }
  0xd1   : > { %1008 = vmatprep.mubr.bf16.mxu1 %v2036_v0 }
  0xd4   : > { %1796 = vmatmul.mubr.msk.bf16.vlgmr.msra.gmra.mrb[0].mxu0 %vm275_vm2, %v2004_v14 }
  0xd5   : > { %1094 = vmatpush1.bf16.msra.mxu0 %v1082_v15  ;;  %965 = vmatprep.mubr.bf16.mxu0 %v2036_v0 }
  0xd6   : > { %1819 = vmatprep.subr.msk.bf16.mxu0 %vm282_vm1, %v1242_v17 }
  0xd8   : > { %1799 = vmatmul.mubr.msk.bf16.vlgmr.msra.gmra.mrb[0].mxu1 %vm275_vm2, %v2004_v14 }
  0xd9   : > { %1147 = vmatpush1.bf16.msra.mxu1 %v1088_v20  ;;  %1018 = vmatprep.mubr.bf16.mxu1 %v2036_v0 }
  0xda   : > { %1822 = vmatprep.subr.msk.bf16.mxu1 %vm282_vm1, %v1244_v21 }
  0xdb   : > { %v1562_v44 = vpop.permute.xlu1 %1561 }
  0xdc   : > { %1797 = vmatmul.mubr.msk.bf16.gmra.mrb[4].mxu0 %vm275_vm2, %v2005_v22 }
  0xdd   : > { %1125 = vmatprep.mubr.bf16.mxu0 %v2036_v0 }
  0xdf   : > { %v1567_v46 = vpop.permute.xlu0 %1566  ;;  %v1572_v53 = vpop.permute.xlu1 %1571 }
  0xe0   : > { %1800 = vmatmul.mubr.msk.bf16.gmra.mrb[4].mxu1 %vm275_vm2, %v2005_v22 }
  0xe1   : > { %1178 = vmatprep.mubr.bf16.mxu1 %v2036_v0 }
  0xe3   : > { %v1577_v2 = vpop.permute.xlu1 %1576 }
  0xe4   : > { %1808 = vmatmul.mubr.msk.bf16.vlgmr.msra.gmra.mrb[0].mxu0 %vm275_vm2, %v2006_v27 }
  0xe5   : > { %1264 = vmatpush1.bf16.msra.mxu0 %v1252_v28  ;;  %1135 = vmatprep.mubr.bf16.mxu0 %v2036_v0 }
  0xe6   : > { %1831 = vmatprep.subr.msk.bf16.mxu0 %vm282_vm1, %v1412_v30 }
  0xe8   : > { %1811 = vmatmul.mubr.msk.bf16.vlgmr.msra.gmra.mrb[0].mxu1 %vm275_vm2, %v2006_v27 }
  0xe9   : > { %1317 = vmatpush1.bf16.msra.mxu1 %v1258_v33  ;;  %1188 = vmatprep.mubr.bf16.mxu1 %v2036_v0 }
  0xea   : > { %1834 = vmatprep.subr.msk.bf16.mxu1 %vm282_vm1, %v1414_v34 }
  0xec   : > { %1809 = vmatmul.mubr.msk.bf16.gmra.mrb[4].mxu0 %vm275_vm2, %v2007_v35 }
  0xed   : > { %1295 = vmatprep.mubr.bf16.mxu0 %v2036_v0 }
  0xf0   : > { %1812 = vmatmul.mubr.msk.bf16.gmra.mrb[4].mxu1 %vm275_vm2, %v2007_v35 }
  0xf1   : > { %1348 = vmatprep.mubr.bf16.mxu1 %v2036_v0 }
  0xf4   : > { %1820 = vmatmul.mubr.msk.bf16.vlgmr.msra.gmra.mrb[0].mxu0 %vm275_vm2, %v2008_v37 }
  0xf5   : > { %1434 = vmatpush1.bf16.msra.mxu0 %v1422_v38  ;;  %1305 = vmatprep.mubr.bf16.mxu0 %v2036_v0 }
  0xf8   : > { %1823 = vmatmul.mubr.msk.bf16.vlgmr.msra.gmra.mrb[0].mxu1 %vm275_vm2, %v2008_v37 }
  0xf9   : > { %1487 = vmatpush1.bf16.msra.mxu1 %v1428_v40  ;;  %1358 = vmatprep.mubr.bf16.mxu1 %v2036_v0 }
  0xfc   : > { %1821 = vmatmul.mubr.msk.bf16.gmra.mrb[4].mxu0 %vm275_vm2, %v2009_v41 }
  0xfd   : > { %1465 = vmatprep.mubr.bf16.mxu0 %v2036_v0 }
 0x100   : > { %1824 = vmatmul.mubr.msk.bf16.gmra.mrb[4].mxu1 %vm275_vm2, %v2009_v41 }
 0x101   : > { %1518 = vmatprep.mubr.bf16.mxu1 %v2036_v0 }
 0x104   : > { %1832 = vmatmul.mubr.msk.bf16.vlgmr.msra.gmra.mrb[0].mxu0 %vm275_vm2, %v2010_v42 }
 0x105   : > { %1475 = vmatprep.mubr.bf16.mxu0 %v2036_v0 }
 0x108   : > { %1835 = vmatmul.mubr.msk.bf16.vlgmr.msra.gmra.mrb[0].mxu1 %vm275_vm2, %v2010_v42 }
 0x109   : > { %1528 = vmatprep.mubr.bf16.mxu1 %v2036_v0 }
 0x10c   : > { %1833 = vmatmul.mubr.msk.bf16.gmra.mrb[4].mxu0 %vm275_vm2, %v2011_v43 }
 0x110   : > { %1836 = vmatmul.mubr.msk.bf16.gmra.mrb[4].mxu1 %vm275_vm2, %v2011_v43 }
 0x1d7   : > { %v1467_v45 = vpop.f32.mrb[0].mxu0 }
 0x1d8   : > { %v1579_v47 = vadd.f32 %v1562_v44, %v1467_v45  ;;  %v1469_v48 = vpop.f32.mrb[1].mxu0 }
 0x1d9   : > { %v1580_v49 = vadd.f32 %v1562_v44, %v1469_v48  ;;  %v1471_v50 = vpop.f32.mrb[2].mxu0 }
 0x1da   : > { %1595 = vst [vmem:[%s2322_s21] sm:$0xff] %v1579_v47  ;;  %v1583_v0 = vadd.f32 %v1567_v46, %v1471_v50  ;;  %v1473_v51 = vpop.f32.mrb[3].mxu0 }
 0x1db   : > { %1596 = vst [vmem:[%s2322_s21 + $0x8] sm:$0xff] %v1580_v49  ;;  %v1584_v52 = vadd.f32 %v1567_v46, %v1473_v51  ;;  %v1520_v54 = vpop.f32.mrb[0].mxu1 }
 0x1dc   : > { %1599 = vst [vmem:[%s2322_s21 + $0x20] sm:$0xff] %v1583_v0  ;;  %v1581_v55 = vadd.f32 %v1562_v44, %v1520_v54  ;;  %v1522_v56 = vpop.f32.mrb[1].mxu1 }
 0x1dd   : > { %1600 = vst [vmem:[%s2322_s21 + $0x28] sm:$0xff] %v1584_v52  ;;  %v1582_v57 = vadd.f32 %v1562_v44, %v1522_v56  ;;  %v1524_v58 = vpop.f32.mrb[2].mxu1 }
 0x1de   : > { %1597 = vst [vmem:[%s2322_s21 + $0x10] sm:$0xff] %v1581_v55  ;;  %v1585_v59 = vadd.f32 %v1567_v46, %v1524_v58  ;;  %v1526_v60 = vpop.f32.mrb[3].mxu1 }
 0x1df   : > { %1598 = vst [vmem:[%s2322_s21 + $0x18] sm:$0xff] %v1582_v57  ;;  %v1586_v61 = vadd.f32 %v1567_v46, %v1526_v60  ;;  %v1477_v62 = vpop.f32.mrb[4].mxu0 }
 0x1e0   : > { %1601 = vst [vmem:[%s2322_s21 + $0x30] sm:$0xff] %v1585_v59  ;;  %v1587_v63 = vadd.f32 %v1572_v53, %v1477_v62  ;;  %v1479_v1 = vpop.f32.mrb[5].mxu0 }
 0x1e1   : > { %1602 = vst [vmem:[%s2322_s21 + $0x38] sm:$0xff] %v1586_v61  ;;  %v1588_v3 = vadd.f32 %v1572_v53, %v1479_v1  ;;  %v1481_v4 = vpop.f32.mrb[6].mxu0  ;;  %v1633_v16 = vld [vmem:[%s2322_s21] sm:$0xff] (%p2094_p4) }
 0x1e2   : > { %1603 = vst [vmem:[%s2322_s21 + $0x40] sm:$0xff] %v1587_v63  ;;  %v1591_v5 = vadd.f32 %v1577_v2, %v1481_v4  ;;  %v1483_v6 = vpop.f32.mrb[7].mxu0  ;;  %v1635_v17 = vld [vmem:[%s2322_s21 + $0x8] sm:$0xff] (%p2094_p4)  ;;  %1634 = vst [vmem:[%s1620_s26] sm:$0xff] (%p2094_p4), %v1633_v16 }
 0x1e3   : > { %1604 = vst [vmem:[%s2322_s21 + $0x48] sm:$0xff] %v1588_v3  ;;  %v1592_v7 = vadd.f32 %v1577_v2, %v1483_v6  ;;  %v1530_v8 = vpop.f32.mrb[4].mxu1  ;;  %1617 = sbr.rel (!%p2094_p4) target bundleno = 498 (0x1f2), region = 40  ;;  %v1641_v20 = vld [vmem:[%s2322_s21 + $0x20] sm:$0xff] (%p2094_p4)  ;;  %1636 = vst [vmem:[%s1620_s26 + $0x8] sm:$0xff] (%p2094_p4), %v1635_v17 }
 0x1e4   : > { %1607 = vst [vmem:[%s2322_s21 + $0x60] sm:$0xff] %v1591_v5  ;;  %v1589_v9 = vadd.f32 %v1572_v53, %v1530_v8  ;;  %v1532_v10 = vpop.f32.mrb[5].mxu1  ;;  %v1643_v21 = vld [vmem:[%s2322_s21 + $0x28] sm:$0xff] (%p2094_p4)  ;;  %1642 = vst [vmem:[%s1620_s26 + $0x40] sm:$0xff] (%p2094_p4), %v1641_v20 }
 0x1e5   : > { %1608 = vst [vmem:[%s2322_s21 + $0x68] sm:$0xff] %v1592_v7  ;;  %v1590_v11 = vadd.f32 %v1572_v53, %v1532_v10  ;;  %v1534_v12 = vpop.f32.mrb[6].mxu1  ;;  %v1637_v18 = vld [vmem:[%s2322_s21 + $0x10] sm:$0xff] (%p2094_p4)  ;;  %1644 = vst [vmem:[%s1620_s26 + $0x48] sm:$0xff] (%p2094_p4), %v1643_v21 }
 0x1e6   : > { %1605 = vst [vmem:[%s2322_s21 + $0x50] sm:$0xff] %v1589_v9  ;;  %v1593_v13 = vadd.f32 %v1577_v2, %v1534_v12  ;;  %v1536_v14 = vpop.f32.mrb[7].mxu1  ;;  %v1639_v19 = vld [vmem:[%s2322_s21 + $0x18] sm:$0xff] (%p2094_p4)  ;;  %1638 = vst [vmem:[%s1620_s26 + $0x10] sm:$0xff] (%p2094_p4), %v1637_v18 }
 0x1e7   : > { %1606 = vst [vmem:[%s2322_s21 + $0x58] sm:$0xff] %v1590_v11  ;;  %v1594_v15 = vadd.f32 %v1577_v2, %v1536_v14  ;;  %1640 = vst [vmem:[%s1620_s26 + $0x18] sm:$0xff] (%p2094_p4), %v1639_v19  ;;  %v1645_v22 = vld [vmem:[%s2322_s21 + $0x30] sm:$0xff] (%p2094_p4) }
 0x1e8   : > { %1609 = vst [vmem:[%s2322_s21 + $0x70] sm:$0xff] %v1593_v13  ;;  %v1647_v23 = vld [vmem:[%s2322_s21 + $0x38] sm:$0xff] (%p2094_p4)  ;;  %1646 = vst [vmem:[%s1620_s26 + $0x50] sm:$0xff] (%p2094_p4), %v1645_v22 }
 0x1e9   : > { %1610 = vst [vmem:[%s2322_s21 + $0x78] sm:$0xff] %v1594_v15  ;;  %v1649_v24 = vld [vmem:[%s2322_s21 + $0x40] sm:$0xff] (%p2094_p4)  ;;  %1648 = vst [vmem:[%s1620_s26 + $0x58] sm:$0xff] (%p2094_p4), %v1647_v23 }
 0x1ea   : > { %1650 = vst [vmem:[%s1620_s26 + $0x80] sm:$0xff] %v1649_v24  ;;  %v1651_v25 = vld [vmem:[%s2322_s21 + $0x48] sm:$0xff] }
 0x1eb   : > { %1652 = vst [vmem:[%s1620_s26 + $0x88] sm:$0xff] %v1651_v25  ;;  %v1657_v28 = vld [vmem:[%s2322_s21 + $0x60] sm:$0xff] }
 0x1ec   : > { %v1659_v29 = vld [vmem:[%s2322_s21 + $0x68] sm:$0xff]  ;;  %1658 = vst [vmem:[%s1620_s26 + $0xc0] sm:$0xff] %v1657_v28 }
 0x1ed   : > { %v1653_v26 = vld [vmem:[%s2322_s21 + $0x50] sm:$0xff]  ;;  %1660 = vst [vmem:[%s1620_s26 + $0xc8] sm:$0xff] %v1659_v29 }
 0x1ee   : > { %v1655_v27 = vld [vmem:[%s2322_s21 + $0x58] sm:$0xff]  ;;  %1654 = vst [vmem:[%s1620_s26 + $0x90] sm:$0xff] %v1653_v26 }
 0x1ef   : > { %1656 = vst [vmem:[%s1620_s26 + $0x98] sm:$0xff] %v1655_v27  ;;  %v1661_v30 = vld [vmem:[%s2322_s21 + $0x70] sm:$0xff] }
 0x1f0   : > { %1662 = vst [vmem:[%s1620_s26 + $0xd0] sm:$0xff] %v1661_v30  ;;  %v1663_v31 = vld [vmem:[%s2322_s21 + $0x78] sm:$0xff] }
 0x1f1   : > { %1664 = vst [vmem:[%s1620_s26 + $0xd8] sm:$0xff] %v1663_v31 }
 0x1f2 PF: > { %p11_p9 = scmp.ge.s32.totalorder %s2084_s19, 4   ;;  %s2378_s15 = smov %s2030_s16 }
 0x1f3   : > { %s2379_s16 = smov %s2092_s22  ;;  %s2380_s17 = smov %s2084_s19 }
 0x1f4   :  { %13 = sbr.rel (!%p11_p9) target bundleno = 2 (0x2), region = 99 }

</bundles_post_ra>
